<compile_context>
chip_gen: v6e
topology: v6e:2x2x1
jax: 0.10.0
libtpu: 0.0.40
codegen_flags: <defaults>
</compile_context>

<pallas_src>
import jax
import jax.numpy as jnp
import numpy as np
from jax import lax
from jax.experimental import pallas as pl
from jax.experimental.pallas import tpu as pltpu


TB = 128          # images per grid step (lane dimension of every slab)
_ROW_PITCH = 32   # each 28-pixel input image row is padded to 32 columns


# ---------------------------------------------------------------------------
# Fused kernel: one grid step == one tile of TB images (batch on lanes)
# ---------------------------------------------------------------------------
def _fused_forward_kernel(x_ref, w1r_ref, b1_ref, w2_ref, w3_ref, w4_ref,
                          w5_ref, w5s_ref, b5_ref, w6_ref, b6_ref,
                          o_ref, x1_scr):
    # ---- conv1 (5x5, 1->8, bias) + MaxPool2d(2) + Tanh ----------------------
    # x_ref: (896, TB) = 28 image rows * pitch 32, batch on lanes.
    # For each pooled output row `py`, one (384, 192) @ (192, TB) matmul over
    # the 6 input rows it needs produces all 4 pool phases (dy, dx) x 8 output
    # channels x 12 output columns; then max over the 4 phases, + bias, tanh.
    w1r = w1r_ref[...]                     # (384, 192)  hoisted out of the loop
    b1e = b1_ref[...]                      # (96, 1)     bias per (co, px)
    for py in range(12):
        xs = x_ref[py * 64:py * 64 + 192, :]                       # rows 2py..2py+5
        g = jnp.dot(w1r, xs, preferred_element_type=jnp.float32)   # (384, TB)
        m = jnp.maximum(jnp.maximum(g[0:96], g[96:192]),
                        jnp.maximum(g[192:288], g[288:384]))       # max over pool
        x1_scr[py * 96:(py + 1) * 96, :] = jnp.tanh(m + b1e)

    x1 = x1_scr[...]                                               # (1152, TB)

    # ---- conv2 (5x5, 8->4, no bias) + Tanh  -> x_identity -------------------
    x2 = jnp.tanh(jnp.dot(w2_ref[...], x1,
                          preferred_element_type=jnp.float32))     # (256, TB)

    # ---- conv3 (4x4, 4->6, no bias) + Tanh ----------------------------------
    x3 = jnp.tanh(jnp.dot(w3_ref[...], x2,
                          preferred_element_type=jnp.float32))     # (150, TB)

    # ---- conv4 (3x3, 6->4, no bias) + Tanh ----------------------------------
    x4 = jnp.tanh(jnp.dot(w4_ref[...], x3,
                          preferred_element_type=jnp.float32))     # (36, TB)

    # ---- residual skip (folded into w5s) + fc5 + Tanh -----------------------
    h5 = jnp.tanh(jnp.dot(w5_ref[...], x4, preferred_element_type=jnp.float32)
                  + jnp.dot(w5s_ref[...], x2, preferred_element_type=jnp.float32)
                  + b5_ref[...])                                   # (18, TB)

    # ---- fc6 (lane-dense (10, TB) output store) -----------------------------
    o_ref[...] = (jnp.dot(w6_ref[...], h5, preferred_element_type=jnp.float32)
                  + b6_ref[...])


# ---------------------------------------------------------------------------
# One-time parameter re-layout (all conv -> dense-matrix packing lives here)
# ---------------------------------------------------------------------------
def prepare_params(params):
    w1 = np.asarray(params["w1"], np.float32).reshape(8, 5, 5)
    b1 = np.asarray(params["b1"], np.float32)
    w2 = np.asarray(params["w2"], np.float32)
    w3 = np.asarray(params["w3"], np.float32)
    w4 = np.asarray(params["w4"], np.float32)
    w5 = np.asarray(params["w5"], np.float32)
    b5 = np.asarray(params["b5"], np.float32)
    w6 = np.asarray(params["w6"], np.float32)
    b6 = np.asarray(params["b6"], np.float32)

    # conv1+pool packed row-matrix: row = (dy*2+dx)*96 + co*12 + px,
    # column = k*32 + c where k is the row offset inside the 6-row input slab
    # and c the (pitch-32) column.  Value = w1[co, k-dy, c-(2px+dx)].
    w1row = np.zeros((384, 192), np.float32)
    for dy in range(2):
        for dx in range(2):
            for co in range(8):
                for px in range(12):
                    r = (dy * 2 + dx) * 96 + co * 12 + px
                    for i in range(5):
                        for j in range(5):
                            k = dy + i
                            c = 2 * px + dx + j
                            w1row[r, k * 32 + c] = w1[co, i, j]
    b1e = np.repeat(b1, 12).reshape(96, 1)                 # per (co, px)

    # conv2 as dense matrix: out row co2*64+oy*8+ox, in row py*96+ci*12+px.
    w2m = np.zeros((256, 1152), np.float32)
    for co in range(4):
        for oy in range(8):
            for ox in range(8):
                r = co * 64 + oy * 8 + ox
                for ci in range(8):
                    for i in range(5):
                        for j in range(5):
                            w2m[r, (oy + i) * 96 + ci * 12 + (ox + j)] = w2[co, ci, i, j]

    # conv3: out row co3*25+y*5+x, in row ci*64+oy*8+ox.
    w3m = np.zeros((150, 256), np.float32)
    for co in range(6):
        for oy in range(5):
            for ox in range(5):
                r = co * 25 + oy * 5 + ox
                for ci in range(4):
                    for i in range(4):
                        for j in range(4):
                            w3m[r, ci * 64 + (oy + i) * 8 + (ox + j)] = w3[co, ci, i, j]

    # conv4: out row co4*9+h*3+w (== torch NCHW flatten order), in row ci*25+y*5+x.
    w4m = np.zeros((36, 150), np.float32)
    for co in range(4):
        for oy in range(3):
            for ox in range(3):
                r = co * 9 + oy * 3 + ox
                for ci in range(6):
                    for i in range(3):
                        for j in range(3):
                            w4m[r, ci * 25 + (oy + i) * 5 + (ox + j)] = w4[co, ci, i, j]

    # Residual skip x_identity[:, :, 1:-1, 1:-1][:, :, ::2, ::2] folded into fc5:
    # fc5(x4 + sel(x2)) = w5 @ x4 + (w5 @ Sel) @ x2.
    w5skip = np.zeros((18, 256), np.float32)
    for c in range(4):
        for h in range(3):
            for w in range(3):
                w5skip[:, c * 64 + (1 + 2 * h) * 8 + (1 + 2 * w)] += w5[:, c * 9 + h * 3 + w]

    as_j = lambda a: jnp.asarray(a, jnp.float32)
    return {
        "w1row": as_j(w1row), "b1e": as_j(b1e),
        "w2m": as_j(w2m), "w3m": as_j(w3m), "w4m": as_j(w4m),
        "w5": as_j(w5), "w5skip": as_j(w5skip), "b5": as_j(b5.reshape(18, 1)),
        "w6": as_j(w6), "b6": as_j(b6.reshape(10, 1)),
    }


# ---------------------------------------------------------------------------
# Forward pass: single fused pallas_call, grid over batch tiles of TB images
# ---------------------------------------------------------------------------
def _const_spec(arr):
    nd = arr.ndim
    return pl.BlockSpec(arr.shape, lambda *_: (0,) * nd)


@jax.jit
def forward(prepped, x):
    """x: (N, 1, 28, 28) NCHW float32 -> logits (N, 10)."""
    n, cin, hh, ww = x.shape
    assert (cin, hh, ww) == (1, 28, 28), x.shape
    n_pad = ((n + TB - 1) // TB) * TB

    img = x.astype(jnp.float32).reshape(n, 28, 28)
    img = jnp.pad(img, ((0, n_pad - n), (0, 0), (0, _ROW_PITCH - 28)))
    xt = img.reshape(n_pad, 28 * _ROW_PITCH).T              # (896, n_pad), batch on lanes

    w = prepped
    out = pl.pallas_call(
        _fused_forward_kernel,
        out_shape=jax.ShapeDtypeStruct((10, n_pad), jnp.float32),
        grid=(n_pad // TB,),
        in_specs=[
            pl.BlockSpec((28 * _ROW_PITCH, TB), lambda b: (0, b)),   # input tile
            _const_spec(w["w1row"]), _const_spec(w["b1e"]),
            _const_spec(w["w2m"]), _const_spec(w["w3m"]), _const_spec(w["w4m"]),
            _const_spec(w["w5"]), _const_spec(w["w5skip"]), _const_spec(w["b5"]),
            _const_spec(w["w6"]), _const_spec(w["b6"]),
        ],
        out_specs=pl.BlockSpec((10, TB), lambda b: (0, b)),          # lane-dense store
        scratch_shapes=[pltpu.VMEM((1152, TB), jnp.float32)],        # act1 (pool+tanh)
        compiler_params=pltpu.CompilerParams(
            dimension_semantics=("parallel",),
            vmem_limit_bytes=32 * 1024 * 1024),
    )(xt, w["w1row"], w["b1e"], w["w2m"], w["w3m"], w["w4m"],
      w["w5"], w["w5skip"], w["b5"], w["w6"], w["b6"])

    return out.T[:n]                                          # (N, 10)


# ---------------------------------------------------------------------------
# Deterministic synthetic parameters (biases filled with 0.01 like init_single)
# ---------------------------------------------------------------------------
def init_params(key):
    ks = jax.random.split(key, 6)
    f32 = jnp.float32
    return {
        "w1": (0.1 * jax.random.normal(ks[0], (8, 1, 5, 5))).astype(f32),
        "b1": jnp.full((8,), 0.01, f32),
        "w2": (0.1 * jax.random.normal(ks[1], (4, 8, 5, 5))).astype(f32),
        "w3": (0.1 * jax.random.normal(ks[2], (6, 4, 4, 4))).astype(f32),
        "w4": (0.1 * jax.random.normal(ks[3], (4, 6, 3, 3))).astype(f32),
        "w5": (0.1 * jax.random.normal(ks[4], (18, 36))).astype(f32),
        "b5": jnp.full((18,), 0.01, f32),
        "w6": (0.1 * jax.random.normal(ks[5], (10, 18))).astype(f32),
        "b6": jnp.full((10,), 0.01, f32),
    }


def _reference_forward(params, x):
    """Pure-JAX reference matching the PyTorch module."""
    dn = ("NCHW", "OIHW", "NCHW")
    conv = lambda v, w: lax.conv_general_dilated(
        v, w, (1, 1), "VALID", dimension_numbers=dn,
        precision=lax.Precision.HIGHEST)
    y = conv(x, params["w1"]) + params["b1"].reshape(1, 8, 1, 1)
    y = lax.reduce_window(y, -jnp.inf, lax.max, (1, 1, 2, 2), (1, 1, 2, 2), "VALID")
    y = jnp.tanh(y)
    y = jnp.tanh(conv(y, params["w2"]))
    x_id = y
    y = jnp.tanh(conv(y, params["w3"]))
    y = jnp.tanh(conv(y, params["w4"]))
    y = y + x_id[:, :, 1:-1, 1:-1][:, :, ::2, ::2]
    y = y.reshape(y.shape[0], -1)
    y = jnp.tanh(jnp.dot(y, params["w5"].T, precision=lax.Precision.HIGHEST)
                 + params["b5"])
    return jnp.dot(y, params["w6"].T, precision=lax.Precision.HIGHEST) + params["b6"]


if __name__ == "__main__":
    key = jax.random.PRNGKey(0)
    pkey, xkey = jax.random.split(key)
    params = init_params(pkey)
    prepped = prepare_params(params)
    ref_fn = jax.jit(_reference_forward)

    # Small batch (padded to one TB=128 tile internally).
    x_small = jax.random.normal(xkey, (2, 1, 28, 28), dtype=jnp.float32)
    out_small = jax.block_until_ready(forward(prepped, x_small))
    assert out_small.shape == (2, 10), out_small.shape
    ref_small = jax.block_until_ready(ref_fn(params, x_small))
    err_small = float(jnp.max(jnp.abs(out_small - ref_small)))
    assert err_small < 3e-2, f"small-batch max abs error vs reference: {err_small}"

    # Larger ragged batch: exercises the batched multi-step grid + padding path.
    x_big = jax.random.normal(jax.random.fold_in(xkey, 1), (300, 1, 28, 28),
                              dtype=jnp.float32)
    out_big = jax.block_until_ready(forward(prepped, x_big))
    assert out_big.shape == (300, 10), out_big.shape
    ref_big = jax.block_until_ready(ref_fn(params, x_big))
    err_big = float(jnp.max(jnp.abs(out_big - ref_big)))
    assert err_big < 3e-2, f"big-batch max abs error vs reference: {err_big}"

    print("KERNEL_OK")
</pallas_src>

<mosaic_0001>
module attributes {stable_mosaic.version = 11 : i64} {
  func.func @_fused_forward_kernel(%arg0: i32, %arg1: memref<896x128xf32, #tpu.memory_space<vmem>>, %arg2: memref<384x192xf32, #tpu.memory_space<vmem>>, %arg3: memref<96x1xf32, #tpu.memory_space<vmem>>, %arg4: memref<256x1152xf32, #tpu.memory_space<vmem>>, %arg5: memref<150x256xf32, #tpu.memory_space<vmem>>, %arg6: memref<36x150xf32, #tpu.memory_space<vmem>>, %arg7: memref<18x36xf32, #tpu.memory_space<vmem>>, %arg8: memref<18x256xf32, #tpu.memory_space<vmem>>, %arg9: memref<18x1xf32, #tpu.memory_space<vmem>>, %arg10: memref<10x18xf32, #tpu.memory_space<vmem>>, %arg11: memref<10x1xf32, #tpu.memory_space<vmem>>, %arg12: memref<10x128xf32, #tpu.memory_space<vmem>>, %arg13: memref<1152x128xf32, #tpu.memory_space<vmem>>) attributes {dimension_semantics = [#tpu.dimension_semantics<parallel>], iteration_bounds = array<i64: 1>, scalar_prefetch = 0 : i64, scratch_operands = 1 : i64, tpu.core_type = #tpu.core_type<tc>, window_params = [{transform_indices = @transform_0, window_bounds = array<i64: 896, 128>}, {pipeline_mode = #tpu.pipeline_mode<synchronous>, transform_indices = @transform_1, window_bounds = array<i64: 384, 192>}, {pipeline_mode = #tpu.pipeline_mode<synchronous>, transform_indices = @transform_2, window_bounds = array<i64: 96, 1>}, {pipeline_mode = #tpu.pipeline_mode<synchronous>, transform_indices = @transform_3, window_bounds = array<i64: 256, 1152>}, {pipeline_mode = #tpu.pipeline_mode<synchronous>, transform_indices = @transform_4, window_bounds = array<i64: 150, 256>}, {pipeline_mode = #tpu.pipeline_mode<synchronous>, transform_indices = @transform_5, window_bounds = array<i64: 36, 150>}, {pipeline_mode = #tpu.pipeline_mode<synchronous>, transform_indices = @transform_6, window_bounds = array<i64: 18, 36>}, {pipeline_mode = #tpu.pipeline_mode<synchronous>, transform_indices = @transform_7, window_bounds = array<i64: 18, 256>}, {pipeline_mode = #tpu.pipeline_mode<synchronous>, transform_indices = @transform_8, window_bounds = array<i64: 18, 1>}, {pipeline_mode = #tpu.pipeline_mode<synchronous>, transform_indices = @transform_9, window_bounds = array<i64: 10, 18>}, {pipeline_mode = #tpu.pipeline_mode<synchronous>, transform_indices = @transform_10, window_bounds = array<i64: 10, 1>}, {transform_indices = @transform_11, window_bounds = array<i64: 10, 128>}]} {
    %c0 = arith.constant 0 : index
    %c0_0 = arith.constant 0 : index
    %0 = vector.load %arg2[%c0, %c0_0] : memref<384x192xf32, #tpu.memory_space<vmem>>, vector<384x192xf32>
    %c0_1 = arith.constant 0 : index
    %c0_2 = arith.constant 0 : index
    %1 = vector.load %arg3[%c0_1, %c0_2] : memref<96x1xf32, #tpu.memory_space<vmem>>, vector<96x1xf32>
    %c0_3 = arith.constant 0 : index
    %c0_4 = arith.constant 0 : index
    %2 = vector.load %arg1[%c0_3, %c0_4] : memref<896x128xf32, #tpu.memory_space<vmem>>, vector<192x128xf32>
    %cst = arith.constant dense<0.000000e+00> : vector<384x128xf32>
    %3 = tpu.matmul %0, %2, %cst {dimension_numbers = #tpu.dot_dimension_numbers<[1], [0], [0], [1], [0, 0, 1, 1], [], []>} : vector<384x192xf32>, vector<192x128xf32>, vector<384x128xf32> -> vector<384x128xf32>
    %4 = vector.extract_strided_slice %3 {offsets = [0, 0], sizes = [96, 128], strides = [1, 1]} : vector<384x128xf32> to vector<96x128xf32>
    %5 = vector.extract_strided_slice %3 {offsets = [96, 0], sizes = [96, 128], strides = [1, 1]} : vector<384x128xf32> to vector<96x128xf32>
    %6 = arith.maximumf %4, %5 : vector<96x128xf32>
    %7 = vector.extract_strided_slice %3 {offsets = [192, 0], sizes = [96, 128], strides = [1, 1]} : vector<384x128xf32> to vector<96x128xf32>
    %8 = vector.extract_strided_slice %3 {offsets = [288, 0], sizes = [96, 128], strides = [1, 1]} : vector<384x128xf32> to vector<96x128xf32>
    %9 = arith.maximumf %7, %8 : vector<96x128xf32>
    %10 = arith.maximumf %6, %9 : vector<96x128xf32>
    %11 = vector.broadcast %1 : vector<96x1xf32> to vector<96x128xf32>
    %12 = arith.addf %10, %11 : vector<96x128xf32>
    %13 = math.tanh %12 : vector<96x128xf32>
    %c0_5 = arith.constant 0 : index
    %c0_6 = arith.constant 0 : index
    %14 = vector.load %arg13[%c0_5, %c0_6] : memref<1152x128xf32, #tpu.memory_space<vmem>>, vector<96x128xf32>
    tpu.vector_store %arg13[%c0_5, %c0_6], %13 {strides = array<i32>} : memref<1152x128xf32, #tpu.memory_space<vmem>>, vector<96x128xf32>,
    %c64 = arith.constant 64 : index
    %c0_7 = arith.constant 0 : index
    %15 = vector.load %arg1[%c64, %c0_7] : memref<896x128xf32, #tpu.memory_space<vmem>>, vector<192x128xf32>
    %cst_8 = arith.constant dense<0.000000e+00> : vector<384x128xf32>
    %16 = tpu.matmul %0, %15, %cst_8 {dimension_numbers = #tpu.dot_dimension_numbers<[1], [0], [0], [1], [0, 0, 1, 1], [], []>} : vector<384x192xf32>, vector<192x128xf32>, vector<384x128xf32> -> vector<384x128xf32>
    %17 = vector.extract_strided_slice %16 {offsets = [0, 0], sizes = [96, 128], strides = [1, 1]} : vector<384x128xf32> to vector<96x128xf32>
    %18 = vector.extract_strided_slice %16 {offsets = [96, 0], sizes = [96, 128], strides = [1, 1]} : vector<384x128xf32> to vector<96x128xf32>
    %19 = arith.maximumf %17, %18 : vector<96x128xf32>
    %20 = vector.extract_strided_slice %16 {offsets = [192, 0], sizes = [96, 128], strides = [1, 1]} : vector<384x128xf32> to vector<96x128xf32>
    %21 = vector.extract_strided_slice %16 {offsets = [288, 0], sizes = [96, 128], strides = [1, 1]} : vector<384x128xf32> to vector<96x128xf32>
    %22 = arith.maximumf %20, %21 : vector<96x128xf32>
    %23 = arith.maximumf %19, %22 : vector<96x128xf32>
    %24 = vector.broadcast %1 : vector<96x1xf32> to vector<96x128xf32>
    %25 = arith.addf %23, %24 : vector<96x128xf32>
    %26 = math.tanh %25 : vector<96x128xf32>
    %c96 = arith.constant 96 : index
    %c0_9 = arith.constant 0 : index
    %27 = vector.load %arg13[%c96, %c0_9] : memref<1152x128xf32, #tpu.memory_space<vmem>>, vector<96x128xf32>
    tpu.vector_store %arg13[%c96, %c0_9], %26 {strides = array<i32>} : memref<1152x128xf32, #tpu.memory_space<vmem>>, vector<96x128xf32>,
    %c128 = arith.constant 128 : index
    %c0_10 = arith.constant 0 : index
    %28 = vector.load %arg1[%c128, %c0_10] : memref<896x128xf32, #tpu.memory_space<vmem>>, vector<192x128xf32>
    %cst_11 = arith.constant dense<0.000000e+00> : vector<384x128xf32>
    %29 = tpu.matmul %0, %28, %cst_11 {dimension_numbers = #tpu.dot_dimension_numbers<[1], [0], [0], [1], [0, 0, 1, 1], [], []>} : vector<384x192xf32>, vector<192x128xf32>, vector<384x128xf32> -> vector<384x128xf32>
    %30 = vector.extract_strided_slice %29 {offsets = [0, 0], sizes = [96, 128], strides = [1, 1]} : vector<384x128xf32> to vector<96x128xf32>
    %31 = vector.extract_strided_slice %29 {offsets = [96, 0], sizes = [96, 128], strides = [1, 1]} : vector<384x128xf32> to vector<96x128xf32>
    %32 = arith.maximumf %30, %31 : vector<96x128xf32>
    %33 = vector.extract_strided_slice %29 {offsets = [192, 0], sizes = [96, 128], strides = [1, 1]} : vector<384x128xf32> to vector<96x128xf32>
    %34 = vector.extract_strided_slice %29 {offsets = [288, 0], sizes = [96, 128], strides = [1, 1]} : vector<384x128xf32> to vector<96x128xf32>
    %35 = arith.maximumf %33, %34 : vector<96x128xf32>
    %36 = arith.maximumf %32, %35 : vector<96x128xf32>
    %37 = vector.broadcast %1 : vector<96x1xf32> to vector<96x128xf32>
    %38 = arith.addf %36, %37 : vector<96x128xf32>
    %39 = math.tanh %38 : vector<96x128xf32>
    %c192 = arith.constant 192 : index
    %c0_12 = arith.constant 0 : index
    %40 = vector.load %arg13[%c192, %c0_12] : memref<1152x128xf32, #tpu.memory_space<vmem>>, vector<96x128xf32>
    tpu.vector_store %arg13[%c192, %c0_12], %39 {strides = array<i32>} : memref<1152x128xf32, #tpu.memory_space<vmem>>, vector<96x128xf32>,
    %c192_13 = arith.constant 192 : index
    %c0_14 = arith.constant 0 : index
    %41 = vector.load %arg1[%c192_13, %c0_14] : memref<896x128xf32, #tpu.memory_space<vmem>>, vector<192x128xf32>
    %cst_15 = arith.constant dense<0.000000e+00> : vector<384x128xf32>
    %42 = tpu.matmul %0, %41, %cst_15 {dimension_numbers = #tpu.dot_dimension_numbers<[1], [0], [0], [1], [0, 0, 1, 1], [], []>} : vector<384x192xf32>, vector<192x128xf32>, vector<384x128xf32> -> vector<384x128xf32>
    %43 = vector.extract_strided_slice %42 {offsets = [0, 0], sizes = [96, 128], strides = [1, 1]} : vector<384x128xf32> to vector<96x128xf32>
    %44 = vector.extract_strided_slice %42 {offsets = [96, 0], sizes = [96, 128], strides = [1, 1]} : vector<384x128xf32> to vector<96x128xf32>
    %45 = arith.maximumf %43, %44 : vector<96x128xf32>
    %46 = vector.extract_strided_slice %42 {offsets = [192, 0], sizes = [96, 128], strides = [1, 1]} : vector<384x128xf32> to vector<96x128xf32>
    %47 = vector.extract_strided_slice %42 {offsets = [288, 0], sizes = [96, 128], strides = [1, 1]} : vector<384x128xf32> to vector<96x128xf32>
    %48 = arith.maximumf %46, %47 : vector<96x128xf32>
    %49 = arith.maximumf %45, %48 : vector<96x128xf32>
    %50 = vector.broadcast %1 : vector<96x1xf32> to vector<96x128xf32>
    %51 = arith.addf %49, %50 : vector<96x128xf32>
    %52 = math.tanh %51 : vector<96x128xf32>
    %c288 = arith.constant 288 : index
    %c0_16 = arith.constant 0 : index
    %53 = vector.load %arg13[%c288, %c0_16] : memref<1152x128xf32, #tpu.memory_space<vmem>>, vector<96x128xf32>
    tpu.vector_store %arg13[%c288, %c0_16], %52 {strides = array<i32>} : memref<1152x128xf32, #tpu.memory_space<vmem>>, vector<96x128xf32>,
    %c256 = arith.constant 256 : index
    %c0_17 = arith.constant 0 : index
    %54 = vector.load %arg1[%c256, %c0_17] : memref<896x128xf32, #tpu.memory_space<vmem>>, vector<192x128xf32>
    %cst_18 = arith.constant dense<0.000000e+00> : vector<384x128xf32>
    %55 = tpu.matmul %0, %54, %cst_18 {dimension_numbers = #tpu.dot_dimension_numbers<[1], [0], [0], [1], [0, 0, 1, 1], [], []>} : vector<384x192xf32>, vector<192x128xf32>, vector<384x128xf32> -> vector<384x128xf32>
    %56 = vector.extract_strided_slice %55 {offsets = [0, 0], sizes = [96, 128], strides = [1, 1]} : vector<384x128xf32> to vector<96x128xf32>
    %57 = vector.extract_strided_slice %55 {offsets = [96, 0], sizes = [96, 128], strides = [1, 1]} : vector<384x128xf32> to vector<96x128xf32>
    %58 = arith.maximumf %56, %57 : vector<96x128xf32>
    %59 = vector.extract_strided_slice %55 {offsets = [192, 0], sizes = [96, 128], strides = [1, 1]} : vector<384x128xf32> to vector<96x128xf32>
    %60 = vector.extract_strided_slice %55 {offsets = [288, 0], sizes = [96, 128], strides = [1, 1]} : vector<384x128xf32> to vector<96x128xf32>
    %61 = arith.maximumf %59, %60 : vector<96x128xf32>
    %62 = arith.maximumf %58, %61 : vector<96x128xf32>
    %63 = vector.broadcast %1 : vector<96x1xf32> to vector<96x128xf32>
    %64 = arith.addf %62, %63 : vector<96x128xf32>
    %65 = math.tanh %64 : vector<96x128xf32>
    %c384 = arith.constant 384 : index
    %c0_19 = arith.constant 0 : index
    %66 = vector.load %arg13[%c384, %c0_19] : memref<1152x128xf32, #tpu.memory_space<vmem>>, vector<96x128xf32>
    tpu.vector_store %arg13[%c384, %c0_19], %65 {strides = array<i32>} : memref<1152x128xf32, #tpu.memory_space<vmem>>, vector<96x128xf32>,
    %c320 = arith.constant 320 : index
    %c0_20 = arith.constant 0 : index
    %67 = vector.load %arg1[%c320, %c0_20] : memref<896x128xf32, #tpu.memory_space<vmem>>, vector<192x128xf32>
    %cst_21 = arith.constant dense<0.000000e+00> : vector<384x128xf32>
    %68 = tpu.matmul %0, %67, %cst_21 {dimension_numbers = #tpu.dot_dimension_numbers<[1], [0], [0], [1], [0, 0, 1, 1], [], []>} : vector<384x192xf32>, vector<192x128xf32>, vector<384x128xf32> -> vector<384x128xf32>
    %69 = vector.extract_strided_slice %68 {offsets = [0, 0], sizes = [96, 128], strides = [1, 1]} : vector<384x128xf32> to vector<96x128xf32>
    %70 = vector.extract_strided_slice %68 {offsets = [96, 0], sizes = [96, 128], strides = [1, 1]} : vector<384x128xf32> to vector<96x128xf32>
    %71 = arith.maximumf %69, %70 : vector<96x128xf32>
    %72 = vector.extract_strided_slice %68 {offsets = [192, 0], sizes = [96, 128], strides = [1, 1]} : vector<384x128xf32> to vector<96x128xf32>
    %73 = vector.extract_strided_slice %68 {offsets = [288, 0], sizes = [96, 128], strides = [1, 1]} : vector<384x128xf32> to vector<96x128xf32>
    %74 = arith.maximumf %72, %73 : vector<96x128xf32>
    %75 = arith.maximumf %71, %74 : vector<96x128xf32>
    %76 = vector.broadcast %1 : vector<96x1xf32> to vector<96x128xf32>
    %77 = arith.addf %75, %76 : vector<96x128xf32>
    %78 = math.tanh %77 : vector<96x128xf32>
    %c480 = arith.constant 480 : index
    %c0_22 = arith.constant 0 : index
    %79 = vector.load %arg13[%c480, %c0_22] : memref<1152x128xf32, #tpu.memory_space<vmem>>, vector<96x128xf32>
    tpu.vector_store %arg13[%c480, %c0_22], %78 {strides = array<i32>} : memref<1152x128xf32, #tpu.memory_space<vmem>>, vector<96x128xf32>,
    %c384_23 = arith.constant 384 : index
    %c0_24 = arith.constant 0 : index
    %80 = vector.load %arg1[%c384_23, %c0_24] : memref<896x128xf32, #tpu.memory_space<vmem>>, vector<192x128xf32>
    %cst_25 = arith.constant dense<0.000000e+00> : vector<384x128xf32>
    %81 = tpu.matmul %0, %80, %cst_25 {dimension_numbers = #tpu.dot_dimension_numbers<[1], [0], [0], [1], [0, 0, 1, 1], [], []>} : vector<384x192xf32>, vector<192x128xf32>, vector<384x128xf32> -> vector<384x128xf32>
    %82 = vector.extract_strided_slice %81 {offsets = [0, 0], sizes = [96, 128], strides = [1, 1]} : vector<384x128xf32> to vector<96x128xf32>
    %83 = vector.extract_strided_slice %81 {offsets = [96, 0], sizes = [96, 128], strides = [1, 1]} : vector<384x128xf32> to vector<96x128xf32>
    %84 = arith.maximumf %82, %83 : vector<96x128xf32>
    %85 = vector.extract_strided_slice %81 {offsets = [192, 0], sizes = [96, 128], strides = [1, 1]} : vector<384x128xf32> to vector<96x128xf32>
    %86 = vector.extract_strided_slice %81 {offsets = [288, 0], sizes = [96, 128], strides = [1, 1]} : vector<384x128xf32> to vector<96x128xf32>
    %87 = arith.maximumf %85, %86 : vector<96x128xf32>
    %88 = arith.maximumf %84, %87 : vector<96x128xf32>
    %89 = vector.broadcast %1 : vector<96x1xf32> to vector<96x128xf32>
    %90 = arith.addf %88, %89 : vector<96x128xf32>
    %91 = math.tanh %90 : vector<96x128xf32>
    %c576 = arith.constant 576 : index
    %c0_26 = arith.constant 0 : index
    %92 = vector.load %arg13[%c576, %c0_26] : memref<1152x128xf32, #tpu.memory_space<vmem>>, vector<96x128xf32>
    tpu.vector_store %arg13[%c576, %c0_26], %91 {strides = array<i32>} : memref<1152x128xf32, #tpu.memory_space<vmem>>, vector<96x128xf32>,
    %c448 = arith.constant 448 : index
    %c0_27 = arith.constant 0 : index
    %93 = vector.load %arg1[%c448, %c0_27] : memref<896x128xf32, #tpu.memory_space<vmem>>, vector<192x128xf32>
    %cst_28 = arith.constant dense<0.000000e+00> : vector<384x128xf32>
    %94 = tpu.matmul %0, %93, %cst_28 {dimension_numbers = #tpu.dot_dimension_numbers<[1], [0], [0], [1], [0, 0, 1, 1], [], []>} : vector<384x192xf32>, vector<192x128xf32>, vector<384x128xf32> -> vector<384x128xf32>
    %95 = vector.extract_strided_slice %94 {offsets = [0, 0], sizes = [96, 128], strides = [1, 1]} : vector<384x128xf32> to vector<96x128xf32>
    %96 = vector.extract_strided_slice %94 {offsets = [96, 0], sizes = [96, 128], strides = [1, 1]} : vector<384x128xf32> to vector<96x128xf32>
    %97 = arith.maximumf %95, %96 : vector<96x128xf32>
    %98 = vector.extract_strided_slice %94 {offsets = [192, 0], sizes = [96, 128], strides = [1, 1]} : vector<384x128xf32> to vector<96x128xf32>
    %99 = vector.extract_strided_slice %94 {offsets = [288, 0], sizes = [96, 128], strides = [1, 1]} : vector<384x128xf32> to vector<96x128xf32>
    %100 = arith.maximumf %98, %99 : vector<96x128xf32>
    %101 = arith.maximumf %97, %100 : vector<96x128xf32>
    %102 = vector.broadcast %1 : vector<96x1xf32> to vector<96x128xf32>
    %103 = arith.addf %101, %102 : vector<96x128xf32>
    %104 = math.tanh %103 : vector<96x128xf32>
    %c672 = arith.constant 672 : index
    %c0_29 = arith.constant 0 : index
    %105 = vector.load %arg13[%c672, %c0_29] : memref<1152x128xf32, #tpu.memory_space<vmem>>, vector<96x128xf32>
    tpu.vector_store %arg13[%c672, %c0_29], %104 {strides = array<i32>} : memref<1152x128xf32, #tpu.memory_space<vmem>>, vector<96x128xf32>,
    %c512 = arith.constant 512 : index
    %c0_30 = arith.constant 0 : index
    %106 = vector.load %arg1[%c512, %c0_30] : memref<896x128xf32, #tpu.memory_space<vmem>>, vector<192x128xf32>
    %cst_31 = arith.constant dense<0.000000e+00> : vector<384x128xf32>
    %107 = tpu.matmul %0, %106, %cst_31 {dimension_numbers = #tpu.dot_dimension_numbers<[1], [0], [0], [1], [0, 0, 1, 1], [], []>} : vector<384x192xf32>, vector<192x128xf32>, vector<384x128xf32> -> vector<384x128xf32>
    %108 = vector.extract_strided_slice %107 {offsets = [0, 0], sizes = [96, 128], strides = [1, 1]} : vector<384x128xf32> to vector<96x128xf32>
    %109 = vector.extract_strided_slice %107 {offsets = [96, 0], sizes = [96, 128], strides = [1, 1]} : vector<384x128xf32> to vector<96x128xf32>
    %110 = arith.maximumf %108, %109 : vector<96x128xf32>
    %111 = vector.extract_strided_slice %107 {offsets = [192, 0], sizes = [96, 128], strides = [1, 1]} : vector<384x128xf32> to vector<96x128xf32>
    %112 = vector.extract_strided_slice %107 {offsets = [288, 0], sizes = [96, 128], strides = [1, 1]} : vector<384x128xf32> to vector<96x128xf32>
    %113 = arith.maximumf %111, %112 : vector<96x128xf32>
    %114 = arith.maximumf %110, %113 : vector<96x128xf32>
    %115 = vector.broadcast %1 : vector<96x1xf32> to vector<96x128xf32>
    %116 = arith.addf %114, %115 : vector<96x128xf32>
    %117 = math.tanh %116 : vector<96x128xf32>
    %c768 = arith.constant 768 : index
    %c0_32 = arith.constant 0 : index
    %118 = vector.load %arg13[%c768, %c0_32] : memref<1152x128xf32, #tpu.memory_space<vmem>>, vector<96x128xf32>
    tpu.vector_store %arg13[%c768, %c0_32], %117 {strides = array<i32>} : memref<1152x128xf32, #tpu.memory_space<vmem>>, vector<96x128xf32>,
    %c576_33 = arith.constant 576 : index
    %c0_34 = arith.constant 0 : index
    %119 = vector.load %arg1[%c576_33, %c0_34] : memref<896x128xf32, #tpu.memory_space<vmem>>, vector<192x128xf32>
    %cst_35 = arith.constant dense<0.000000e+00> : vector<384x128xf32>
    %120 = tpu.matmul %0, %119, %cst_35 {dimension_numbers = #tpu.dot_dimension_numbers<[1], [0], [0], [1], [0, 0, 1, 1], [], []>} : vector<384x192xf32>, vector<192x128xf32>, vector<384x128xf32> -> vector<384x128xf32>
    %121 = vector.extract_strided_slice %120 {offsets = [0, 0], sizes = [96, 128], strides = [1, 1]} : vector<384x128xf32> to vector<96x128xf32>
    %122 = vector.extract_strided_slice %120 {offsets = [96, 0], sizes = [96, 128], strides = [1, 1]} : vector<384x128xf32> to vector<96x128xf32>
    %123 = arith.maximumf %121, %122 : vector<96x128xf32>
    %124 = vector.extract_strided_slice %120 {offsets = [192, 0], sizes = [96, 128], strides = [1, 1]} : vector<384x128xf32> to vector<96x128xf32>
    %125 = vector.extract_strided_slice %120 {offsets = [288, 0], sizes = [96, 128], strides = [1, 1]} : vector<384x128xf32> to vector<96x128xf32>
    %126 = arith.maximumf %124, %125 : vector<96x128xf32>
    %127 = arith.maximumf %123, %126 : vector<96x128xf32>
    %128 = vector.broadcast %1 : vector<96x1xf32> to vector<96x128xf32>
    %129 = arith.addf %127, %128 : vector<96x128xf32>
    %130 = math.tanh %129 : vector<96x128xf32>
    %c864 = arith.constant 864 : index
    %c0_36 = arith.constant 0 : index
    %131 = vector.load %arg13[%c864, %c0_36] : memref<1152x128xf32, #tpu.memory_space<vmem>>, vector<96x128xf32>
    tpu.vector_store %arg13[%c864, %c0_36], %130 {strides = array<i32>} : memref<1152x128xf32, #tpu.memory_space<vmem>>, vector<96x128xf32>,
    %c640 = arith.constant 640 : index
    %c0_37 = arith.constant 0 : index
    %132 = vector.load %arg1[%c640, %c0_37] : memref<896x128xf32, #tpu.memory_space<vmem>>, vector<192x128xf32>
    %cst_38 = arith.constant dense<0.000000e+00> : vector<384x128xf32>
    %133 = tpu.matmul %0, %132, %cst_38 {dimension_numbers = #tpu.dot_dimension_numbers<[1], [0], [0], [1], [0, 0, 1, 1], [], []>} : vector<384x192xf32>, vector<192x128xf32>, vector<384x128xf32> -> vector<384x128xf32>
    %134 = vector.extract_strided_slice %133 {offsets = [0, 0], sizes = [96, 128], strides = [1, 1]} : vector<384x128xf32> to vector<96x128xf32>
    %135 = vector.extract_strided_slice %133 {offsets = [96, 0], sizes = [96, 128], strides = [1, 1]} : vector<384x128xf32> to vector<96x128xf32>
    %136 = arith.maximumf %134, %135 : vector<96x128xf32>
    %137 = vector.extract_strided_slice %133 {offsets = [192, 0], sizes = [96, 128], strides = [1, 1]} : vector<384x128xf32> to vector<96x128xf32>
    %138 = vector.extract_strided_slice %133 {offsets = [288, 0], sizes = [96, 128], strides = [1, 1]} : vector<384x128xf32> to vector<96x128xf32>
    %139 = arith.maximumf %137, %138 : vector<96x128xf32>
    %140 = arith.maximumf %136, %139 : vector<96x128xf32>
    %141 = vector.broadcast %1 : vector<96x1xf32> to vector<96x128xf32>
    %142 = arith.addf %140, %141 : vector<96x128xf32>
    %143 = math.tanh %142 : vector<96x128xf32>
    %c960 = arith.constant 960 : index
    %c0_39 = arith.constant 0 : index
    %144 = vector.load %arg13[%c960, %c0_39] : memref<1152x128xf32, #tpu.memory_space<vmem>>, vector<96x128xf32>
    tpu.vector_store %arg13[%c960, %c0_39], %143 {strides = array<i32>} : memref<1152x128xf32, #tpu.memory_space<vmem>>, vector<96x128xf32>,
    %c704 = arith.constant 704 : index
    %c0_40 = arith.constant 0 : index
    %145 = vector.load %arg1[%c704, %c0_40] : memref<896x128xf32, #tpu.memory_space<vmem>>, vector<192x128xf32>
    %cst_41 = arith.constant dense<0.000000e+00> : vector<384x128xf32>
    %146 = tpu.matmul %0, %145, %cst_41 {dimension_numbers = #tpu.dot_dimension_numbers<[1], [0], [0], [1], [0, 0, 1, 1], [], []>} : vector<384x192xf32>, vector<192x128xf32>, vector<384x128xf32> -> vector<384x128xf32>
    %147 = vector.extract_strided_slice %146 {offsets = [0, 0], sizes = [96, 128], strides = [1, 1]} : vector<384x128xf32> to vector<96x128xf32>
    %148 = vector.extract_strided_slice %146 {offsets = [96, 0], sizes = [96, 128], strides = [1, 1]} : vector<384x128xf32> to vector<96x128xf32>
    %149 = arith.maximumf %147, %148 : vector<96x128xf32>
    %150 = vector.extract_strided_slice %146 {offsets = [192, 0], sizes = [96, 128], strides = [1, 1]} : vector<384x128xf32> to vector<96x128xf32>
    %151 = vector.extract_strided_slice %146 {offsets = [288, 0], sizes = [96, 128], strides = [1, 1]} : vector<384x128xf32> to vector<96x128xf32>
    %152 = arith.maximumf %150, %151 : vector<96x128xf32>
    %153 = arith.maximumf %149, %152 : vector<96x128xf32>
    %154 = vector.broadcast %1 : vector<96x1xf32> to vector<96x128xf32>
    %155 = arith.addf %153, %154 : vector<96x128xf32>
    %156 = math.tanh %155 : vector<96x128xf32>
    %c1056 = arith.constant 1056 : index
    %c0_42 = arith.constant 0 : index
    %157 = vector.load %arg13[%c1056, %c0_42] : memref<1152x128xf32, #tpu.memory_space<vmem>>, vector<96x128xf32>
    tpu.vector_store %arg13[%c1056, %c0_42], %156 {strides = array<i32>} : memref<1152x128xf32, #tpu.memory_space<vmem>>, vector<96x128xf32>,
    %c0_43 = arith.constant 0 : index
    %c0_44 = arith.constant 0 : index
    %158 = vector.load %arg13[%c0_43, %c0_44] : memref<1152x128xf32, #tpu.memory_space<vmem>>, vector<1152x128xf32>
    %c0_45 = arith.constant 0 : index
    %c0_46 = arith.constant 0 : index
    %159 = vector.load %arg4[%c0_45, %c0_46] : memref<256x1152xf32, #tpu.memory_space<vmem>>, vector<256x1152xf32>
    %cst_47 = arith.constant dense<0.000000e+00> : vector<256x128xf32>
    %160 = tpu.matmul %159, %158, %cst_47 {dimension_numbers = #tpu.dot_dimension_numbers<[1], [0], [0], [1], [0, 0, 1, 1], [], []>} : vector<256x1152xf32>, vector<1152x128xf32>, vector<256x128xf32> -> vector<256x128xf32>
    %161 = math.tanh %160 : vector<256x128xf32>
    %c0_48 = arith.constant 0 : index
    %c0_49 = arith.constant 0 : index
    %162 = vector.load %arg5[%c0_48, %c0_49] : memref<150x256xf32, #tpu.memory_space<vmem>>, vector<150x256xf32>
    %cst_50 = arith.constant dense<0.000000e+00> : vector<150x128xf32>
    %163 = tpu.matmul %162, %161, %cst_50 {dimension_numbers = #tpu.dot_dimension_numbers<[1], [0], [0], [1], [0, 0, 1, 1], [], []>} : vector<150x256xf32>, vector<256x128xf32>, vector<150x128xf32> -> vector<150x128xf32>
    %164 = math.tanh %163 : vector<150x128xf32>
    %c0_51 = arith.constant 0 : index
    %c0_52 = arith.constant 0 : index
    %165 = vector.load %arg6[%c0_51, %c0_52] : memref<36x150xf32, #tpu.memory_space<vmem>>, vector<36x150xf32>
    %cst_53 = arith.constant dense<0.000000e+00> : vector<36x128xf32>
    %166 = tpu.matmul %165, %164, %cst_53 {dimension_numbers = #tpu.dot_dimension_numbers<[1], [0], [0], [1], [0, 0, 1, 1], [], []>} : vector<36x150xf32>, vector<150x128xf32>, vector<36x128xf32> -> vector<36x128xf32>
    %167 = math.tanh %166 : vector<36x128xf32>
    %c0_54 = arith.constant 0 : index
    %c0_55 = arith.constant 0 : index
    %168 = vector.load %arg7[%c0_54, %c0_55] : memref<18x36xf32, #tpu.memory_space<vmem>>, vector<18x36xf32>
    %cst_56 = arith.constant dense<0.000000e+00> : vector<18x128xf32>
    %169 = tpu.matmul %168, %167, %cst_56 {dimension_numbers = #tpu.dot_dimension_numbers<[1], [0], [0], [1], [0, 0, 1, 1], [], []>} : vector<18x36xf32>, vector<36x128xf32>, vector<18x128xf32> -> vector<18x128xf32>
    %c0_57 = arith.constant 0 : index
    %c0_58 = arith.constant 0 : index
    %170 = vector.load %arg8[%c0_57, %c0_58] : memref<18x256xf32, #tpu.memory_space<vmem>>, vector<18x256xf32>
    %cst_59 = arith.constant dense<0.000000e+00> : vector<18x128xf32>
    %171 = tpu.matmul %170, %161, %cst_59 {dimension_numbers = #tpu.dot_dimension_numbers<[1], [0], [0], [1], [0, 0, 1, 1], [], []>} : vector<18x256xf32>, vector<256x128xf32>, vector<18x128xf32> -> vector<18x128xf32>
    %172 = arith.addf %169, %171 : vector<18x128xf32>
    %c0_60 = arith.constant 0 : index
    %c0_61 = arith.constant 0 : index
    %173 = vector.load %arg9[%c0_60, %c0_61] : memref<18x1xf32, #tpu.memory_space<vmem>>, vector<18x1xf32>
    %174 = vector.broadcast %173 : vector<18x1xf32> to vector<18x128xf32>
    %175 = arith.addf %172, %174 : vector<18x128xf32>
    %176 = math.tanh %175 : vector<18x128xf32>
    %c0_62 = arith.constant 0 : index
    %c0_63 = arith.constant 0 : index
    %177 = vector.load %arg10[%c0_62, %c0_63] : memref<10x18xf32, #tpu.memory_space<vmem>>, vector<10x18xf32>
    %cst_64 = arith.constant dense<0.000000e+00> : vector<10x128xf32>
    %178 = tpu.matmul %177, %176, %cst_64 {dimension_numbers = #tpu.dot_dimension_numbers<[1], [0], [0], [1], [0, 0, 1, 1], [], []>} : vector<10x18xf32>, vector<18x128xf32>, vector<10x128xf32> -> vector<10x128xf32>
    %c0_65 = arith.constant 0 : index
    %c0_66 = arith.constant 0 : index
    %179 = vector.load %arg11[%c0_65, %c0_66] : memref<10x1xf32, #tpu.memory_space<vmem>>, vector<10x1xf32>
    %180 = vector.broadcast %179 : vector<10x1xf32> to vector<10x128xf32>
    %181 = arith.addf %178, %180 : vector<10x128xf32>
    %c0_67 = arith.constant 0 : index
    %c0_68 = arith.constant 0 : index
    %182 = vector.load %arg12[%c0_67, %c0_68] : memref<10x128xf32, #tpu.memory_space<vmem>>, vector<10x128xf32>
    tpu.vector_store %arg12[%c0_67, %c0_68], %181 {strides = array<i32>} : memref<10x128xf32, #tpu.memory_space<vmem>>, vector<10x128xf32>,
    return
  }
  func.func @transform_0(%arg0: i32) -> (i32, i32) {
    %c0_i32 = arith.constant 0 : i32
    %c0_i32_0 = arith.constant 0 : i32
    return %c0_i32, %arg0 : i32, i32
  }
  func.func @transform_1(%arg0: i32) -> (i32, i32) {
    %c0_i32 = arith.constant 0 : i32
    %c0_i32_0 = arith.constant 0 : i32
    %c0_i32_1 = arith.constant 0 : i32
    return %c0_i32, %c0_i32_0 : i32, i32
  }
  func.func @transform_2(%arg0: i32) -> (i32, i32) {
    %c0_i32 = arith.constant 0 : i32
    %c0_i32_0 = arith.constant 0 : i32
    %c0_i32_1 = arith.constant 0 : i32
    return %c0_i32, %c0_i32_0 : i32, i32
  }
  func.func @transform_3(%arg0: i32) -> (i32, i32) {
    %c0_i32 = arith.constant 0 : i32
    %c0_i32_0 = arith.constant 0 : i32
    %c0_i32_1 = arith.constant 0 : i32
    return %c0_i32, %c0_i32_0 : i32, i32
  }
  func.func @transform_4(%arg0: i32) -> (i32, i32) {
    %c0_i32 = arith.constant 0 : i32
    %c0_i32_0 = arith.constant 0 : i32
    %c0_i32_1 = arith.constant 0 : i32
    return %c0_i32, %c0_i32_0 : i32, i32
  }
  func.func @transform_5(%arg0: i32) -> (i32, i32) {
    %c0_i32 = arith.constant 0 : i32
    %c0_i32_0 = arith.constant 0 : i32
    %c0_i32_1 = arith.constant 0 : i32
    return %c0_i32, %c0_i32_0 : i32, i32
  }
  func.func @transform_6(%arg0: i32) -> (i32, i32) {
    %c0_i32 = arith.constant 0 : i32
    %c0_i32_0 = arith.constant 0 : i32
    %c0_i32_1 = arith.constant 0 : i32
    return %c0_i32, %c0_i32_0 : i32, i32
  }
  func.func @transform_7(%arg0: i32) -> (i32, i32) {
    %c0_i32 = arith.constant 0 : i32
    %c0_i32_0 = arith.constant 0 : i32
    %c0_i32_1 = arith.constant 0 : i32
    return %c0_i32, %c0_i32_0 : i32, i32
  }
  func.func @transform_8(%arg0: i32) -> (i32, i32) {
    %c0_i32 = arith.constant 0 : i32
    %c0_i32_0 = arith.constant 0 : i32
    %c0_i32_1 = arith.constant 0 : i32
    return %c0_i32, %c0_i32_0 : i32, i32
  }
  func.func @transform_9(%arg0: i32) -> (i32, i32) {
    %c0_i32 = arith.constant 0 : i32
    %c0_i32_0 = arith.constant 0 : i32
    %c0_i32_1 = arith.constant 0 : i32
    return %c0_i32, %c0_i32_0 : i32, i32
  }
  func.func @transform_10(%arg0: i32) -> (i32, i32) {
    %c0_i32 = arith.constant 0 : i32
    %c0_i32_0 = arith.constant 0 : i32
    %c0_i32_1 = arith.constant 0 : i32
    return %c0_i32, %c0_i32_0 : i32, i32
  }
  func.func @transform_11(%arg0: i32) -> (i32, i32) {
    %c0_i32 = arith.constant 0 : i32
    %c0_i32_0 = arith.constant 0 : i32
    return %c0_i32, %arg0 : i32, i32
  }
}

</mosaic_0001>

<bundles_post_ra>
// kernel: forward.1
= control target key start
LH: loop header
LB: loop body
LE: loop exit
PB: predicated region body
PF: predicated region fallthrough
CT: control target
= control target key end

     0   :  { %v16764_v0 = vmov 0.0   ;;  %vm170_vm0 = vcmask 523264   ;;  %vm6979_vm1 = vcmask 179200   ;;  %vm6995_vm2 = vcmask 1045504   ;;  %s16752_s0 = inlined_call_operand.vmem [shape: f32[896,128], index: 0, kind: input, shape index: {}]   ;;  %s16753_s1 = inlined_call_operand.vmem [shape: f32[384,192], index: 1, kind: input, shape index: {}]   ;;  %s16754_s2 = inlined_call_operand.vmem [shape: f32[96,1], index: 2, kind: input, shape index: {}]   ;;  %s16755_s8 = inlined_call_operand.vmem [shape: f32[18,1], index: 8, kind: input, shape index: {}]   ;;  %s16756_s10 = inlined_call_operand.vmem [shape: f32[10,1], index: 10, kind: input, shape index: {}]   ;;  %s16757_s3 = inlined_call_operand.vmem [shape: f32[256,1152], index: 3, kind: input, shape index: {}]   ;;  %s16758_s4 = inlined_call_operand.vmem [shape: f32[150,256], index: 4, kind: input, shape index: {}]   ;;  %s16759_s5 = inlined_call_operand.vmem [shape: f32[36,150], index: 5, kind: input, shape index: {}]   ;;  %s16760_s7 = inlined_call_operand.vmem [shape: f32[18,256], index: 7, kind: input, shape index: {}]   ;;  %s16761_s6 = inlined_call_operand.vmem [shape: f32[18,36], index: 6, kind: input, shape index: {}]   ;;  %s16762_s9 = inlined_call_operand.vmem [shape: f32[10,18], index: 9, kind: input, shape index: {}]   ;;  %s16763_s11 = inlined_call_operand.vmem [shape: f32[10,128], index: 11, kind: output, shape index: {}]  }
   0x1   :  { %315 = vmatprep.subr.mxu0 %v16764_v0  ;;  %776 = vmatprep.subr.mxu1 %v16764_v0  ;;  %v161_v1 = vld [vmem:[%s16752_s0 + $0x78] sm:$0xff]  ;;  %v160_v3 = vld [vmem:[%s16752_s0 + $0x70] sm:$0xff]  ;;  %v159_v5 = vld [vmem:[%s16752_s0 + $0x68] sm:$0xff]  ;;  %vm9039_vm3 = vmmov 0   ;;  %vm7193_vm4 = vcmask 1043456   ;;  %vm7183_vm5 = vcmask 293888  }
   0x2   :  { %v9108_v2 = vld [vmem:[%s16752_s0 + $0xb8] sm:$0xff]  ;;  %316 = vmatpush1.msra.mxu0 %v161_v1  ;;  %v9117_v4 = vld [vmem:[%s16752_s0 + $0xb0] sm:$0xff]  ;;  %v9127_v6 = vld [vmem:[%s16752_s0 + $0xa8] sm:$0xff]  ;;  %vm7315_vm6 = vcmask 146432   ;;  %vm7322_vm7 = vcmask 1041408  }
   0x3   :  { %777 = vmatpush1.msra.mxu1 %v9108_v2  ;;  %317 = vmatprep.subr.mxu0 %v16764_v0  ;;  %v158_v7 = vld [vmem:[%s16752_s0 + $0x60] sm:$0xff]  ;;  %v157_v9 = vld [vmem:[%s16752_s0 + $0x58] sm:$0xff]  ;;  %v156_v11 = vld [vmem:[%s16752_s0 + $0x50] sm:$0xff] }
   0x4   :  { %778 = vmatprep.subr.mxu1 %v16764_v0  ;;  %318 = vmatpush1.msra.mxu0 %v160_v3  ;;  %v9138_v8 = vld [vmem:[%s16752_s0 + $0xa0] sm:$0xff]  ;;  %v9149_v10 = vld [vmem:[%s16752_s0 + $0x98] sm:$0xff]  ;;  %v9160_v12 = vld [vmem:[%s16752_s0 + $0x90] sm:$0xff] }
   0x5   :  { %779 = vmatpush1.msra.mxu1 %v9117_v4  ;;  %319 = vmatprep.subr.mxu0 %v16764_v0  ;;  %v155_v13 = vld [vmem:[%s16752_s0 + $0x48] sm:$0xff]  ;;  %v154_v15 = vld [vmem:[%s16752_s0 + $0x40] sm:$0xff]  ;;  %v153_v17 = vld [vmem:[%s16752_s0 + $0x38] sm:$0xff] }
   0x6   :  { %780 = vmatprep.subr.mxu1 %v16764_v0  ;;  %320 = vmatpush1.msra.mxu0 %v159_v5  ;;  %v9171_v14 = vld [vmem:[%s16752_s0 + $0x88] sm:$0xff]  ;;  %v9182_v16 = vld [vmem:[%s16752_s0 + $0x80] sm:$0xff]  ;;  %v152_v18 = vld [vmem:[%s16752_s0 + $0x30] sm:$0xff] }
   0x7   :  { %781 = vmatpush1.msra.mxu1 %v9127_v6  ;;  %321 = vmatprep.subr.mxu0 %v16764_v0  ;;  %v151_v19 = vld [vmem:[%s16752_s0 + $0x28] sm:$0xff]  ;;  %v150_v20 = vld [vmem:[%s16752_s0 + $0x20] sm:$0xff]  ;;  %v149_v21 = vld [vmem:[%s16752_s0 + $0x18] sm:$0xff] }
   0x8   :  { %782 = vmatprep.subr.mxu1 %v16764_v0  ;;  %322 = vmatpush1.msra.mxu0 %v158_v7  ;;  %v148_v22 = vld [vmem:[%s16752_s0 + $0x10] sm:$0xff]  ;;  %v147_v23 = vld [vmem:[%s16752_s0 + $0x8] sm:$0xff]  ;;  %v146_v24 = vld [vmem:[%s16752_s0] sm:$0xff] }
   0x9   :  { %783 = vmatpush1.msra.mxu1 %v9138_v8  ;;  %323 = vmatprep.subr.mxu0 %v16764_v0  ;;  %v9231_v25 = vld [vmem:[%s16752_s0 + $0xf8] sm:$0xff]  ;;  %v9238_v26 = vld [vmem:[%s16752_s0 + $0xf0] sm:$0xff]  ;;  %v9247_v27 = vld [vmem:[%s16752_s0 + $0xe8] sm:$0xff] }
   0xa   :  { %784 = vmatprep.subr.mxu1 %v16764_v0  ;;  %324 = vmatpush1.msra.mxu0 %v157_v9  ;;  %v9256_v28 = vld [vmem:[%s16752_s0 + $0xe0] sm:$0xff]  ;;  %v9265_v29 = vld [vmem:[%s16752_s0 + $0xd8] sm:$0xff]  ;;  %v9274_v30 = vld [vmem:[%s16752_s0 + $0xd0] sm:$0xff] }
   0xb   :  { %785 = vmatpush1.msra.mxu1 %v9149_v10  ;;  %325 = vmatprep.subr.mxu0 %v16764_v0  ;;  %v9283_v31 = vld [vmem:[%s16752_s0 + $0xc8] sm:$0xff]  ;;  %v9299_v33 = vld [vmem:[%s16752_s0 + $0xc0] sm:$0xff]  ;;  %v9314_v35 = vld [vmem:[%s16753_s1 + $0x18] sm:$0xff] }
   0xc   :  { %786 = vmatprep.subr.mxu1 %v16764_v0  ;;  %326 = vmatpush1.msra.mxu0 %v156_v11  ;;  %v9292_v32 = vld [vmem:[%s16753_s1 + $0x8] sm:$0xff]  ;;  %v9306_v34 = vld [vmem:[%s16753_s1] sm:$0xff]  ;;  %v9324_v36 = vld [vmem:[%s16752_s0 + $0x138] sm:$0xff] }
   0xd   :  { %787 = vmatpush1.msra.mxu1 %v9160_v12  ;;  %327 = vmatprep.subr.mxu0 %v16764_v0  ;;  %v9333_v37 = vld [vmem:[%s16753_s1 + $0x10] sm:$0xff]  ;;  %v9338_v38 = vld [vmem:[%s16753_s1 + $0x28] sm:$0xff]  ;;  %v9358_v40 = vld [vmem:[%s16753_s1 + $0x20] sm:$0xff] }
   0xe   :  { %788 = vmatprep.subr.mxu1 %v16764_v0  ;;  %328 = vmatpush1.msra.mxu0 %v155_v13  ;;  %v9349_v39 = vld [vmem:[%s16752_s0 + $0x130] sm:$0xff]  ;;  %v9363_v41 = vld [vmem:[%s16753_s1 + $0x38] sm:$0xff]  ;;  %v9374_v42 = vld [vmem:[%s16752_s0 + $0x128] sm:$0xff] }
   0xf   :  { %789 = vmatpush1.msra.mxu1 %v9171_v14  ;;  %329 = vmatprep.subr.mxu0 %v16764_v0  ;;  %v9383_v43 = vld [vmem:[%s16753_s1 + $0x30] sm:$0xff]  ;;  %v9388_v44 = vld [vmem:[%s16753_s1 + $0x48] sm:$0xff]  ;;  %v9399_v45 = vld [vmem:[%s16752_s0 + $0x120] sm:$0xff] }
  0x10   :  { %790 = vmatprep.subr.mxu1 %v16764_v0  ;;  %330 = vmatpush1.msra.mxu0 %v154_v15  ;;  %v9408_v46 = vld [vmem:[%s16753_s1 + $0x40] sm:$0xff]  ;;  %v9413_v47 = vld [vmem:[%s16753_s1 + $0x58] sm:$0xff]  ;;  %v9433_v49 = vld [vmem:[%s16753_s1 + $0x50] sm:$0xff] }
  0x11   :  { %791 = vmatpush1.msra.mxu1 %v9182_v16  ;;  %331 = vmatprep.subr.mxu0 %v16764_v0  ;;  %v9424_v48 = vld [vmem:[%s16752_s0 + $0x118] sm:$0xff]  ;;  %v9438_v50 = vld [vmem:[%s16753_s1 + $0x68] sm:$0xff]  ;;  %v9449_v51 = vld [vmem:[%s16752_s0 + $0x110] sm:$0xff] }
  0x12   :  { %792 = vmatprep.subr.mxu1 %v16764_v0  ;;  %332 = vmatpush1.msra.mxu0 %v153_v17  ;;  %v9458_v52 = vld [vmem:[%s16753_s1 + $0x60] sm:$0xff]  ;;  %v9463_v53 = vld [vmem:[%s16753_s1 + $0x78] sm:$0xff]  ;;  %v9474_v54 = vld [vmem:[%s16752_s0 + $0x108] sm:$0xff] }
  0x13   :  { %793 = vmatpush1.msra.mxu1 %v161_v1  ;;  %333 = vmatprep.subr.mxu0 %v16764_v0  ;;  %v9483_v55 = vld [vmem:[%s16753_s1 + $0x70] sm:$0xff]  ;;  %v9488_v56 = vld [vmem:[%s16753_s1 + $0x88] sm:$0xff]  ;;  %v9499_v57 = vld [vmem:[%s16752_s0 + $0x100] sm:$0xff] }
  0x14   :  { %794 = vmatprep.subr.mxu1 %v16764_v0  ;;  %334 = vmatpush1.msra.mxu0 %v152_v18  ;;  %v9508_v58 = vld [vmem:[%s16753_s1 + $0x80] sm:$0xff]  ;;  %v9513_v59 = vld [vmem:[%s16753_s1 + $0x98] sm:$0xff]  ;;  %v9528_v60 = vld [vmem:[%s16753_s1 + $0x90] sm:$0xff] }
  0x15   :  { %795 = vmatpush1.msra.mxu1 %v160_v3  ;;  %335 = vmatprep.subr.mxu0 %v16764_v0  ;;  %v9533_v61 = vld [vmem:[%s16753_s1 + $0xa8] sm:$0xff]  ;;  %v9548_v62 = vld [vmem:[%s16753_s1 + $0xa0] sm:$0xff]  ;;  %v9553_v63 = vld [vmem:[%s16753_s1 + $0xb8] sm:$0xff] }
  0x16   :  { %796 = vmatprep.subr.mxu1 %v16764_v0  ;;  %336 = vmatpush1.msra.mxu0 %v151_v19  ;;  %v9568_v1 = vld [vmem:[%s16753_s1 + $0xb0] sm:$0xff]  ;;  %v9588_v3 = vld [vmem:[%s16753_s1 + $0xc0] sm:$0xff]  ;;  %v9723_v18 = vld [vmem:[%s16753_s1 + $0x138] sm:$0xff] }
  0x17   :  { %797 = vmatpush1.msra.mxu1 %v159_v5  ;;  %337 = vmatprep.subr.mxu0 %v16764_v0  ;;  %v9608_v5 = vld [vmem:[%s16753_s1 + $0xd0] sm:$0xff]  ;;  %v9718_v17 = vld [vmem:[%s16753_s1 + $0x120] sm:$0xff]  ;;  %v9734_v19 = vld [vmem:[%s16752_s0 + $0x168] sm:$0xff] }
  0x18   :  { %798 = vmatprep.subr.mxu1 %v16764_v0  ;;  %338 = vmatpush1.msra.mxu0 %v150_v20  ;;  %v9743_v20 = vld [vmem:[%s16753_s1 + $0x130] sm:$0xff] }
  0x19   :  { %799 = vmatpush1.msra.mxu1 %v158_v7  ;;  %339 = vmatprep.subr.mxu0 %v16764_v0  ;;  %v9628_v7 = vld [vmem:[%s16753_s1 + $0xe0] sm:$0xff] }
  0x1a   :  { %800 = vmatprep.subr.mxu1 %v16764_v0  ;;  %340 = vmatpush1.msra.mxu0 %v149_v21  ;;  %v9748_v21 = vld [vmem:[%s16753_s1 + $0x148] sm:$0xff] }
  0x1b   :  { %801 = vmatpush1.msra.mxu1 %v157_v9  ;;  %341 = vmatprep.subr.mxu0 %v16764_v0  ;;  %v9648_v9 = vld [vmem:[%s16753_s1 + $0xf0] sm:$0xff] }
  0x1c   :  { %802 = vmatprep.subr.mxu1 %v16764_v0  ;;  %342 = vmatpush1.msra.mxu0 %v148_v22  ;;  %v9759_v22 = vld [vmem:[%s16752_s0 + $0x160] sm:$0xff] }
  0x1d   :  { %803 = vmatpush1.msra.mxu1 %v156_v11  ;;  %343 = vmatprep.subr.mxu0 %v16764_v0  ;;  %v9668_v11 = vld [vmem:[%s16753_s1 + $0x100] sm:$0xff] }
  0x1e   :  { %804 = vmatprep.subr.mxu1 %v16764_v0  ;;  %344 = vmatpush1.msra.mxu0 %v147_v23  ;;  %v9768_v23 = vld [vmem:[%s16753_s1 + $0x140] sm:$0xff] }
  0x1f   :  { %805 = vmatpush1.msra.mxu1 %v155_v13  ;;  %345 = vmatprep.subr.mxu0 %v16764_v0  ;;  %v9684_v13 = vld [vmem:[%s16752_s0 + $0x178] sm:$0xff] }
  0x20   :  { %806 = vmatprep.subr.mxu1 %v16764_v0  ;;  %346 = vmatpush1.msra.mxu0 %v146_v24  ;;  %v9773_v24 = vld [vmem:[%s16753_s1 + $0x158] sm:$0xff] }
  0x21   :  { %807 = vmatpush1.msra.mxu1 %v154_v15  ;;  %363 = vmatprep.subr.mxu0 %v16764_v0  ;;  %v9698_v15 = vld [vmem:[%s16753_s1 + $0x128] sm:$0xff] }
  0x22   :  { %824 = vmatprep.subr.mxu1 %v16764_v0  ;;  %364 = vmatpush2.msra.mxu0 %v9108_v2 }
  0x23   :  { %825 = vmatpush2.msra.mxu1 %v9231_v25  ;;  %365 = vmatprep.subr.mxu0 %v16764_v0 }
  0x24   :  { %826 = vmatprep.subr.mxu1 %v16764_v0  ;;  %366 = vmatpush2.msra.mxu0 %v9117_v4 }
  0x25   :  { %827 = vmatpush2.msra.mxu1 %v9238_v26  ;;  %367 = vmatprep.subr.mxu0 %v16764_v0 }
  0x26   :  { %828 = vmatprep.subr.mxu1 %v16764_v0  ;;  %368 = vmatpush2.msra.mxu0 %v9127_v6 }
  0x27   :  { %829 = vmatpush2.msra.mxu1 %v9247_v27  ;;  %369 = vmatprep.subr.mxu0 %v16764_v0 }
  0x28   :  { %830 = vmatprep.subr.mxu1 %v16764_v0  ;;  %370 = vmatpush2.msra.mxu0 %v9138_v8 }
  0x29   :  { %831 = vmatpush2.msra.mxu1 %v9256_v28  ;;  %371 = vmatprep.subr.mxu0 %v16764_v0 }
  0x2a   :  { %832 = vmatprep.subr.mxu1 %v16764_v0  ;;  %372 = vmatpush2.msra.mxu0 %v9149_v10 }
  0x2b   :  { %833 = vmatpush2.msra.mxu1 %v9265_v29  ;;  %373 = vmatprep.subr.mxu0 %v16764_v0 }
  0x2c   :  { %834 = vmatprep.subr.mxu1 %v16764_v0  ;;  %374 = vmatpush2.msra.mxu0 %v9160_v12 }
  0x2d   :  { %835 = vmatpush2.msra.mxu1 %v9274_v30  ;;  %375 = vmatprep.subr.mxu0 %v16764_v0 }
  0x2e   :  { %836 = vmatprep.subr.mxu1 %v16764_v0  ;;  %376 = vmatpush2.msra.mxu0 %v9171_v14 }
  0x2f   :  { %837 = vmatpush2.msra.mxu1 %v9283_v31  ;;  %377 = vmatprep.subr.mxu0 %v16764_v0 }
  0x30   :  { %838 = vmatprep.subr.mxu1 %v16764_v0  ;;  %378 = vmatpush2.msra.mxu0 %v9182_v16 }
  0x31   :  { %7407 = vmatprep.mubr.msk.f32.mxu0 %vm170_vm0, %v9292_v32  ;;  %839 = vmatpush2.msra.mxu1 %v9299_v33 }
  0x32   :  { %7455 = vmatprep.mubr.msk.f32.mxu1 %vm170_vm0, %v9292_v32  ;;  %380 = vmatmul.mubr.f32.vlgmr.msra.gmra.mxu0 %v9306_v34 }
  0x33   :  { %841 = vmatmul.mubr.f32.vlgmr.msra.gmra.mxu1 %v9306_v34  ;;  %7408 = vmatprep.mubr.msk.f32.mxu0 %vm170_vm0, %v9314_v35 }
  0x34   :  { %7456 = vmatprep.mubr.msk.f32.mxu1 %vm170_vm0, %v9314_v35  ;;  %1177 = vmatprep.subr.mxu0 %v16764_v0 }
  0x35   :  { %1578 = vmatprep.subr.mxu1 %v16764_v0  ;;  %1178 = vmatpush1.msra.mxu0 %v9231_v25 }
  0x36   :  { %1579 = vmatpush1.msra.mxu1 %v9324_v36  ;;  %385 = vmatmul.mubr.f32.gmra.mxu0 %v9333_v37 }
  0x37   :  { %846 = vmatmul.mubr.f32.gmra.mxu1 %v9333_v37  ;;  %7409 = vmatprep.mubr.msk.f32.mxu0 %vm170_vm0, %v9338_v38 }
  0x38   :  { %7457 = vmatprep.mubr.msk.f32.mxu1 %vm170_vm0, %v9338_v38  ;;  %1179 = vmatprep.subr.mxu0 %v16764_v0 }
  0x39   :  { %1580 = vmatprep.subr.mxu1 %v16764_v0  ;;  %1180 = vmatpush1.msra.mxu0 %v9238_v26 }
  0x3a   :  { %1581 = vmatpush1.msra.mxu1 %v9349_v39  ;;  %390 = vmatmul.mubr.f32.gmra.mxu0 %v9358_v40 }
  0x3b   :  { %851 = vmatmul.mubr.f32.gmra.mxu1 %v9358_v40  ;;  %7410 = vmatprep.mubr.msk.f32.mxu0 %vm170_vm0, %v9363_v41 }
  0x3c   :  { %7458 = vmatprep.mubr.msk.f32.mxu1 %vm170_vm0, %v9363_v41  ;;  %1181 = vmatprep.subr.mxu0 %v16764_v0 }
  0x3d   :  { %1582 = vmatprep.subr.mxu1 %v16764_v0  ;;  %1182 = vmatpush1.msra.mxu0 %v9247_v27 }
  0x3e   :  { %1583 = vmatpush1.msra.mxu1 %v9374_v42  ;;  %395 = vmatmul.mubr.f32.gmra.mxu0 %v9383_v43 }
  0x3f   :  { %856 = vmatmul.mubr.f32.gmra.mxu1 %v9383_v43  ;;  %7411 = vmatprep.mubr.msk.f32.mxu0 %vm170_vm0, %v9388_v44 }
  0x40   :  { %7459 = vmatprep.mubr.msk.f32.mxu1 %vm170_vm0, %v9388_v44  ;;  %1183 = vmatprep.subr.mxu0 %v16764_v0 }
  0x41   :  { %1584 = vmatprep.subr.mxu1 %v16764_v0  ;;  %1184 = vmatpush1.msra.mxu0 %v9256_v28 }
  0x42   :  { %1585 = vmatpush1.msra.mxu1 %v9399_v45  ;;  %400 = vmatmul.mubr.f32.gmra.mxu0 %v9408_v46 }
  0x43   :  { %861 = vmatmul.mubr.f32.gmra.mxu1 %v9408_v46  ;;  %7412 = vmatprep.mubr.msk.f32.mxu0 %vm170_vm0, %v9413_v47 }
  0x44   :  { %7460 = vmatprep.mubr.msk.f32.mxu1 %vm170_vm0, %v9413_v47  ;;  %1185 = vmatprep.subr.mxu0 %v16764_v0 }
  0x45   :  { %1586 = vmatprep.subr.mxu1 %v16764_v0  ;;  %1186 = vmatpush1.msra.mxu0 %v9265_v29 }
  0x46   :  { %1587 = vmatpush1.msra.mxu1 %v9424_v48  ;;  %405 = vmatmul.mubr.f32.gmra.mxu0 %v9433_v49 }
  0x47   :  { %866 = vmatmul.mubr.f32.gmra.mxu1 %v9433_v49  ;;  %7413 = vmatprep.mubr.msk.f32.mxu0 %vm170_vm0, %v9438_v50 }
  0x48   :  { %7461 = vmatprep.mubr.msk.f32.mxu1 %vm170_vm0, %v9438_v50  ;;  %1187 = vmatprep.subr.mxu0 %v16764_v0 }
  0x49   :  { %1588 = vmatprep.subr.mxu1 %v16764_v0  ;;  %1188 = vmatpush1.msra.mxu0 %v9274_v30 }
  0x4a   :  { %1589 = vmatpush1.msra.mxu1 %v9449_v51  ;;  %410 = vmatmul.mubr.f32.gmra.mxu0 %v9458_v52 }
  0x4b   :  { %871 = vmatmul.mubr.f32.gmra.mxu1 %v9458_v52  ;;  %7414 = vmatprep.mubr.msk.f32.mxu0 %vm170_vm0, %v9463_v53 }
  0x4c   :  { %7462 = vmatprep.mubr.msk.f32.mxu1 %vm170_vm0, %v9463_v53  ;;  %1189 = vmatprep.subr.mxu0 %v16764_v0 }
  0x4d   :  { %1590 = vmatprep.subr.mxu1 %v16764_v0  ;;  %1190 = vmatpush1.msra.mxu0 %v9283_v31 }
  0x4e   :  { %1591 = vmatpush1.msra.mxu1 %v9474_v54  ;;  %415 = vmatmul.mubr.f32.gmra.mxu0 %v9483_v55 }
  0x4f   :  { %876 = vmatmul.mubr.f32.gmra.mxu1 %v9483_v55  ;;  %7415 = vmatprep.mubr.msk.f32.mxu0 %vm170_vm0, %v9488_v56 }
  0x50   :  { %7463 = vmatprep.mubr.msk.f32.mxu1 %vm170_vm0, %v9488_v56  ;;  %1191 = vmatprep.subr.mxu0 %v16764_v0 }
  0x51   :  { %1592 = vmatprep.subr.mxu1 %v16764_v0  ;;  %1192 = vmatpush1.msra.mxu0 %v9299_v33 }
  0x52   :  { %1593 = vmatpush1.msra.mxu1 %v9499_v57  ;;  %420 = vmatmul.mubr.f32.gmra.mxu0 %v9508_v58 }
  0x53   :  { %881 = vmatmul.mubr.f32.gmra.mxu1 %v9508_v58  ;;  %7416 = vmatprep.mubr.msk.f32.mxu0 %vm170_vm0, %v9513_v59 }
  0x54   :  { %7464 = vmatprep.mubr.msk.f32.mxu1 %vm170_vm0, %v9513_v59  ;;  %1193 = vmatprep.subr.mxu0 %v16764_v0 }
  0x55   :  { %1594 = vmatprep.subr.mxu1 %v16764_v0  ;;  %1194 = vmatpush1.msra.mxu0 %v9108_v2  ;;  %v9573_v2 = vld [vmem:[%s16753_s1 + $0xc8] sm:$0xff] }
  0x56   :  { %1595 = vmatpush1.msra.mxu1 %v9231_v25  ;;  %425 = vmatmul.mubr.f32.gmra.mxu0 %v9528_v60  ;;  %v9784_v25 = vld [vmem:[%s16752_s0 + $0x158] sm:$0xff] }
  0x57   :  { %886 = vmatmul.mubr.f32.gmra.mxu1 %v9528_v60  ;;  %7417 = vmatprep.mubr.msk.f32.mxu0 %vm170_vm0, %v9533_v61 }
  0x58   :  { %7465 = vmatprep.mubr.msk.f32.mxu1 %vm170_vm0, %v9533_v61  ;;  %1195 = vmatprep.subr.mxu0 %v16764_v0 }
  0x59   :  { %1596 = vmatprep.subr.mxu1 %v16764_v0  ;;  %1196 = vmatpush1.msra.mxu0 %v9117_v4  ;;  %v9593_v4 = vld [vmem:[%s16753_s1 + $0xd8] sm:$0xff] }
  0x5a   :  { %1597 = vmatpush1.msra.mxu1 %v9238_v26  ;;  %430 = vmatmul.mubr.f32.gmra.mxu0 %v9548_v62  ;;  %v9793_v26 = vld [vmem:[%s16753_s1 + $0x150] sm:$0xff] }
  0x5b   :  { %891 = vmatmul.mubr.f32.gmra.mxu1 %v9548_v62  ;;  %7418 = vmatprep.mubr.msk.f32.mxu0 %vm170_vm0, %v9553_v63 }
  0x5c   :  { %7466 = vmatprep.mubr.msk.f32.mxu1 %vm170_vm0, %v9553_v63  ;;  %1197 = vmatprep.subr.mxu0 %v16764_v0 }
  0x5d   :  { %1598 = vmatprep.subr.mxu1 %v16764_v0  ;;  %1198 = vmatpush1.msra.mxu0 %v9127_v6  ;;  %v9613_v6 = vld [vmem:[%s16753_s1 + $0xe8] sm:$0xff] }
  0x5e   :  { %1599 = vmatpush1.msra.mxu1 %v9247_v27  ;;  %435 = vmatmul.mubr.f32.gmra.mxu0 %v9568_v1  ;;  %v83_v27 = vld [vmem:[%s16753_s1 + $0x168] sm:$0xff] }
  0x5f   :  { %896 = vmatmul.mubr.f32.gmra.mxu1 %v9568_v1  ;;  %7419 = vmatprep.mubr.msk.f32.mxu0 %vm170_vm0, %v9573_v2 }
  0x60   :  { %7467 = vmatprep.mubr.msk.f32.mxu1 %vm170_vm0, %v9573_v2  ;;  %1199 = vmatprep.subr.mxu0 %v16764_v0 }
  0x61   :  { %1600 = vmatprep.subr.mxu1 %v16764_v0  ;;  %1200 = vmatpush1.msra.mxu0 %v9138_v8  ;;  %v9633_v8 = vld [vmem:[%s16753_s1 + $0xf8] sm:$0xff] }
  0x62   :  { %1601 = vmatpush1.msra.mxu1 %v9256_v28  ;;  %440 = vmatmul.mubr.f32.gmra.mxu0 %v9588_v3  ;;  %v9807_v28 = vld [vmem:[%s16752_s0 + $0x150] sm:$0xff] }
  0x63   :  { %901 = vmatmul.mubr.f32.gmra.mxu1 %v9588_v3  ;;  %7420 = vmatprep.mubr.msk.f32.mxu0 %vm170_vm0, %v9593_v4 }
  0x64   :  { %7468 = vmatprep.mubr.msk.f32.mxu1 %vm170_vm0, %v9593_v4  ;;  %1201 = vmatprep.subr.mxu0 %v16764_v0 }
  0x65   :  { %1602 = vmatprep.subr.mxu1 %v16764_v0  ;;  %1202 = vmatpush1.msra.mxu0 %v9149_v10  ;;  %v9653_v10 = vld [vmem:[%s16753_s1 + $0x108] sm:$0xff] }
  0x66   :  { %1603 = vmatpush1.msra.mxu1 %v9265_v29  ;;  %445 = vmatmul.mubr.f32.gmra.mxu0 %v9608_v5  ;;  %v82_v29 = vld [vmem:[%s16753_s1 + $0x160] sm:$0xff] }
  0x67   :  { %906 = vmatmul.mubr.f32.gmra.mxu1 %v9608_v5  ;;  %7421 = vmatprep.mubr.msk.f32.mxu0 %vm170_vm0, %v9613_v6 }
  0x68   :  { %7469 = vmatprep.mubr.msk.f32.mxu1 %vm170_vm0, %v9613_v6  ;;  %1203 = vmatprep.subr.mxu0 %v16764_v0 }
  0x69   :  { %1604 = vmatprep.subr.mxu1 %v16764_v0  ;;  %1204 = vmatpush1.msra.mxu0 %v9160_v12  ;;  %v9673_v12 = vld [vmem:[%s16753_s1 + $0x118] sm:$0xff] }
  0x6a   :  { %1605 = vmatpush1.msra.mxu1 %v9274_v30  ;;  %450 = vmatmul.mubr.f32.gmra.mxu0 %v9628_v7  ;;  %v85_v30 = vld [vmem:[%s16753_s1 + $0x178] sm:$0xff] }
  0x6b   :  { %911 = vmatmul.mubr.f32.gmra.mxu1 %v9628_v7  ;;  %7422 = vmatprep.mubr.msk.f32.mxu0 %vm170_vm0, %v9633_v8 }
  0x6c   :  { %7470 = vmatprep.mubr.msk.f32.mxu1 %vm170_vm0, %v9633_v8  ;;  %1205 = vmatprep.subr.mxu0 %v16764_v0 }
  0x6d   :  { %1606 = vmatprep.subr.mxu1 %v16764_v0  ;;  %1206 = vmatpush1.msra.mxu0 %v9171_v14  ;;  %v9693_v14 = vld [vmem:[%s16753_s1 + $0x110] sm:$0xff] }
  0x6e   :  { %1607 = vmatpush1.msra.mxu1 %v9283_v31  ;;  %455 = vmatmul.mubr.f32.gmra.mxu0 %v9648_v9  ;;  %v9824_v31 = vld [vmem:[%s16752_s0 + $0x148] sm:$0xff] }
  0x6f   :  { %916 = vmatmul.mubr.f32.gmra.mxu1 %v9648_v9  ;;  %7423 = vmatprep.mubr.msk.f32.mxu0 %vm170_vm0, %v9653_v10 }
  0x70   :  { %7471 = vmatprep.mubr.msk.f32.mxu1 %vm170_vm0, %v9653_v10  ;;  %1207 = vmatprep.subr.mxu0 %v16764_v0 }
  0x71   :  { %1608 = vmatprep.subr.mxu1 %v16764_v0  ;;  %1208 = vmatpush1.msra.mxu0 %v9182_v16  ;;  %v9709_v16 = vld [vmem:[%s16752_s0 + $0x170] sm:$0xff] }
  0x72   :  { %1609 = vmatpush1.msra.mxu1 %v9299_v33  ;;  %460 = vmatmul.mubr.f32.gmra.mxu0 %v9668_v11  ;;  %v84_v33 = vld [vmem:[%s16753_s1 + $0x170] sm:$0xff] }
  0x73   :  { %921 = vmatmul.mubr.f32.gmra.mxu1 %v9668_v11  ;;  %7424 = vmatprep.mubr.msk.f32.mxu0 %vm170_vm0, %v9673_v12 }
  0x74   :  { %7472 = vmatprep.mubr.msk.f32.mxu1 %vm170_vm0, %v9673_v12  ;;  %1225 = vmatprep.subr.mxu0 %v16764_v0 }
  0x75   :  { %1626 = vmatprep.subr.mxu1 %v16764_v0  ;;  %1226 = vmatpush2.msra.mxu0 %v9324_v36  ;;  %v87_v36 = vld [vmem:[%s16753_s1 + $0x188] sm:$0xff] }
  0x76   :  { %1627 = vmatpush2.msra.mxu1 %v9684_v13  ;;  %465 = vmatmul.mubr.f32.gmra.mxu0 %v9693_v14 }
  0x77   :  { %926 = vmatmul.mubr.f32.gmra.mxu1 %v9693_v14  ;;  %7425 = vmatprep.mubr.msk.f32.mxu0 %vm170_vm0, %v9698_v15 }
  0x78   :  { %7473 = vmatprep.mubr.msk.f32.mxu1 %vm170_vm0, %v9698_v15  ;;  %1227 = vmatprep.subr.mxu0 %v16764_v0 }
  0x79   :  { %1628 = vmatprep.subr.mxu1 %v16764_v0  ;;  %1228 = vmatpush2.msra.mxu0 %v9349_v39  ;;  %v9841_v39 = vld [vmem:[%s16752_s0 + $0x140] sm:$0xff] }
  0x7a   :  { %1629 = vmatpush2.msra.mxu1 %v9709_v16  ;;  %470 = vmatmul.mubr.f32.gmra.mxu0 %v9718_v17 }
  0x7b   :  { %931 = vmatmul.mubr.f32.gmra.mxu1 %v9718_v17  ;;  %7426 = vmatprep.mubr.msk.f32.mxu0 %vm170_vm0, %v9723_v18 }
  0x7c   :  { %7474 = vmatprep.mubr.msk.f32.mxu1 %vm170_vm0, %v9723_v18  ;;  %1229 = vmatprep.subr.mxu0 %v16764_v0 }
  0x7d   :  { %1630 = vmatprep.subr.mxu1 %v16764_v0  ;;  %1230 = vmatpush2.msra.mxu0 %v9374_v42  ;;  %v86_v42 = vld [vmem:[%s16753_s1 + $0x180] sm:$0xff] }
  0x7e   :  { %1631 = vmatpush2.msra.mxu1 %v9734_v19  ;;  %475 = vmatmul.mubr.f32.gmra.mxu0 %v9743_v20 }
  0x7f   :  { %936 = vmatmul.mubr.f32.gmra.mxu1 %v9743_v20  ;;  %7427 = vmatprep.mubr.msk.f32.mxu0 %vm170_vm0, %v9748_v21 }
  0x80   :  { %7475 = vmatprep.mubr.msk.f32.mxu1 %vm170_vm0, %v9748_v21  ;;  %1231 = vmatprep.subr.mxu0 %v16764_v0 }
  0x81   :  { %1632 = vmatprep.subr.mxu1 %v16764_v0  ;;  %1232 = vmatpush2.msra.mxu0 %v9399_v45  ;;  %v89_v45 = vld [vmem:[%s16753_s1 + $0x198] sm:$0xff] }
  0x82   :  { %1633 = vmatpush2.msra.mxu1 %v9759_v22  ;;  %480 = vmatmul.mubr.f32.gmra.mxu0 %v9768_v23 }
  0x83   :  { %941 = vmatmul.mubr.f32.gmra.mxu1 %v9768_v23  ;;  %7428 = vmatprep.mubr.msk.f32.mxu0 %vm170_vm0, %v9773_v24 }
  0x84   :  { %7476 = vmatprep.mubr.msk.f32.mxu1 %vm170_vm0, %v9773_v24  ;;  %1233 = vmatprep.subr.mxu0 %v16764_v0 }
  0x85   :  { %1634 = vmatprep.subr.mxu1 %v16764_v0  ;;  %1234 = vmatpush2.msra.mxu0 %v9424_v48  ;;  %v135_v48 = vld [vmem:[%s16754_s2 + $0x8] sm:$0xff] }
  0x86   :  { %1635 = vmatpush2.msra.mxu1 %v9784_v25  ;;  %485 = vmatmul.mubr.f32.gmra.mxu0 %v9793_v26 }
  0x87   :  { %946 = vmatmul.mubr.f32.gmra.mxu1 %v9793_v26  ;;  %7429 = vmatprep.mubr.msk.f32.mxu0 %vm170_vm0, %v83_v27 }
  0x88   :  { %7477 = vmatprep.mubr.msk.f32.mxu1 %vm170_vm0, %v83_v27  ;;  %1235 = vmatprep.subr.mxu0 %v16764_v0  ;;  %v9038_v27 = vmov 0  }
  0x89   :  { %1636 = vmatprep.subr.mxu1 %v16764_v0  ;;  %1236 = vmatpush2.msra.mxu0 %v9449_v51  ;;  %v137_v51 = vld [vmem:[%s16754_s2 + $0x18] sm:$0xff] }
  0x8a   :  { %1637 = vmatpush2.msra.mxu1 %v9807_v28  ;;  %490 = vmatmul.mubr.f32.gmra.mxu0 %v82_v29 }
  0x8b   :  { %951 = vmatmul.mubr.f32.gmra.mxu1 %v82_v29  ;;  %7430 = vmatprep.mubr.msk.f32.mxu0 %vm170_vm0, %v85_v30  ;;  %v134_v29 = vld [vmem:[%s16754_s2] sm:$0xff] }
  0x8c   :  { %7478 = vmatprep.mubr.msk.f32.mxu1 %vm170_vm0, %v85_v30  ;;  %1237 = vmatprep.subr.mxu0 %v16764_v0  ;;  %v136_v30 = vld [vmem:[%s16754_s2 + $0x10] sm:$0xff] }
  0x8d   :  { %1638 = vmatprep.subr.mxu1 %v16764_v0  ;;  %1238 = vmatpush2.msra.mxu0 %v9474_v54  ;;  %v88_v54 = vld [vmem:[%s16753_s1 + $0x190] sm:$0xff] }
  0x8e   :  { %1639 = vmatpush2.msra.mxu1 %v9824_v31  ;;  %495 = vmatmul.mubr.f32.gmra.mxu0 %v84_v33 }
  0x8f   :  { %956 = vmatmul.mubr.f32.gmra.mxu1 %v84_v33  ;;  %7431 = vmatprep.mubr.msk.f32.mxu0 %vm170_vm0, %v87_v36  ;;  %v90_v33 = vld [vmem:[%s16753_s1 + $0x1a0] sm:$0xff] }
  0x90   :  { %7479 = vmatprep.mubr.msk.f32.mxu1 %vm170_vm0, %v87_v36  ;;  %1239 = vmatprep.subr.mxu0 %v16764_v0  ;;  %v93_v36 = vld [vmem:[%s16753_s1 + $0x1b8] sm:$0xff] }
  0x91   :  { %1640 = vmatprep.subr.mxu1 %v16764_v0  ;;  %1240 = vmatpush2.msra.mxu0 %v9499_v57  ;;  %v91_v57 = vld [vmem:[%s16753_s1 + $0x1a8] sm:$0xff] }
  0x92   :  { %1641 = vmatpush2.msra.mxu1 %v9841_v39  ;;  %500 = vmatmul.mubr.f32.gmra.mxu0 %v86_v42 }
  0x93   :  { %961 = vmatmul.mubr.f32.gmra.mxu1 %v86_v42  ;;  %7432 = vmatprep.mubr.msk.f32.mxu0 %vm170_vm0, %v89_v45  ;;  %v144_v42 = vld [vmem:[%s16754_s2 + $0x50] sm:$0xff] }
  0x94   :  { %7480 = vmatprep.mubr.msk.f32.mxu1 %vm170_vm0, %v89_v45  ;;  %8210 = vset.pattern.permute.xlu1 %v9038_v27  ;;  %v145_v45 = vld [vmem:[%s16754_s2 + $0x58] sm:$0xff] }
  0x95   :  { %8209 = vset.pattern.permute.xlu0 %v9038_v27  ;;  %663 = vperm.xlu1 %8210, %v135_v48   ;;  %v9896_v48 = vld [vmem:[%s16753_s1 + $0x1b0] sm:$0xff]  ;;  %v9918_v27 = vld [vmem:[%s16753_s1 + $0x1c0] sm:$0xff] }
  0x96   :  { %673 = vperm.xlu0 %8209, %v137_v51   ;;  %505 = vmatmul.mubr.f32.gmra.mxu0 %v88_v54  ;;  %v9901_v51 = vld [vmem:[%s16753_s1 + $0x1c8] sm:$0xff] }
  0x97   :  { %966 = vmatmul.mubr.f32.gmra.mxu1 %v88_v54  ;;  %7433 = vmatprep.mubr.msk.f32.mxu0 %vm170_vm0, %v91_v57  ;;  %v142_v54 = vld [vmem:[%s16754_s2 + $0x40] sm:$0xff] }
  0x98   :  { %7481 = vmatprep.mubr.msk.f32.mxu1 %vm170_vm0, %v91_v57  ;;  %1979 = vmatprep.subr.mxu0 %v16764_v0  ;;  %v143_v57 = vld [vmem:[%s16754_s2 + $0x48] sm:$0xff] }
  0x99   :  { %2380 = vmatprep.subr.mxu1 %v16764_v0  ;;  %658 = vperm.xlu1 %8210, %v134_v29   ;;  %v9923_v29 = vld [vmem:[%s16753_s1 + $0x1d8] sm:$0xff] }
  0x9a   :  { %668 = vperm.xlu0 %8209, %v136_v30   ;;  %510 = vmatmul.mubr.f32.gmra.mxu0 %v90_v33  ;;  %16936 = vst [vmem:[#allocation3_spill] sm:$0xff] %v9923_v29  ;;  %v140_v30 = vld [vmem:[%s16754_s2 + $0x30] sm:$0xff]  ;;  %v9999_v0 = vld [vmem:[%s16753_s1 + $0x218] sm:$0xff] }
  0x9b   :  { %971 = vmatmul.mubr.f32.gmra.mxu1 %v90_v33  ;;  %7434 = vmatprep.mubr.msk.f32.mxu0 %vm170_vm0, %v93_v36  ;;  %v141_v33 = vld [vmem:[%s16754_s2 + $0x38] sm:$0xff]  ;;  %16944 = vst [vmem:[#allocation11_spill] sm:$0xff] %v9999_v0 }
  0x9c   :  { %7482 = vmatprep.mubr.msk.f32.mxu1 %vm170_vm0, %v93_v36  ;;  %v9940_v36 = vld [vmem:[%s16753_s1 + $0x1d0] sm:$0xff] }
  0x9d   :  { %708 = vperm.xlu1 %8210, %v144_v42   ;;  %16937 = vst [vmem:[#allocation4_spill] sm:$0xff] %v9940_v36  ;;  %v9945_v42 = vld [vmem:[%s16753_s1 + $0x1e8] sm:$0xff] }
  0x9e   :  { %713 = vperm.xlu0 %8209, %v145_v45   ;;  %515 = vmatmul.mubr.f32.gmra.mxu0 %v9896_v48  ;;  %16938 = vst [vmem:[#allocation5_spill] sm:$0xff] %v9945_v42  ;;  %v138_v45 = vld [vmem:[%s16754_s2 + $0x20] sm:$0xff] }
  0x9f   :  { %976 = vmatmul.mubr.f32.gmra.mxu1 %v9896_v48  ;;  %7435 = vmatprep.mubr.msk.f32.mxu0 %vm170_vm0, %v9901_v51 }
  0xa0   :  { %7483 = vmatprep.mubr.msk.f32.mxu1 %vm170_vm0, %v9901_v51 }
  0xa1   :  { %698 = vperm.xlu1 %8210, %v142_v54   ;;  %v139_v54 = vld [vmem:[%s16754_s2 + $0x28] sm:$0xff] }
  0xa2   :  { %703 = vperm.xlu0 %8209, %v143_v57   ;;  %520 = vmatmul.mubr.f32.gmra.mxu0 %v9918_v27  ;;  %v9962_v57 = vld [vmem:[%s16753_s1 + $0x1e0] sm:$0xff] }
  0xa3   :  { %981 = vmatmul.mubr.f32.gmra.mxu1 %v9918_v27  ;;  %7436 = vmatprep.mubr.msk.f32.mxu0 %vm170_vm0, %v9923_v29  ;;  %16939 = vst [vmem:[#allocation6_spill] sm:$0xff] %v9962_v57 }
  0xa4   :  { %7484 = vmatprep.mubr.msk.f32.mxu1 %vm170_vm0, %v9923_v29 }
  0xa5   :  { %688 = vperm.xlu1 %8210, %v140_v30   ;;  %v9967_v30 = vld [vmem:[%s16753_s1 + $0x1f8] sm:$0xff] }
  0xa6   :  { %693 = vperm.xlu0 %8209, %v141_v33   ;;  %525 = vmatmul.mubr.f32.gmra.mxu0 %v9940_v36  ;;  %16940 = vst [vmem:[#allocation7_spill] sm:$0xff] %v9967_v30  ;;  %v9978_v33 = vld [vmem:[%s16753_s1 + $0x1f0] sm:$0xff] }
  0xa7   :  { %986 = vmatmul.mubr.f32.gmra.mxu1 %v9940_v36  ;;  %7437 = vmatprep.mubr.msk.f32.mxu0 %vm170_vm0, %v9945_v42  ;;  %16941 = vst [vmem:[#allocation8_spill] sm:$0xff] %v9978_v33 }
  0xa8   :  { %7485 = vmatprep.mubr.msk.f32.mxu1 %vm170_vm0, %v9945_v42 }
  0xa9   :  { %678 = vperm.xlu1 %8210, %v138_v45   ;;  %v9983_v45 = vld [vmem:[%s16753_s1 + $0x208] sm:$0xff] }
  0xaa   :  { %683 = vperm.xlu0 %8209, %v139_v54   ;;  %530 = vmatmul.mubr.f32.gmra.mxu0 %v9962_v57  ;;  %16942 = vst [vmem:[#allocation9_spill] sm:$0xff] %v9983_v45  ;;  %v9994_v54 = vld [vmem:[%s16753_s1 + $0x200] sm:$0xff] }
  0xab   :  { %991 = vmatmul.mubr.f32.gmra.mxu1 %v9962_v57  ;;  %7438 = vmatprep.mubr.msk.f32.mxu0 %vm170_vm0, %v9967_v30  ;;  %16943 = vst [vmem:[#allocation10_spill] sm:$0xff] %v9994_v54 }
  0xac   :  { %7486 = vmatprep.mubr.msk.f32.mxu1 %vm170_vm0, %v9967_v30  ;;  %v16950_v30 = vmov 0.0  }
  0xae   :  { %535 = vmatmul.mubr.f32.gmra.mxu0 %v9978_v33 }
  0xaf   :  { %996 = vmatmul.mubr.f32.gmra.mxu1 %v9978_v33  ;;  %7439 = vmatprep.mubr.msk.f32.mxu0 %vm170_vm0, %v9983_v45  ;;  %v10015_v33 = vld [vmem:[%s16753_s1 + $0x228] sm:$0xff] }
  0xb0   :  { %7487 = vmatprep.mubr.msk.f32.mxu1 %vm170_vm0, %v9983_v45  ;;  %v10010_v45 = vld [vmem:[%s16753_s1 + $0x210] sm:$0xff]  ;;  %16946 = vst [vmem:[#allocation13_spill] sm:$0xff] %v10015_v33 }
  0xb1   :  { %16945 = vst [vmem:[#allocation12_spill] sm:$0xff] %v10010_v45 }
  0xb2   :  { %540 = vmatmul.mubr.f32.gmra.mxu0 %v9994_v54 }
  0xb3   :  { %1001 = vmatmul.mubr.f32.gmra.mxu1 %v9994_v54  ;;  %7440 = vmatprep.mubr.msk.f32.mxu0 %vm170_vm0, %v9999_v0  ;;  %v10031_v54 = vld [vmem:[%s16753_s1 + $0x238] sm:$0xff] }
  0xb4   :  { %7488 = vmatprep.mubr.msk.f32.mxu1 %vm170_vm0, %v9999_v0  ;;  %v10026_v0 = vld [vmem:[%s16753_s1 + $0x220] sm:$0xff]  ;;  %16948 = vst [vmem:[#allocation15_spill] sm:$0xff] %v10031_v54 }
  0xb5   :  { %16947 = vst [vmem:[#allocation14_spill] sm:$0xff] %v10026_v0 }
  0xb6   :  { %545 = vmatmul.mubr.f32.gmra.mxu0 %v10010_v45 }
  0xb7   :  { %1006 = vmatmul.mubr.f32.gmra.mxu1 %v10010_v45  ;;  %7441 = vmatprep.mubr.msk.f32.mxu0 %vm170_vm0, %v10015_v33  ;;  %v111_v45 = vld [vmem:[%s16753_s1 + $0x248] sm:$0xff] }
  0xb8   :  { %7489 = vmatprep.mubr.msk.f32.mxu1 %vm170_vm0, %v10015_v33  ;;  %v10042_v33 = vld [vmem:[%s16753_s1 + $0x230] sm:$0xff] }
  0xb9   :  { %16949 = vst [vmem:[#allocation16_spill] sm:$0xff] %v10042_v33 }
  0xba   :  { %550 = vmatmul.mubr.f32.gmra.mxu0 %v10026_v0 }
  0xbb   :  { %1011 = vmatmul.mubr.f32.gmra.mxu1 %v10026_v0  ;;  %7442 = vmatprep.mubr.msk.f32.mxu0 %vm170_vm0, %v10031_v54  ;;  %v113_v0 = vld [vmem:[%s16753_s1 + $0x258] sm:$0xff] }
  0xbc   :  { %7490 = vmatprep.mubr.msk.f32.mxu1 %vm170_vm0, %v10031_v54  ;;  %v110_v54 = vld [vmem:[%s16753_s1 + $0x240] sm:$0xff] }
  0xbe   :  { %555 = vmatmul.mubr.f32.gmra.mxu0 %v10042_v33 }
  0xbf   :  { %1016 = vmatmul.mubr.f32.gmra.mxu1 %v10042_v33  ;;  %7443 = vmatprep.mubr.msk.f32.mxu0 %vm170_vm0, %v111_v45  ;;  %v112_v33 = vld [vmem:[%s16753_s1 + $0x250] sm:$0xff] }
  0xc0   :  { %7491 = vmatprep.mubr.msk.f32.mxu1 %vm170_vm0, %v111_v45  ;;  %v115_v45 = vld [vmem:[%s16753_s1 + $0x268] sm:$0xff] }
  0xc2   :  { %560 = vmatmul.mubr.f32.gmra.mxu0 %v110_v54 }
  0xc3   :  { %1021 = vmatmul.mubr.f32.gmra.mxu1 %v110_v54  ;;  %7444 = vmatprep.mubr.msk.f32.mxu0 %vm170_vm0, %v113_v0  ;;  %v114_v54 = vld [vmem:[%s16753_s1 + $0x260] sm:$0xff] }
  0xc4   :  { %7492 = vmatprep.mubr.msk.f32.mxu1 %vm170_vm0, %v113_v0  ;;  %v117_v0 = vld [vmem:[%s16753_s1 + $0x278] sm:$0xff] }
  0xc6   :  { %565 = vmatmul.mubr.f32.gmra.mxu0 %v112_v33 }
  0xc7   :  { %1026 = vmatmul.mubr.f32.gmra.mxu1 %v112_v33  ;;  %7445 = vmatprep.mubr.msk.f32.mxu0 %vm170_vm0, %v115_v45  ;;  %v116_v33 = vld [vmem:[%s16753_s1 + $0x270] sm:$0xff] }
  0xc8   :  { %7493 = vmatprep.mubr.msk.f32.mxu1 %vm170_vm0, %v115_v45  ;;  %v119_v45 = vld [vmem:[%s16753_s1 + $0x288] sm:$0xff] }
  0xca   :  { %570 = vmatmul.mubr.f32.gmra.mxu0 %v114_v54 }
  0xcb   :  { %1031 = vmatmul.mubr.f32.gmra.mxu1 %v114_v54  ;;  %7446 = vmatprep.mubr.msk.f32.mxu0 %vm170_vm0, %v117_v0  ;;  %v118_v54 = vld [vmem:[%s16753_s1 + $0x280] sm:$0xff] }
  0xcc   :  { %7494 = vmatprep.mubr.msk.f32.mxu1 %vm170_vm0, %v117_v0  ;;  %v121_v0 = vld [vmem:[%s16753_s1 + $0x298] sm:$0xff] }
  0xce   :  { %575 = vmatmul.mubr.f32.gmra.mxu0 %v116_v33 }
  0xcf   :  { %1036 = vmatmul.mubr.f32.gmra.mxu1 %v116_v33  ;;  %7447 = vmatprep.mubr.msk.f32.mxu0 %vm170_vm0, %v119_v45  ;;  %v120_v33 = vld [vmem:[%s16753_s1 + $0x290] sm:$0xff] }
  0xd0   :  { %7495 = vmatprep.mubr.msk.f32.mxu1 %vm170_vm0, %v119_v45  ;;  %v123_v45 = vld [vmem:[%s16753_s1 + $0x2a8] sm:$0xff] }
  0xd2   :  { %580 = vmatmul.mubr.f32.gmra.mxu0 %v118_v54 }
  0xd3   :  { %1041 = vmatmul.mubr.f32.gmra.mxu1 %v118_v54  ;;  %7448 = vmatprep.mubr.msk.f32.mxu0 %vm170_vm0, %v121_v0  ;;  %v122_v54 = vld [vmem:[%s16753_s1 + $0x2a0] sm:$0xff] }
  0xd4   :  { %7496 = vmatprep.mubr.msk.f32.mxu1 %vm170_vm0, %v121_v0  ;;  %v125_v0 = vld [vmem:[%s16753_s1 + $0x2b8] sm:$0xff] }
  0xd6   :  { %585 = vmatmul.mubr.f32.gmra.mxu0 %v120_v33 }
  0xd7   :  { %1046 = vmatmul.mubr.f32.gmra.mxu1 %v120_v33  ;;  %7449 = vmatprep.mubr.msk.f32.mxu0 %vm170_vm0, %v123_v45  ;;  %v124_v33 = vld [vmem:[%s16753_s1 + $0x2b0] sm:$0xff] }
  0xd8   :  { %7497 = vmatprep.mubr.msk.f32.mxu1 %vm170_vm0, %v123_v45  ;;  %v127_v45 = vld [vmem:[%s16753_s1 + $0x2c8] sm:$0xff] }
  0xda   :  { %590 = vmatmul.mubr.f32.gmra.mxu0 %v122_v54 }
  0xdb   :  { %1051 = vmatmul.mubr.f32.gmra.mxu1 %v122_v54  ;;  %7450 = vmatprep.mubr.msk.f32.mxu0 %vm170_vm0, %v125_v0  ;;  %v126_v54 = vld [vmem:[%s16753_s1 + $0x2c0] sm:$0xff] }
  0xdc   :  { %7498 = vmatprep.mubr.msk.f32.mxu1 %vm170_vm0, %v125_v0  ;;  %v129_v0 = vld [vmem:[%s16753_s1 + $0x2d8] sm:$0xff] }
  0xde   :  { %595 = vmatmul.mubr.f32.gmra.mxu0 %v124_v33 }
  0xdf   :  { %1056 = vmatmul.mubr.f32.gmra.mxu1 %v124_v33  ;;  %7451 = vmatprep.mubr.msk.f32.mxu0 %vm170_vm0, %v127_v45  ;;  %v128_v33 = vld [vmem:[%s16753_s1 + $0x2d0] sm:$0xff] }
  0xe0   :  { %7499 = vmatprep.mubr.msk.f32.mxu1 %vm170_vm0, %v127_v45  ;;  %v131_v45 = vld [vmem:[%s16753_s1 + $0x2e8] sm:$0xff] }
  0xe2   :  { %600 = vmatmul.mubr.f32.gmra.mxu0 %v126_v54 }
  0xe3   :  { %1061 = vmatmul.mubr.f32.gmra.mxu1 %v126_v54  ;;  %7452 = vmatprep.mubr.msk.f32.mxu0 %vm170_vm0, %v129_v0  ;;  %v130_v54 = vld [vmem:[%s16753_s1 + $0x2e0] sm:$0xff] }
  0xe4   :  { %7500 = vmatprep.mubr.msk.f32.mxu1 %vm170_vm0, %v129_v0  ;;  %v133_v0 = vld [vmem:[%s16753_s1 + $0x2f8] sm:$0xff] }
  0xe6   :  { %605 = vmatmul.mubr.f32.gmra.mxu0 %v128_v33 }
  0xe7   :  { %1066 = vmatmul.mubr.f32.gmra.mxu1 %v128_v33  ;;  %7453 = vmatprep.mubr.msk.f32.mxu0 %vm170_vm0, %v131_v45  ;;  %v132_v33 = vld [vmem:[%s16753_s1 + $0x2f0] sm:$0xff] }
  0xe8   :  { %7501 = vmatprep.mubr.msk.f32.mxu1 %vm170_vm0, %v131_v45  ;;  %v10149_v45 = vld [vmem:[%s16752_s0 + $0x1b8] sm:$0xff] }
  0xea   :  { %610 = vmatmul.mubr.f32.gmra.mxu0 %v130_v54 }
  0xeb   :  { %1071 = vmatmul.mubr.f32.gmra.mxu1 %v130_v54  ;;  %7454 = vmatprep.mubr.msk.f32.mxu0 %vm170_vm0, %v133_v0 }
  0xec   :  { %7502 = vmatprep.mubr.msk.f32.mxu1 %vm170_vm0, %v133_v0 }
  0xee   :  { %615 = vmatmul.mubr.f32.gmra.mxu0 %v132_v33 }
  0xef   :  { %1076 = vmatmul.mubr.f32.gmra.mxu1 %v132_v33  ;;  %7503 = vmatprep.mubr.msk.f32.mxu0 %vm170_vm0, %v9292_v32 }
  0xf0   :  { %7551 = vmatprep.mubr.msk.f32.mxu1 %vm170_vm0, %v9292_v32 }
  0xf2   :  { %v10151_v54 = vpop.f32.mrf.mxu0  ;;  %1242 = vmatmul.mubr.f32.vlgmr.msra.gmra.mxu0 %v9306_v34 }
  0xf3   :  { %v10153_v0 = vpop.f32.mrf.mxu1  ;;  %1643 = vmatmul.mubr.f32.vlgmr.msra.gmra.mxu1 %v9306_v34  ;;  %7504 = vmatprep.mubr.msk.f32.mxu0 %vm170_vm0, %v9314_v35  ;;  %v10168_v34 = vld [vmem:[%s16752_s0 + $0x1b0] sm:$0xff] }
  0xf4   :  { %7552 = vmatprep.mubr.msk.f32.mxu1 %vm170_vm0, %v9314_v35  ;;  %v383_v32 = vpop.f32.mrf.mxu0  ;;  %1980 = vmatpush1.msra.mxu0 %v9684_v13 }
  0xf5   :  { %v844_v33 = vpop.f32.mrf.mxu1  ;;  %2381 = vmatpush1.msra.mxu1 %v10149_v45  ;;  %1981 = vmatprep.subr.mxu0 %v16950_v30 }
  0xf6   :  { %2382 = vmatprep.subr.mxu1 %v16950_v30  ;;  %v10170_v57 = vpop.f32.mrf.mxu0  ;;  %1247 = vmatmul.mubr.f32.gmra.mxu0 %v9333_v37 }
  0xf7   :  { %v10172_v42 = vpop.f32.mrf.mxu1  ;;  %1648 = vmatmul.mubr.f32.gmra.mxu1 %v9333_v37  ;;  %7505 = vmatprep.mubr.msk.f32.mxu0 %vm170_vm0, %v9338_v38  ;;  %v10187_v37 = vld [vmem:[%s16752_s0 + $0x1a8] sm:$0xff] }
  0xf8   :  { %7553 = vmatprep.mubr.msk.f32.mxu1 %vm170_vm0, %v9338_v38  ;;  %v388_v35 = vpop.f32.mrf.mxu0  ;;  %1982 = vmatpush1.msra.mxu0 %v9709_v16 }
  0xf9   :  { %v849_v13 = vpop.f32.mrf.mxu1  ;;  %2383 = vmatpush1.msra.mxu1 %v10168_v34  ;;  %1983 = vmatprep.subr.mxu0 %v16950_v30 }
  0xfa   :  { %2384 = vmatprep.subr.mxu1 %v16950_v30  ;;  %v10189_v32 = vpop.f32.mrf.mxu0  ;;  %1252 = vmatmul.mubr.f32.gmra.mxu0 %v9358_v40 }
  0xfb   :  { %v10191_v33 = vpop.f32.mrf.mxu1  ;;  %1653 = vmatmul.mubr.f32.gmra.mxu1 %v9358_v40  ;;  %7506 = vmatprep.mubr.msk.f32.mxu0 %vm170_vm0, %v9363_v41  ;;  %v10206_v40 = vld [vmem:[%s16752_s0 + $0x1a0] sm:$0xff] }
  0xfc   :  { %7554 = vmatprep.mubr.msk.f32.mxu1 %vm170_vm0, %v9363_v41  ;;  %v393_v38 = vpop.f32.mrf.mxu0  ;;  %1984 = vmatpush1.msra.mxu0 %v9734_v19 }
  0xfd   :  { %v854_v16 = vpop.f32.mrf.mxu1  ;;  %2385 = vmatpush1.msra.mxu1 %v10187_v37  ;;  %1985 = vmatprep.subr.mxu0 %v16950_v30 }
  0xfe   :  { %2386 = vmatprep.subr.mxu1 %v16950_v30  ;;  %v10208_v35 = vpop.f32.mrf.mxu0  ;;  %1257 = vmatmul.mubr.f32.gmra.mxu0 %v9383_v43 }
  0xff   :  { %v10210_v13 = vpop.f32.mrf.mxu1  ;;  %1658 = vmatmul.mubr.f32.gmra.mxu1 %v9383_v43  ;;  %7507 = vmatprep.mubr.msk.f32.mxu0 %vm170_vm0, %v9388_v44  ;;  %v10225_v43 = vld [vmem:[%s16752_s0 + $0x198] sm:$0xff] }
 0x100   :  { %7555 = vmatprep.mubr.msk.f32.mxu1 %vm170_vm0, %v9388_v44  ;;  %v398_v41 = vpop.f32.mrf.mxu0  ;;  %1986 = vmatpush1.msra.mxu0 %v9759_v22 }
 0x101   :  { %v859_v19 = vpop.f32.mrf.mxu1  ;;  %2387 = vmatpush1.msra.mxu1 %v10206_v40  ;;  %1987 = vmatprep.subr.mxu0 %v16950_v30 }
 0x102   :  { %2388 = vmatprep.subr.mxu1 %v16950_v30  ;;  %v10227_v38 = vpop.f32.mrf.mxu0  ;;  %1262 = vmatmul.mubr.f32.gmra.mxu0 %v9408_v46 }
 0x103   :  { %v10229_v16 = vpop.f32.mrf.mxu1  ;;  %1663 = vmatmul.mubr.f32.gmra.mxu1 %v9408_v46  ;;  %7508 = vmatprep.mubr.msk.f32.mxu0 %vm170_vm0, %v9413_v47  ;;  %v10244_v46 = vld [vmem:[%s16752_s0 + $0x190] sm:$0xff] }
 0x104   :  { %7556 = vmatprep.mubr.msk.f32.mxu1 %vm170_vm0, %v9413_v47  ;;  %v403_v44 = vpop.f32.mrf.mxu0  ;;  %1988 = vmatpush1.msra.mxu0 %v9784_v25 }
 0x105   :  { %v864_v22 = vpop.f32.mrf.mxu1  ;;  %2389 = vmatpush1.msra.mxu1 %v10225_v43  ;;  %1989 = vmatprep.subr.mxu0 %v16950_v30 }
 0x106   :  { %2390 = vmatprep.subr.mxu1 %v16950_v30  ;;  %v10246_v41 = vpop.f32.mrf.mxu0  ;;  %1267 = vmatmul.mubr.f32.gmra.mxu0 %v9433_v49 }
 0x107   :  { %v10248_v19 = vpop.f32.mrf.mxu1  ;;  %1668 = vmatmul.mubr.f32.gmra.mxu1 %v9433_v49  ;;  %7509 = vmatprep.mubr.msk.f32.mxu0 %vm170_vm0, %v9438_v50  ;;  %v10263_v49 = vld [vmem:[%s16752_s0 + $0x188] sm:$0xff] }
 0x108   :  { %7557 = vmatprep.mubr.msk.f32.mxu1 %vm170_vm0, %v9438_v50  ;;  %v408_v47 = vpop.f32.mrf.mxu0  ;;  %1990 = vmatpush1.msra.mxu0 %v9807_v28 }
 0x109   :  { %v869_v25 = vpop.f32.mrf.mxu1  ;;  %2391 = vmatpush1.msra.mxu1 %v10244_v46  ;;  %1991 = vmatprep.subr.mxu0 %v16950_v30 }
 0x10a   :  { %2392 = vmatprep.subr.mxu1 %v16950_v30  ;;  %v10265_v44 = vpop.f32.mrf.mxu0  ;;  %1272 = vmatmul.mubr.f32.gmra.mxu0 %v9458_v52 }
 0x10b   :  { %v10267_v22 = vpop.f32.mrf.mxu1  ;;  %1673 = vmatmul.mubr.f32.gmra.mxu1 %v9458_v52  ;;  %7510 = vmatprep.mubr.msk.f32.mxu0 %vm170_vm0, %v9463_v53 }
 0x10c   :  { %7558 = vmatprep.mubr.msk.f32.mxu1 %vm170_vm0, %v9463_v53  ;;  %v413_v50 = vpop.f32.mrf.mxu0  ;;  %1992 = vmatpush1.msra.mxu0 %v9824_v31  ;;  %v1962_v31 = vld [vmem:[%s16752_s0 + $0x138] sm:$0xff] }
 0x10d   :  { %v874_v28 = vpop.f32.mrf.mxu1  ;;  %2393 = vmatpush1.msra.mxu1 %v10263_v49  ;;  %1993 = vmatprep.subr.mxu0 %v16950_v30 }
 0x10e   :  { %2394 = vmatprep.subr.mxu1 %v16950_v30  ;;  %v10279_v47 = vpop.f32.mrf.mxu0  ;;  %1277 = vmatmul.mubr.f32.gmra.mxu0 %v9483_v55 }
 0x10f   :  { %v10281_v25 = vpop.f32.mrf.mxu1  ;;  %1678 = vmatmul.mubr.f32.gmra.mxu1 %v9483_v55  ;;  %7511 = vmatprep.mubr.msk.f32.mxu0 %vm170_vm0, %v9488_v56  ;;  %v10297_v55 = vld [vmem:[%s16752_s0 + $0x180] sm:$0xff] }
 0x110   :  { %7559 = vmatprep.mubr.msk.f32.mxu1 %vm170_vm0, %v9488_v56  ;;  %v418_v52 = vpop.f32.mrf.mxu0  ;;  %1994 = vmatpush1.msra.mxu0 %v9841_v39 }
 0x111   :  { %v879_v53 = vpop.f32.mrf.mxu1  ;;  %1995 = vmatprep.subr.mxu0 %v16950_v30  ;;  %2395 = vmatpush1.msra.mxu1 %v10297_v55  ;;  %v1961_v52 = vld [vmem:[%s16752_s0 + $0x130] sm:$0xff] }
 0x112   :  { %v10299_v50 = vpop.f32.mrf.mxu0  ;;  %1282 = vmatmul.mubr.f32.gmra.mxu0 %v9508_v58  ;;  %2396 = vmatprep.subr.mxu1 %v16950_v30 }
 0x113   :  { %v10301_v28 = vpop.f32.mrf.mxu1  ;;  %1683 = vmatmul.mubr.f32.gmra.mxu1 %v9508_v58  ;;  %7512 = vmatprep.mubr.msk.f32.mxu0 %vm170_vm0, %v9513_v59  ;;  %v2363_v58 = vld [vmem:[%s16752_s0 + $0x178] sm:$0xff] }
 0x114   :  { %7560 = vmatprep.mubr.msk.f32.mxu1 %vm170_vm0, %v9513_v59  ;;  %v423_v56 = vpop.f32.mrf.mxu0  ;;  %1996 = vmatpush1.msra.mxu0 %v1962_v31 }
 0x115   :  { %v884_v39 = vpop.f32.mrf.mxu1  ;;  %1997 = vmatprep.subr.mxu0 %v16950_v30  ;;  %2397 = vmatpush1.msra.mxu1 %v2363_v58  ;;  %v1959_v58 = vld [vmem:[%s16752_s0 + $0x120] sm:$0xff] }
 0x116   :  { %v10318_v53 = vpop.f32.mrf.mxu0  ;;  %1287 = vmatmul.mubr.f32.gmra.mxu0 %v9528_v60  ;;  %v1960_v39 = vld [vmem:[%s16752_s0 + $0x128] sm:$0xff]  ;;  %2398 = vmatprep.subr.mxu1 %v16950_v30 }
 0x117   :  { %16951 = vst [vmem:[#allocation17_spill] sm:$0xff] %v10318_v53  ;;  %v10320_v59 = vpop.f32.mrf.mxu1  ;;  %1688 = vmatmul.mubr.f32.gmra.mxu1 %v9528_v60  ;;  %7513 = vmatprep.mubr.msk.f32.mxu0 %vm170_vm0, %v9533_v61  ;;  %v2362_v60 = vld [vmem:[%s16752_s0 + $0x170] sm:$0xff] }
 0x118   :  { %16952 = vst [vmem:[#allocation18_spill] sm:$0xff] %v10320_v59  ;;  %7561 = vmatprep.mubr.msk.f32.mxu1 %vm170_vm0, %v9533_v61  ;;  %v428_v31 = vpop.f32.mrf.mxu0  ;;  %1998 = vmatpush1.msra.mxu0 %v1961_v52 }
 0x119   :  { %v889_v56 = vpop.f32.mrf.mxu1  ;;  %1999 = vmatprep.subr.mxu0 %v16950_v30  ;;  %2399 = vmatpush1.msra.mxu1 %v2362_v60  ;;  %v1958_v60 = vld [vmem:[%s16752_s0 + $0x118] sm:$0xff] }
 0x11a   :  { %v10336_v36 = vpop.f32.mrf.mxu0  ;;  %1292 = vmatmul.mubr.f32.gmra.mxu0 %v9548_v62  ;;  %2400 = vmatprep.subr.mxu1 %v16950_v30 }
 0x11b   :  { %16953 = vst [vmem:[#allocation19_spill] sm:$0xff] %v10336_v36  ;;  %v10338_v29 = vpop.f32.mrf.mxu1  ;;  %1693 = vmatmul.mubr.f32.gmra.mxu1 %v9548_v62  ;;  %7514 = vmatprep.mubr.msk.f32.mxu0 %vm170_vm0, %v9553_v63  ;;  %v2361_v62 = vld [vmem:[%s16752_s0 + $0x168] sm:$0xff] }
 0x11c   :  { %16954 = vst [vmem:[#allocation20_spill] sm:$0xff] %v10338_v29  ;;  %7562 = vmatprep.mubr.msk.f32.mxu1 %vm170_vm0, %v9553_v63  ;;  %v433_v61 = vpop.f32.mrf.mxu0  ;;  %2000 = vmatpush1.msra.mxu0 %v1960_v39 }
 0x11d   :  { %v894_v52 = vpop.f32.mrf.mxu1  ;;  %2001 = vmatprep.subr.mxu0 %v16950_v30  ;;  %2401 = vmatpush1.msra.mxu1 %v2361_v62 }
 0x11e   :  { %v10354_v31 = vpop.f32.mrf.mxu0  ;;  %1297 = vmatmul.mubr.f32.gmra.mxu0 %v9568_v1  ;;  %2402 = vmatprep.subr.mxu1 %v16950_v30 }
 0x11f   :  { %16955 = vst [vmem:[#allocation21_spill] sm:$0xff] %v10354_v31  ;;  %v10356_v56 = vpop.f32.mrf.mxu1  ;;  %1698 = vmatmul.mubr.f32.gmra.mxu1 %v9568_v1  ;;  %7515 = vmatprep.mubr.msk.f32.mxu0 %vm170_vm0, %v9573_v2  ;;  %v2360_v1 = vld [vmem:[%s16752_s0 + $0x160] sm:$0xff] }
 0x120   :  { %16956 = vst [vmem:[#allocation22_spill] sm:$0xff] %v10356_v56  ;;  %7563 = vmatprep.mubr.msk.f32.mxu1 %vm170_vm0, %v9573_v2  ;;  %v438_v63 = vpop.f32.mrf.mxu0  ;;  %2002 = vmatpush1.msra.mxu0 %v1959_v58 }
 0x121   :  { %v899_v39 = vpop.f32.mrf.mxu1  ;;  %2003 = vmatprep.subr.mxu0 %v16950_v30  ;;  %2403 = vmatpush1.msra.mxu1 %v2360_v1 }
 0x122   :  { %v10372_v61 = vpop.f32.mrf.mxu0  ;;  %1302 = vmatmul.mubr.f32.gmra.mxu0 %v9588_v3  ;;  %2404 = vmatprep.subr.mxu1 %v16950_v30  ;;  %v2359_v39 = vld [vmem:[%s16752_s0 + $0x158] sm:$0xff] }
 0x123   :  { %v10374_v52 = vpop.f32.mrf.mxu1  ;;  %1703 = vmatmul.mubr.f32.gmra.mxu1 %v9588_v3  ;;  %7516 = vmatprep.mubr.msk.f32.mxu0 %vm170_vm0, %v9593_v4  ;;  %v1957_v3 = vld [vmem:[%s16752_s0 + $0x110] sm:$0xff] }
 0x124   :  { %7564 = vmatprep.mubr.msk.f32.mxu1 %vm170_vm0, %v9593_v4  ;;  %v443_v62 = vpop.f32.mrf.mxu0  ;;  %2004 = vmatpush1.msra.mxu0 %v1958_v60 }
 0x125   :  { %v904_v63 = vpop.f32.mrf.mxu1  ;;  %2005 = vmatprep.subr.mxu0 %v16950_v30  ;;  %2405 = vmatpush1.msra.mxu1 %v2359_v39 }
 0x126   :  { %v10394_v58 = vpop.f32.mrf.mxu0  ;;  %1307 = vmatmul.mubr.f32.gmra.mxu0 %v9608_v5  ;;  %2406 = vmatprep.subr.mxu1 %v16950_v30  ;;  %v2358_v63 = vld [vmem:[%s16752_s0 + $0x150] sm:$0xff] }
 0x127   :  { %v10396_v2 = vpop.f32.mrf.mxu1  ;;  %1708 = vmatmul.mubr.f32.gmra.mxu1 %v9608_v5  ;;  %7517 = vmatprep.mubr.msk.f32.mxu0 %vm170_vm0, %v9613_v6  ;;  %v1956_v5 = vld [vmem:[%s16752_s0 + $0x108] sm:$0xff] }
 0x128   :  { %7565 = vmatprep.mubr.msk.f32.mxu1 %vm170_vm0, %v9613_v6  ;;  %v448_v1 = vpop.f32.mrf.mxu0  ;;  %2006 = vmatpush1.msra.mxu0 %v1957_v3 }
 0x129   :  { %v909_v62 = vpop.f32.mrf.mxu1  ;;  %2007 = vmatprep.subr.mxu0 %v16950_v30  ;;  %2407 = vmatpush1.msra.mxu1 %v2358_v63 }
 0x12a   :  { %v10416_v60 = vpop.f32.mrf.mxu0  ;;  %1312 = vmatmul.mubr.f32.gmra.mxu0 %v9628_v7  ;;  %2408 = vmatprep.subr.mxu1 %v16950_v30  ;;  %v2357_v62 = vld [vmem:[%s16752_s0 + $0x148] sm:$0xff] }
 0x12b   :  { %v10418_v4 = vpop.f32.mrf.mxu1  ;;  %1713 = vmatmul.mubr.f32.gmra.mxu1 %v9628_v7  ;;  %7518 = vmatprep.mubr.msk.f32.mxu0 %vm170_vm0, %v9633_v8  ;;  %v1955_v7 = vld [vmem:[%s16752_s0 + $0x100] sm:$0xff] }
 0x12c   :  { %7566 = vmatprep.mubr.msk.f32.mxu1 %vm170_vm0, %v9633_v8  ;;  %v453_v39 = vpop.f32.mrf.mxu0  ;;  %2008 = vmatpush1.msra.mxu0 %v1956_v5 }
 0x12d   :  { %v914_v1 = vpop.f32.mrf.mxu1  ;;  %2009 = vmatprep.subr.mxu0 %v16950_v30  ;;  %2409 = vmatpush1.msra.mxu1 %v2357_v62 }
 0x12e   :  { %v10438_v3 = vpop.f32.mrf.mxu0  ;;  %1317 = vmatmul.mubr.f32.gmra.mxu0 %v9648_v9  ;;  %2410 = vmatprep.subr.mxu1 %v16950_v30 }
 0x12f   :  { %v10440_v6 = vpop.f32.mrf.mxu1  ;;  %1718 = vmatmul.mubr.f32.gmra.mxu1 %v9648_v9  ;;  %7519 = vmatprep.mubr.msk.f32.mxu0 %vm170_vm0, %v9653_v10  ;;  %v2356_v9 = vld [vmem:[%s16752_s0 + $0x140] sm:$0xff] }
 0x130   :  { %7567 = vmatprep.mubr.msk.f32.mxu1 %vm170_vm0, %v9653_v10  ;;  %v458_v63 = vpop.f32.mrf.mxu0  ;;  %2010 = vmatpush1.msra.mxu0 %v1955_v7 }
 0x131   :  { %v919_v39 = vpop.f32.mrf.mxu1  ;;  %2027 = vmatprep.subr.mxu0 %v16950_v30  ;;  %2411 = vmatpush1.msra.mxu1 %v2356_v9 }
 0x132   :  { %v10457_v1 = vpop.f32.mrf.mxu0  ;;  %1322 = vmatmul.mubr.f32.gmra.mxu0 %v9668_v11  ;;  %2428 = vmatprep.subr.mxu1 %v16950_v30 }
 0x133   :  { %v10459_v5 = vpop.f32.mrf.mxu1  ;;  %1723 = vmatmul.mubr.f32.gmra.mxu1 %v9668_v11  ;;  %7520 = vmatprep.mubr.msk.f32.mxu0 %vm170_vm0, %v9673_v12  ;;  %v10476_v11 = vld [vmem:[%s16752_s0 + $0x1f8] sm:$0xff] }
 0x134   :  { %7568 = vmatprep.mubr.msk.f32.mxu1 %vm170_vm0, %v9673_v12  ;;  %v463_v62 = vpop.f32.mrf.mxu0  ;;  %2028 = vmatpush2.msra.mxu0 %v10149_v45  ;;  %16957 = vst [vmem:[#allocation23_spill] sm:$0xff] %v10476_v11 }
 0x135   :  { %v924_v63 = vpop.f32.mrf.mxu1  ;;  %2029 = vmatprep.subr.mxu0 %v16950_v30  ;;  %2429 = vmatpush2.msra.mxu1 %v10476_v11 }
 0x136   :  { %v10479_v39 = vpop.f32.mrf.mxu0  ;;  %1327 = vmatmul.mubr.f32.gmra.mxu0 %v9693_v14  ;;  %2430 = vmatprep.subr.mxu1 %v16950_v30 }
 0x137   :  { %v10481_v7 = vpop.f32.mrf.mxu1  ;;  %1728 = vmatmul.mubr.f32.gmra.mxu1 %v9693_v14  ;;  %7521 = vmatprep.mubr.msk.f32.mxu0 %vm170_vm0, %v9698_v15  ;;  %v10499_v14 = vld [vmem:[%s16752_s0 + $0x1f0] sm:$0xff] }
 0x138   :  { %7569 = vmatprep.mubr.msk.f32.mxu1 %vm170_vm0, %v9698_v15  ;;  %v468_v9 = vpop.f32.mrf.mxu0  ;;  %2030 = vmatpush2.msra.mxu0 %v10168_v34  ;;  %16958 = vst [vmem:[#allocation24_spill] sm:$0xff] %v10499_v14 }
 0x139   :  { %v929_v62 = vpop.f32.mrf.mxu1  ;;  %2031 = vmatprep.subr.mxu0 %v16950_v30  ;;  %2431 = vmatpush2.msra.mxu1 %v10499_v14  ;;  %v8626_v14 = vld [vmem:[%s16753_s1 + $0x1a0] sm:$0xff] }
 0x13a   :  { %v10502_v63 = vpop.f32.mrf.mxu0  ;;  %1332 = vmatmul.mubr.f32.gmra.mxu0 %v9718_v17  ;;  %2432 = vmatprep.subr.mxu1 %v16950_v30 }
 0x13b   :  { %v10504_v45 = vpop.f32.mrf.mxu1  ;;  %1733 = vmatmul.mubr.f32.gmra.mxu1 %v9718_v17  ;;  %7522 = vmatprep.mubr.msk.f32.mxu0 %vm170_vm0, %v9723_v18  ;;  %v10522_v17 = vld [vmem:[%s16752_s0 + $0x1e8] sm:$0xff] }
 0x13c   :  { %7570 = vmatprep.mubr.msk.f32.mxu1 %vm170_vm0, %v9723_v18  ;;  %v473_v9 = vpop.f32.mrf.mxu0  ;;  %2032 = vmatpush2.msra.mxu0 %v10187_v37  ;;  %16959 = vst [vmem:[#allocation25_spill] sm:$0xff] %v10522_v17 }
 0x13d   :  { %v934_v62 = vpop.f32.mrf.mxu1  ;;  %2033 = vmatprep.subr.mxu0 %v16950_v30  ;;  %2433 = vmatpush2.msra.mxu1 %v10522_v17 }
 0x13e   :  { %v10525_v34 = vpop.f32.mrf.mxu0  ;;  %1337 = vmatmul.mubr.f32.gmra.mxu0 %v9743_v20  ;;  %2434 = vmatprep.subr.mxu1 %v16950_v30 }
 0x13f   :  { %v10527_v15 = vpop.f32.mrf.mxu1  ;;  %1738 = vmatmul.mubr.f32.gmra.mxu1 %v9743_v20  ;;  %7523 = vmatprep.mubr.msk.f32.mxu0 %vm170_vm0, %v9748_v21  ;;  %v10545_v20 = vld [vmem:[%s16752_s0 + $0x1e0] sm:$0xff] }
 0x140   :  { %7571 = vmatprep.mubr.msk.f32.mxu1 %vm170_vm0, %v9748_v21  ;;  %v478_v9 = vpop.f32.mrf.mxu0  ;;  %2034 = vmatpush2.msra.mxu0 %v10206_v40  ;;  %16960 = vst [vmem:[#allocation26_spill] sm:$0xff] %v10545_v20 }
 0x141   :  { %v939_v62 = vpop.f32.mrf.mxu1  ;;  %2035 = vmatprep.subr.mxu0 %v16950_v30  ;;  %2435 = vmatpush2.msra.mxu1 %v10545_v20 }
 0x142   :  { %v10548_v37 = vpop.f32.mrf.mxu0  ;;  %1342 = vmatmul.mubr.f32.gmra.mxu0 %v9768_v23  ;;  %2436 = vmatprep.subr.mxu1 %v16950_v30 }
 0x143   :  { %v10550_v18 = vpop.f32.mrf.mxu1  ;;  %1743 = vmatmul.mubr.f32.gmra.mxu1 %v9768_v23  ;;  %7524 = vmatprep.mubr.msk.f32.mxu0 %vm170_vm0, %v9773_v24  ;;  %v10568_v23 = vld [vmem:[%s16752_s0 + $0x1d8] sm:$0xff] }
 0x144   :  { %7572 = vmatprep.mubr.msk.f32.mxu1 %vm170_vm0, %v9773_v24  ;;  %v483_v9 = vpop.f32.mrf.mxu0  ;;  %2036 = vmatpush2.msra.mxu0 %v10225_v43  ;;  %16961 = vst [vmem:[#allocation27_spill] sm:$0xff] %v10568_v23 }
 0x145   :  { %v944_v62 = vpop.f32.mrf.mxu1  ;;  %2037 = vmatprep.subr.mxu0 %v16950_v30  ;;  %v8617_v9 = vld [vmem:[%s16753_s1 + $0x168] sm:$0xff]  ;;  %2437 = vmatpush2.msra.mxu1 %v10568_v23 }
 0x146   :  { %v10571_v40 = vpop.f32.mrf.mxu0  ;;  %1347 = vmatmul.mubr.f32.gmra.mxu0 %v9793_v26  ;;  %2438 = vmatprep.subr.mxu1 %v16950_v30 }
 0x147   :  { %16962 = vst [vmem:[#allocation28_spill] sm:$0xff] %v10571_v40  ;;  %v10573_v21 = vpop.f32.mrf.mxu1  ;;  %1748 = vmatmul.mubr.f32.gmra.mxu1 %v9793_v26  ;;  %7525 = vmatprep.mubr.msk.f32.mxu0 %vm170_vm0, %v8617_v9  ;;  %v10592_v26 = vld [vmem:[%s16752_s0 + $0x1d0] sm:$0xff] }
 0x148   :  { %16963 = vst [vmem:[#allocation29_spill] sm:$0xff] %v10573_v21  ;;  %7573 = vmatprep.mubr.msk.f32.mxu1 %vm170_vm0, %v8617_v9  ;;  %v488_v62 = vpop.f32.mrf.mxu0  ;;  %2038 = vmatpush2.msra.mxu0 %v10244_v46  ;;  %16964 = vst [vmem:[#allocation30_spill] sm:$0xff] %v10592_v26 }
 0x149   :  { %v949_v12 = vpop.f32.mrf.mxu1  ;;  %2039 = vmatprep.subr.mxu0 %v16950_v30  ;;  %v8619_v62 = vld [vmem:[%s16753_s1 + $0x178] sm:$0xff]  ;;  %2439 = vmatpush2.msra.mxu1 %v10592_v26 }
 0x14a   :  { %v10595_v43 = vpop.f32.mrf.mxu0  ;;  %v8618_v12 = vld [vmem:[%s16753_s1 + $0x160] sm:$0xff]  ;;  %2040 = vmatpush2.msra.mxu0 %v10263_v49  ;;  %2440 = vmatprep.subr.mxu1 %v16950_v30 }
 0x14b   :  { %16965 = vst [vmem:[#allocation31_spill] sm:$0xff] %v10595_v43  ;;  %v10597_v24 = vpop.f32.mrf.mxu1  ;;  %1352 = vmatmul.mubr.f32.gmra.mxu0 %v8618_v12  ;;  %1753 = vmatmul.mubr.f32.gmra.mxu1 %v8618_v12  ;;  %v10617_v12 = vld [vmem:[%s16752_s0 + $0x1c8] sm:$0xff] }
 0x14c   :  { %16966 = vst [vmem:[#allocation32_spill] sm:$0xff] %v10597_v24  ;;  %7526 = vmatprep.mubr.msk.f32.mxu0 %vm170_vm0, %v8619_v62  ;;  %7574 = vmatprep.mubr.msk.f32.mxu1 %vm170_vm0, %v8619_v62  ;;  %v493_v10 = vpop.f32.mrf.mxu0  ;;  %16967 = vst [vmem:[#allocation33_spill] sm:$0xff] %v10617_v12  ;;  %v8621_v62 = vld [vmem:[%s16753_s1 + $0x188] sm:$0xff] }
 0x14d   :  { %v954_v8 = vpop.f32.mrf.mxu1  ;;  %2041 = vmatprep.subr.mxu0 %v16950_v30  ;;  %2441 = vmatpush2.msra.mxu1 %v10617_v12 }
 0x14e   :  { %v10620_v9 = vpop.f32.mrf.mxu0  ;;  %v8620_v8 = vld [vmem:[%s16753_s1 + $0x170] sm:$0xff]  ;;  %2042 = vmatpush2.msra.mxu0 %v10297_v55  ;;  %2442 = vmatprep.subr.mxu1 %v16950_v30  ;;  %v8623_v55 = vld [vmem:[%s16753_s1 + $0x198] sm:$0xff] }
 0x14f   :  { %16968 = vst [vmem:[#allocation34_spill] sm:$0xff] %v10620_v9  ;;  %v10622_v46 = vpop.f32.mrf.mxu1  ;;  %1357 = vmatmul.mubr.f32.gmra.mxu0 %v8620_v8  ;;  %1758 = vmatmul.mubr.f32.gmra.mxu1 %v8620_v8  ;;  %v10642_v8 = vld [vmem:[%s16752_s0 + $0x1c0] sm:$0xff] }
 0x150   :  { %16969 = vst [vmem:[#allocation35_spill] sm:$0xff] %v10622_v46  ;;  %7527 = vmatprep.mubr.msk.f32.mxu0 %vm170_vm0, %v8621_v62  ;;  %7575 = vmatprep.mubr.msk.f32.mxu1 %vm170_vm0, %v8621_v62  ;;  %v498_v26 = vpop.f32.mrf.mxu0  ;;  %16970 = vst [vmem:[#allocation36_spill] sm:$0xff] %v10642_v8 }
 0x151   :  { %v959_v23 = vpop.f32.mrf.mxu1  ;;  %2781 = vmatprep.subr.mxu0 %v16950_v30  ;;  %2443 = vmatpush2.msra.mxu1 %v10642_v8 }
 0x152   :  { %v10645_v10 = vpop.f32.mrf.mxu0  ;;  %v8622_v23 = vld [vmem:[%s16753_s1 + $0x180] sm:$0xff]  ;;  %3182 = vmatprep.subr.mxu1 %v16950_v30 }
 0x153   :  { %v10647_v49 = vpop.f32.mrf.mxu1  ;;  %1362 = vmatmul.mubr.f32.gmra.mxu0 %v8622_v23  ;;  %1763 = vmatmul.mubr.f32.gmra.mxu1 %v8622_v23  ;;  %v8624_v23 = vld [vmem:[%s16753_s1 + $0x190] sm:$0xff] }
 0x154   :  { %7528 = vmatprep.mubr.msk.f32.mxu0 %vm170_vm0, %v8623_v55  ;;  %7576 = vmatprep.mubr.msk.f32.mxu1 %vm170_vm0, %v8623_v55  ;;  %v503_v26 = vpop.f32.mrf.mxu0  ;;  %v8625_v55 = vld [vmem:[%s16753_s1 + $0x1a8] sm:$0xff] }
 0x155   :  { %v964_v62 = vpop.f32.mrf.mxu1 }
 0x156   :  { %v10659_v12 = vpop.f32.mrf.mxu0 }
 0x157   :  { %v10661_v20 = vpop.f32.mrf.mxu1  ;;  %1367 = vmatmul.mubr.f32.gmra.mxu0 %v8624_v23  ;;  %1768 = vmatmul.mubr.f32.gmra.mxu1 %v8624_v23  ;;  %v8627_v23 = vld [vmem:[%s16753_s1 + $0x1b8] sm:$0xff] }
 0x158   :  { %7529 = vmatprep.mubr.msk.f32.mxu0 %vm170_vm0, %v8625_v55  ;;  %7577 = vmatprep.mubr.msk.f32.mxu1 %vm170_vm0, %v8625_v55  ;;  %v508_v26 = vpop.f32.mrf.mxu0 }
 0x159   :  { %v969_v62 = vpop.f32.mrf.mxu1 }
 0x15a   :  { %v10671_v8 = vpop.f32.mrf.mxu0 }
 0x15b   :  { %v10673_v17 = vpop.f32.mrf.mxu1  ;;  %1372 = vmatmul.mubr.f32.gmra.mxu0 %v8626_v14  ;;  %1773 = vmatmul.mubr.f32.gmra.mxu1 %v8626_v14 }
 0x15c   :  { %7530 = vmatprep.mubr.msk.f32.mxu0 %vm170_vm0, %v8627_v23  ;;  %7578 = vmatprep.mubr.msk.f32.mxu1 %vm170_vm0, %v8627_v23  ;;  %v513_v55 = vpop.f32.mrf.mxu0 }
 0x15d   :  { %v974_v26 = vpop.f32.mrf.mxu1  ;;  %v16971_v55 = vld [vmem:[#allocation3_spill] sm:$0xff] }
 0x15e   :  { %v10683_v62 = vpop.f32.mrf.mxu0 }
 0x15f   :  { %v10685_v30 = vpop.f32.mrf.mxu1  ;;  %1377 = vmatmul.mubr.f32.gmra.mxu0 %v9896_v48  ;;  %1778 = vmatmul.mubr.f32.gmra.mxu1 %v9896_v48 }
 0x160   :  { %7531 = vmatprep.mubr.msk.f32.mxu0 %vm170_vm0, %v9901_v51  ;;  %7579 = vmatprep.mubr.msk.f32.mxu1 %vm170_vm0, %v9901_v51  ;;  %v518_v14 = vpop.f32.mrf.mxu0 }
 0x161   :  { %v979_v11 = vpop.f32.mrf.mxu1  ;;  %v16973_v14 = vld [vmem:[#allocation5_spill] sm:$0xff] }
 0x162   :  { %v10693_v46 = vpop.f32.mrf.mxu0  ;;  %v16972_v11 = vld [vmem:[#allocation4_spill] sm:$0xff] }
 0x163   :  { %v10695_v23 = vpop.f32.mrf.mxu1  ;;  %1382 = vmatmul.mubr.f32.gmra.mxu0 %v9918_v27  ;;  %1783 = vmatmul.mubr.f32.gmra.mxu1 %v9918_v27 }
 0x164   :  { %7532 = vmatprep.mubr.msk.f32.mxu0 %vm170_vm0, %v16971_v55  ;;  %7580 = vmatprep.mubr.msk.f32.mxu1 %vm170_vm0, %v16971_v55  ;;  %v523_v48 = vpop.f32.mrf.mxu0 }
 0x165   :  { %v984_v26 = vpop.f32.mrf.mxu1  ;;  %v16974_v48 = vld [vmem:[#allocation6_spill] sm:$0xff] }
 0x166   :  { %v10703_v56 = vpop.f32.mrf.mxu0  ;;  %v16975_v26 = vld [vmem:[#allocation7_spill] sm:$0xff] }
 0x167   :  { %v10705_v51 = vpop.f32.mrf.mxu1  ;;  %1387 = vmatmul.mubr.f32.gmra.mxu0 %v16972_v11  ;;  %1788 = vmatmul.mubr.f32.gmra.mxu1 %v16972_v11 }
 0x168   :  { %7533 = vmatprep.mubr.msk.f32.mxu0 %vm170_vm0, %v16973_v14  ;;  %7581 = vmatprep.mubr.msk.f32.mxu1 %vm170_vm0, %v16973_v14  ;;  %v528_v27 = vpop.f32.mrf.mxu0 }
 0x169   :  { %v989_v9 = vpop.f32.mrf.mxu1  ;;  %v16977_v27 = vld [vmem:[#allocation9_spill] sm:$0xff] }
 0x16a   :  { %v10713_v31 = vpop.f32.mrf.mxu0  ;;  %v16976_v9 = vld [vmem:[#allocation8_spill] sm:$0xff] }
 0x16b   :  { %v10715_v55 = vpop.f32.mrf.mxu1  ;;  %1392 = vmatmul.mubr.f32.gmra.mxu0 %v16974_v48  ;;  %1793 = vmatmul.mubr.f32.gmra.mxu1 %v16974_v48 }
 0x16c   :  { %7534 = vmatprep.mubr.msk.f32.mxu0 %vm170_vm0, %v16975_v26  ;;  %7582 = vmatprep.mubr.msk.f32.mxu1 %vm170_vm0, %v16975_v26  ;;  %v533_v11 = vpop.f32.mrf.mxu0 }
 0x16d   :  { %v994_v24 = vpop.f32.mrf.mxu1  ;;  %v16979_v11 = vld [vmem:[#allocation11_spill] sm:$0xff] }
 0x16e   :  { %v10723_v29 = vpop.f32.mrf.mxu0  ;;  %v16978_v24 = vld [vmem:[#allocation10_spill] sm:$0xff] }
 0x16f   :  { %v10725_v14 = vpop.f32.mrf.mxu1  ;;  %1397 = vmatmul.mubr.f32.gmra.mxu0 %v16976_v9  ;;  %1798 = vmatmul.mubr.f32.gmra.mxu1 %v16976_v9 }
 0x170   :  { %7535 = vmatprep.mubr.msk.f32.mxu0 %vm170_vm0, %v16977_v27  ;;  %7583 = vmatprep.mubr.msk.f32.mxu1 %vm170_vm0, %v16977_v27  ;;  %v538_v48 = vpop.f32.mrf.mxu0 }
 0x171   :  { %v999_v43 = vpop.f32.mrf.mxu1  ;;  %v16983_v48 = vld [vmem:[#allocation13_spill] sm:$0xff] }
 0x172   :  { %v10733_v36 = vpop.f32.mrf.mxu0  ;;  %v16982_v43 = vld [vmem:[#allocation12_spill] sm:$0xff] }
 0x173   :  { %v10735_v26 = vpop.f32.mrf.mxu1  ;;  %1402 = vmatmul.mubr.f32.gmra.mxu0 %v16978_v24  ;;  %1803 = vmatmul.mubr.f32.gmra.mxu1 %v16978_v24 }
 0x174   :  { %7536 = vmatprep.mubr.msk.f32.mxu0 %vm170_vm0, %v16979_v11  ;;  %7584 = vmatprep.mubr.msk.f32.mxu1 %vm170_vm0, %v16979_v11  ;;  %v543_v9 = vpop.f32.mrf.mxu0 }
 0x175   :  { %v1004_v21 = vpop.f32.mrf.mxu1  ;;  %v16987_v9 = vld [vmem:[#allocation15_spill] sm:$0xff] }
 0x176   :  { %v10743_v59 = vpop.f32.mrf.mxu0  ;;  %v16986_v21 = vld [vmem:[#allocation14_spill] sm:$0xff] }
 0x177   :  { %16980 = vst [vmem:[#allocation3_spill] sm:$0xff] %v10743_v59  ;;  %v10745_v27 = vpop.f32.mrf.mxu1  ;;  %1407 = vmatmul.mubr.f32.gmra.mxu0 %v16982_v43  ;;  %1808 = vmatmul.mubr.f32.gmra.mxu1 %v16982_v43 }
 0x178   :  { %16981 = vst [vmem:[#allocation4_spill] sm:$0xff] %v10745_v27  ;;  %7537 = vmatprep.mubr.msk.f32.mxu0 %vm170_vm0, %v16983_v48  ;;  %7585 = vmatprep.mubr.msk.f32.mxu1 %vm170_vm0, %v16983_v48  ;;  %v548_v24 = vpop.f32.mrf.mxu0 }
 0x179   :  { %v1009_v40 = vpop.f32.mrf.mxu1  ;;  %v8628_v24 = vld [vmem:[%s16753_s1 + $0x230] sm:$0xff] }
 0x17a   :  { %v10753_v53 = vpop.f32.mrf.mxu0  ;;  %v16990_v40 = vld [vmem:[#allocation16_spill] sm:$0xff] }
 0x17b   :  { %16984 = vst [vmem:[#allocation5_spill] sm:$0xff] %v10753_v53  ;;  %v10755_v11 = vpop.f32.mrf.mxu1  ;;  %1412 = vmatmul.mubr.f32.gmra.mxu0 %v16986_v21  ;;  %1813 = vmatmul.mubr.f32.gmra.mxu1 %v16986_v21  ;;  %v8629_v21 = vld [vmem:[%s16753_s1 + $0x248] sm:$0xff] }
 0x17c   :  { %16985 = vst [vmem:[#allocation6_spill] sm:$0xff] %v10755_v11  ;;  %7538 = vmatprep.mubr.msk.f32.mxu0 %vm170_vm0, %v16987_v9  ;;  %7586 = vmatprep.mubr.msk.f32.mxu1 %vm170_vm0, %v16987_v9  ;;  %v553_v43 = vpop.f32.mrf.mxu0  ;;  %v8631_v11 = vld [vmem:[%s16753_s1 + $0x258] sm:$0xff] }
 0x17d   :  { %v1014_v27 = vpop.f32.mrf.mxu1 }
 0x17e   :  { %v10763_v59 = vpop.f32.mrf.mxu0 }
 0x17f   :  { %16988 = vst [vmem:[#allocation7_spill] sm:$0xff] %v10763_v59  ;;  %v10765_v48 = vpop.f32.mrf.mxu1  ;;  %1417 = vmatmul.mubr.f32.gmra.mxu0 %v16990_v40  ;;  %1818 = vmatmul.mubr.f32.gmra.mxu1 %v8628_v24  ;;  %v8630_v40 = vld [vmem:[%s16753_s1 + $0x240] sm:$0xff] }
 0x180   :  { %16989 = vst [vmem:[#allocation8_spill] sm:$0xff] %v10765_v48  ;;  %7539 = vmatprep.mubr.msk.f32.mxu0 %vm170_vm0, %v8629_v21  ;;  %7587 = vmatprep.mubr.msk.f32.mxu1 %vm170_vm0, %v8629_v21  ;;  %v558_v27 = vpop.f32.mrf.mxu0 }
 0x181   :  { %v1019_v9 = vpop.f32.mrf.mxu1 }
 0x182   :  { %v561_v43 = vpop.f32.mrf.mxu0  ;;  %v16991_v9 = vmax.f32 %v10151_v54, %v10372_v61  ;;  %v8633_v54 = vld [vmem:[%s16753_s1 + $0x268] sm:$0xff] }
 0x183   :  { %v1022_v59 = vpop.f32.mrf.mxu1  ;;  %1422 = vmatmul.mubr.f32.gmra.mxu0 %v8630_v40  ;;  %1823 = vmatmul.mubr.f32.gmra.mxu1 %v8630_v40  ;;  %v632_v24 = vmax.f32 %v10645_v10, %v561_v43  ;;  %v16993_v10 = vmax.f32 %v10153_v0, %v10374_v52  ;;  %v8632_v40 = vld [vmem:[%s16753_s1 + $0x250] sm:$0xff]  ;;  %v16995_v52 = vmax.f32 %v10170_v57, %v10394_v58  ;;  %v8635_v57 = vld [vmem:[%s16753_s1 + $0x278] sm:$0xff] }
 0x184   :  { %v1093_v48 = vmax.f32 %v10647_v49, %v1022_v59  ;;  %7540 = vmatprep.mubr.msk.f32.mxu0 %vm170_vm0, %v8631_v11  ;;  %7588 = vmatprep.mubr.msk.f32.mxu1 %vm170_vm0, %v8631_v11  ;;  %v563_v21 = vpop.f32.mrf.mxu0  ;;  %v16999_v58 = vmax.f32 %v10189_v32, %v10416_v60  ;;  %v8637_v32 = vld [vmem:[%s16753_s1 + $0x288] sm:$0xff]  ;;  %v17003_v60 = vmax.f32 %v10208_v35, %v10438_v3  ;;  %v8639_v35 = vld [vmem:[%s16753_s1 + $0x298] sm:$0xff] }
 0x185   :  { %v1024_v27 = vpop.f32.mrf.mxu1  ;;  %v10789_v53 = vmax.f32 %v16991_v9, %v632_v24  ;;  %v8634_v9 = vld [vmem:[%s16753_s1 + $0x260] sm:$0xff]  ;;  %v17007_v3 = vmax.f32 %v10227_v38, %v10457_v1  ;;  %v8641_v38 = vld [vmem:[%s16753_s1 + $0x2a8] sm:$0xff]  ;;  %v17011_v1 = vmax.f32 %v10246_v41, %v10479_v39  ;;  %v8643_v41 = vld [vmem:[%s16753_s1 + $0x2b8] sm:$0xff]  ;;  %v17015_v39 = vmax.f32 %v10265_v44, %v10502_v63 }
 0x186   :  { %v10794_v43 = vmax.f32 %v16993_v10, %v1093_v48  ;;  %v566_v59 = vpop.f32.mrf.mxu0  ;;  %v8645_v44 = vld [vmem:[%s16753_s1 + $0x2c8] sm:$0xff]  ;;  %v17019_v63 = vmax.f32 %v10279_v47, %v10525_v34  ;;  %v8647_v47 = vld [vmem:[%s16753_s1 + $0x2d8] sm:$0xff]  ;;  %v17023_v34 = vmax.f32 %v10299_v50, %v10548_v37  ;;  %v17029_v37 = vld [vmem:[#allocation17_spill] sm:$0xff] }
 0x187   :  { %16992 = vst [vmem:[#allocation9_spill] sm:$0xff] %v10789_v53  ;;  %v1027_v49 = vpop.f32.mrf.mxu1  ;;  %1427 = vmatmul.mubr.f32.gmra.mxu0 %v8632_v40  ;;  %1828 = vmatmul.mubr.f32.gmra.mxu1 %v8632_v40  ;;  %v633_v11 = vmax.f32 %v10659_v12, %v566_v59  ;;  %v16997_v12 = vmax.f32 %v10172_v42, %v10396_v2  ;;  %v8649_v50 = vld [vmem:[%s16753_s1 + $0x2e8] sm:$0xff] }
 0x188   :  { %16994 = vst [vmem:[#allocation10_spill] sm:$0xff] %v10794_v43  ;;  %v1094_v21 = vmax.f32 %v10661_v20, %v1027_v49  ;;  %7541 = vmatprep.mubr.msk.f32.mxu0 %vm170_vm0, %v8633_v54  ;;  %v568_v0 = vpop.f32.mrf.mxu0  ;;  %7589 = vmatprep.mubr.msk.f32.mxu1 %vm170_vm0, %v8633_v54 }
 0x189   :  { %v1029_v61 = vpop.f32.mrf.mxu1  ;;  %v10809_v48 = vmax.f32 %v16995_v52, %v633_v11 }
 0x18a   :  { %v10814_v24 = vmax.f32 %v16997_v12, %v1094_v21  ;;  %v571_v20 = vpop.f32.mrf.mxu0  ;;  %v8636_v21 = vld [vmem:[%s16753_s1 + $0x270] sm:$0xff] }
 0x18b   :  { %16996 = vst [vmem:[#allocation11_spill] sm:$0xff] %v10809_v48  ;;  %v1032_v27 = vpop.f32.mrf.mxu1  ;;  %1432 = vmatmul.mubr.f32.gmra.mxu0 %v8634_v9  ;;  %1833 = vmatmul.mubr.f32.gmra.mxu1 %v8634_v9  ;;  %v634_v10 = vmax.f32 %v10671_v8, %v571_v20  ;;  %v17001_v8 = vmax.f32 %v10191_v33, %v10418_v4  ;;  %v8638_v20 = vld [vmem:[%s16753_s1 + $0x280] sm:$0xff] }
 0x18c   :  { %16998 = vst [vmem:[#allocation12_spill] sm:$0xff] %v10814_v24  ;;  %v1095_v59 = vmax.f32 %v10673_v17, %v1032_v27  ;;  %7542 = vmatprep.mubr.msk.f32.mxu0 %vm170_vm0, %v8635_v57  ;;  %v573_v42 = vpop.f32.mrf.mxu0  ;;  %7590 = vmatprep.mubr.msk.f32.mxu1 %vm170_vm0, %v8635_v57 }
 0x18d   :  { %v1034_v2 = vpop.f32.mrf.mxu1  ;;  %v10829_v49 = vmax.f32 %v16999_v58, %v634_v10  ;;  %v8640_v42 = vld [vmem:[%s16753_s1 + $0x290] sm:$0xff] }
 0x18e   :  { %v10834_v40 = vmax.f32 %v17001_v8, %v1095_v59  ;;  %v576_v17 = vpop.f32.mrf.mxu0 }
 0x18f   :  { %17000 = vst [vmem:[#allocation13_spill] sm:$0xff] %v10829_v49  ;;  %v1037_v11 = vpop.f32.mrf.mxu1  ;;  %1437 = vmatmul.mubr.f32.gmra.mxu0 %v8636_v21  ;;  %1838 = vmatmul.mubr.f32.gmra.mxu1 %v8636_v21  ;;  %v635_v54 = vmax.f32 %v10683_v62, %v576_v17  ;;  %v17005_v62 = vmax.f32 %v10210_v13, %v10440_v6  ;;  %v8642_v21 = vld [vmem:[%s16753_s1 + $0x2a0] sm:$0xff] }
 0x190   :  { %17002 = vst [vmem:[#allocation14_spill] sm:$0xff] %v10834_v40  ;;  %v1096_v0 = vmax.f32 %v10685_v30, %v1037_v11  ;;  %7543 = vmatprep.mubr.msk.f32.mxu0 %vm170_vm0, %v8637_v32  ;;  %v578_v33 = vpop.f32.mrf.mxu0  ;;  %7591 = vmatprep.mubr.msk.f32.mxu1 %vm170_vm0, %v8637_v32 }
 0x191   :  { %v1039_v4 = vpop.f32.mrf.mxu1  ;;  %v10849_v61 = vmax.f32 %v17003_v60, %v635_v54  ;;  %v8644_v60 = vld [vmem:[%s16753_s1 + $0x2b0] sm:$0xff] }
 0x192   :  { %v10854_v52 = vmax.f32 %v17005_v62, %v1096_v0  ;;  %v581_v30 = vpop.f32.mrf.mxu0 }
 0x193   :  { %17004 = vst [vmem:[#allocation15_spill] sm:$0xff] %v10849_v61  ;;  %v1042_v12 = vpop.f32.mrf.mxu1  ;;  %1442 = vmatmul.mubr.f32.gmra.mxu0 %v8638_v20  ;;  %1843 = vmatmul.mubr.f32.gmra.mxu1 %v8638_v20  ;;  %v636_v27 = vmax.f32 %v10693_v46, %v581_v30  ;;  %v17009_v46 = vmax.f32 %v10229_v16, %v10459_v5 }
 0x194   :  { %17006 = vst [vmem:[#allocation16_spill] sm:$0xff] %v10854_v52  ;;  %v1097_v9 = vmax.f32 %v10695_v23, %v1042_v12  ;;  %7544 = vmatprep.mubr.msk.f32.mxu0 %vm170_vm0, %v8639_v35  ;;  %v583_v13 = vpop.f32.mrf.mxu0  ;;  %7592 = vmatprep.mubr.msk.f32.mxu1 %vm170_vm0, %v8639_v35 }
 0x195   :  { %v1044_v6 = vpop.f32.mrf.mxu1  ;;  %v10869_v10 = vmax.f32 %v17007_v3, %v636_v27 }
 0x196   :  { %v10874_v59 = vmax.f32 %v17009_v46, %v1097_v9  ;;  %v586_v23 = vpop.f32.mrf.mxu0  ;;  %v8646_v9 = vld [vmem:[%s16753_s1 + $0x2c0] sm:$0xff] }
 0x197   :  { %17008 = vst [vmem:[#allocation37_spill] sm:$0xff] %v10869_v10  ;;  %v1047_v57 = vpop.f32.mrf.mxu1  ;;  %1447 = vmatmul.mubr.f32.gmra.mxu0 %v8640_v42  ;;  %1848 = vmatmul.mubr.f32.gmra.mxu1 %v8640_v42  ;;  %v637_v2 = vmax.f32 %v10703_v56, %v586_v23  ;;  %v17013_v56 = vmax.f32 %v10248_v19, %v10481_v7  ;;  %v8648_v23 = vld [vmem:[%s16753_s1 + $0x2d0] sm:$0xff] }
 0x198   :  { %17010 = vst [vmem:[#allocation38_spill] sm:$0xff] %v10874_v59  ;;  %v1098_v58 = vmax.f32 %v10705_v51, %v1047_v57  ;;  %7545 = vmatprep.mubr.msk.f32.mxu0 %vm170_vm0, %v8641_v38  ;;  %v588_v16 = vpop.f32.mrf.mxu0  ;;  %7593 = vmatprep.mubr.msk.f32.mxu1 %vm170_vm0, %v8641_v38  ;;  %v17027_v57 = vld [vmem:[#allocation3_spill] sm:$0xff]  ;;  %v17030_v38 = vld [vmem:[#allocation28_spill] sm:$0xff] }
 0x199   :  { %v1049_v5 = vpop.f32.mrf.mxu1  ;;  %v10889_v8 = vmax.f32 %v17011_v1, %v637_v2  ;;  %v17028_v2 = vld [vmem:[#allocation4_spill] sm:$0xff]  ;;  %v17031_v16 = vmax.f32 %v17029_v37, %v17030_v38  ;;  %v17033_v1 = vld [vmem:[#allocation18_spill] sm:$0xff]  ;;  %v8654_v38 = vld [vmem:[%s16753_s1] sm:$0xff] }
 0x19a   :  { %v10894_v17 = vmax.f32 %v17013_v56, %v1098_v58  ;;  %v591_v51 = vpop.f32.mrf.mxu0  ;;  %v17034_v56 = vld [vmem:[#allocation29_spill] sm:$0xff] }
 0x19b   :  { %17012 = vst [vmem:[#allocation39_spill] sm:$0xff] %v10889_v8  ;;  %v1052_v11 = vpop.f32.mrf.mxu1  ;;  %1452 = vmatmul.mubr.f32.gmra.mxu0 %v8642_v21  ;;  %1853 = vmatmul.mubr.f32.gmra.mxu1 %v8642_v21  ;;  %v638_v54 = vmax.f32 %v10713_v31, %v591_v51  ;;  %v17017_v31 = vmax.f32 %v10267_v22, %v10504_v45 }
 0x19c   :  { %17014 = vst [vmem:[#allocation40_spill] sm:$0xff] %v10894_v17  ;;  %v1099_v0 = vmax.f32 %v10715_v55, %v1052_v11  ;;  %7546 = vmatprep.mubr.msk.f32.mxu0 %vm170_vm0, %v8643_v41  ;;  %v593_v19 = vpop.f32.mrf.mxu0  ;;  %7594 = vmatprep.mubr.msk.f32.mxu1 %vm170_vm0, %v8643_v41  ;;  %v17035_v51 = vmax.f32 %v17033_v1, %v17034_v56  ;;  %v17037_v41 = vld [vmem:[#allocation5_spill] sm:$0xff] }
 0x19d   :  { %v1054_v7 = vpop.f32.mrf.mxu1  ;;  %v10909_v32 = vmax.f32 %v17015_v39, %v638_v54 }
 0x19e   :  { %v10914_v33 = vmax.f32 %v17017_v31, %v1099_v0  ;;  %v596_v55 = vpop.f32.mrf.mxu0  ;;  %v8650_v0 = vld [vmem:[%s16753_s1 + $0x2e0] sm:$0xff]  ;;  %v17038_v7 = vld [vmem:[#allocation6_spill] sm:$0xff] }
 0x19f   :  { %17016 = vst [vmem:[#allocation41_spill] sm:$0xff] %v10909_v32  ;;  %v1057_v4 = vpop.f32.mrf.mxu1  ;;  %1457 = vmatmul.mubr.f32.gmra.mxu0 %v8644_v60  ;;  %1858 = vmatmul.mubr.f32.gmra.mxu1 %v8644_v60  ;;  %v639_v62 = vmax.f32 %v10723_v29, %v596_v55  ;;  %v17021_v29 = vmax.f32 %v10281_v25, %v10527_v15  ;;  %v8651_v31 = vld [vmem:[%s16753_s1 + $0x2f8] sm:$0xff]  ;;  %v17039_v60 = vld [vmem:[#allocation19_spill] sm:$0xff] }
 0x1a0   :  { %17018 = vst [vmem:[#allocation42_spill] sm:$0xff] %v10914_v33  ;;  %v1100_v30 = vmax.f32 %v10725_v14, %v1057_v4  ;;  %7547 = vmatprep.mubr.msk.f32.mxu0 %vm170_vm0, %v8645_v44  ;;  %v598_v22 = vpop.f32.mrf.mxu0  ;;  %7595 = vmatprep.mubr.msk.f32.mxu1 %vm170_vm0, %v8645_v44 }
 0x1a1   :  { %v1059_v45 = vpop.f32.mrf.mxu1  ;;  %v10929_v12 = vmax.f32 %v17019_v63, %v639_v62  ;;  %v17040_v62 = vld [vmem:[#allocation31_spill] sm:$0xff]  ;;  %v17043_v22 = vld [vmem:[#allocation20_spill] sm:$0xff] }
 0x1a2   :  { %v10934_v20 = vmax.f32 %v17021_v29, %v1100_v30  ;;  %v601_v14 = vpop.f32.mrf.mxu0  ;;  %v17041_v30 = vmax.f32 %v17039_v60, %v17040_v62  ;;  %v17044_v45 = vld [vmem:[#allocation32_spill] sm:$0xff] }
 0x1a3   :  { %17020 = vst [vmem:[#allocation43_spill] sm:$0xff] %v10929_v12  ;;  %v1062_v27 = vpop.f32.mrf.mxu1  ;;  %1462 = vmatmul.mubr.f32.gmra.mxu0 %v8646_v9  ;;  %1863 = vmatmul.mubr.f32.gmra.mxu1 %v8646_v9  ;;  %v640_v35 = vmax.f32 %v10733_v36, %v601_v14  ;;  %v17025_v36 = vmax.f32 %v10301_v28, %v10550_v18  ;;  %v8652_v9 = vld [vmem:[%s16753_s1 + $0x2f0] sm:$0xff] }
 0x1a4   :  { %17022 = vst [vmem:[#allocation44_spill] sm:$0xff] %v10934_v20  ;;  %v1101_v13 = vmax.f32 %v10735_v26, %v1062_v27  ;;  %7548 = vmatprep.mubr.msk.f32.mxu0 %vm170_vm0, %v8647_v47  ;;  %v603_v25 = vpop.f32.mrf.mxu0  ;;  %7596 = vmatprep.mubr.msk.f32.mxu1 %vm170_vm0, %v8647_v47  ;;  %v17045_v63 = vmax.f32 %v17043_v22, %v17044_v45  ;;  %v17048_v47 = vld [vmem:[#allocation8_spill] sm:$0xff]  ;;  %v8659_v22 = vld [vmem:[%s16753_s1 + $0x38] sm:$0xff] }
 0x1a5   :  { %v1064_v15 = vpop.f32.mrf.mxu1  ;;  %v10949_v6 = vmax.f32 %v17023_v34, %v640_v35  ;;  %v17047_v35 = vld [vmem:[#allocation7_spill] sm:$0xff] }
 0x1a6   :  { %v10954_v3 = vmax.f32 %v17025_v36, %v1101_v13  ;;  %v606_v26 = vpop.f32.mrf.mxu0  ;;  %v8653_v15 = vld [vmem:[%s16753_s1 + $0x8] sm:$0xff] }
 0x1a7   :  { %17024 = vst [vmem:[#allocation45_spill] sm:$0xff] %v10949_v6  ;;  %v1067_v46 = vpop.f32.mrf.mxu1  ;;  %1467 = vmatmul.mubr.f32.gmra.mxu0 %v8648_v23  ;;  %1868 = vmatmul.mubr.f32.gmra.mxu1 %v8648_v23  ;;  %v641_v42 = vmax.f32 %v17027_v57, %v606_v26  ;;  %v17049_v26 = vld [vmem:[#allocation21_spill] sm:$0xff] }
 0x1a8   :  { %17026 = vst [vmem:[#allocation46_spill] sm:$0xff] %v10954_v3  ;;  %v1102_v58 = vmax.f32 %v17028_v2, %v1067_v46  ;;  %7549 = vmatprep.mubr.msk.f32.mxu0 %vm170_vm0, %v8649_v50  ;;  %v608_v28 = vpop.f32.mrf.mxu0  ;;  %7597 = vmatprep.mubr.msk.f32.mxu1 %vm170_vm0, %v8649_v50  ;;  %v17050_v46 = vld [vmem:[#allocation34_spill] sm:$0xff]  ;;  %v17054_v2 = vld [vmem:[#allocation35_spill] sm:$0xff] }
 0x1a9   :  { %v1069_v18 = vpop.f32.mrf.mxu1  ;;  %v10969_v5 = vmax.f32 %v17031_v16, %v641_v42  ;;  %v17051_v23 = vmax.f32 %v17049_v26, %v17050_v46  ;;  %v17053_v42 = vld [vmem:[#allocation22_spill] sm:$0xff] }
 0x1aa   :  { %v10974_v11 = vmax.f32 %v17035_v51, %v1102_v58  ;;  %v611_v21 = vpop.f32.mrf.mxu0  ;;  %v17055_v58 = vmax.f32 %v17053_v42, %v17054_v2  ;;  %v11019_v28 = vld [vmem:[%s16752_s0 + $0x238] sm:$0xff]  ;;  %v17057_v51 = vld [vmem:[#allocation23_spill] sm:$0xff] }
 0x1ab   :  { %17032 = vst [vmem:[#allocation3_spill] sm:$0xff] %v10969_v5  ;;  %v1072_v54 = vpop.f32.mrf.mxu1  ;;  %1472 = vmatmul.mubr.f32.gmra.mxu0 %v8650_v0  ;;  %1873 = vmatmul.mubr.f32.gmra.mxu1 %v8650_v0  ;;  %v642_v19 = vmax.f32 %v17037_v41, %v611_v21  ;;  %v8655_v16 = vld [vmem:[%s16753_s1 + $0x18] sm:$0xff]  ;;  %v17058_v21 = vmov 0.0  }
 0x1ac   :  { %17036 = vst [vmem:[#allocation4_spill] sm:$0xff] %v10974_v11  ;;  %v1103_v39 = vmax.f32 %v17038_v7, %v1072_v54  ;;  %7550 = vmatprep.mubr.msk.f32.mxu0 %vm170_vm0, %v8651_v31  ;;  %v613_v55 = vpop.f32.mrf.mxu0  ;;  %7598 = vmatprep.mubr.msk.f32.mxu1 %vm170_vm0, %v8651_v31  ;;  %v11040_v54 = vld [vmem:[%s16752_s0 + $0x230] sm:$0xff]  ;;  %v8657_v7 = vld [vmem:[%s16753_s1 + $0x28] sm:$0xff]  ;;  %v8663_v42 = vld [vmem:[%s16753_s1 + $0x58] sm:$0xff] }
 0x1ad   :  { %v1074_v4 = vpop.f32.mrf.mxu1  ;;  %v10989_v44 = vmax.f32 %v17041_v30, %v642_v19  ;;  %v8656_v19 = vld [vmem:[%s16753_s1 + $0x10] sm:$0xff]  ;;  %v17059_v55 = vld [vmem:[#allocation24_spill] sm:$0xff]  ;;  %v8658_v30 = vld [vmem:[%s16753_s1 + $0x20] sm:$0xff] }
 0x1ae   :  { %v10994_v29 = vmax.f32 %v17045_v63, %v1103_v39  ;;  %v616_v14 = vpop.f32.mrf.mxu0  ;;  %v11061_v4 = vld [vmem:[%s16752_s0 + $0x228] sm:$0xff] }
 0x1af   :  { %17042 = vst [vmem:[#allocation17_spill] sm:$0xff] %v10989_v44  ;;  %v1077_v27 = vpop.f32.mrf.mxu1  ;;  %1477 = vmatmul.mubr.f32.gmra.mxu0 %v8652_v9  ;;  %1878 = vmatmul.mubr.f32.gmra.mxu1 %v8652_v9  ;;  %v643_v13 = vmax.f32 %v17047_v35, %v616_v14  ;;  %v17060_v14 = vld [vmem:[#allocation25_spill] sm:$0xff] }
 0x1b0   :  { %17046 = vst [vmem:[#allocation28_spill] sm:$0xff] %v10994_v29  ;;  %v1104_v25 = vmax.f32 %v17048_v47, %v1077_v27  ;;  %7599 = vmatprep.mubr.msk.f32.mxu0 %vm170_vm0, %v8653_v15  ;;  %v618_v34 = vpop.f32.mrf.mxu0  ;;  %7647 = vmatprep.mubr.msk.f32.mxu1 %vm170_vm0, %v8653_v15  ;;  %v11082_v27 = vld [vmem:[%s16752_s0 + $0x220] sm:$0xff]  ;;  %v8661_v47 = vld [vmem:[%s16753_s1 + $0x48] sm:$0xff] }
 0x1b1   :  { %v1079_v36 = vpop.f32.mrf.mxu1  ;;  %v11009_v57 = vmax.f32 %v17051_v23, %v643_v13  ;;  %v8660_v13 = vld [vmem:[%s16753_s1 + $0x30] sm:$0xff]  ;;  %v17061_v34 = vld [vmem:[#allocation26_spill] sm:$0xff]  ;;  %v8662_v23 = vld [vmem:[%s16753_s1 + $0x40] sm:$0xff] }
 0x1b2   :  { %v11014_v50 = vmax.f32 %v17055_v58, %v1104_v25  ;;  %v11021_v18 = vpop.f32.mrf.mxu0  ;;  %v11103_v36 = vld [vmem:[%s16752_s0 + $0x218] sm:$0xff] }
 0x1b3   :  { %17052 = vst [vmem:[#allocation18_spill] sm:$0xff] %v11009_v57  ;;  %v11023_v37 = vpop.f32.mrf.mxu1  ;;  %2044 = vmatmul.mubr.f32.vlgmr.msra.gmra.mxu0 %v8654_v38  ;;  %2445 = vmatmul.mubr.f32.vlgmr.msra.gmra.mxu1 %v8654_v38  ;;  %v17062_v38 = vld [vmem:[#allocation27_spill] sm:$0xff] }
 0x1b4   :  { %17056 = vst [vmem:[#allocation29_spill] sm:$0xff] %v11014_v50  ;;  %7600 = vmatprep.mubr.msk.f32.mxu0 %vm170_vm0, %v8655_v16  ;;  %7648 = vmatprep.mubr.msk.f32.mxu1 %vm170_vm0, %v8655_v16  ;;  %v1245_v1 = vpop.f32.mrf.mxu0  ;;  %v11124_v16 = vld [vmem:[%s16752_s0 + $0x210] sm:$0xff] }
 0x1b5   :  { %v1646_v56 = vpop.f32.mrf.mxu1  ;;  %2782 = vmatpush1.msra.mxu0 %v17057_v51  ;;  %3183 = vmatpush1.msra.mxu1 %v11019_v28  ;;  %v8664_v51 = vld [vmem:[%s16753_s1 + $0x50] sm:$0xff] }
 0x1b6   :  { %2783 = vmatprep.subr.mxu0 %v17058_v21  ;;  %3184 = vmatprep.subr.mxu1 %v17058_v21  ;;  %v11042_v0 = vpop.f32.mrf.mxu0 }
 0x1b7   :  { %v11044_v41 = vpop.f32.mrf.mxu1  ;;  %2049 = vmatmul.mubr.f32.gmra.mxu0 %v8656_v19  ;;  %2450 = vmatmul.mubr.f32.gmra.mxu1 %v8656_v19  ;;  %v8665_v19 = vld [vmem:[%s16753_s1 + $0x68] sm:$0xff] }
 0x1b8   :  { %7601 = vmatprep.mubr.msk.f32.mxu0 %vm170_vm0, %v8657_v7  ;;  %7649 = vmatprep.mubr.msk.f32.mxu1 %vm170_vm0, %v8657_v7  ;;  %v1250_v39 = vpop.f32.mrf.mxu0 }
 0x1b9   :  { %v1651_v31 = vpop.f32.mrf.mxu1  ;;  %2784 = vmatpush1.msra.mxu0 %v17059_v55  ;;  %3185 = vmatpush1.msra.mxu1 %v11040_v54 }
 0x1ba   :  { %2785 = vmatprep.subr.mxu0 %v17058_v21  ;;  %3186 = vmatprep.subr.mxu1 %v17058_v21  ;;  %v11063_v60 = vpop.f32.mrf.mxu0  ;;  %v17063_v31 = vld [vmem:[#allocation30_spill] sm:$0xff] }
 0x1bb   :  { %v11065_v62 = vpop.f32.mrf.mxu1  ;;  %2054 = vmatmul.mubr.f32.gmra.mxu0 %v8658_v30  ;;  %2455 = vmatmul.mubr.f32.gmra.mxu1 %v8658_v30 }
 0x1bc   :  { %7602 = vmatprep.mubr.msk.f32.mxu0 %vm170_vm0, %v8659_v22  ;;  %7650 = vmatprep.mubr.msk.f32.mxu1 %vm170_vm0, %v8659_v22  ;;  %v1255_v45 = vpop.f32.mrf.mxu0  ;;  %v8666_v22 = vld [vmem:[%s16753_s1 + $0x60] sm:$0xff] }
 0x1bd   :  { %v1656_v63 = vpop.f32.mrf.mxu1  ;;  %2786 = vmatpush1.msra.mxu0 %v17060_v14  ;;  %3187 = vmatpush1.msra.mxu1 %v11061_v4  ;;  %v11152_v45 = vld [vmem:[%s16752_s0 + $0x208] sm:$0xff] }
 0x1be   :  { %2787 = vmatprep.subr.mxu0 %v17058_v21  ;;  %3188 = vmatprep.subr.mxu1 %v17058_v21  ;;  %v11084_v9 = vpop.f32.mrf.mxu0  ;;  %v8667_v63 = vld [vmem:[%s16753_s1 + $0x78] sm:$0xff] }
 0x1bf   :  { %v11086_v35 = vpop.f32.mrf.mxu1  ;;  %2059 = vmatmul.mubr.f32.gmra.mxu0 %v8660_v13  ;;  %2460 = vmatmul.mubr.f32.gmra.mxu1 %v8660_v13 }
 0x1c0   :  { %7603 = vmatprep.mubr.msk.f32.mxu0 %vm170_vm0, %v8661_v47  ;;  %7651 = vmatprep.mubr.msk.f32.mxu1 %vm170_vm0, %v8661_v47  ;;  %v1260_v25 = vpop.f32.mrf.mxu0  ;;  %v17064_v47 = vld [vmem:[#allocation33_spill] sm:$0xff] }
 0x1c1   :  { %v1661_v15 = vpop.f32.mrf.mxu1  ;;  %2788 = vmatpush1.msra.mxu0 %v17061_v34  ;;  %3189 = vmatpush1.msra.mxu1 %v11082_v27  ;;  %v8668_v34 = vld [vmem:[%s16753_s1 + $0x70] sm:$0xff] }
 0x1c2   :  { %2789 = vmatprep.subr.mxu0 %v17058_v21  ;;  %3190 = vmatprep.subr.mxu1 %v17058_v21  ;;  %v11105_v26 = vpop.f32.mrf.mxu0 }
 0x1c3   :  { %v11107_v46 = vpop.f32.mrf.mxu1  ;;  %2064 = vmatmul.mubr.f32.gmra.mxu0 %v8662_v23  ;;  %2465 = vmatmul.mubr.f32.gmra.mxu1 %v8662_v23  ;;  %v8669_v23 = vld [vmem:[%s16753_s1 + $0x88] sm:$0xff] }
 0x1c4   :  { %7604 = vmatprep.mubr.msk.f32.mxu0 %vm170_vm0, %v8663_v42  ;;  %7652 = vmatprep.mubr.msk.f32.mxu1 %vm170_vm0, %v8663_v42  ;;  %v1265_v2 = vpop.f32.mrf.mxu0 }
 0x1c5   :  { %v1666_v58 = vpop.f32.mrf.mxu1  ;;  %2790 = vmatpush1.msra.mxu0 %v17062_v38  ;;  %3191 = vmatpush1.msra.mxu1 %v11103_v36  ;;  %v2764_v38 = vld [vmem:[%s16752_s0 + $0x1b8] sm:$0xff] }
 0x1c6   :  { %2791 = vmatprep.subr.mxu0 %v17058_v21  ;;  %3192 = vmatprep.subr.mxu1 %v17058_v21  ;;  %v11126_v1 = vpop.f32.mrf.mxu0  ;;  %v17065_v58 = vld [vmem:[#allocation36_spill] sm:$0xff] }
 0x1c7   :  { %v11128_v56 = vpop.f32.mrf.mxu1  ;;  %2069 = vmatmul.mubr.f32.gmra.mxu0 %v8664_v51  ;;  %2470 = vmatmul.mubr.f32.gmra.mxu1 %v8664_v51  ;;  %v11183_v51 = vld [vmem:[%s16752_s0 + $0x200] sm:$0xff] }
 0x1c8   :  { %7605 = vmatprep.mubr.msk.f32.mxu0 %vm170_vm0, %v8665_v19  ;;  %7653 = vmatprep.mubr.msk.f32.mxu1 %vm170_vm0, %v8665_v19  ;;  %v1270_v7 = vpop.f32.mrf.mxu0 }
 0x1c9   :  { %v1671_v39 = vpop.f32.mrf.mxu1  ;;  %2792 = vmatpush1.msra.mxu0 %v17063_v31  ;;  %3193 = vmatpush1.msra.mxu1 %v11124_v16  ;;  %v8671_v31 = vld [vmem:[%s16753_s1 + $0x98] sm:$0xff] }
 0x1ca   :  { %2793 = vmatprep.subr.mxu0 %v17058_v21  ;;  %3194 = vmatprep.subr.mxu1 %v17058_v21  ;;  %v11142_v55 = vpop.f32.mrf.mxu0  ;;  %v8670_v39 = vld [vmem:[%s16753_s1 + $0x80] sm:$0xff] }
 0x1cb   :  { %v11144_v30 = vpop.f32.mrf.mxu1  ;;  %2074 = vmatmul.mubr.f32.gmra.mxu0 %v8666_v22  ;;  %2475 = vmatmul.mubr.f32.gmra.mxu1 %v8666_v22 }
 0x1cc   :  { %7606 = vmatprep.mubr.msk.f32.mxu0 %vm170_vm0, %v8667_v63  ;;  %7654 = vmatprep.mubr.msk.f32.mxu1 %vm170_vm0, %v8667_v63  ;;  %v1275_v14 = vpop.f32.mrf.mxu0 }
 0x1cd   :  { %v1676_v13 = vpop.f32.mrf.mxu1  ;;  %2794 = vmatpush1.msra.mxu0 %v17064_v47  ;;  %3195 = vmatpush1.msra.mxu1 %v11152_v45  ;;  %v2763_v14 = vld [vmem:[%s16752_s0 + $0x1b0] sm:$0xff] }
 0x1ce   :  { %2795 = vmatprep.subr.mxu0 %v17058_v21  ;;  %3196 = vmatprep.subr.mxu1 %v17058_v21  ;;  %v11163_v25 = vpop.f32.mrf.mxu0  ;;  %v3165_v13 = vld [vmem:[%s16752_s0 + $0x1f8] sm:$0xff] }
 0x1cf   :  { %v11165_v15 = vpop.f32.mrf.mxu1  ;;  %2079 = vmatmul.mubr.f32.gmra.mxu0 %v8668_v34  ;;  %2480 = vmatmul.mubr.f32.gmra.mxu1 %v8668_v34 }
 0x1d0   :  { %7607 = vmatprep.mubr.msk.f32.mxu0 %vm170_vm0, %v8669_v23  ;;  %7655 = vmatprep.mubr.msk.f32.mxu1 %vm170_vm0, %v8669_v23  ;;  %v1280_v42 = vpop.f32.mrf.mxu0  ;;  %v8672_v23 = vld [vmem:[%s16753_s1 + $0x90] sm:$0xff] }
 0x1d1   :  { %v1681_v2 = vpop.f32.mrf.mxu1  ;;  %2796 = vmatpush1.msra.mxu0 %v17065_v58  ;;  %3197 = vmatpush1.msra.mxu1 %v11183_v51  ;;  %v8673_v42 = vld [vmem:[%s16753_s1 + $0xa8] sm:$0xff] }
 0x1d2   :  { %2797 = vmatprep.subr.mxu0 %v17058_v21  ;;  %v11185_v19 = vpop.f32.mrf.mxu0  ;;  %3198 = vmatprep.subr.mxu1 %v17058_v21 }
 0x1d3   :  { %v11187_v7 = vpop.f32.mrf.mxu1  ;;  %2084 = vmatmul.mubr.f32.gmra.mxu0 %v8670_v39  ;;  %2485 = vmatmul.mubr.f32.gmra.mxu1 %v8670_v39  ;;  %v3164_v39 = vld [vmem:[%s16752_s0 + $0x1f0] sm:$0xff] }
 0x1d4   :  { %7608 = vmatprep.mubr.msk.f32.mxu0 %vm170_vm0, %v8671_v31  ;;  %7656 = vmatprep.mubr.msk.f32.mxu1 %vm170_vm0, %v8671_v31  ;;  %v1285_v22 = vpop.f32.mrf.mxu0 }
 0x1d5   :  { %v1686_v63 = vpop.f32.mrf.mxu1  ;;  %2798 = vmatpush1.msra.mxu0 %v2764_v38  ;;  %3199 = vmatpush1.msra.mxu1 %v3165_v13  ;;  %v2762_v38 = vld [vmem:[%s16752_s0 + $0x1a8] sm:$0xff] }
 0x1d6   :  { %2799 = vmatprep.subr.mxu0 %v17058_v21  ;;  %v11206_v47 = vpop.f32.mrf.mxu0  ;;  %3200 = vmatprep.subr.mxu1 %v17058_v21  ;;  %v8674_v63 = vld [vmem:[%s16753_s1 + $0xa0] sm:$0xff] }
 0x1d7   :  { %17066 = vst [vmem:[#allocation5_spill] sm:$0xff] %v11206_v47  ;;  %v11208_v34 = vpop.f32.mrf.mxu1  ;;  %2089 = vmatmul.mubr.f32.gmra.mxu0 %v8672_v23  ;;  %2490 = vmatmul.mubr.f32.gmra.mxu1 %v8672_v23 }
 0x1d8   :  { %17067 = vst [vmem:[#allocation6_spill] sm:$0xff] %v11208_v34  ;;  %7609 = vmatprep.mubr.msk.f32.mxu0 %vm170_vm0, %v8673_v42  ;;  %7657 = vmatprep.mubr.msk.f32.mxu1 %vm170_vm0, %v8673_v42  ;;  %v1290_v2 = vpop.f32.mrf.mxu0  ;;  %v2761_v42 = vld [vmem:[%s16752_s0 + $0x1a0] sm:$0xff] }
 0x1d9   :  { %v1691_v58 = vpop.f32.mrf.mxu1  ;;  %2800 = vmatpush1.msra.mxu0 %v2763_v14  ;;  %v8675_v14 = vld [vmem:[%s16753_s1 + $0xb8] sm:$0xff]  ;;  %3201 = vmatpush1.msra.mxu1 %v3164_v39  ;;  %v3163_v2 = vld [vmem:[%s16752_s0 + $0x1e8] sm:$0xff] }
 0x1da   :  { %2801 = vmatprep.subr.mxu0 %v17058_v21  ;;  %v11226_v31 = vpop.f32.mrf.mxu0  ;;  %3202 = vmatprep.subr.mxu1 %v17058_v21  ;;  %v8677_v39 = vld [vmem:[%s16753_s1 + $0xc8] sm:$0xff] }
 0x1db   :  { %17068 = vst [vmem:[#allocation19_spill] sm:$0xff] %v11226_v31  ;;  %v11228_v22 = vpop.f32.mrf.mxu1  ;;  %2094 = vmatmul.mubr.f32.gmra.mxu0 %v8674_v63  ;;  %2495 = vmatmul.mubr.f32.gmra.mxu1 %v8674_v63 }
 0x1dc   :  { %17069 = vst [vmem:[#allocation31_spill] sm:$0xff] %v11228_v22  ;;  %7610 = vmatprep.mubr.msk.f32.mxu0 %vm170_vm0, %v8675_v14  ;;  %7658 = vmatprep.mubr.msk.f32.mxu1 %vm170_vm0, %v8675_v14  ;;  %v1295_v13 = vpop.f32.mrf.mxu0 }
 0x1dd   :  { %v1696_v23 = vpop.f32.mrf.mxu1  ;;  %2802 = vmatpush1.msra.mxu0 %v2762_v38  ;;  %v8676_v38 = vld [vmem:[%s16753_s1 + $0xb0] sm:$0xff]  ;;  %3203 = vmatpush1.msra.mxu1 %v3163_v2 }
 0x1de   :  { %2803 = vmatprep.subr.mxu0 %v17058_v21  ;;  %v11246_v58 = vpop.f32.mrf.mxu0  ;;  %v2760_v23 = vld [vmem:[%s16752_s0 + $0x198] sm:$0xff]  ;;  %3204 = vmatprep.subr.mxu1 %v17058_v21 }
 0x1df   :  { %17070 = vst [vmem:[#allocation20_spill] sm:$0xff] %v11246_v58  ;;  %v11248_v63 = vpop.f32.mrf.mxu1  ;;  %2099 = vmatmul.mubr.f32.gmra.mxu0 %v8676_v38  ;;  %2500 = vmatmul.mubr.f32.gmra.mxu1 %v8676_v38  ;;  %v3162_v38 = vld [vmem:[%s16752_s0 + $0x1e0] sm:$0xff] }
 0x1e0   :  { %17071 = vst [vmem:[#allocation32_spill] sm:$0xff] %v11248_v63  ;;  %7611 = vmatprep.mubr.msk.f32.mxu0 %vm170_vm0, %v8677_v39  ;;  %7659 = vmatprep.mubr.msk.f32.mxu1 %vm170_vm0, %v8677_v39  ;;  %v1300_v14 = vpop.f32.mrf.mxu0  ;;  %v3161_v39 = vld [vmem:[%s16752_s0 + $0x1d8] sm:$0xff] }
 0x1e1   :  { %v1701_v13 = vpop.f32.mrf.mxu1  ;;  %2804 = vmatpush1.msra.mxu0 %v2761_v42  ;;  %v8678_v42 = vld [vmem:[%s16753_s1 + $0xc0] sm:$0xff]  ;;  %v8679_v14 = vld [vmem:[%s16753_s1 + $0xd8] sm:$0xff]  ;;  %3205 = vmatpush1.msra.mxu1 %v3162_v38  ;;  %v3160_v38 = vld [vmem:[%s16752_s0 + $0x1d0] sm:$0xff] }
 0x1e2   :  { %2805 = vmatprep.subr.mxu0 %v17058_v21  ;;  %v11266_v59 = vpop.f32.mrf.mxu0  ;;  %3206 = vmatprep.subr.mxu1 %v17058_v21 }
 0x1e3   :  { %v11268_v17 = vpop.f32.mrf.mxu1  ;;  %2104 = vmatmul.mubr.f32.gmra.mxu0 %v8678_v42  ;;  %2505 = vmatmul.mubr.f32.gmra.mxu1 %v8678_v42  ;;  %v2759_v42 = vld [vmem:[%s16752_s0 + $0x190] sm:$0xff] }
 0x1e4   :  { %7612 = vmatprep.mubr.msk.f32.mxu0 %vm170_vm0, %v8679_v14  ;;  %7660 = vmatprep.mubr.msk.f32.mxu1 %vm170_vm0, %v8679_v14  ;;  %v1305_v13 = vpop.f32.mrf.mxu0  ;;  %v8681_v14 = vld [vmem:[%s16753_s1 + $0xe8] sm:$0xff] }
 0x1e5   :  { %v1706_v33 = vpop.f32.mrf.mxu1  ;;  %2806 = vmatpush1.msra.mxu0 %v2760_v23  ;;  %3207 = vmatpush1.msra.mxu1 %v3161_v39 }
 0x1e6   :  { %2807 = vmatprep.subr.mxu0 %v17058_v21  ;;  %v11290_v2 = vpop.f32.mrf.mxu0  ;;  %v8680_v33 = vld [vmem:[%s16753_s1 + $0xd0] sm:$0xff]  ;;  %3208 = vmatprep.subr.mxu1 %v17058_v21 }
 0x1e7   :  { %v11292_v20 = vpop.f32.mrf.mxu1  ;;  %2109 = vmatmul.mubr.f32.gmra.mxu0 %v8680_v33  ;;  %2510 = vmatmul.mubr.f32.gmra.mxu1 %v8680_v33  ;;  %v2758_v33 = vld [vmem:[%s16752_s0 + $0x188] sm:$0xff] }
 0x1e8   :  { %7613 = vmatprep.mubr.msk.f32.mxu0 %vm170_vm0, %v8681_v14  ;;  %7661 = vmatprep.mubr.msk.f32.mxu1 %vm170_vm0, %v8681_v14  ;;  %v1310_v13 = vpop.f32.mrf.mxu0  ;;  %v8683_v14 = vld [vmem:[%s16753_s1 + $0xf8] sm:$0xff] }
 0x1e9   :  { %v1711_v3 = vpop.f32.mrf.mxu1  ;;  %2808 = vmatpush1.msra.mxu0 %v2759_v42  ;;  %3209 = vmatpush1.msra.mxu1 %v3160_v38  ;;  %v3159_v42 = vld [vmem:[%s16752_s0 + $0x1c8] sm:$0xff] }
 0x1ea   :  { %2809 = vmatprep.subr.mxu0 %v17058_v21  ;;  %v11314_v23 = vpop.f32.mrf.mxu0  ;;  %v8682_v3 = vld [vmem:[%s16753_s1 + $0xe0] sm:$0xff]  ;;  %3210 = vmatprep.subr.mxu1 %v17058_v21 }
 0x1eb   :  { %v11316_v11 = vpop.f32.mrf.mxu1  ;;  %2114 = vmatmul.mubr.f32.gmra.mxu0 %v8682_v3  ;;  %2515 = vmatmul.mubr.f32.gmra.mxu1 %v8682_v3  ;;  %v2757_v3 = vld [vmem:[%s16752_s0 + $0x180] sm:$0xff] }
 0x1ec   :  { %7614 = vmatprep.mubr.msk.f32.mxu0 %vm170_vm0, %v8683_v14  ;;  %7662 = vmatprep.mubr.msk.f32.mxu1 %vm170_vm0, %v8683_v14  ;;  %v1315_v13 = vpop.f32.mrf.mxu0  ;;  %v8685_v14 = vld [vmem:[%s16753_s1 + $0x108] sm:$0xff] }
 0x1ed   :  { %v1716_v29 = vpop.f32.mrf.mxu1  ;;  %2810 = vmatpush1.msra.mxu0 %v2758_v33  ;;  %3211 = vmatpush1.msra.mxu1 %v3159_v42 }
 0x1ee   :  { %2811 = vmatprep.subr.mxu0 %v17058_v21  ;;  %v11338_v39 = vpop.f32.mrf.mxu0  ;;  %v8684_v29 = vld [vmem:[%s16753_s1 + $0xf0] sm:$0xff]  ;;  %3212 = vmatprep.subr.mxu1 %v17058_v21 }
 0x1ef   :  { %v11340_v50 = vpop.f32.mrf.mxu1  ;;  %2119 = vmatmul.mubr.f32.gmra.mxu0 %v8684_v29  ;;  %2520 = vmatmul.mubr.f32.gmra.mxu1 %v8684_v29  ;;  %v3158_v29 = vld [vmem:[%s16752_s0 + $0x1c0] sm:$0xff] }
 0x1f0   :  { %7615 = vmatprep.mubr.msk.f32.mxu0 %vm170_vm0, %v8685_v14  ;;  %7663 = vmatprep.mubr.msk.f32.mxu1 %vm170_vm0, %v8685_v14  ;;  %v1320_v13 = vpop.f32.mrf.mxu0  ;;  %v8686_v14 = vld [vmem:[%s16753_s1 + $0x100] sm:$0xff] }
 0x1f1   :  { %v1721_v53 = vpop.f32.mrf.mxu1  ;;  %2812 = vmatpush1.msra.mxu0 %v2757_v3  ;;  %v8687_v3 = vld [vmem:[%s16753_s1 + $0x118] sm:$0xff]  ;;  %3213 = vmatpush1.msra.mxu1 %v3158_v29 }
 0x1f2   :  { %2829 = vmatprep.subr.mxu0 %v17058_v21  ;;  %v11359_v33 = vpop.f32.mrf.mxu0  ;;  %3230 = vmatprep.subr.mxu1 %v17058_v21 }
 0x1f3   :  { %v11361_v38 = vpop.f32.mrf.mxu1  ;;  %2124 = vmatmul.mubr.f32.gmra.mxu0 %v8686_v14  ;;  %2525 = vmatmul.mubr.f32.gmra.mxu1 %v8686_v14  ;;  %v11380_v14 = vld [vmem:[%s16752_s0 + $0x278] sm:$0xff] }
 0x1f4   :  { %7616 = vmatprep.mubr.msk.f32.mxu0 %vm170_vm0, %v8687_v3  ;;  %7664 = vmatprep.mubr.msk.f32.mxu1 %vm170_vm0, %v8687_v3  ;;  %v1325_v13 = vpop.f32.mrf.mxu0  ;;  %17072 = vst [vmem:[#allocation7_spill] sm:$0xff] %v11380_v14  ;;  %v8689_v3 = vld [vmem:[%s16753_s1 + $0x128] sm:$0xff] }
 0x1f5   :  { %v1726_v48 = vpop.f32.mrf.mxu1  ;;  %2830 = vmatpush2.msra.mxu0 %v11019_v28  ;;  %3231 = vmatpush2.msra.mxu1 %v11380_v14 }
 0x1f6   :  { %2831 = vmatprep.subr.mxu0 %v17058_v21  ;;  %v11383_v42 = vpop.f32.mrf.mxu0  ;;  %v8688_v48 = vld [vmem:[%s16753_s1 + $0x110] sm:$0xff]  ;;  %3232 = vmatprep.subr.mxu1 %v17058_v21 }
 0x1f7   :  { %v11385_v53 = vpop.f32.mrf.mxu1  ;;  %2129 = vmatmul.mubr.f32.gmra.mxu0 %v8688_v48  ;;  %2530 = vmatmul.mubr.f32.gmra.mxu1 %v8688_v48  ;;  %v11405_v48 = vld [vmem:[%s16752_s0 + $0x270] sm:$0xff] }
 0x1f8   :  { %7617 = vmatprep.mubr.msk.f32.mxu0 %vm170_vm0, %v8689_v3  ;;  %7665 = vmatprep.mubr.msk.f32.mxu1 %vm170_vm0, %v8689_v3  ;;  %v1330_v13 = vpop.f32.mrf.mxu0  ;;  %17073 = vst [vmem:[#allocation8_spill] sm:$0xff] %v11405_v48 }
 0x1f9   :  { %v1731_v49 = vpop.f32.mrf.mxu1  ;;  %2832 = vmatpush2.msra.mxu0 %v11040_v54  ;;  %v8691_v13 = vld [vmem:[%s16753_s1 + $0x138] sm:$0xff]  ;;  %3233 = vmatpush2.msra.mxu1 %v11405_v48 }
 0x1fa   :  { %2833 = vmatprep.subr.mxu0 %v17058_v21  ;;  %v11408_v29 = vpop.f32.mrf.mxu0  ;;  %v8690_v49 = vld [vmem:[%s16753_s1 + $0x120] sm:$0xff]  ;;  %3234 = vmatprep.subr.mxu1 %v17058_v21 }
 0x1fb   :  { %v11410_v28 = vpop.f32.mrf.mxu1  ;;  %2134 = vmatmul.mubr.f32.gmra.mxu0 %v8690_v49  ;;  %2535 = vmatmul.mubr.f32.gmra.mxu1 %v8690_v49  ;;  %v11430_v49 = vld [vmem:[%s16752_s0 + $0x268] sm:$0xff] }
 0x1fc   :  { %7618 = vmatprep.mubr.msk.f32.mxu0 %vm170_vm0, %v8691_v13  ;;  %7666 = vmatprep.mubr.msk.f32.mxu1 %vm170_vm0, %v8691_v13  ;;  %v1335_v61 = vpop.f32.mrf.mxu0  ;;  %17074 = vst [vmem:[#allocation21_spill] sm:$0xff] %v11430_v49  ;;  %v8693_v13 = vld [vmem:[%s16753_s1 + $0x148] sm:$0xff] }
 0x1fd   :  { %v1736_v10 = vpop.f32.mrf.mxu1  ;;  %2834 = vmatpush2.msra.mxu0 %v11061_v4  ;;  %v8692_v61 = vld [vmem:[%s16753_s1 + $0x130] sm:$0xff]  ;;  %3235 = vmatpush2.msra.mxu1 %v11430_v49 }
 0x1fe   :  { %2835 = vmatprep.subr.mxu0 %v17058_v21  ;;  %v11433_v3 = vpop.f32.mrf.mxu0  ;;  %3236 = vmatprep.subr.mxu1 %v17058_v21  ;;  %v8708_v49 = vld [vmem:[%s16753_s1 + $0x1b0] sm:$0xff] }
 0x1ff   :  { %v11435_v54 = vpop.f32.mrf.mxu1  ;;  %2139 = vmatmul.mubr.f32.gmra.mxu0 %v8692_v61  ;;  %2540 = vmatmul.mubr.f32.gmra.mxu1 %v8692_v61  ;;  %v11455_v61 = vld [vmem:[%s16752_s0 + $0x260] sm:$0xff] }
 0x200   :  { %7619 = vmatprep.mubr.msk.f32.mxu0 %vm170_vm0, %v8693_v13  ;;  %7667 = vmatprep.mubr.msk.f32.mxu1 %vm170_vm0, %v8693_v13  ;;  %v1340_v8 = vpop.f32.mrf.mxu0  ;;  %17075 = vst [vmem:[#allocation34_spill] sm:$0xff] %v11455_v61  ;;  %v8695_v13 = vld [vmem:[%s16753_s1 + $0x158] sm:$0xff] }
 0x201   :  { %v1741_v32 = vpop.f32.mrf.mxu1  ;;  %2836 = vmatpush2.msra.mxu0 %v11082_v27  ;;  %v8694_v8 = vld [vmem:[%s16753_s1 + $0x140] sm:$0xff]  ;;  %3237 = vmatpush2.msra.mxu1 %v11455_v61 }
 0x202   :  { %2837 = vmatprep.subr.mxu0 %v17058_v21  ;;  %v11458_v4 = vpop.f32.mrf.mxu0  ;;  %3238 = vmatprep.subr.mxu1 %v17058_v21 }
 0x203   :  { %v11460_v10 = vpop.f32.mrf.mxu1  ;;  %2144 = vmatmul.mubr.f32.gmra.mxu0 %v8694_v8  ;;  %2545 = vmatmul.mubr.f32.gmra.mxu1 %v8694_v8  ;;  %v11480_v8 = vld [vmem:[%s16752_s0 + $0x258] sm:$0xff] }
 0x204   :  { %7620 = vmatprep.mubr.msk.f32.mxu0 %vm170_vm0, %v8695_v13  ;;  %7668 = vmatprep.mubr.msk.f32.mxu1 %vm170_vm0, %v8695_v13  ;;  %v1345_v12 = vpop.f32.mrf.mxu0  ;;  %17076 = vst [vmem:[#allocation22_spill] sm:$0xff] %v11480_v8  ;;  %v8697_v13 = vld [vmem:[%s16753_s1 + $0x168] sm:$0xff] }
 0x205   :  { %v1746_v6 = vpop.f32.mrf.mxu1  ;;  %2838 = vmatpush2.msra.mxu0 %v11103_v36  ;;  %v8696_v12 = vld [vmem:[%s16753_s1 + $0x150] sm:$0xff]  ;;  %3239 = vmatpush2.msra.mxu1 %v11480_v8  ;;  %v8706_v8 = vld [vmem:[%s16753_s1 + $0x1a0] sm:$0xff] }
 0x206   :  { %2839 = vmatprep.subr.mxu0 %v17058_v21  ;;  %v11483_v27 = vpop.f32.mrf.mxu0  ;;  %3240 = vmatprep.subr.mxu1 %v17058_v21 }
 0x207   :  { %17077 = vst [vmem:[#allocation35_spill] sm:$0xff] %v11483_v27  ;;  %v11485_v32 = vpop.f32.mrf.mxu1  ;;  %2149 = vmatmul.mubr.f32.gmra.mxu0 %v8696_v12  ;;  %2550 = vmatmul.mubr.f32.gmra.mxu1 %v8696_v12  ;;  %v11505_v12 = vld [vmem:[%s16752_s0 + $0x250] sm:$0xff]  ;;  %v8722_v27 = vld [vmem:[%s16753_s1 + $0x220] sm:$0xff] }
 0x208   :  { %17078 = vst [vmem:[#allocation23_spill] sm:$0xff] %v11485_v32  ;;  %7621 = vmatprep.mubr.msk.f32.mxu0 %vm170_vm0, %v8697_v13  ;;  %7669 = vmatprep.mubr.msk.f32.mxu1 %vm170_vm0, %v8697_v13  ;;  %v1350_v5 = vpop.f32.mrf.mxu0  ;;  %17079 = vst [vmem:[#allocation24_spill] sm:$0xff] %v11505_v12  ;;  %v8699_v13 = vld [vmem:[%s16753_s1 + $0x178] sm:$0xff]  ;;  %v8720_v32 = vld [vmem:[%s16753_s1 + $0x210] sm:$0xff] }
 0x209   :  { %v1751_v44 = vpop.f32.mrf.mxu1  ;;  %2840 = vmatpush2.msra.mxu0 %v11124_v16  ;;  %v8698_v5 = vld [vmem:[%s16753_s1 + $0x160] sm:$0xff]  ;;  %3241 = vmatpush2.msra.mxu1 %v11505_v12 }
 0x20a   :  { %2841 = vmatprep.subr.mxu0 %v17058_v21  ;;  %3242 = vmatprep.subr.mxu1 %v17058_v21 }
 0x20b   :  { %v11508_v36 = vpop.f32.mrf.mxu0  ;;  %v11510_v6 = vpop.f32.mrf.mxu1  ;;  %2154 = vmatmul.mubr.f32.gmra.mxu0 %v8698_v5  ;;  %2555 = vmatmul.mubr.f32.gmra.mxu1 %v8698_v5  ;;  %v11530_v5 = vld [vmem:[%s16752_s0 + $0x248] sm:$0xff] }
 0x20c   :  { %17080 = vst [vmem:[#allocation25_spill] sm:$0xff] %v11508_v36  ;;  %17081 = vst [vmem:[#allocation26_spill] sm:$0xff] %v11510_v6  ;;  %7622 = vmatprep.mubr.msk.f32.mxu0 %vm170_vm0, %v8699_v13  ;;  %7670 = vmatprep.mubr.msk.f32.mxu1 %vm170_vm0, %v8699_v13  ;;  %v8701_v13 = vld [vmem:[%s16753_s1 + $0x188] sm:$0xff]  ;;  %v8716_v6 = vld [vmem:[%s16753_s1 + $0x1f0] sm:$0xff] }
 0x20d   :  { %v1355_v57 = vpop.f32.mrf.mxu0  ;;  %v1756_v43 = vpop.f32.mrf.mxu1  ;;  %2842 = vmatpush2.msra.mxu0 %v11152_v45  ;;  %17082 = vst [vmem:[#allocation27_spill] sm:$0xff] %v11530_v5  ;;  %3243 = vmatpush2.msra.mxu1 %v11530_v5  ;;  %v8718_v36 = vld [vmem:[%s16753_s1 + $0x200] sm:$0xff] }
 0x20e   :  { %2843 = vmatprep.subr.mxu0 %v17058_v21  ;;  %v8700_v43 = vld [vmem:[%s16753_s1 + $0x170] sm:$0xff]  ;;  %3244 = vmatprep.subr.mxu1 %v17058_v21 }
 0x20f   :  { %v11533_v16 = vpop.f32.mrf.mxu0  ;;  %v11535_v44 = vpop.f32.mrf.mxu1  ;;  %2159 = vmatmul.mubr.f32.gmra.mxu0 %v8700_v43  ;;  %2560 = vmatmul.mubr.f32.gmra.mxu1 %v8700_v43  ;;  %v11555_v43 = vld [vmem:[%s16752_s0 + $0x240] sm:$0xff] }
 0x210   :  { %17083 = vst [vmem:[#allocation30_spill] sm:$0xff] %v11533_v16  ;;  %17084 = vst [vmem:[#allocation33_spill] sm:$0xff] %v11535_v44  ;;  %7623 = vmatprep.mubr.msk.f32.mxu0 %vm170_vm0, %v8701_v13  ;;  %7671 = vmatprep.mubr.msk.f32.mxu1 %vm170_vm0, %v8701_v13  ;;  %v8712_v44 = vld [vmem:[%s16753_s1 + $0x1d0] sm:$0xff]  ;;  %v8714_v16 = vld [vmem:[%s16753_s1 + $0x1e0] sm:$0xff] }
 0x211   :  { %v1360_v24 = vpop.f32.mrf.mxu0  ;;  %v1761_v40 = vpop.f32.mrf.mxu1  ;;  %2844 = vmatpush2.msra.mxu0 %v11183_v51  ;;  %17085 = vst [vmem:[#allocation36_spill] sm:$0xff] %v11555_v43  ;;  %3245 = vmatpush2.msra.mxu1 %v11555_v43 }
 0x212   :  { %3583 = vmatprep.subr.mxu0 %v17058_v21  ;;  %v8702_v24 = vld [vmem:[%s16753_s1 + $0x180] sm:$0xff]  ;;  %v8703_v40 = vld [vmem:[%s16753_s1 + $0x198] sm:$0xff]  ;;  %3984 = vmatprep.subr.mxu1 %v17058_v21 }
 0x213   :  { %v11558_v45 = vpop.f32.mrf.mxu0  ;;  %v11560_v57 = vpop.f32.mrf.mxu1  ;;  %2164 = vmatmul.mubr.f32.gmra.mxu0 %v8702_v24  ;;  %2565 = vmatmul.mubr.f32.gmra.mxu1 %v8702_v24  ;;  %v8704_v24 = vld [vmem:[%s16753_s1 + $0x190] sm:$0xff]  ;;  %v8710_v21 = vld [vmem:[%s16753_s1 + $0x1c0] sm:$0xff] }
 0x214   :  { %7624 = vmatprep.mubr.msk.f32.mxu0 %vm170_vm0, %v8703_v40  ;;  %7672 = vmatprep.mubr.msk.f32.mxu1 %vm170_vm0, %v8703_v40  ;;  %v8705_v40 = vld [vmem:[%s16753_s1 + $0x1a8] sm:$0xff] }
 0x215   :  { %v1365_v51 = vpop.f32.mrf.mxu0  ;;  %v1766_v13 = vpop.f32.mrf.mxu1 }
 0x217   :  { %v11572_v52 = vpop.f32.mrf.mxu0  ;;  %v11574_v5 = vpop.f32.mrf.mxu1  ;;  %2169 = vmatmul.mubr.f32.gmra.mxu0 %v8704_v24  ;;  %2570 = vmatmul.mubr.f32.gmra.mxu1 %v8704_v24  ;;  %v8707_v24 = vld [vmem:[%s16753_s1 + $0x1b8] sm:$0xff] }
 0x218   :  { %7625 = vmatprep.mubr.msk.f32.mxu0 %vm170_vm0, %v8705_v40  ;;  %7673 = vmatprep.mubr.msk.f32.mxu1 %vm170_vm0, %v8705_v40 }
 0x219   :  { %v1370_v51 = vpop.f32.mrf.mxu0  ;;  %v1771_v13 = vpop.f32.mrf.mxu1 }
 0x21b   :  { %v11584_v43 = vpop.f32.mrf.mxu0  ;;  %v11586_v12 = vpop.f32.mrf.mxu1  ;;  %2174 = vmatmul.mubr.f32.gmra.mxu0 %v8706_v8  ;;  %2575 = vmatmul.mubr.f32.gmra.mxu1 %v8706_v8  ;;  %v8709_v8 = vld [vmem:[%s16753_s1 + $0x1c8] sm:$0xff] }
 0x21c   :  { %7626 = vmatprep.mubr.msk.f32.mxu0 %vm170_vm0, %v8707_v24  ;;  %7674 = vmatprep.mubr.msk.f32.mxu1 %vm170_vm0, %v8707_v24 }
 0x21d   :  { %v1375_v40 = vpop.f32.mrf.mxu0  ;;  %v1776_v51 = vpop.f32.mrf.mxu1 }
 0x21f   :  { %v11596_v13 = vpop.f32.mrf.mxu0  ;;  %v11598_v61 = vpop.f32.mrf.mxu1  ;;  %2179 = vmatmul.mubr.f32.gmra.mxu0 %v8708_v49  ;;  %2580 = vmatmul.mubr.f32.gmra.mxu1 %v8708_v49  ;;  %v8711_v49 = vld [vmem:[%s16753_s1 + $0x1d8] sm:$0xff] }
 0x220   :  { %7627 = vmatprep.mubr.msk.f32.mxu0 %vm170_vm0, %v8709_v8  ;;  %7675 = vmatprep.mubr.msk.f32.mxu1 %vm170_vm0, %v8709_v8 }
 0x221   :  { %v1380_v24 = vpop.f32.mrf.mxu0  ;;  %v1781_v40 = vpop.f32.mrf.mxu1 }
 0x223   :  { %v11608_v51 = vpop.f32.mrf.mxu0  ;;  %v11610_v48 = vpop.f32.mrf.mxu1  ;;  %2184 = vmatmul.mubr.f32.gmra.mxu0 %v8710_v21  ;;  %2585 = vmatmul.mubr.f32.gmra.mxu1 %v8710_v21  ;;  %v8713_v21 = vld [vmem:[%s16753_s1 + $0x1e8] sm:$0xff] }
 0x224   :  { %7628 = vmatprep.mubr.msk.f32.mxu0 %vm170_vm0, %v8711_v49  ;;  %7676 = vmatprep.mubr.msk.f32.mxu1 %vm170_vm0, %v8711_v49 }
 0x225   :  { %v1385_v8 = vpop.f32.mrf.mxu0  ;;  %v1786_v24 = vpop.f32.mrf.mxu1 }
 0x227   :  { %v11620_v40 = vpop.f32.mrf.mxu0  ;;  %v11622_v14 = vpop.f32.mrf.mxu1  ;;  %2189 = vmatmul.mubr.f32.gmra.mxu0 %v8712_v44  ;;  %2590 = vmatmul.mubr.f32.gmra.mxu1 %v8712_v44  ;;  %v8715_v44 = vld [vmem:[%s16753_s1 + $0x1f8] sm:$0xff] }
 0x228   :  { %7629 = vmatprep.mubr.msk.f32.mxu0 %vm170_vm0, %v8713_v21  ;;  %7677 = vmatprep.mubr.msk.f32.mxu1 %vm170_vm0, %v8713_v21 }
 0x229   :  { %v1390_v49 = vpop.f32.mrf.mxu0  ;;  %v1791_v8 = vpop.f32.mrf.mxu1 }
 0x22b   :  { %v11632_v24 = vpop.f32.mrf.mxu0  ;;  %v11634_v63 = vpop.f32.mrf.mxu1  ;;  %2194 = vmatmul.mubr.f32.gmra.mxu0 %v8714_v16  ;;  %2595 = vmatmul.mubr.f32.gmra.mxu1 %v8714_v16  ;;  %v8717_v16 = vld [vmem:[%s16753_s1 + $0x208] sm:$0xff] }
 0x22c   :  { %7630 = vmatprep.mubr.msk.f32.mxu0 %vm170_vm0, %v8715_v44  ;;  %7678 = vmatprep.mubr.msk.f32.mxu1 %vm170_vm0, %v8715_v44 }
 0x22d   :  { %v1395_v21 = vpop.f32.mrf.mxu0  ;;  %v1796_v49 = vpop.f32.mrf.mxu1 }
 0x22f   :  { %v11644_v8 = vpop.f32.mrf.mxu0  ;;  %v11646_v58 = vpop.f32.mrf.mxu1  ;;  %2199 = vmatmul.mubr.f32.gmra.mxu0 %v8716_v6  ;;  %2600 = vmatmul.mubr.f32.gmra.mxu1 %v8716_v6  ;;  %v8719_v6 = vld [vmem:[%s16753_s1 + $0x218] sm:$0xff] }
 0x230   :  { %7631 = vmatprep.mubr.msk.f32.mxu0 %vm170_vm0, %v8717_v16  ;;  %7679 = vmatprep.mubr.msk.f32.mxu1 %vm170_vm0, %v8717_v16 }
 0x231   :  { %v1400_v44 = vpop.f32.mrf.mxu0  ;;  %v1801_v21 = vpop.f32.mrf.mxu1 }
 0x233   :  { %v11656_v49 = vpop.f32.mrf.mxu0  ;;  %v11658_v22 = vpop.f32.mrf.mxu1  ;;  %2204 = vmatmul.mubr.f32.gmra.mxu0 %v8718_v36  ;;  %2605 = vmatmul.mubr.f32.gmra.mxu1 %v8718_v36  ;;  %v8721_v36 = vld [vmem:[%s16753_s1 + $0x228] sm:$0xff] }
 0x234   :  { %7632 = vmatprep.mubr.msk.f32.mxu0 %vm170_vm0, %v8719_v6  ;;  %7680 = vmatprep.mubr.msk.f32.mxu1 %vm170_vm0, %v8719_v6 }
 0x235   :  { %v1405_v16 = vpop.f32.mrf.mxu0  ;;  %v1806_v44 = vpop.f32.mrf.mxu1 }
 0x237   :  { %v11668_v21 = vpop.f32.mrf.mxu0  ;;  %v11670_v31 = vpop.f32.mrf.mxu1  ;;  %2209 = vmatmul.mubr.f32.gmra.mxu0 %v8720_v32  ;;  %2610 = vmatmul.mubr.f32.gmra.mxu1 %v8720_v32  ;;  %v8723_v32 = vld [vmem:[%s16753_s1 + $0x238] sm:$0xff] }
 0x238   :  { %17086 = vst [vmem:[#allocation47_spill] sm:$0xff] %v11668_v21  ;;  %17087 = vst [vmem:[#allocation48_spill] sm:$0xff] %v11670_v31  ;;  %7633 = vmatprep.mubr.msk.f32.mxu0 %vm170_vm0, %v8721_v36  ;;  %7681 = vmatprep.mubr.msk.f32.mxu1 %vm170_vm0, %v8721_v36  ;;  %v8727_v31 = vld [vmem:[%s16753_s1 + $0x258] sm:$0xff] }
 0x239   :  { %v1410_v6 = vpop.f32.mrf.mxu0  ;;  %v1811_v16 = vpop.f32.mrf.mxu1 }
 0x23b   :  { %v11680_v44 = vpop.f32.mrf.mxu0  ;;  %v11682_v34 = vpop.f32.mrf.mxu1  ;;  %2214 = vmatmul.mubr.f32.gmra.mxu0 %v8722_v27  ;;  %2615 = vmatmul.mubr.f32.gmra.mxu1 %v8722_v27  ;;  %v8725_v27 = vld [vmem:[%s16753_s1 + $0x248] sm:$0xff] }
 0x23c   :  { %17088 = vst [vmem:[#allocation49_spill] sm:$0xff] %v11680_v44  ;;  %17089 = vst [vmem:[#allocation50_spill] sm:$0xff] %v11682_v34  ;;  %7634 = vmatprep.mubr.msk.f32.mxu0 %vm170_vm0, %v8723_v32  ;;  %7682 = vmatprep.mubr.msk.f32.mxu1 %vm170_vm0, %v8723_v32  ;;  %v8724_v34 = vld [vmem:[%s16753_s1 + $0x230] sm:$0xff] }
 0x23d   :  { %v1415_v36 = vpop.f32.mrf.mxu0  ;;  %v1816_v6 = vpop.f32.mrf.mxu1 }
 0x23f   :  { %v11692_v16 = vpop.f32.mrf.mxu0  ;;  %v11694_v44 = vpop.f32.mrf.mxu1  ;;  %2219 = vmatmul.mubr.f32.gmra.mxu0 %v8724_v34  ;;  %2620 = vmatmul.mubr.f32.gmra.mxu1 %v8724_v34 }
 0x240   :  { %17090 = vst [vmem:[#allocation51_spill] sm:$0xff] %v11692_v16  ;;  %17091 = vst [vmem:[#allocation52_spill] sm:$0xff] %v11694_v44  ;;  %7635 = vmatprep.mubr.msk.f32.mxu0 %vm170_vm0, %v8725_v27  ;;  %7683 = vmatprep.mubr.msk.f32.mxu1 %vm170_vm0, %v8725_v27  ;;  %v8726_v44 = vld [vmem:[%s16753_s1 + $0x240] sm:$0xff] }
 0x241   :  { %v1420_v32 = vpop.f32.mrf.mxu0  ;;  %v1821_v36 = vpop.f32.mrf.mxu1 }
 0x242   :  { %v17092_v36 = vmax.f32 %v11021_v18, %v11266_v59  ;;  %v8729_v59 = vld [vmem:[%s16753_s1 + $0x268] sm:$0xff] }
 0x243   :  { %v1423_v6 = vpop.f32.mrf.mxu0  ;;  %v1824_v16 = vpop.f32.mrf.mxu1  ;;  %2224 = vmatmul.mubr.f32.gmra.mxu0 %v8726_v44  ;;  %2625 = vmatmul.mubr.f32.gmra.mxu1 %v8726_v44 }
 0x244   :  { %v1494_v34 = vmax.f32 %v11558_v45, %v1423_v6  ;;  %v1895_v47 = vmax.f32 %v11560_v57, %v1824_v16  ;;  %7636 = vmatprep.mubr.msk.f32.mxu0 %vm170_vm0, %v8727_v31  ;;  %7684 = vmatprep.mubr.msk.f32.mxu1 %vm170_vm0, %v8727_v31  ;;  %v17094_v45 = vmax.f32 %v11023_v37, %v11268_v17  ;;  %v8728_v6 = vld [vmem:[%s16753_s1 + $0x250] sm:$0xff] }
 0x245   :  { %v1425_v27 = vpop.f32.mrf.mxu0  ;;  %v1826_v32 = vpop.f32.mrf.mxu1  ;;  %v17096_v37 = vmax.f32 %v11042_v0, %v11290_v2  ;;  %v8731_v0 = vld [vmem:[%s16753_s1 + $0x278] sm:$0xff]  ;;  %v17100_v2 = vmax.f32 %v11063_v60, %v11314_v23  ;;  %v8733_v60 = vld [vmem:[%s16753_s1 + $0x288] sm:$0xff]  ;;  %v17104_v23 = vmax.f32 %v11084_v9, %v11338_v39  ;;  %v17108_v39 = vmax.f32 %v11105_v26, %v11359_v33 }
 0x246   :  { %v11717_v21 = vmax.f32 %v17092_v36, %v1494_v34  ;;  %v11722_v44 = vmax.f32 %v17094_v45, %v1895_v47  ;;  %v8730_v36 = vld [vmem:[%s16753_s1 + $0x260] sm:$0xff]  ;;  %v8735_v9 = vld [vmem:[%s16753_s1 + $0x298] sm:$0xff]  ;;  %v8737_v26 = vld [vmem:[%s16753_s1 + $0x2a8] sm:$0xff]  ;;  %v17112_v33 = vmax.f32 %v11126_v1, %v11383_v42  ;;  %v17116_v42 = vmax.f32 %v11142_v55, %v11408_v29 }
 0x247   :  { %v1428_v57 = vpop.f32.mrf.mxu0  ;;  %v1829_v16 = vpop.f32.mrf.mxu1  ;;  %2229 = vmatmul.mubr.f32.gmra.mxu0 %v8728_v6  ;;  %2630 = vmatmul.mubr.f32.gmra.mxu1 %v8728_v6  ;;  %v8739_v1 = vld [vmem:[%s16753_s1 + $0x2b8] sm:$0xff]  ;;  %v8741_v55 = vld [vmem:[%s16753_s1 + $0x2c8] sm:$0xff]  ;;  %v17120_v29 = vmax.f32 %v11163_v25, %v11433_v3  ;;  %v17124_v3 = vmax.f32 %v11185_v19, %v11458_v4  ;;  %v17130_v4 = vld [vmem:[#allocation5_spill] sm:$0xff] }
 0x248   :  { %17093 = vst [vmem:[#allocation53_spill] sm:$0xff] %v11717_v21  ;;  %17095 = vst [vmem:[#allocation54_spill] sm:$0xff] %v11722_v44  ;;  %v1495_v31 = vmax.f32 %v11572_v52, %v1428_v57  ;;  %v1896_v27 = vmax.f32 %v11574_v5, %v1829_v16  ;;  %7637 = vmatprep.mubr.msk.f32.mxu0 %vm170_vm0, %v8729_v59  ;;  %7685 = vmatprep.mubr.msk.f32.mxu1 %vm170_vm0, %v8729_v59  ;;  %v8743_v25 = vld [vmem:[%s16753_s1 + $0x2d8] sm:$0xff]  ;;  %v8745_v19 = vld [vmem:[%s16753_s1 + $0x2e8] sm:$0xff] }
 0x249   :  { %v1430_v17 = vpop.f32.mrf.mxu0  ;;  %v1831_v18 = vpop.f32.mrf.mxu1  ;;  %v17098_v52 = vmax.f32 %v11044_v41, %v11292_v20 }
 0x24a   :  { %v11737_v47 = vmax.f32 %v17096_v37, %v1495_v31 }
 0x24b   :  { %v11742_v34 = vmax.f32 %v17098_v52, %v1896_v27  ;;  %v1433_v5 = vpop.f32.mrf.mxu0  ;;  %v1834_v32 = vpop.f32.mrf.mxu1  ;;  %2234 = vmatmul.mubr.f32.gmra.mxu0 %v8730_v36  ;;  %2635 = vmatmul.mubr.f32.gmra.mxu1 %v8730_v36  ;;  %v8732_v27 = vld [vmem:[%s16753_s1 + $0x270] sm:$0xff] }
 0x24c   :  { %17097 = vst [vmem:[#allocation55_spill] sm:$0xff] %v11737_v47  ;;  %v1496_v45 = vmax.f32 %v11584_v43, %v1433_v5  ;;  %v1897_v57 = vmax.f32 %v11586_v12, %v1834_v32  ;;  %7638 = vmatprep.mubr.msk.f32.mxu0 %vm170_vm0, %v8731_v0  ;;  %7686 = vmatprep.mubr.msk.f32.mxu1 %vm170_vm0, %v8731_v0  ;;  %v8734_v5 = vld [vmem:[%s16753_s1 + $0x280] sm:$0xff] }
 0x24d   :  { %17099 = vst [vmem:[#allocation56_spill] sm:$0xff] %v11742_v34  ;;  %v1435_v20 = vpop.f32.mrf.mxu0  ;;  %v1836_v41 = vpop.f32.mrf.mxu1  ;;  %v17102_v43 = vmax.f32 %v11065_v62, %v11316_v11 }
 0x24e   :  { %v11757_v16 = vmax.f32 %v17100_v2, %v1496_v45  ;;  %v8736_v20 = vld [vmem:[%s16753_s1 + $0x290] sm:$0xff] }
 0x24f   :  { %v11762_v6 = vmax.f32 %v17102_v43, %v1897_v57  ;;  %v1438_v12 = vpop.f32.mrf.mxu0  ;;  %v1839_v31 = vpop.f32.mrf.mxu1  ;;  %2239 = vmatmul.mubr.f32.gmra.mxu0 %v8732_v27  ;;  %2640 = vmatmul.mubr.f32.gmra.mxu1 %v8732_v27  ;;  %v8738_v27 = vld [vmem:[%s16753_s1 + $0x2a0] sm:$0xff] }
 0x250   :  { %17101 = vst [vmem:[#allocation57_spill] sm:$0xff] %v11757_v16  ;;  %v1497_v59 = vmax.f32 %v11596_v13, %v1438_v12  ;;  %v1898_v17 = vmax.f32 %v11598_v61, %v1839_v31  ;;  %7639 = vmatprep.mubr.msk.f32.mxu0 %vm170_vm0, %v8733_v60  ;;  %7687 = vmatprep.mubr.msk.f32.mxu1 %vm170_vm0, %v8733_v60 }
 0x251   :  { %17103 = vst [vmem:[#allocation58_spill] sm:$0xff] %v11762_v6  ;;  %v1440_v11 = vpop.f32.mrf.mxu0  ;;  %v1841_v62 = vpop.f32.mrf.mxu1  ;;  %v17106_v13 = vmax.f32 %v11086_v35, %v11340_v50 }
 0x252   :  { %v11777_v18 = vmax.f32 %v17104_v23, %v1497_v59  ;;  %v8740_v23 = vld [vmem:[%s16753_s1 + $0x2b0] sm:$0xff] }
 0x253   :  { %v11782_v37 = vmax.f32 %v17106_v13, %v1898_v17  ;;  %v1443_v61 = vpop.f32.mrf.mxu0  ;;  %v1844_v52 = vpop.f32.mrf.mxu1  ;;  %2244 = vmatmul.mubr.f32.gmra.mxu0 %v8734_v5  ;;  %2645 = vmatmul.mubr.f32.gmra.mxu1 %v8734_v5 }
 0x254   :  { %17105 = vst [vmem:[#allocation59_spill] sm:$0xff] %v11777_v18  ;;  %v1498_v32 = vmax.f32 %v11608_v51, %v1443_v61  ;;  %v1899_v36 = vmax.f32 %v11610_v48, %v1844_v52  ;;  %7640 = vmatprep.mubr.msk.f32.mxu0 %vm170_vm0, %v8735_v9  ;;  %7688 = vmatprep.mubr.msk.f32.mxu1 %vm170_vm0, %v8735_v9 }
 0x255   :  { %17107 = vst [vmem:[#allocation60_spill] sm:$0xff] %v11782_v37  ;;  %v1445_v50 = vpop.f32.mrf.mxu0  ;;  %v1846_v35 = vpop.f32.mrf.mxu1  ;;  %v17110_v51 = vmax.f32 %v11107_v46, %v11361_v38 }
 0x256   :  { %v11797_v45 = vmax.f32 %v17108_v39, %v1498_v32 }
 0x257   :  { %v11802_v57 = vmax.f32 %v17110_v51, %v1899_v36  ;;  %v1448_v48 = vpop.f32.mrf.mxu0  ;;  %v1849_v0 = vpop.f32.mrf.mxu1  ;;  %2249 = vmatmul.mubr.f32.gmra.mxu0 %v8736_v20  ;;  %2650 = vmatmul.mubr.f32.gmra.mxu1 %v8736_v20  ;;  %v8742_v36 = vld [vmem:[%s16753_s1 + $0x2c0] sm:$0xff] }
 0x258   :  { %17109 = vst [vmem:[#allocation61_spill] sm:$0xff] %v11797_v45  ;;  %v1499_v41 = vmax.f32 %v11620_v40, %v1448_v48  ;;  %v1900_v2 = vmax.f32 %v11622_v14, %v1849_v0  ;;  %7641 = vmatprep.mubr.msk.f32.mxu0 %vm170_vm0, %v8737_v26  ;;  %7689 = vmatprep.mubr.msk.f32.mxu1 %vm170_vm0, %v8737_v26  ;;  %v8744_v48 = vld [vmem:[%s16753_s1 + $0x2d0] sm:$0xff]  ;;  %v17128_v0 = vld [vmem:[#allocation47_spill] sm:$0xff] }
 0x259   :  { %17111 = vst [vmem:[#allocation62_spill] sm:$0xff] %v11802_v57  ;;  %v1450_v46 = vpop.f32.mrf.mxu0  ;;  %v1851_v38 = vpop.f32.mrf.mxu1  ;;  %v17114_v40 = vmax.f32 %v11128_v56, %v11385_v53  ;;  %v17131_v26 = vld [vmem:[#allocation35_spill] sm:$0xff] }
 0x25a   :  { %v11817_v43 = vmax.f32 %v17112_v33, %v1499_v41  ;;  %v17129_v41 = vld [vmem:[#allocation48_spill] sm:$0xff]  ;;  %v17132_v46 = vmax.f32 %v17130_v4, %v17131_v26  ;;  %v17134_v33 = vld [vmem:[#allocation6_spill] sm:$0xff]  ;;  %v8750_v26 = vld [vmem:[%s16753_s1] sm:$0xff] }
 0x25b   :  { %v11822_v12 = vmax.f32 %v17114_v40, %v1900_v2  ;;  %v1453_v14 = vpop.f32.mrf.mxu0  ;;  %v1854_v31 = vpop.f32.mrf.mxu1  ;;  %2254 = vmatmul.mubr.f32.gmra.mxu0 %v8738_v27  ;;  %2655 = vmatmul.mubr.f32.gmra.mxu1 %v8738_v27  ;;  %v17135_v40 = vld [vmem:[#allocation23_spill] sm:$0xff] }
 0x25c   :  { %17113 = vst [vmem:[#allocation63_spill] sm:$0xff] %v11817_v43  ;;  %v1500_v59 = vmax.f32 %v11632_v24, %v1453_v14  ;;  %v1901_v17 = vmax.f32 %v11634_v63, %v1854_v31  ;;  %7642 = vmatprep.mubr.msk.f32.mxu0 %vm170_vm0, %v8739_v1  ;;  %7690 = vmatprep.mubr.msk.f32.mxu1 %vm170_vm0, %v8739_v1  ;;  %v17138_v1 = vld [vmem:[#allocation49_spill] sm:$0xff] }
 0x25d   :  { %17115 = vst [vmem:[#allocation64_spill] sm:$0xff] %v11822_v12  ;;  %v1455_v56 = vpop.f32.mrf.mxu0  ;;  %v1856_v53 = vpop.f32.mrf.mxu1  ;;  %v17118_v24 = vmax.f32 %v11144_v30, %v11410_v28  ;;  %v17136_v14 = vmax.f32 %v17134_v33, %v17135_v40 }
 0x25e   :  { %v11837_v60 = vmax.f32 %v17116_v42, %v1500_v59  ;;  %v17139_v53 = vld [vmem:[#allocation50_spill] sm:$0xff] }
 0x25f   :  { %v11842_v11 = vmax.f32 %v17118_v24, %v1901_v17  ;;  %v1458_v63 = vpop.f32.mrf.mxu0  ;;  %v1859_v62 = vpop.f32.mrf.mxu1  ;;  %2259 = vmatmul.mubr.f32.gmra.mxu0 %v8740_v23  ;;  %2660 = vmatmul.mubr.f32.gmra.mxu1 %v8740_v23  ;;  %v8746_v17 = vld [vmem:[%s16753_s1 + $0x2e0] sm:$0xff]  ;;  %v8747_v24 = vld [vmem:[%s16753_s1 + $0x2f8] sm:$0xff] }
 0x260   :  { %17117 = vst [vmem:[#allocation65_spill] sm:$0xff] %v11837_v60  ;;  %v1501_v13 = vmax.f32 %v11644_v8, %v1458_v63  ;;  %v1902_v61 = vmax.f32 %v11646_v58, %v1859_v62  ;;  %7643 = vmatprep.mubr.msk.f32.mxu0 %vm170_vm0, %v8741_v55  ;;  %7691 = vmatprep.mubr.msk.f32.mxu1 %vm170_vm0, %v8741_v55  ;;  %v17140_v23 = vld [vmem:[#allocation19_spill] sm:$0xff] }
 0x261   :  { %17119 = vst [vmem:[#allocation66_spill] sm:$0xff] %v11842_v11  ;;  %v1460_v30 = vpop.f32.mrf.mxu0  ;;  %v1861_v28 = vpop.f32.mrf.mxu1  ;;  %v17122_v8 = vmax.f32 %v11165_v15, %v11435_v54 }
 0x262   :  { %v11857_v52 = vmax.f32 %v17120_v29, %v1501_v13  ;;  %v17141_v13 = vld [vmem:[#allocation25_spill] sm:$0xff]  ;;  %v17144_v30 = vld [vmem:[#allocation31_spill] sm:$0xff]  ;;  %v17145_v28 = vld [vmem:[#allocation26_spill] sm:$0xff] }
 0x263   :  { %v11862_v5 = vmax.f32 %v17122_v8, %v1902_v61  ;;  %v1463_v58 = vpop.f32.mrf.mxu0  ;;  %v1864_v32 = vpop.f32.mrf.mxu1  ;;  %2264 = vmatmul.mubr.f32.gmra.mxu0 %v8742_v36  ;;  %2665 = vmatmul.mubr.f32.gmra.mxu1 %v8742_v36  ;;  %v17142_v61 = vmax.f32 %v17140_v23, %v17141_v13  ;;  %v17146_v29 = vmax.f32 %v17144_v30, %v17145_v28  ;;  %v8748_v36 = vld [vmem:[%s16753_s1 + $0x2f0] sm:$0xff]  ;;  %v8755_v30 = vld [vmem:[%s16753_s1 + $0x38] sm:$0xff] }
 0x264   :  { %17121 = vst [vmem:[#allocation67_spill] sm:$0xff] %v11857_v52  ;;  %v1502_v9 = vmax.f32 %v11656_v49, %v1463_v58  ;;  %v1903_v50 = vmax.f32 %v11658_v22, %v1864_v32  ;;  %7644 = vmatprep.mubr.msk.f32.mxu0 %vm170_vm0, %v8743_v25  ;;  %7692 = vmatprep.mubr.msk.f32.mxu1 %vm170_vm0, %v8743_v25  ;;  %v17149_v25 = vld [vmem:[#allocation52_spill] sm:$0xff] }
 0x265   :  { %17123 = vst [vmem:[#allocation68_spill] sm:$0xff] %v11862_v5  ;;  %v1465_v15 = vpop.f32.mrf.mxu0  ;;  %v1866_v54 = vpop.f32.mrf.mxu1  ;;  %v17126_v49 = vmax.f32 %v11187_v7, %v11460_v10 }
 0x266   :  { %v11877_v35 = vmax.f32 %v17124_v3, %v1502_v9  ;;  %v17148_v9 = vld [vmem:[#allocation51_spill] sm:$0xff]  ;;  %v8749_v54 = vld [vmem:[%s16753_s1 + $0x8] sm:$0xff] }
 0x267   :  { %v11882_v39 = vmax.f32 %v17126_v49, %v1903_v50  ;;  %v1468_v22 = vpop.f32.mrf.mxu0  ;;  %v1869_v51 = vpop.f32.mrf.mxu1  ;;  %2269 = vmatmul.mubr.f32.gmra.mxu0 %v8744_v48  ;;  %2670 = vmatmul.mubr.f32.gmra.mxu1 %v8744_v48 }
 0x268   :  { %17125 = vst [vmem:[#allocation69_spill] sm:$0xff] %v11877_v35  ;;  %v1503_v20 = vmax.f32 %v17128_v0, %v1468_v22  ;;  %v1904_v2 = vmax.f32 %v17129_v41, %v1869_v51  ;;  %7645 = vmatprep.mubr.msk.f32.mxu0 %vm170_vm0, %v8745_v19  ;;  %7693 = vmatprep.mubr.msk.f32.mxu1 %vm170_vm0, %v8745_v19  ;;  %v17150_v22 = vld [vmem:[#allocation20_spill] sm:$0xff]  ;;  %v17151_v51 = vld [vmem:[#allocation30_spill] sm:$0xff]  ;;  %v17155_v41 = vld [vmem:[#allocation33_spill] sm:$0xff] }
 0x269   :  { %17127 = vst [vmem:[#allocation70_spill] sm:$0xff] %v11882_v39  ;;  %v1470_v7 = vpop.f32.mrf.mxu0  ;;  %v1871_v10 = vpop.f32.mrf.mxu1  ;;  %v17152_v48 = vmax.f32 %v17150_v22, %v17151_v51 }
 0x26a   :  { %v11897_v38 = vmax.f32 %v17132_v46, %v1503_v20  ;;  %v11902_v31 = vmax.f32 %v17136_v14, %v1904_v2  ;;  %v17154_v20 = vld [vmem:[#allocation32_spill] sm:$0xff]  ;;  %v11947_v7 = vld [vmem:[%s16752_s0 + $0x2b8] sm:$0xff]  ;;  %v17158_v14 = vld [vmem:[#allocation7_spill] sm:$0xff] }
 0x26b   :  { %v1473_v27 = vpop.f32.mrf.mxu0  ;;  %v1874_v59 = vpop.f32.mrf.mxu1  ;;  %2274 = vmatmul.mubr.f32.gmra.mxu0 %v8746_v17  ;;  %2675 = vmatmul.mubr.f32.gmra.mxu1 %v8746_v17  ;;  %v17156_v2 = vmax.f32 %v17154_v20, %v17155_v41  ;;  %v8751_v46 = vld [vmem:[%s16753_s1 + $0x18] sm:$0xff] }
 0x26c   :  { %17133 = vst [vmem:[#allocation47_spill] sm:$0xff] %v11897_v38  ;;  %17137 = vst [vmem:[#allocation48_spill] sm:$0xff] %v11902_v31  ;;  %v1504_v56 = vmax.f32 %v17138_v1, %v1473_v27  ;;  %v1905_v42 = vmax.f32 %v17139_v53, %v1874_v59  ;;  %7646 = vmatprep.mubr.msk.f32.mxu0 %vm170_vm0, %v8747_v24  ;;  %7694 = vmatprep.mubr.msk.f32.mxu1 %vm170_vm0, %v8747_v24  ;;  %v17159_v27 = vmov 0.0   ;;  %v11968_v59 = vld [vmem:[%s16752_s0 + $0x2b0] sm:$0xff]  ;;  %v8753_v53 = vld [vmem:[%s16753_s1 + $0x28] sm:$0xff] }
 0x26d   :  { %v1475_v63 = vpop.f32.mrf.mxu0  ;;  %v1876_v62 = vpop.f32.mrf.mxu1  ;;  %v8759_v20 = vld [vmem:[%s16753_s1 + $0x58] sm:$0xff] }
 0x26e   :  { %v11917_v55 = vmax.f32 %v17142_v61, %v1504_v56  ;;  %v11922_v8 = vmax.f32 %v17146_v29, %v1905_v42  ;;  %v8752_v56 = vld [vmem:[%s16753_s1 + $0x10] sm:$0xff]  ;;  %v17160_v63 = vld [vmem:[#allocation8_spill] sm:$0xff]  ;;  %v8754_v61 = vld [vmem:[%s16753_s1 + $0x20] sm:$0xff] }
 0x26f   :  { %v1478_v58 = vpop.f32.mrf.mxu0  ;;  %v1879_v32 = vpop.f32.mrf.mxu1  ;;  %2279 = vmatmul.mubr.f32.gmra.mxu0 %v8748_v36  ;;  %2680 = vmatmul.mubr.f32.gmra.mxu1 %v8748_v36  ;;  %v11989_v62 = vld [vmem:[%s16752_s0 + $0x2a8] sm:$0xff] }
 0x270   :  { %17143 = vst [vmem:[#allocation5_spill] sm:$0xff] %v11917_v55  ;;  %17147 = vst [vmem:[#allocation35_spill] sm:$0xff] %v11922_v8  ;;  %v1505_v50 = vmax.f32 %v17148_v9, %v1478_v58  ;;  %v1906_v15 = vmax.f32 %v17149_v25, %v1879_v32  ;;  %7695 = vmatprep.mubr.msk.f32.mxu0 %vm170_vm0, %v8749_v54  ;;  %7743 = vmatprep.mubr.msk.f32.mxu1 %vm170_vm0, %v8749_v54  ;;  %v17161_v58 = vld [vmem:[#allocation21_spill] sm:$0xff]  ;;  %v12010_v32 = vld [vmem:[%s16752_s0 + $0x2a0] sm:$0xff] }
 0x271   :  { %v1480_v3 = vpop.f32.mrf.mxu0  ;;  %v1881_v49 = vpop.f32.mrf.mxu1  ;;  %v8757_v25 = vld [vmem:[%s16753_s1 + $0x48] sm:$0xff] }
 0x272   :  { %v11937_v0 = vmax.f32 %v17152_v48, %v1505_v50  ;;  %v11942_v19 = vmax.f32 %v17156_v2, %v1906_v15  ;;  %v8756_v50 = vld [vmem:[%s16753_s1 + $0x30] sm:$0xff]  ;;  %v17162_v3 = vld [vmem:[#allocation34_spill] sm:$0xff]  ;;  %v8758_v48 = vld [vmem:[%s16753_s1 + $0x40] sm:$0xff] }
 0x273   :  { %v11949_v10 = vpop.f32.mrf.mxu0  ;;  %v11951_v4 = vpop.f32.mrf.mxu1  ;;  %2846 = vmatmul.mubr.f32.vlgmr.msra.gmra.mxu0 %v8750_v26  ;;  %3247 = vmatmul.mubr.f32.vlgmr.msra.gmra.mxu1 %v8750_v26  ;;  %v12031_v49 = vld [vmem:[%s16752_s0 + $0x298] sm:$0xff] }
 0x274   :  { %17153 = vst [vmem:[#allocation6_spill] sm:$0xff] %v11937_v0  ;;  %17157 = vst [vmem:[#allocation23_spill] sm:$0xff] %v11942_v19  ;;  %7696 = vmatprep.mubr.msk.f32.mxu0 %vm170_vm0, %v8751_v46  ;;  %7744 = vmatprep.mubr.msk.f32.mxu1 %vm170_vm0, %v8751_v46  ;;  %v17163_v26 = vld [vmem:[#allocation22_spill] sm:$0xff]  ;;  %v12052_v46 = vld [vmem:[%s16752_s0 + $0x290] sm:$0xff] }
 0x275   :  { %v2047_v33 = vpop.f32.mrf.mxu0  ;;  %v2448_v40 = vpop.f32.mrf.mxu1  ;;  %3584 = vmatpush1.msra.mxu0 %v17158_v14  ;;  %3985 = vmatpush1.msra.mxu1 %v11947_v7  ;;  %v8760_v14 = vld [vmem:[%s16753_s1 + $0x50] sm:$0xff] }
 0x276   :  { %3585 = vmatprep.subr.mxu0 %v17159_v27  ;;  %3986 = vmatprep.subr.mxu1 %v17159_v27 }
 0x277   :  { %v11970_v17 = vpop.f32.mrf.mxu0  ;;  %v11972_v1 = vpop.f32.mrf.mxu1  ;;  %2851 = vmatmul.mubr.f32.gmra.mxu0 %v8752_v56  ;;  %3252 = vmatmul.mubr.f32.gmra.mxu1 %v8752_v56  ;;  %v8761_v56 = vld [vmem:[%s16753_s1 + $0x68] sm:$0xff] }
 0x278   :  { %7697 = vmatprep.mubr.msk.f32.mxu0 %vm170_vm0, %v8753_v53  ;;  %7745 = vmatprep.mubr.msk.f32.mxu1 %vm170_vm0, %v8753_v53 }
 0x279   :  { %v2052_v42 = vpop.f32.mrf.mxu0  ;;  %v2453_v24 = vpop.f32.mrf.mxu1  ;;  %3586 = vmatpush1.msra.mxu0 %v17160_v63  ;;  %3987 = vmatpush1.msra.mxu1 %v11968_v59 }
 0x27a   :  { %3587 = vmatprep.subr.mxu0 %v17159_v27  ;;  %3988 = vmatprep.subr.mxu1 %v17159_v27  ;;  %v17164_v24 = vld [vmem:[#allocation24_spill] sm:$0xff] }
 0x27b   :  { %v11991_v23 = vpop.f32.mrf.mxu0  ;;  %v11993_v13 = vpop.f32.mrf.mxu1  ;;  %2856 = vmatmul.mubr.f32.gmra.mxu0 %v8754_v61  ;;  %3257 = vmatmul.mubr.f32.gmra.mxu1 %v8754_v61 }
 0x27c   :  { %7698 = vmatprep.mubr.msk.f32.mxu0 %vm170_vm0, %v8755_v30  ;;  %7746 = vmatprep.mubr.msk.f32.mxu1 %vm170_vm0, %v8755_v30  ;;  %v8762_v30 = vld [vmem:[%s16753_s1 + $0x60] sm:$0xff] }
 0x27d   :  { %v2057_v28 = vpop.f32.mrf.mxu0  ;;  %v2458_v29 = vpop.f32.mrf.mxu1  ;;  %3588 = vmatpush1.msra.mxu0 %v17161_v58  ;;  %3989 = vmatpush1.msra.mxu1 %v11989_v62 }
 0x27e   :  { %3589 = vmatprep.subr.mxu0 %v17159_v27  ;;  %3990 = vmatprep.subr.mxu1 %v17159_v27  ;;  %v12080_v28 = vld [vmem:[%s16752_s0 + $0x288] sm:$0xff]  ;;  %v8763_v29 = vld [vmem:[%s16753_s1 + $0x78] sm:$0xff] }
 0x27f   :  { %v12012_v36 = vpop.f32.mrf.mxu0  ;;  %v12014_v9 = vpop.f32.mrf.mxu1  ;;  %2861 = vmatmul.mubr.f32.gmra.mxu0 %v8756_v50  ;;  %3262 = vmatmul.mubr.f32.gmra.mxu1 %v8756_v50 }
 0x280   :  { %7699 = vmatprep.mubr.msk.f32.mxu0 %vm170_vm0, %v8757_v25  ;;  %7747 = vmatprep.mubr.msk.f32.mxu1 %vm170_vm0, %v8757_v25  ;;  %v17165_v25 = vld [vmem:[#allocation27_spill] sm:$0xff] }
 0x281   :  { %v2062_v15 = vpop.f32.mrf.mxu0  ;;  %v2463_v54 = vpop.f32.mrf.mxu1  ;;  %3590 = vmatpush1.msra.mxu0 %v17162_v3  ;;  %3991 = vmatpush1.msra.mxu1 %v12010_v32  ;;  %v8764_v3 = vld [vmem:[%s16753_s1 + $0x70] sm:$0xff] }
 0x282   :  { %3591 = vmatprep.subr.mxu0 %v17159_v27  ;;  %3992 = vmatprep.subr.mxu1 %v17159_v27 }
 0x283   :  { %v12033_v22 = vpop.f32.mrf.mxu0  ;;  %v12035_v51 = vpop.f32.mrf.mxu1  ;;  %2866 = vmatmul.mubr.f32.gmra.mxu0 %v8758_v48  ;;  %3267 = vmatmul.mubr.f32.gmra.mxu1 %v8758_v48  ;;  %v8765_v48 = vld [vmem:[%s16753_s1 + $0x88] sm:$0xff] }
 0x284   :  { %7700 = vmatprep.mubr.msk.f32.mxu0 %vm170_vm0, %v8759_v20  ;;  %7748 = vmatprep.mubr.msk.f32.mxu1 %vm170_vm0, %v8759_v20 }
 0x285   :  { %v2067_v41 = vpop.f32.mrf.mxu0  ;;  %v2468_v2 = vpop.f32.mrf.mxu1  ;;  %3592 = vmatpush1.msra.mxu0 %v17163_v26  ;;  %3993 = vmatpush1.msra.mxu1 %v12031_v49  ;;  %v3566_v26 = vld [vmem:[%s16752_s0 + $0x238] sm:$0xff] }
 0x286   :  { %3593 = vmatprep.subr.mxu0 %v17159_v27  ;;  %3994 = vmatprep.subr.mxu1 %v17159_v27  ;;  %v17166_v2 = vld [vmem:[#allocation36_spill] sm:$0xff] }
 0x287   :  { %v12054_v33 = vpop.f32.mrf.mxu0  ;;  %v12056_v40 = vpop.f32.mrf.mxu1  ;;  %2871 = vmatmul.mubr.f32.gmra.mxu0 %v8760_v14  ;;  %3272 = vmatmul.mubr.f32.gmra.mxu1 %v8760_v14  ;;  %v12111_v14 = vld [vmem:[%s16752_s0 + $0x280] sm:$0xff] }
 0x288   :  { %7701 = vmatprep.mubr.msk.f32.mxu0 %vm170_vm0, %v8761_v56  ;;  %7749 = vmatprep.mubr.msk.f32.mxu1 %vm170_vm0, %v8761_v56 }
 0x289   :  { %v2072_v53 = vpop.f32.mrf.mxu0  ;;  %v2473_v42 = vpop.f32.mrf.mxu1  ;;  %3594 = vmatpush1.msra.mxu0 %v17164_v24  ;;  %3995 = vmatpush1.msra.mxu1 %v12052_v46  ;;  %v8767_v24 = vld [vmem:[%s16753_s1 + $0x98] sm:$0xff] }
 0x28a   :  { %3595 = vmatprep.subr.mxu0 %v17159_v27  ;;  %3996 = vmatprep.subr.mxu1 %v17159_v27  ;;  %v8766_v42 = vld [vmem:[%s16753_s1 + $0x80] sm:$0xff] }
 0x28b   :  { %v12070_v63 = vpop.f32.mrf.mxu0  ;;  %v12072_v61 = vpop.f32.mrf.mxu1  ;;  %2876 = vmatmul.mubr.f32.gmra.mxu0 %v8762_v30  ;;  %3277 = vmatmul.mubr.f32.gmra.mxu1 %v8762_v30 }
 0x28c   :  { %7702 = vmatprep.mubr.msk.f32.mxu0 %vm170_vm0, %v8763_v29  ;;  %7750 = vmatprep.mubr.msk.f32.mxu1 %vm170_vm0, %v8763_v29 }
 0x28d   :  { %v2077_v58 = vpop.f32.mrf.mxu0  ;;  %v2478_v50 = vpop.f32.mrf.mxu1  ;;  %3596 = vmatpush1.msra.mxu0 %v17165_v25  ;;  %3997 = vmatpush1.msra.mxu1 %v12080_v28 }
 0x28e   :  { %3597 = vmatprep.subr.mxu0 %v17159_v27  ;;  %3998 = vmatprep.subr.mxu1 %v17159_v27  ;;  %v3565_v58 = vld [vmem:[%s16752_s0 + $0x230] sm:$0xff]  ;;  %v3967_v50 = vld [vmem:[%s16752_s0 + $0x278] sm:$0xff] }
 0x28f   :  { %v12091_v15 = vpop.f32.mrf.mxu0  ;;  %v12093_v54 = vpop.f32.mrf.mxu1  ;;  %2881 = vmatmul.mubr.f32.gmra.mxu0 %v8764_v3  ;;  %3282 = vmatmul.mubr.f32.gmra.mxu1 %v8764_v3 }
 0x290   :  { %7703 = vmatprep.mubr.msk.f32.mxu0 %vm170_vm0, %v8765_v48  ;;  %7751 = vmatprep.mubr.msk.f32.mxu1 %vm170_vm0, %v8765_v48  ;;  %v8768_v48 = vld [vmem:[%s16753_s1 + $0x90] sm:$0xff] }
 0x291   :  { %v2082_v20 = vpop.f32.mrf.mxu0  ;;  %v2483_v41 = vpop.f32.mrf.mxu1  ;;  %3598 = vmatpush1.msra.mxu0 %v17166_v2  ;;  %3999 = vmatpush1.msra.mxu1 %v12111_v14 }
 0x292   :  { %3599 = vmatprep.subr.mxu0 %v17159_v27  ;;  %4000 = vmatprep.subr.mxu1 %v17159_v27  ;;  %v8769_v20 = vld [vmem:[%s16753_s1 + $0xa8] sm:$0xff] }
 0x293   :  { %v12113_v56 = vpop.f32.mrf.mxu0  ;;  %v12115_v53 = vpop.f32.mrf.mxu1  ;;  %2886 = vmatmul.mubr.f32.gmra.mxu0 %v8766_v42  ;;  %3287 = vmatmul.mubr.f32.gmra.mxu1 %v8766_v42  ;;  %v3966_v42 = vld [vmem:[%s16752_s0 + $0x270] sm:$0xff] }
 0x294   :  { %7704 = vmatprep.mubr.msk.f32.mxu0 %vm170_vm0, %v8767_v24  ;;  %7752 = vmatprep.mubr.msk.f32.mxu1 %vm170_vm0, %v8767_v24 }
 0x295   :  { %v2087_v30 = vpop.f32.mrf.mxu0  ;;  %v2488_v29 = vpop.f32.mrf.mxu1  ;;  %3600 = vmatpush1.msra.mxu0 %v3566_v26  ;;  %4001 = vmatpush1.msra.mxu1 %v3967_v50  ;;  %v3564_v26 = vld [vmem:[%s16752_s0 + $0x228] sm:$0xff] }
 0x296   :  { %3601 = vmatprep.subr.mxu0 %v17159_v27  ;;  %4002 = vmatprep.subr.mxu1 %v17159_v27  ;;  %v8770_v29 = vld [vmem:[%s16753_s1 + $0xa0] sm:$0xff] }
 0x297   :  { %v12134_v25 = vpop.f32.mrf.mxu0  ;;  %v12136_v3 = vpop.f32.mrf.mxu1  ;;  %2891 = vmatmul.mubr.f32.gmra.mxu0 %v8768_v48  ;;  %3292 = vmatmul.mubr.f32.gmra.mxu1 %v8768_v48 }
 0x298   :  { %17167 = vst [vmem:[#allocation49_spill] sm:$0xff] %v12134_v25  ;;  %17168 = vst [vmem:[#allocation50_spill] sm:$0xff] %v12136_v3  ;;  %7705 = vmatprep.mubr.msk.f32.mxu0 %vm170_vm0, %v8769_v20  ;;  %7753 = vmatprep.mubr.msk.f32.mxu1 %vm170_vm0, %v8769_v20  ;;  %v3563_v20 = vld [vmem:[%s16752_s0 + $0x220] sm:$0xff] }
 0x299   :  { %v2092_v41 = vpop.f32.mrf.mxu0  ;;  %v2493_v2 = vpop.f32.mrf.mxu1  ;;  %3602 = vmatpush1.msra.mxu0 %v3565_v58  ;;  %v8771_v58 = vld [vmem:[%s16753_s1 + $0xb8] sm:$0xff]  ;;  %4003 = vmatpush1.msra.mxu1 %v3966_v42  ;;  %v8773_v42 = vld [vmem:[%s16753_s1 + $0xc8] sm:$0xff] }
 0x29a   :  { %3603 = vmatprep.subr.mxu0 %v17159_v27  ;;  %4004 = vmatprep.subr.mxu1 %v17159_v27  ;;  %v3965_v41 = vld [vmem:[%s16752_s0 + $0x268] sm:$0xff] }
 0x29b   :  { %v12154_v24 = vpop.f32.mrf.mxu0  ;;  %v12156_v30 = vpop.f32.mrf.mxu1  ;;  %2896 = vmatmul.mubr.f32.gmra.mxu0 %v8770_v29  ;;  %3297 = vmatmul.mubr.f32.gmra.mxu1 %v8770_v29 }
 0x29c   :  { %17169 = vst [vmem:[#allocation19_spill] sm:$0xff] %v12154_v24  ;;  %17170 = vst [vmem:[#allocation25_spill] sm:$0xff] %v12156_v30  ;;  %7706 = vmatprep.mubr.msk.f32.mxu0 %vm170_vm0, %v8771_v58  ;;  %7754 = vmatprep.mubr.msk.f32.mxu1 %vm170_vm0, %v8771_v58 }
 0x29d   :  { %v2097_v50 = vpop.f32.mrf.mxu0  ;;  %v2498_v48 = vpop.f32.mrf.mxu1  ;;  %3604 = vmatpush1.msra.mxu0 %v3564_v26  ;;  %v8772_v26 = vld [vmem:[%s16753_s1 + $0xb0] sm:$0xff]  ;;  %4005 = vmatpush1.msra.mxu1 %v3965_v41 }
 0x29e   :  { %3605 = vmatprep.subr.mxu0 %v17159_v27  ;;  %v3562_v48 = vld [vmem:[%s16752_s0 + $0x218] sm:$0xff]  ;;  %4006 = vmatprep.subr.mxu1 %v17159_v27 }
 0x29f   :  { %v12174_v2 = vpop.f32.mrf.mxu0  ;;  %v12176_v29 = vpop.f32.mrf.mxu1  ;;  %2901 = vmatmul.mubr.f32.gmra.mxu0 %v8772_v26  ;;  %3302 = vmatmul.mubr.f32.gmra.mxu1 %v8772_v26  ;;  %v3964_v26 = vld [vmem:[%s16752_s0 + $0x260] sm:$0xff] }
 0x2a0   :  { %17171 = vst [vmem:[#allocation31_spill] sm:$0xff] %v12174_v2  ;;  %17172 = vst [vmem:[#allocation26_spill] sm:$0xff] %v12176_v29  ;;  %7707 = vmatprep.mubr.msk.f32.mxu0 %vm170_vm0, %v8773_v42  ;;  %7755 = vmatprep.mubr.msk.f32.mxu1 %vm170_vm0, %v8773_v42  ;;  %v3963_v42 = vld [vmem:[%s16752_s0 + $0x258] sm:$0xff] }
 0x2a1   :  { %v2102_v58 = vpop.f32.mrf.mxu0  ;;  %v2503_v50 = vpop.f32.mrf.mxu1  ;;  %3606 = vmatpush1.msra.mxu0 %v3563_v20  ;;  %v8774_v20 = vld [vmem:[%s16753_s1 + $0xc0] sm:$0xff]  ;;  %4007 = vmatpush1.msra.mxu1 %v3964_v26  ;;  %v3962_v26 = vld [vmem:[%s16752_s0 + $0x250] sm:$0xff] }
 0x2a2   :  { %3607 = vmatprep.subr.mxu0 %v17159_v27  ;;  %v8775_v58 = vld [vmem:[%s16753_s1 + $0xd8] sm:$0xff]  ;;  %4008 = vmatprep.subr.mxu1 %v17159_v27 }
 0x2a3   :  { %v12194_v21 = vpop.f32.mrf.mxu0  ;;  %v12196_v47 = vpop.f32.mrf.mxu1  ;;  %2906 = vmatmul.mubr.f32.gmra.mxu0 %v8774_v20  ;;  %3307 = vmatmul.mubr.f32.gmra.mxu1 %v8774_v20  ;;  %v3561_v20 = vld [vmem:[%s16752_s0 + $0x210] sm:$0xff] }
 0x2a4   :  { %7708 = vmatprep.mubr.msk.f32.mxu0 %vm170_vm0, %v8775_v58  ;;  %7756 = vmatprep.mubr.msk.f32.mxu1 %vm170_vm0, %v8775_v58  ;;  %v8777_v58 = vld [vmem:[%s16753_s1 + $0xe8] sm:$0xff] }
 0x2a5   :  { %v2107_v50 = vpop.f32.mrf.mxu0  ;;  %v2508_v16 = vpop.f32.mrf.mxu1  ;;  %3608 = vmatpush1.msra.mxu0 %v3562_v48  ;;  %4009 = vmatpush1.msra.mxu1 %v3963_v42 }
 0x2a6   :  { %3609 = vmatprep.subr.mxu0 %v17159_v27  ;;  %v8776_v16 = vld [vmem:[%s16753_s1 + $0xd0] sm:$0xff]  ;;  %4010 = vmatprep.subr.mxu1 %v17159_v27 }
 0x2a7   :  { %v12218_v41 = vpop.f32.mrf.mxu0  ;;  %v12220_v18 = vpop.f32.mrf.mxu1  ;;  %2911 = vmatmul.mubr.f32.gmra.mxu0 %v8776_v16  ;;  %3312 = vmatmul.mubr.f32.gmra.mxu1 %v8776_v16  ;;  %v3560_v16 = vld [vmem:[%s16752_s0 + $0x208] sm:$0xff] }
 0x2a8   :  { %7709 = vmatprep.mubr.msk.f32.mxu0 %vm170_vm0, %v8777_v58  ;;  %7757 = vmatprep.mubr.msk.f32.mxu1 %vm170_vm0, %v8777_v58  ;;  %v8779_v58 = vld [vmem:[%s16753_s1 + $0xf8] sm:$0xff] }
 0x2a9   :  { %v2112_v50 = vpop.f32.mrf.mxu0  ;;  %v2513_v45 = vpop.f32.mrf.mxu1  ;;  %3610 = vmatpush1.msra.mxu0 %v3561_v20  ;;  %4011 = vmatpush1.msra.mxu1 %v3962_v26  ;;  %v3961_v20 = vld [vmem:[%s16752_s0 + $0x248] sm:$0xff] }
 0x2aa   :  { %3611 = vmatprep.subr.mxu0 %v17159_v27  ;;  %v8778_v45 = vld [vmem:[%s16753_s1 + $0xe0] sm:$0xff]  ;;  %4012 = vmatprep.subr.mxu1 %v17159_v27 }
 0x2ab   :  { %v12242_v48 = vpop.f32.mrf.mxu0  ;;  %v12244_v43 = vpop.f32.mrf.mxu1  ;;  %2916 = vmatmul.mubr.f32.gmra.mxu0 %v8778_v45  ;;  %3317 = vmatmul.mubr.f32.gmra.mxu1 %v8778_v45  ;;  %v3559_v45 = vld [vmem:[%s16752_s0 + $0x200] sm:$0xff] }
 0x2ac   :  { %7710 = vmatprep.mubr.msk.f32.mxu0 %vm170_vm0, %v8779_v58  ;;  %7758 = vmatprep.mubr.msk.f32.mxu1 %vm170_vm0, %v8779_v58  ;;  %v8781_v58 = vld [vmem:[%s16753_s1 + $0x108] sm:$0xff] }
 0x2ad   :  { %v2117_v50 = vpop.f32.mrf.mxu0  ;;  %v2518_v60 = vpop.f32.mrf.mxu1  ;;  %3612 = vmatpush1.msra.mxu0 %v3560_v16  ;;  %4013 = vmatpush1.msra.mxu1 %v3961_v20 }
 0x2ae   :  { %3613 = vmatprep.subr.mxu0 %v17159_v27  ;;  %v8780_v60 = vld [vmem:[%s16753_s1 + $0xf0] sm:$0xff]  ;;  %4014 = vmatprep.subr.mxu1 %v17159_v27 }
 0x2af   :  { %v12266_v42 = vpop.f32.mrf.mxu0  ;;  %v12268_v52 = vpop.f32.mrf.mxu1  ;;  %2921 = vmatmul.mubr.f32.gmra.mxu0 %v8780_v60  ;;  %3322 = vmatmul.mubr.f32.gmra.mxu1 %v8780_v60  ;;  %v3960_v60 = vld [vmem:[%s16752_s0 + $0x240] sm:$0xff] }
 0x2b0   :  { %7711 = vmatprep.mubr.msk.f32.mxu0 %vm170_vm0, %v8781_v58  ;;  %7759 = vmatprep.mubr.msk.f32.mxu1 %vm170_vm0, %v8781_v58  ;;  %v8782_v58 = vld [vmem:[%s16753_s1 + $0x100] sm:$0xff] }
 0x2b1   :  { %v2122_v50 = vpop.f32.mrf.mxu0  ;;  %v2523_v35 = vpop.f32.mrf.mxu1  ;;  %3614 = vmatpush1.msra.mxu0 %v3559_v45  ;;  %v8783_v45 = vld [vmem:[%s16753_s1 + $0x118] sm:$0xff]  ;;  %4015 = vmatpush1.msra.mxu1 %v3960_v60 }
 0x2b2   :  { %3631 = vmatprep.subr.mxu0 %v17159_v27  ;;  %4032 = vmatprep.subr.mxu1 %v17159_v27 }
 0x2b3   :  { %v12287_v16 = vpop.f32.mrf.mxu0  ;;  %v12289_v26 = vpop.f32.mrf.mxu1  ;;  %2926 = vmatmul.mubr.f32.gmra.mxu0 %v8782_v58  ;;  %3327 = vmatmul.mubr.f32.gmra.mxu1 %v8782_v58  ;;  %v12308_v58 = vld [vmem:[%s16752_s0 + $0x2f8] sm:$0xff] }
 0x2b4   :  { %7712 = vmatprep.mubr.msk.f32.mxu0 %vm170_vm0, %v8783_v45  ;;  %7760 = vmatprep.mubr.msk.f32.mxu1 %vm170_vm0, %v8783_v45  ;;  %17173 = vst [vmem:[#allocation51_spill] sm:$0xff] %v12308_v58  ;;  %v8785_v45 = vld [vmem:[%s16753_s1 + $0x128] sm:$0xff] }
 0x2b5   :  { %v2127_v50 = vpop.f32.mrf.mxu0  ;;  %v2528_v38 = vpop.f32.mrf.mxu1  ;;  %3632 = vmatpush2.msra.mxu0 %v11947_v7  ;;  %4033 = vmatpush2.msra.mxu1 %v12308_v58 }
 0x2b6   :  { %3633 = vmatprep.subr.mxu0 %v17159_v27  ;;  %v8784_v38 = vld [vmem:[%s16753_s1 + $0x110] sm:$0xff]  ;;  %4034 = vmatprep.subr.mxu1 %v17159_v27 }
 0x2b7   :  { %v12311_v20 = vpop.f32.mrf.mxu0  ;;  %v12313_v35 = vpop.f32.mrf.mxu1  ;;  %2931 = vmatmul.mubr.f32.gmra.mxu0 %v8784_v38  ;;  %3332 = vmatmul.mubr.f32.gmra.mxu1 %v8784_v38  ;;  %v12333_v38 = vld [vmem:[%s16752_s0 + $0x2f0] sm:$0xff] }
 0x2b8   :  { %7713 = vmatprep.mubr.msk.f32.mxu0 %vm170_vm0, %v8785_v45  ;;  %7761 = vmatprep.mubr.msk.f32.mxu1 %vm170_vm0, %v8785_v45  ;;  %17174 = vst [vmem:[#allocation52_spill] sm:$0xff] %v12333_v38 }
 0x2b9   :  { %v2132_v50 = vpop.f32.mrf.mxu0  ;;  %v2533_v55 = vpop.f32.mrf.mxu1  ;;  %3634 = vmatpush2.msra.mxu0 %v11968_v59  ;;  %4035 = vmatpush2.msra.mxu1 %v12333_v38 }
 0x2ba   :  { %3635 = vmatprep.subr.mxu0 %v17159_v27  ;;  %v8786_v55 = vld [vmem:[%s16753_s1 + $0x120] sm:$0xff]  ;;  %v8787_v50 = vld [vmem:[%s16753_s1 + $0x138] sm:$0xff]  ;;  %4036 = vmatprep.subr.mxu1 %v17159_v27 }
 0x2bb   :  { %v12336_v60 = vpop.f32.mrf.mxu0  ;;  %v12338_v7 = vpop.f32.mrf.mxu1  ;;  %2936 = vmatmul.mubr.f32.gmra.mxu0 %v8786_v55  ;;  %3337 = vmatmul.mubr.f32.gmra.mxu1 %v8786_v55  ;;  %v12358_v55 = vld [vmem:[%s16752_s0 + $0x2e8] sm:$0xff] }
 0x2bc   :  { %7714 = vmatprep.mubr.msk.f32.mxu0 %vm170_vm0, %v8787_v50  ;;  %7762 = vmatprep.mubr.msk.f32.mxu1 %vm170_vm0, %v8787_v50  ;;  %17175 = vst [vmem:[#allocation20_spill] sm:$0xff] %v12358_v55  ;;  %v8789_v50 = vld [vmem:[%s16753_s1 + $0x148] sm:$0xff] }
 0x2bd   :  { %v2137_v0 = vpop.f32.mrf.mxu0  ;;  %v2538_v44 = vpop.f32.mrf.mxu1  ;;  %3636 = vmatpush2.msra.mxu0 %v11989_v62  ;;  %4037 = vmatpush2.msra.mxu1 %v12358_v55  ;;  %v8804_v55 = vld [vmem:[%s16753_s1 + $0x1b0] sm:$0xff] }
 0x2be   :  { %3637 = vmatprep.subr.mxu0 %v17159_v27  ;;  %v8788_v44 = vld [vmem:[%s16753_s1 + $0x130] sm:$0xff]  ;;  %4038 = vmatprep.subr.mxu1 %v17159_v27 }
 0x2bf   :  { %v12361_v45 = vpop.f32.mrf.mxu0  ;;  %v12363_v59 = vpop.f32.mrf.mxu1  ;;  %2941 = vmatmul.mubr.f32.gmra.mxu0 %v8788_v44  ;;  %3342 = vmatmul.mubr.f32.gmra.mxu1 %v8788_v44  ;;  %v12383_v44 = vld [vmem:[%s16752_s0 + $0x2e0] sm:$0xff] }
 0x2c0   :  { %7715 = vmatprep.mubr.msk.f32.mxu0 %vm170_vm0, %v8789_v50  ;;  %7763 = vmatprep.mubr.msk.f32.mxu1 %vm170_vm0, %v8789_v50  ;;  %17176 = vst [vmem:[#allocation30_spill] sm:$0xff] %v12383_v44  ;;  %v8791_v50 = vld [vmem:[%s16753_s1 + $0x158] sm:$0xff] }
 0x2c1   :  { %v2142_v34 = vpop.f32.mrf.mxu0  ;;  %v2543_v6 = vpop.f32.mrf.mxu1  ;;  %3638 = vmatpush2.msra.mxu0 %v12010_v32  ;;  %4039 = vmatpush2.msra.mxu1 %v12383_v44 }
 0x2c2   :  { %3639 = vmatprep.subr.mxu0 %v17159_v27  ;;  %v8790_v34 = vld [vmem:[%s16753_s1 + $0x140] sm:$0xff]  ;;  %4040 = vmatprep.subr.mxu1 %v17159_v27 }
 0x2c3   :  { %v12386_v62 = vpop.f32.mrf.mxu0  ;;  %v12388_v0 = vpop.f32.mrf.mxu1  ;;  %2946 = vmatmul.mubr.f32.gmra.mxu0 %v8790_v34  ;;  %3347 = vmatmul.mubr.f32.gmra.mxu1 %v8790_v34  ;;  %v12408_v34 = vld [vmem:[%s16752_s0 + $0x2d8] sm:$0xff] }
 0x2c4   :  { %7716 = vmatprep.mubr.msk.f32.mxu0 %vm170_vm0, %v8791_v50  ;;  %7764 = vmatprep.mubr.msk.f32.mxu1 %vm170_vm0, %v8791_v50  ;;  %17177 = vst [vmem:[#allocation32_spill] sm:$0xff] %v12408_v34  ;;  %v8793_v50 = vld [vmem:[%s16753_s1 + $0x168] sm:$0xff] }
 0x2c5   :  { %v2147_v37 = vpop.f32.mrf.mxu0  ;;  %v2548_v57 = vpop.f32.mrf.mxu1  ;;  %3640 = vmatpush2.msra.mxu0 %v12031_v49  ;;  %4041 = vmatpush2.msra.mxu1 %v12408_v34  ;;  %v8802_v34 = vld [vmem:[%s16753_s1 + $0x1a0] sm:$0xff] }
 0x2c6   :  { %3641 = vmatprep.subr.mxu0 %v17159_v27  ;;  %v8792_v37 = vld [vmem:[%s16753_s1 + $0x150] sm:$0xff]  ;;  %4042 = vmatprep.subr.mxu1 %v17159_v27 }
 0x2c7   :  { %v12411_v32 = vpop.f32.mrf.mxu0  ;;  %v12413_v6 = vpop.f32.mrf.mxu1  ;;  %2951 = vmatmul.mubr.f32.gmra.mxu0 %v8792_v37  ;;  %3352 = vmatmul.mubr.f32.gmra.mxu1 %v8792_v37  ;;  %v12433_v37 = vld [vmem:[%s16752_s0 + $0x2d0] sm:$0xff] }
 0x2c8   :  { %17178 = vst [vmem:[#allocation33_spill] sm:$0xff] %v12411_v32  ;;  %17179 = vst [vmem:[#allocation7_spill] sm:$0xff] %v12413_v6  ;;  %7717 = vmatprep.mubr.msk.f32.mxu0 %vm170_vm0, %v8793_v50  ;;  %7765 = vmatprep.mubr.msk.f32.mxu1 %vm170_vm0, %v8793_v50  ;;  %v8795_v50 = vld [vmem:[%s16753_s1 + $0x178] sm:$0xff]  ;;  %v8816_v6 = vld [vmem:[%s16753_s1 + $0x210] sm:$0xff] }
 0x2c9   :  { %v2152_v12 = vpop.f32.mrf.mxu0  ;;  %v2553_v11 = vpop.f32.mrf.mxu1  ;;  %3642 = vmatpush2.msra.mxu0 %v12052_v46  ;;  %17180 = vst [vmem:[#allocation8_spill] sm:$0xff] %v12433_v37  ;;  %4043 = vmatpush2.msra.mxu1 %v12433_v37  ;;  %v8818_v32 = vld [vmem:[%s16753_s1 + $0x220] sm:$0xff] }
 0x2ca   :  { %3643 = vmatprep.subr.mxu0 %v17159_v27  ;;  %v8794_v12 = vld [vmem:[%s16753_s1 + $0x160] sm:$0xff]  ;;  %4044 = vmatprep.subr.mxu1 %v17159_v27 }
 0x2cb   :  { %v12436_v49 = vpop.f32.mrf.mxu0  ;;  %v12438_v57 = vpop.f32.mrf.mxu1  ;;  %2956 = vmatmul.mubr.f32.gmra.mxu0 %v8794_v12  ;;  %3357 = vmatmul.mubr.f32.gmra.mxu1 %v8794_v12  ;;  %v12458_v12 = vld [vmem:[%s16752_s0 + $0x2c8] sm:$0xff] }
 0x2cc   :  { %17181 = vst [vmem:[#allocation21_spill] sm:$0xff] %v12436_v49  ;;  %17182 = vst [vmem:[#allocation34_spill] sm:$0xff] %v12438_v57  ;;  %7718 = vmatprep.mubr.msk.f32.mxu0 %vm170_vm0, %v8795_v50  ;;  %7766 = vmatprep.mubr.msk.f32.mxu1 %vm170_vm0, %v8795_v50  ;;  %v8797_v50 = vld [vmem:[%s16753_s1 + $0x188] sm:$0xff]  ;;  %v8812_v57 = vld [vmem:[%s16753_s1 + $0x1f0] sm:$0xff] }
 0x2cd   :  { %v2157_v5 = vpop.f32.mrf.mxu0  ;;  %v2558_v39 = vpop.f32.mrf.mxu1  ;;  %3644 = vmatpush2.msra.mxu0 %v12080_v28  ;;  %17183 = vst [vmem:[#allocation22_spill] sm:$0xff] %v12458_v12  ;;  %4045 = vmatpush2.msra.mxu1 %v12458_v12  ;;  %v8814_v49 = vld [vmem:[%s16753_s1 + $0x200] sm:$0xff] }
 0x2ce   :  { %3645 = vmatprep.subr.mxu0 %v17159_v27  ;;  %v8796_v5 = vld [vmem:[%s16753_s1 + $0x170] sm:$0xff]  ;;  %4046 = vmatprep.subr.mxu1 %v17159_v27 }
 0x2cf   :  { %v12461_v46 = vpop.f32.mrf.mxu0  ;;  %v12463_v11 = vpop.f32.mrf.mxu1  ;;  %2961 = vmatmul.mubr.f32.gmra.mxu0 %v8796_v5  ;;  %3362 = vmatmul.mubr.f32.gmra.mxu1 %v8796_v5  ;;  %v12483_v5 = vld [vmem:[%s16752_s0 + $0x2c0] sm:$0xff] }
 0x2d0   :  { %17184 = vst [vmem:[#allocation24_spill] sm:$0xff] %v12461_v46  ;;  %17185 = vst [vmem:[#allocation27_spill] sm:$0xff] %v12463_v11  ;;  %7719 = vmatprep.mubr.msk.f32.mxu0 %vm170_vm0, %v8797_v50  ;;  %7767 = vmatprep.mubr.msk.f32.mxu1 %vm170_vm0, %v8797_v50  ;;  %v8808_v11 = vld [vmem:[%s16753_s1 + $0x1d0] sm:$0xff]  ;;  %v8810_v46 = vld [vmem:[%s16753_s1 + $0x1e0] sm:$0xff] }
 0x2d1   :  { %v2162_v31 = vpop.f32.mrf.mxu0  ;;  %v2563_v8 = vpop.f32.mrf.mxu1  ;;  %3646 = vmatpush2.msra.mxu0 %v12111_v14  ;;  %17186 = vst [vmem:[#allocation36_spill] sm:$0xff] %v12483_v5  ;;  %4047 = vmatpush2.msra.mxu1 %v12483_v5 }
 0x2d2   :  { %4385 = vmatprep.subr.mxu0 %v17159_v27  ;;  %v8798_v31 = vld [vmem:[%s16753_s1 + $0x180] sm:$0xff]  ;;  %v8799_v8 = vld [vmem:[%s16753_s1 + $0x198] sm:$0xff]  ;;  %4786 = vmatprep.subr.mxu1 %v17159_v27 }
 0x2d3   :  { %v12486_v28 = vpop.f32.mrf.mxu0  ;;  %v12488_v39 = vpop.f32.mrf.mxu1  ;;  %2966 = vmatmul.mubr.f32.gmra.mxu0 %v8798_v31  ;;  %3367 = vmatmul.mubr.f32.gmra.mxu1 %v8798_v31  ;;  %v8800_v31 = vld [vmem:[%s16753_s1 + $0x190] sm:$0xff]  ;;  %v8806_v27 = vld [vmem:[%s16753_s1 + $0x1c0] sm:$0xff] }
 0x2d4   :  { %7720 = vmatprep.mubr.msk.f32.mxu0 %vm170_vm0, %v8799_v8  ;;  %7768 = vmatprep.mubr.msk.f32.mxu1 %vm170_vm0, %v8799_v8  ;;  %v8801_v8 = vld [vmem:[%s16753_s1 + $0x1a8] sm:$0xff] }
 0x2d5   :  { %v2167_v14 = vpop.f32.mrf.mxu0  ;;  %v2568_v50 = vpop.f32.mrf.mxu1 }
 0x2d7   :  { %v12500_v19 = vpop.f32.mrf.mxu0  ;;  %v12502_v12 = vpop.f32.mrf.mxu1  ;;  %2971 = vmatmul.mubr.f32.gmra.mxu0 %v8800_v31  ;;  %3372 = vmatmul.mubr.f32.gmra.mxu1 %v8800_v31  ;;  %v8803_v31 = vld [vmem:[%s16753_s1 + $0x1b8] sm:$0xff] }
 0x2d8   :  { %7721 = vmatprep.mubr.msk.f32.mxu0 %vm170_vm0, %v8801_v8  ;;  %7769 = vmatprep.mubr.msk.f32.mxu1 %vm170_vm0, %v8801_v8 }
 0x2d9   :  { %v2172_v14 = vpop.f32.mrf.mxu0  ;;  %v2573_v50 = vpop.f32.mrf.mxu1 }
 0x2db   :  { %v12512_v5 = vpop.f32.mrf.mxu0  ;;  %v12514_v37 = vpop.f32.mrf.mxu1  ;;  %2976 = vmatmul.mubr.f32.gmra.mxu0 %v8802_v34  ;;  %3377 = vmatmul.mubr.f32.gmra.mxu1 %v8802_v34  ;;  %v8805_v34 = vld [vmem:[%s16753_s1 + $0x1c8] sm:$0xff] }
 0x2dc   :  { %7722 = vmatprep.mubr.msk.f32.mxu0 %vm170_vm0, %v8803_v31  ;;  %7770 = vmatprep.mubr.msk.f32.mxu1 %vm170_vm0, %v8803_v31 }
 0x2dd   :  { %v2177_v8 = vpop.f32.mrf.mxu0  ;;  %v2578_v14 = vpop.f32.mrf.mxu1 }
 0x2df   :  { %v12524_v50 = vpop.f32.mrf.mxu0  ;;  %v12526_v44 = vpop.f32.mrf.mxu1  ;;  %2981 = vmatmul.mubr.f32.gmra.mxu0 %v8804_v55  ;;  %3382 = vmatmul.mubr.f32.gmra.mxu1 %v8804_v55  ;;  %v8807_v55 = vld [vmem:[%s16753_s1 + $0x1d8] sm:$0xff] }
 0x2e0   :  { %7723 = vmatprep.mubr.msk.f32.mxu0 %vm170_vm0, %v8805_v34  ;;  %7771 = vmatprep.mubr.msk.f32.mxu1 %vm170_vm0, %v8805_v34 }
 0x2e1   :  { %v2182_v31 = vpop.f32.mrf.mxu0  ;;  %v2583_v8 = vpop.f32.mrf.mxu1 }
 0x2e3   :  { %v12536_v14 = vpop.f32.mrf.mxu0  ;;  %v12538_v38 = vpop.f32.mrf.mxu1  ;;  %2986 = vmatmul.mubr.f32.gmra.mxu0 %v8806_v27  ;;  %3387 = vmatmul.mubr.f32.gmra.mxu1 %v8806_v27  ;;  %v8809_v27 = vld [vmem:[%s16753_s1 + $0x1e8] sm:$0xff] }
 0x2e4   :  { %7724 = vmatprep.mubr.msk.f32.mxu0 %vm170_vm0, %v8807_v55  ;;  %7772 = vmatprep.mubr.msk.f32.mxu1 %vm170_vm0, %v8807_v55 }
 0x2e5   :  { %v2187_v34 = vpop.f32.mrf.mxu0  ;;  %v2588_v31 = vpop.f32.mrf.mxu1 }
 0x2e7   :  { %v12548_v8 = vpop.f32.mrf.mxu0  ;;  %v12550_v58 = vpop.f32.mrf.mxu1  ;;  %2991 = vmatmul.mubr.f32.gmra.mxu0 %v8808_v11  ;;  %3392 = vmatmul.mubr.f32.gmra.mxu1 %v8808_v11  ;;  %v8811_v11 = vld [vmem:[%s16753_s1 + $0x1f8] sm:$0xff] }
 0x2e8   :  { %7725 = vmatprep.mubr.msk.f32.mxu0 %vm170_vm0, %v8809_v27  ;;  %7773 = vmatprep.mubr.msk.f32.mxu1 %vm170_vm0, %v8809_v27 }
 0x2e9   :  { %v2192_v55 = vpop.f32.mrf.mxu0  ;;  %v2593_v34 = vpop.f32.mrf.mxu1 }
 0x2eb   :  { %v12560_v31 = vpop.f32.mrf.mxu0  ;;  %v12562_v29 = vpop.f32.mrf.mxu1  ;;  %2996 = vmatmul.mubr.f32.gmra.mxu0 %v8810_v46  ;;  %3397 = vmatmul.mubr.f32.gmra.mxu1 %v8810_v46  ;;  %v8813_v46 = vld [vmem:[%s16753_s1 + $0x208] sm:$0xff] }
 0x2ec   :  { %7726 = vmatprep.mubr.msk.f32.mxu0 %vm170_vm0, %v8811_v11  ;;  %7774 = vmatprep.mubr.msk.f32.mxu1 %vm170_vm0, %v8811_v11 }
 0x2ed   :  { %v2197_v27 = vpop.f32.mrf.mxu0  ;;  %v2598_v55 = vpop.f32.mrf.mxu1 }
 0x2ef   :  { %v12572_v34 = vpop.f32.mrf.mxu0  ;;  %v12574_v2 = vpop.f32.mrf.mxu1  ;;  %3001 = vmatmul.mubr.f32.gmra.mxu0 %v8812_v57  ;;  %3402 = vmatmul.mubr.f32.gmra.mxu1 %v8812_v57  ;;  %v8815_v57 = vld [vmem:[%s16753_s1 + $0x218] sm:$0xff] }
 0x2f0   :  { %7727 = vmatprep.mubr.msk.f32.mxu0 %vm170_vm0, %v8813_v46  ;;  %7775 = vmatprep.mubr.msk.f32.mxu1 %vm170_vm0, %v8813_v46 }
 0x2f1   :  { %v2202_v11 = vpop.f32.mrf.mxu0  ;;  %v2603_v27 = vpop.f32.mrf.mxu1 }
 0x2f3   :  { %v12584_v55 = vpop.f32.mrf.mxu0  ;;  %v12586_v30 = vpop.f32.mrf.mxu1  ;;  %3006 = vmatmul.mubr.f32.gmra.mxu0 %v8814_v49  ;;  %3407 = vmatmul.mubr.f32.gmra.mxu1 %v8814_v49  ;;  %v8817_v49 = vld [vmem:[%s16753_s1 + $0x228] sm:$0xff] }
 0x2f4   :  { %7728 = vmatprep.mubr.msk.f32.mxu0 %vm170_vm0, %v8815_v57  ;;  %7776 = vmatprep.mubr.msk.f32.mxu1 %vm170_vm0, %v8815_v57 }
 0x2f5   :  { %v2207_v46 = vpop.f32.mrf.mxu0  ;;  %v2608_v11 = vpop.f32.mrf.mxu1 }
 0x2f7   :  { %v12596_v27 = vpop.f32.mrf.mxu0  ;;  %v12598_v24 = vpop.f32.mrf.mxu1  ;;  %3011 = vmatmul.mubr.f32.gmra.mxu0 %v8816_v6  ;;  %3412 = vmatmul.mubr.f32.gmra.mxu1 %v8816_v6  ;;  %v8819_v6 = vld [vmem:[%s16753_s1 + $0x238] sm:$0xff] }
 0x2f8   :  { %17187 = vst [vmem:[#allocation71_spill] sm:$0xff] %v12596_v27  ;;  %17188 = vst [vmem:[#allocation72_spill] sm:$0xff] %v12598_v24  ;;  %7729 = vmatprep.mubr.msk.f32.mxu0 %vm170_vm0, %v8817_v49  ;;  %7777 = vmatprep.mubr.msk.f32.mxu1 %vm170_vm0, %v8817_v49  ;;  %v8823_v24 = vld [vmem:[%s16753_s1 + $0x258] sm:$0xff] }
 0x2f9   :  { %v2212_v57 = vpop.f32.mrf.mxu0  ;;  %v2613_v46 = vpop.f32.mrf.mxu1 }
 0x2fb   :  { %v12608_v11 = vpop.f32.mrf.mxu0  ;;  %v12610_v3 = vpop.f32.mrf.mxu1  ;;  %3016 = vmatmul.mubr.f32.gmra.mxu0 %v8818_v32  ;;  %3417 = vmatmul.mubr.f32.gmra.mxu1 %v8818_v32  ;;  %v8821_v32 = vld [vmem:[%s16753_s1 + $0x248] sm:$0xff] }
 0x2fc   :  { %17189 = vst [vmem:[#allocation73_spill] sm:$0xff] %v12608_v11  ;;  %17190 = vst [vmem:[#allocation74_spill] sm:$0xff] %v12610_v3  ;;  %7730 = vmatprep.mubr.msk.f32.mxu0 %vm170_vm0, %v8819_v6  ;;  %7778 = vmatprep.mubr.msk.f32.mxu1 %vm170_vm0, %v8819_v6  ;;  %v8820_v3 = vld [vmem:[%s16753_s1 + $0x230] sm:$0xff] }
 0x2fd   :  { %v2217_v49 = vpop.f32.mrf.mxu0  ;;  %v2618_v57 = vpop.f32.mrf.mxu1 }
 0x2ff   :  { %v12620_v46 = vpop.f32.mrf.mxu0  ;;  %v12622_v11 = vpop.f32.mrf.mxu1  ;;  %3021 = vmatmul.mubr.f32.gmra.mxu0 %v8820_v3  ;;  %3422 = vmatmul.mubr.f32.gmra.mxu1 %v8820_v3 }
 0x300   :  { %17191 = vst [vmem:[#allocation75_spill] sm:$0xff] %v12620_v46  ;;  %17192 = vst [vmem:[#allocation76_spill] sm:$0xff] %v12622_v11  ;;  %7731 = vmatprep.mubr.msk.f32.mxu0 %vm170_vm0, %v8821_v32  ;;  %7779 = vmatprep.mubr.msk.f32.mxu1 %vm170_vm0, %v8821_v32  ;;  %v8822_v11 = vld [vmem:[%s16753_s1 + $0x240] sm:$0xff] }
 0x301   :  { %v2222_v6 = vpop.f32.mrf.mxu0  ;;  %v2623_v49 = vpop.f32.mrf.mxu1 }
 0x302   :  { %v17193_v49 = vmax.f32 %v11949_v10, %v12194_v21  ;;  %v8825_v21 = vld [vmem:[%s16753_s1 + $0x268] sm:$0xff] }
 0x303   :  { %v2225_v57 = vpop.f32.mrf.mxu0  ;;  %v2626_v46 = vpop.f32.mrf.mxu1  ;;  %3026 = vmatmul.mubr.f32.gmra.mxu0 %v8822_v11  ;;  %3427 = vmatmul.mubr.f32.gmra.mxu1 %v8822_v11 }
 0x304   :  { %v2296_v3 = vmax.f32 %v12486_v28, %v2225_v57  ;;  %v2697_v25 = vmax.f32 %v12488_v39, %v2626_v46  ;;  %7732 = vmatprep.mubr.msk.f32.mxu0 %vm170_vm0, %v8823_v24  ;;  %7780 = vmatprep.mubr.msk.f32.mxu1 %vm170_vm0, %v8823_v24  ;;  %v17195_v28 = vmax.f32 %v11951_v4, %v12196_v47  ;;  %v8824_v57 = vld [vmem:[%s16753_s1 + $0x250] sm:$0xff] }
 0x305   :  { %v2227_v32 = vpop.f32.mrf.mxu0  ;;  %v2628_v6 = vpop.f32.mrf.mxu1  ;;  %v17197_v4 = vmax.f32 %v11970_v17, %v12218_v41  ;;  %v8827_v17 = vld [vmem:[%s16753_s1 + $0x278] sm:$0xff]  ;;  %v17201_v41 = vmax.f32 %v11991_v23, %v12242_v48  ;;  %v8829_v23 = vld [vmem:[%s16753_s1 + $0x288] sm:$0xff]  ;;  %v17205_v48 = vmax.f32 %v12012_v36, %v12266_v42  ;;  %v17209_v42 = vmax.f32 %v12033_v22, %v12287_v16 }
 0x306   :  { %v12645_v27 = vmax.f32 %v17193_v49, %v2296_v3  ;;  %v12650_v11 = vmax.f32 %v17195_v28, %v2697_v25  ;;  %v8826_v49 = vld [vmem:[%s16753_s1 + $0x260] sm:$0xff]  ;;  %v8831_v36 = vld [vmem:[%s16753_s1 + $0x298] sm:$0xff]  ;;  %v8833_v22 = vld [vmem:[%s16753_s1 + $0x2a8] sm:$0xff]  ;;  %v17213_v16 = vmax.f32 %v12054_v33, %v12311_v20  ;;  %v17217_v20 = vmax.f32 %v12070_v63, %v12336_v60 }
 0x307   :  { %v2230_v39 = vpop.f32.mrf.mxu0  ;;  %v2631_v46 = vpop.f32.mrf.mxu1  ;;  %3031 = vmatmul.mubr.f32.gmra.mxu0 %v8824_v57  ;;  %3432 = vmatmul.mubr.f32.gmra.mxu1 %v8824_v57  ;;  %v8835_v33 = vld [vmem:[%s16753_s1 + $0x2b8] sm:$0xff]  ;;  %v8837_v63 = vld [vmem:[%s16753_s1 + $0x2c8] sm:$0xff]  ;;  %v17221_v60 = vmax.f32 %v12091_v15, %v12361_v45  ;;  %v17225_v45 = vmax.f32 %v12113_v56, %v12386_v62  ;;  %v17231_v62 = vld [vmem:[#allocation49_spill] sm:$0xff] }
 0x308   :  { %17194 = vst [vmem:[#allocation77_spill] sm:$0xff] %v12645_v27  ;;  %17196 = vst [vmem:[#allocation78_spill] sm:$0xff] %v12650_v11  ;;  %v2297_v24 = vmax.f32 %v12500_v19, %v2230_v39  ;;  %v2698_v32 = vmax.f32 %v12502_v12, %v2631_v46  ;;  %7733 = vmatprep.mubr.msk.f32.mxu0 %vm170_vm0, %v8825_v21  ;;  %7781 = vmatprep.mubr.msk.f32.mxu1 %vm170_vm0, %v8825_v21  ;;  %v8839_v15 = vld [vmem:[%s16753_s1 + $0x2d8] sm:$0xff]  ;;  %v8841_v56 = vld [vmem:[%s16753_s1 + $0x2e8] sm:$0xff] }
 0x309   :  { %v2232_v47 = vpop.f32.mrf.mxu0  ;;  %v2633_v10 = vpop.f32.mrf.mxu1  ;;  %v17199_v19 = vmax.f32 %v11972_v1, %v12220_v18  ;;  %v8899_v11 = vld [vmem:[%s16753_s1 + $0x1b8] sm:$0xff] }
 0x30a   :  { %v12665_v25 = vmax.f32 %v17197_v4, %v2297_v24 }
 0x30b   :  { %v12670_v3 = vmax.f32 %v17199_v19, %v2698_v32  ;;  %v2235_v12 = vpop.f32.mrf.mxu0  ;;  %v2636_v6 = vpop.f32.mrf.mxu1  ;;  %3036 = vmatmul.mubr.f32.gmra.mxu0 %v8826_v49  ;;  %3437 = vmatmul.mubr.f32.gmra.mxu1 %v8826_v49  ;;  %v8828_v32 = vld [vmem:[%s16753_s1 + $0x270] sm:$0xff] }
 0x30c   :  { %17198 = vst [vmem:[#allocation79_spill] sm:$0xff] %v12665_v25  ;;  %v2298_v28 = vmax.f32 %v12512_v5, %v2235_v12  ;;  %v2699_v39 = vmax.f32 %v12514_v37, %v2636_v6  ;;  %7734 = vmatprep.mubr.msk.f32.mxu0 %vm170_vm0, %v8827_v17  ;;  %7782 = vmatprep.mubr.msk.f32.mxu1 %vm170_vm0, %v8827_v17  ;;  %v8830_v12 = vld [vmem:[%s16753_s1 + $0x280] sm:$0xff] }
 0x30d   :  { %17200 = vst [vmem:[#allocation80_spill] sm:$0xff] %v12670_v3  ;;  %v2237_v18 = vpop.f32.mrf.mxu0  ;;  %v2638_v1 = vpop.f32.mrf.mxu1  ;;  %v17203_v5 = vmax.f32 %v11993_v13, %v12244_v43  ;;  %v8900_v3 = vld [vmem:[%s16753_s1 + $0x1b0] sm:$0xff] }
 0x30e   :  { %v12685_v46 = vmax.f32 %v17201_v41, %v2298_v28  ;;  %v8832_v18 = vld [vmem:[%s16753_s1 + $0x290] sm:$0xff] }
 0x30f   :  { %v12690_v57 = vmax.f32 %v17203_v5, %v2699_v39  ;;  %v2240_v37 = vpop.f32.mrf.mxu0  ;;  %v2641_v24 = vpop.f32.mrf.mxu1  ;;  %3041 = vmatmul.mubr.f32.gmra.mxu0 %v8828_v32  ;;  %3442 = vmatmul.mubr.f32.gmra.mxu1 %v8828_v32  ;;  %v8834_v32 = vld [vmem:[%s16753_s1 + $0x2a0] sm:$0xff] }
 0x310   :  { %17202 = vst [vmem:[#allocation81_spill] sm:$0xff] %v12685_v46  ;;  %v2299_v21 = vmax.f32 %v12524_v50, %v2240_v37  ;;  %v2700_v47 = vmax.f32 %v12526_v44, %v2641_v24  ;;  %7735 = vmatprep.mubr.msk.f32.mxu0 %vm170_vm0, %v8829_v23  ;;  %7783 = vmatprep.mubr.msk.f32.mxu1 %vm170_vm0, %v8829_v23 }
 0x311   :  { %17204 = vst [vmem:[#allocation82_spill] sm:$0xff] %v12690_v57  ;;  %v2242_v43 = vpop.f32.mrf.mxu0  ;;  %v2643_v13 = vpop.f32.mrf.mxu1  ;;  %v17207_v50 = vmax.f32 %v12014_v9, %v12268_v52 }
 0x312   :  { %v12705_v10 = vmax.f32 %v17205_v48, %v2299_v21  ;;  %v8836_v48 = vld [vmem:[%s16753_s1 + $0x2b0] sm:$0xff] }
 0x313   :  { %v12710_v4 = vmax.f32 %v17207_v50, %v2700_v47  ;;  %v2245_v44 = vpop.f32.mrf.mxu0  ;;  %v2646_v19 = vpop.f32.mrf.mxu1  ;;  %3046 = vmatmul.mubr.f32.gmra.mxu0 %v8830_v12  ;;  %3447 = vmatmul.mubr.f32.gmra.mxu1 %v8830_v12 }
 0x314   :  { %17206 = vst [vmem:[#allocation83_spill] sm:$0xff] %v12705_v10  ;;  %v2300_v6 = vmax.f32 %v12536_v14, %v2245_v44  ;;  %v2701_v49 = vmax.f32 %v12538_v38, %v2646_v19  ;;  %7736 = vmatprep.mubr.msk.f32.mxu0 %vm170_vm0, %v8831_v36  ;;  %7784 = vmatprep.mubr.msk.f32.mxu1 %vm170_vm0, %v8831_v36 }
 0x315   :  { %17208 = vst [vmem:[#allocation84_spill] sm:$0xff] %v12710_v4  ;;  %v2247_v52 = vpop.f32.mrf.mxu0  ;;  %v2648_v9 = vpop.f32.mrf.mxu1  ;;  %v17211_v14 = vmax.f32 %v12035_v51, %v12289_v26  ;;  %v8902_v4 = vld [vmem:[%s16753_s1 + $0x1c0] sm:$0xff] }
 0x316   :  { %v12725_v28 = vmax.f32 %v17209_v42, %v2300_v6 }
 0x317   :  { %v12730_v39 = vmax.f32 %v17211_v14, %v2701_v49  ;;  %v2250_v38 = vpop.f32.mrf.mxu0  ;;  %v2651_v17 = vpop.f32.mrf.mxu1  ;;  %3051 = vmatmul.mubr.f32.gmra.mxu0 %v8832_v18  ;;  %3452 = vmatmul.mubr.f32.gmra.mxu1 %v8832_v18  ;;  %v8838_v49 = vld [vmem:[%s16753_s1 + $0x2c0] sm:$0xff] }
 0x318   :  { %17210 = vst [vmem:[#allocation85_spill] sm:$0xff] %v12725_v28  ;;  %v2301_v1 = vmax.f32 %v12548_v8, %v2250_v38  ;;  %v2702_v41 = vmax.f32 %v12550_v58, %v2651_v17  ;;  %7737 = vmatprep.mubr.msk.f32.mxu0 %vm170_vm0, %v8833_v22  ;;  %7785 = vmatprep.mubr.msk.f32.mxu1 %vm170_vm0, %v8833_v22  ;;  %v8840_v38 = vld [vmem:[%s16753_s1 + $0x2d0] sm:$0xff]  ;;  %v17229_v17 = vld [vmem:[#allocation71_spill] sm:$0xff] }
 0x319   :  { %17212 = vst [vmem:[#allocation86_spill] sm:$0xff] %v12730_v39  ;;  %v2252_v51 = vpop.f32.mrf.mxu0  ;;  %v2653_v26 = vpop.f32.mrf.mxu1  ;;  %v17215_v8 = vmax.f32 %v12056_v40, %v12313_v35  ;;  %v17232_v22 = vld [vmem:[#allocation33_spill] sm:$0xff] }
 0x31a   :  { %v12745_v5 = vmax.f32 %v17213_v16, %v2301_v1  ;;  %v17230_v1 = vld [vmem:[#allocation72_spill] sm:$0xff]  ;;  %v17233_v51 = vmax.f32 %v17231_v62, %v17232_v22  ;;  %v17235_v16 = vld [vmem:[#allocation50_spill] sm:$0xff] }
 0x31b   :  { %v12750_v37 = vmax.f32 %v17215_v8, %v2702_v41  ;;  %v2255_v58 = vpop.f32.mrf.mxu0  ;;  %v2656_v24 = vpop.f32.mrf.mxu1  ;;  %3056 = vmatmul.mubr.f32.gmra.mxu0 %v8834_v32  ;;  %3457 = vmatmul.mubr.f32.gmra.mxu1 %v8834_v32  ;;  %v17236_v8 = vld [vmem:[#allocation7_spill] sm:$0xff] }
 0x31c   :  { %17214 = vst [vmem:[#allocation87_spill] sm:$0xff] %v12745_v5  ;;  %v2302_v21 = vmax.f32 %v12560_v31, %v2255_v58  ;;  %v2703_v47 = vmax.f32 %v12562_v29, %v2656_v24  ;;  %7738 = vmatprep.mubr.msk.f32.mxu0 %vm170_vm0, %v8835_v33  ;;  %7786 = vmatprep.mubr.msk.f32.mxu1 %vm170_vm0, %v8835_v33  ;;  %v17239_v33 = vld [vmem:[#allocation73_spill] sm:$0xff] }
 0x31d   :  { %17216 = vst [vmem:[#allocation88_spill] sm:$0xff] %v12750_v37  ;;  %v2257_v40 = vpop.f32.mrf.mxu0  ;;  %v2658_v35 = vpop.f32.mrf.mxu1  ;;  %v17219_v31 = vmax.f32 %v12072_v61, %v12338_v7  ;;  %v17237_v58 = vmax.f32 %v17235_v16, %v17236_v8  ;;  %v8847_v16 = vld [vmem:[%s16753_s1 + $0x18] sm:$0xff] }
 0x31e   :  { %v12765_v23 = vmax.f32 %v17217_v20, %v2302_v21  ;;  %v17240_v35 = vld [vmem:[#allocation74_spill] sm:$0xff] }
 0x31f   :  { %v12770_v43 = vmax.f32 %v17219_v31, %v2703_v47  ;;  %v2260_v29 = vpop.f32.mrf.mxu0  ;;  %v2661_v13 = vpop.f32.mrf.mxu1  ;;  %3061 = vmatmul.mubr.f32.gmra.mxu0 %v8836_v48  ;;  %3462 = vmatmul.mubr.f32.gmra.mxu1 %v8836_v48  ;;  %v8842_v47 = vld [vmem:[%s16753_s1 + $0x2e0] sm:$0xff]  ;;  %v8843_v31 = vld [vmem:[%s16753_s1 + $0x2f8] sm:$0xff] }
 0x320   :  { %17218 = vst [vmem:[#allocation89_spill] sm:$0xff] %v12765_v23  ;;  %v2303_v50 = vmax.f32 %v12572_v34, %v2260_v29  ;;  %v2704_v44 = vmax.f32 %v12574_v2, %v2661_v13  ;;  %7739 = vmatprep.mubr.msk.f32.mxu0 %vm170_vm0, %v8837_v63  ;;  %7787 = vmatprep.mubr.msk.f32.mxu1 %vm170_vm0, %v8837_v63  ;;  %v17241_v48 = vld [vmem:[#allocation19_spill] sm:$0xff] }
 0x321   :  { %17220 = vst [vmem:[#allocation90_spill] sm:$0xff] %v12770_v43  ;;  %v2262_v61 = vpop.f32.mrf.mxu0  ;;  %v2663_v7 = vpop.f32.mrf.mxu1  ;;  %v17223_v34 = vmax.f32 %v12093_v54, %v12363_v59 }
 0x322   :  { %v12785_v19 = vmax.f32 %v17221_v60, %v2303_v50  ;;  %v17242_v50 = vld [vmem:[#allocation21_spill] sm:$0xff]  ;;  %v17246_v7 = vld [vmem:[#allocation34_spill] sm:$0xff] }
 0x323   :  { %v12790_v12 = vmax.f32 %v17223_v34, %v2704_v44  ;;  %v2265_v2 = vpop.f32.mrf.mxu0  ;;  %v2666_v6 = vpop.f32.mrf.mxu1  ;;  %3066 = vmatmul.mubr.f32.gmra.mxu0 %v8838_v49  ;;  %3467 = vmatmul.mubr.f32.gmra.mxu1 %v8838_v49  ;;  %v17243_v44 = vmax.f32 %v17241_v48, %v17242_v50  ;;  %v17245_v61 = vld [vmem:[#allocation25_spill] sm:$0xff]  ;;  %v12920_v48 = vld [vmem:[%s16752_s0 + $0x328] sm:$0xff] }
 0x324   :  { %17222 = vst [vmem:[#allocation91_spill] sm:$0xff] %v12785_v19  ;;  %v2304_v36 = vmax.f32 %v12584_v55, %v2265_v2  ;;  %v2705_v52 = vmax.f32 %v12586_v30, %v2666_v6  ;;  %7740 = vmatprep.mubr.msk.f32.mxu0 %vm170_vm0, %v8839_v15  ;;  %7788 = vmatprep.mubr.msk.f32.mxu1 %vm170_vm0, %v8839_v15  ;;  %v8844_v49 = vld [vmem:[%s16753_s1 + $0x2f0] sm:$0xff]  ;;  %v17250_v15 = vld [vmem:[#allocation76_spill] sm:$0xff] }
 0x325   :  { %17224 = vst [vmem:[#allocation92_spill] sm:$0xff] %v12790_v12  ;;  %v2267_v54 = vpop.f32.mrf.mxu0  ;;  %v2668_v59 = vpop.f32.mrf.mxu1  ;;  %v17227_v55 = vmax.f32 %v12115_v53, %v12388_v0  ;;  %v17247_v60 = vmax.f32 %v17245_v61, %v17246_v7  ;;  %v8850_v61 = vld [vmem:[%s16753_s1 + $0x20] sm:$0xff]  ;;  %v8851_v7 = vld [vmem:[%s16753_s1 + $0x38] sm:$0xff] }
 0x326   :  { %v12805_v9 = vmax.f32 %v17225_v45, %v2304_v36  ;;  %v17249_v36 = vld [vmem:[#allocation75_spill] sm:$0xff]  ;;  %v8845_v59 = vld [vmem:[%s16753_s1 + $0x8] sm:$0xff]  ;;  %v7279_v45 = vld [vmem:[%s16755_s8 + $0x10] sm:$0x3] }
 0x327   :  { %v12810_v42 = vmax.f32 %v17227_v55, %v2705_v52  ;;  %v2270_v30 = vpop.f32.mrf.mxu0  ;;  %v2671_v14 = vpop.f32.mrf.mxu1  ;;  %3071 = vmatmul.mubr.f32.gmra.mxu0 %v8840_v38  ;;  %3472 = vmatmul.mubr.f32.gmra.mxu1 %v8840_v38  ;;  %v17252_v38 = vld [vmem:[#allocation24_spill] sm:$0xff] }
 0x328   :  { %17226 = vst [vmem:[#allocation93_spill] sm:$0xff] %v12805_v9  ;;  %v2305_v18 = vmax.f32 %v17229_v17, %v2270_v30  ;;  %v2706_v41 = vmax.f32 %v17230_v1, %v2671_v14  ;;  %7741 = vmatprep.mubr.msk.f32.mxu0 %vm170_vm0, %v8841_v56  ;;  %7789 = vmatprep.mubr.msk.f32.mxu1 %vm170_vm0, %v8841_v56  ;;  %v17251_v14 = vld [vmem:[#allocation31_spill] sm:$0xff]  ;;  %v17255_v1 = vld [vmem:[#allocation26_spill] sm:$0xff] }
 0x329   :  { %17228 = vst [vmem:[#allocation94_spill] sm:$0xff] %v12810_v42  ;;  %v2272_v53 = vpop.f32.mrf.mxu0  ;;  %v2673_v0 = vpop.f32.mrf.mxu1  ;;  %7292 = vperm.xlu0 %8209, %v7279_v45   ;;  %v17253_v17 = vmax.f32 %v17251_v14, %v17252_v38 }
 0x32a   :  { %v12825_v26 = vmax.f32 %v17233_v51, %v2305_v18  ;;  %v12830_v24 = vmax.f32 %v17237_v58, %v2706_v41  ;;  %v17256_v41 = vld [vmem:[#allocation27_spill] sm:$0xff]  ;;  %v12878_v0 = vld [vmem:[%s16752_s0 + $0x338] sm:$0xff] }
 0x32b   :  { %v2275_v32 = vpop.f32.mrf.mxu0  ;;  %v2676_v21 = vpop.f32.mrf.mxu1  ;;  %3076 = vmatmul.mubr.f32.gmra.mxu0 %v8842_v47  ;;  %3477 = vmatmul.mubr.f32.gmra.mxu1 %v8842_v47  ;;  %v17257_v56 = vmax.f32 %v17255_v1, %v17256_v41  ;;  %v8846_v51 = vld [vmem:[%s16753_s1] sm:$0xff]  ;;  %v12899_v47 = vld [vmem:[%s16752_s0 + $0x330] sm:$0xff]  ;;  %v8855_v41 = vld [vmem:[%s16753_s1 + $0x58] sm:$0xff] }
 0x32c   :  { %17234 = vst [vmem:[#allocation71_spill] sm:$0xff] %v12825_v26  ;;  %17238 = vst [vmem:[#allocation72_spill] sm:$0xff] %v12830_v24  ;;  %v2306_v40 = vmax.f32 %v17239_v33, %v2275_v32  ;;  %v2707_v20 = vmax.f32 %v17240_v35, %v2676_v21  ;;  %7742 = vmatprep.mubr.msk.f32.mxu0 %vm170_vm0, %v8843_v31  ;;  %7790 = vmatprep.mubr.msk.f32.mxu1 %vm170_vm0, %v8843_v31  ;;  %v17259_v32 = vld [vmem:[#allocation51_spill] sm:$0xff]  ;;  %v17260_v21 = vmov 0.0   ;;  %v8848_v35 = vld [vmem:[%s16753_s1 + $0x10] sm:$0xff] }
 0x32d   :  { %v2277_v29 = vpop.f32.mrf.mxu0  ;;  %v2678_v13 = vpop.f32.mrf.mxu1  ;;  %v7277_v1 = vld [vmem:[%s16755_s8] sm:$0xff] }
 0x32e   :  { %v12845_v63 = vmax.f32 %v17243_v44, %v2306_v40  ;;  %v12850_v34 = vmax.f32 %v17247_v60, %v2707_v20  ;;  %v8849_v20 = vld [vmem:[%s16753_s1 + $0x28] sm:$0xff]  ;;  %7282 = vperm.xlu0 %8209, %v7277_v1   ;;  %v8860_v1 = vld [vmem:[%s16753_s1 + $0x70] sm:$0xff] }
 0x32f   :  { %v2280_v2 = vpop.f32.mrf.mxu0  ;;  %v2681_v6 = vpop.f32.mrf.mxu1  ;;  %3081 = vmatmul.mubr.f32.gmra.mxu0 %v8844_v49  ;;  %3482 = vmatmul.mubr.f32.gmra.mxu1 %v8844_v49  ;;  %v17261_v13 = vld [vmem:[#allocation52_spill] sm:$0xff]  ;;  %v12941_v49 = vld [vmem:[%s16752_s0 + $0x320] sm:$0xff] }
 0x330   :  { %17244 = vst [vmem:[#allocation49_spill] sm:$0xff] %v12845_v63  ;;  %17248 = vst [vmem:[#allocation33_spill] sm:$0xff] %v12850_v34  ;;  %v2307_v52 = vmax.f32 %v17249_v36, %v2280_v2  ;;  %v2708_v54 = vmax.f32 %v17250_v15, %v2681_v6  ;;  %7791 = vmatprep.mubr.msk.f32.mxu0 %vm170_vm0, %v8845_v59  ;;  %7839 = vmatprep.mubr.msk.f32.mxu1 %vm170_vm0, %v8845_v59  ;;  %v17262_v6 = vld [vmem:[#allocation20_spill] sm:$0xff]  ;;  %v8852_v15 = vld [vmem:[%s16753_s1 + $0x30] sm:$0xff] }
 0x331   :  { %v2282_v55 = vpop.f32.mrf.mxu0  ;;  %v2683_v30 = vpop.f32.mrf.mxu1  ;;  %v8896_v63 = vld [vmem:[%s16753_s1 + $0x190] sm:$0xff] }
 0x332   :  { %v12868_v18 = vmax.f32 %v17253_v17, %v2307_v52  ;;  %v12873_v53 = vmax.f32 %v17257_v56, %v2708_v54  ;;  %v8853_v54 = vld [vmem:[%s16753_s1 + $0x48] sm:$0xff]  ;;  %v17263_v55 = vld [vmem:[#allocation30_spill] sm:$0xff]  ;;  %v8854_v17 = vld [vmem:[%s16753_s1 + $0x40] sm:$0xff] }
 0x333   :  { %v12880_v62 = vpop.f32.mrf.mxu0  ;;  %v12882_v22 = vpop.f32.mrf.mxu1  ;;  %3648 = vmatmul.mubr.f32.vlgmr.msra.gmra.mxu0 %v8846_v51  ;;  %4049 = vmatmul.mubr.f32.vlgmr.msra.gmra.mxu1 %v8846_v51  ;;  %v12962_v30 = vld [vmem:[%s16752_s0 + $0x318] sm:$0xff] }
 0x334   :  { %17254 = vst [vmem:[#allocation50_spill] sm:$0xff] %v12868_v18  ;;  %17258 = vst [vmem:[#allocation7_spill] sm:$0xff] %v12873_v53  ;;  %7792 = vmatprep.mubr.msk.f32.mxu0 %vm170_vm0, %v8847_v16  ;;  %7840 = vmatprep.mubr.msk.f32.mxu1 %vm170_vm0, %v8847_v16  ;;  %v17264_v16 = vld [vmem:[#allocation32_spill] sm:$0xff] }
 0x335   :  { %v2849_v8 = vpop.f32.mrf.mxu0  ;;  %v3250_v58 = vpop.f32.mrf.mxu1  ;;  %4386 = vmatpush1.msra.mxu0 %v17259_v32  ;;  %4787 = vmatpush1.msra.mxu1 %v12878_v0  ;;  %v8856_v32 = vld [vmem:[%s16753_s1 + $0x50] sm:$0xff] }
 0x336   :  { %4387 = vmatprep.subr.mxu0 %v17260_v21  ;;  %4788 = vmatprep.subr.mxu1 %v17260_v21 }
 0x337   :  { %v12901_v33 = vpop.f32.mrf.mxu0  ;;  %v12903_v40 = vpop.f32.mrf.mxu1  ;;  %3653 = vmatmul.mubr.f32.gmra.mxu0 %v8848_v35  ;;  %4054 = vmatmul.mubr.f32.gmra.mxu1 %v8848_v35  ;;  %v7304_v35 = vld [vmem:[%s16756_s10 + $0x8] sm:$0x3] }
 0x338   :  { %7793 = vmatprep.mubr.msk.f32.mxu0 %vm170_vm0, %v8849_v20  ;;  %7841 = vmatprep.mubr.msk.f32.mxu1 %vm170_vm0, %v8849_v20  ;;  %v8857_v20 = vld [vmem:[%s16753_s1 + $0x68] sm:$0xff] }
 0x339   :  { %v2854_v31 = vpop.f32.mrf.mxu0  ;;  %v3255_v29 = vpop.f32.mrf.mxu1  ;;  %4388 = vmatpush1.msra.mxu0 %v17261_v13  ;;  %4789 = vmatpush1.msra.mxu1 %v12899_v47  ;;  %v17265_v13 = vld [vmem:[#allocation8_spill] sm:$0xff] }
 0x33a   :  { %4389 = vmatprep.subr.mxu0 %v17260_v21  ;;  %4790 = vmatprep.subr.mxu1 %v17260_v21 }
 0x33b   :  { %v12922_v50 = vpop.f32.mrf.mxu0  ;;  %v12924_v44 = vpop.f32.mrf.mxu1  ;;  %3658 = vmatmul.mubr.f32.gmra.mxu0 %v8850_v61  ;;  %4059 = vmatmul.mubr.f32.gmra.mxu1 %v8850_v61  ;;  %v13003_v61 = vld [vmem:[%s16752_s0 + $0x310] sm:$0xff] }
 0x33c   :  { %7794 = vmatprep.mubr.msk.f32.mxu0 %vm170_vm0, %v8851_v7  ;;  %7842 = vmatprep.mubr.msk.f32.mxu1 %vm170_vm0, %v8851_v7 }
 0x33d   :  { %v2859_v60 = vpop.f32.mrf.mxu0  ;;  %v3260_v2 = vpop.f32.mrf.mxu1  ;;  %4390 = vmatpush1.msra.mxu0 %v17262_v6  ;;  %4791 = vmatpush1.msra.mxu1 %v12920_v48  ;;  %v7278_v6 = vld [vmem:[%s16755_s8 + $0x8] sm:$0xff] }
 0x33e   :  { %4391 = vmatprep.subr.mxu0 %v17260_v21  ;;  %4792 = vmatprep.subr.mxu1 %v17260_v21  ;;  %v8858_v2 = vld [vmem:[%s16753_s1 + $0x60] sm:$0xff] }
 0x33f   :  { %v12943_v36 = vpop.f32.mrf.mxu0  ;;  %v12945_v52 = vpop.f32.mrf.mxu1  ;;  %3663 = vmatmul.mubr.f32.gmra.mxu0 %v8852_v15  ;;  %4064 = vmatmul.mubr.f32.gmra.mxu1 %v8852_v15  ;;  %v8859_v15 = vld [vmem:[%s16753_s1 + $0x78] sm:$0xff] }
 0x340   :  { %7795 = vmatprep.mubr.msk.f32.mxu0 %vm170_vm0, %v8853_v54  ;;  %7843 = vmatprep.mubr.msk.f32.mxu1 %vm170_vm0, %v8853_v54 }
 0x341   :  { %v2864_v59 = vpop.f32.mrf.mxu0  ;;  %v3265_v45 = vpop.f32.mrf.mxu1  ;;  %4392 = vmatpush1.msra.mxu0 %v17263_v55  ;;  %4793 = vmatpush1.msra.mxu1 %v12941_v49 }
 0x342   :  { %4393 = vmatprep.subr.mxu0 %v17260_v21  ;;  %4794 = vmatprep.subr.mxu1 %v17260_v21  ;;  %v17266_v45 = vld [vmem:[#allocation22_spill] sm:$0xff] }
 0x343   :  { %v12964_v14 = vpop.f32.mrf.mxu0  ;;  %v12966_v38 = vpop.f32.mrf.mxu1  ;;  %3668 = vmatmul.mubr.f32.gmra.mxu0 %v8854_v17  ;;  %4069 = vmatmul.mubr.f32.gmra.mxu1 %v8854_v17 }
 0x344   :  { %7796 = vmatprep.mubr.msk.f32.mxu0 %vm170_vm0, %v8855_v41  ;;  %7844 = vmatprep.mubr.msk.f32.mxu1 %vm170_vm0, %v8855_v41  ;;  %v13033_v41 = vld [vmem:[%s16752_s0 + $0x308] sm:$0xff] }
 0x345   :  { %v2869_v56 = vpop.f32.mrf.mxu0  ;;  %v3270_v51 = vpop.f32.mrf.mxu1  ;;  %4394 = vmatpush1.msra.mxu0 %v17264_v16  ;;  %4795 = vmatpush1.msra.mxu1 %v12962_v30 }
 0x346   :  { %4395 = vmatprep.subr.mxu0 %v17260_v21  ;;  %4796 = vmatprep.subr.mxu1 %v17260_v21  ;;  %v8861_v56 = vld [vmem:[%s16753_s1 + $0x88] sm:$0xff] }
 0x347   :  { %v12982_v8 = vpop.f32.mrf.mxu0  ;;  %v12984_v58 = vpop.f32.mrf.mxu1  ;;  %3673 = vmatmul.mubr.f32.gmra.mxu0 %v8856_v32  ;;  %4074 = vmatmul.mubr.f32.gmra.mxu1 %v8856_v32  ;;  %v17267_v32 = vld [vmem:[#allocation36_spill] sm:$0xff] }
 0x348   :  { %7797 = vmatprep.mubr.msk.f32.mxu0 %vm170_vm0, %v8857_v20  ;;  %7845 = vmatprep.mubr.msk.f32.mxu1 %vm170_vm0, %v8857_v20  ;;  %v7303_v20 = vld [vmem:[%s16756_s10] sm:$0xff] }
 0x349   :  { %v2874_v31 = vpop.f32.mrf.mxu0  ;;  %v3275_v29 = vpop.f32.mrf.mxu1  ;;  %4396 = vmatpush1.msra.mxu0 %v17265_v13  ;;  %7312 = vperm.xlu0 %8209, %v7304_v35   ;;  %v4368_v35 = vld [vmem:[%s16752_s0 + $0x2b8] sm:$0xff]  ;;  %v8862_v13 = vld [vmem:[%s16753_s1 + $0x80] sm:$0xff] }
 0x34a   :  { %4397 = vmatprep.subr.mxu0 %v17260_v21  ;;  %4797 = vmatpush1.msra.mxu1 %v13003_v61 }
 0x34b   :  { %v13005_v7 = vpop.f32.mrf.mxu0  ;;  %v13007_v60 = vpop.f32.mrf.mxu1  ;;  %3678 = vmatmul.mubr.f32.gmra.mxu0 %v8858_v2  ;;  %4079 = vmatmul.mubr.f32.gmra.mxu1 %v8858_v2  ;;  %v8863_v2 = vld [vmem:[%s16753_s1 + $0x98] sm:$0xff] }
 0x34c   :  { %7798 = vmatprep.mubr.msk.f32.mxu0 %vm170_vm0, %v8859_v15  ;;  %7846 = vmatprep.mubr.msk.f32.mxu1 %vm170_vm0, %v8859_v15 }
 0x34d   :  { %v2879_v54 = vpop.f32.mrf.mxu0  ;;  %v3280_v59 = vpop.f32.mrf.mxu1  ;;  %4398 = vmatpush1.msra.mxu0 %v17266_v45  ;;  %7287 = vperm.xlu1 %8210, %v7278_v6  }
 0x34e   :  { %4399 = vmatprep.subr.mxu0 %v17260_v21  ;;  %4798 = vmatprep.subr.mxu1 %v17260_v21  ;;  %v4367_v54 = vld [vmem:[%s16752_s0 + $0x2b0] sm:$0xff]  ;;  %v13070_v59 = vld [vmem:[%s16752_s0 + $0x300] sm:$0xff] }
 0x34f   :  { %v13023_v55 = vpop.f32.mrf.mxu0  ;;  %v13025_v17 = vpop.f32.mrf.mxu1  ;;  %3683 = vmatmul.mubr.f32.gmra.mxu0 %v8860_v1  ;;  %4084 = vmatmul.mubr.f32.gmra.mxu1 %v8860_v1 }
 0x350   :  { %7799 = vmatprep.mubr.msk.f32.mxu0 %vm170_vm0, %v8861_v56  ;;  %7847 = vmatprep.mubr.msk.f32.mxu1 %vm170_vm0, %v8861_v56  ;;  %v8864_v56 = vld [vmem:[%s16753_s1 + $0x90] sm:$0xff] }
 0x351   :  { %v2884_v51 = vpop.f32.mrf.mxu0  ;;  %v3285_v16 = vpop.f32.mrf.mxu1  ;;  %4400 = vmatpush1.msra.mxu0 %v17267_v32  ;;  %4799 = vmatpush1.msra.mxu1 %v13033_v41 }
 0x352   :  { %4401 = vmatprep.subr.mxu0 %v17260_v21  ;;  %7307 = vperm.xlu1 %8210, %v7303_v20   ;;  %v8865_v51 = vld [vmem:[%s16753_s1 + $0xa8] sm:$0xff]  ;;  %v4769_v20 = vld [vmem:[%s16752_s0 + $0x2f8] sm:$0xff] }
 0x353   :  { %v13050_v31 = vpop.f32.mrf.mxu0  ;;  %v13052_v29 = vpop.f32.mrf.mxu1  ;;  %3688 = vmatmul.mubr.f32.gmra.mxu0 %v8862_v13  ;;  %4089 = vmatmul.mubr.f32.gmra.mxu1 %v8862_v13 }
 0x354   :  { %7800 = vmatprep.mubr.msk.f32.mxu0 %vm170_vm0, %v8863_v2  ;;  %7848 = vmatprep.mubr.msk.f32.mxu1 %vm170_vm0, %v8863_v2 }
 0x355   :  { %v2889_v6 = vpop.f32.mrf.mxu0  ;;  %v3290_v15 = vpop.f32.mrf.mxu1  ;;  %4402 = vmatpush1.msra.mxu0 %v4368_v35  ;;  %4800 = vmatprep.subr.mxu1 %v17260_v21  ;;  %v4366_v35 = vld [vmem:[%s16752_s0 + $0x2a8] sm:$0xff] }
 0x356   :  { %4403 = vmatprep.subr.mxu0 %v17260_v21  ;;  %4801 = vmatpush1.msra.mxu1 %v13070_v59  ;;  %v8866_v6 = vld [vmem:[%s16753_s1 + $0xa0] sm:$0xff]  ;;  %v8867_v15 = vld [vmem:[%s16753_s1 + $0xb8] sm:$0xff] }
 0x357   :  { %v13072_v45 = vpop.f32.mrf.mxu0  ;;  %v13074_v1 = vpop.f32.mrf.mxu1  ;;  %3693 = vmatmul.mubr.f32.gmra.mxu0 %v8864_v56  ;;  %4094 = vmatmul.mubr.f32.gmra.mxu1 %v8864_v56 }
 0x358   :  { %17268 = vst [vmem:[#allocation73_spill] sm:$0xff] %v13072_v45  ;;  %17269 = vst [vmem:[#allocation74_spill] sm:$0xff] %v13074_v1  ;;  %7801 = vmatprep.mubr.msk.f32.mxu0 %vm170_vm0, %v8865_v51  ;;  %7849 = vmatprep.mubr.msk.f32.mxu1 %vm170_vm0, %v8865_v51  ;;  %v4365_v51 = vld [vmem:[%s16752_s0 + $0x2a0] sm:$0xff] }
 0x359   :  { %v2894_v16 = vpop.f32.mrf.mxu0  ;;  %v3295_v32 = vpop.f32.mrf.mxu1  ;;  %4404 = vmatpush1.msra.mxu0 %v4367_v54  ;;  %4802 = vmatprep.subr.mxu1 %v17260_v21 }
 0x35a   :  { %4405 = vmatprep.subr.mxu0 %v17260_v21  ;;  %4803 = vmatpush1.msra.mxu1 %v4769_v20  ;;  %v4768_v16 = vld [vmem:[%s16752_s0 + $0x2f0] sm:$0xff]  ;;  %v8869_v20 = vld [vmem:[%s16753_s1 + $0xc8] sm:$0xff] }
 0x35b   :  { %v13093_v13 = vpop.f32.mrf.mxu0  ;;  %v13095_v2 = vpop.f32.mrf.mxu1  ;;  %3698 = vmatmul.mubr.f32.gmra.mxu0 %v8866_v6  ;;  %4099 = vmatmul.mubr.f32.gmra.mxu1 %v8866_v6 }
 0x35c   :  { %17270 = vst [vmem:[#allocation19_spill] sm:$0xff] %v13093_v13  ;;  %17271 = vst [vmem:[#allocation21_spill] sm:$0xff] %v13095_v2  ;;  %7802 = vmatprep.mubr.msk.f32.mxu0 %vm170_vm0, %v8867_v15  ;;  %7850 = vmatprep.mubr.msk.f32.mxu1 %vm170_vm0, %v8867_v15 }
 0x35d   :  { %v2899_v54 = vpop.f32.mrf.mxu0  ;;  %v3300_v56 = vpop.f32.mrf.mxu1  ;;  %4406 = vmatpush1.msra.mxu0 %v4366_v35  ;;  %4804 = vmatprep.subr.mxu1 %v17260_v21  ;;  %v8868_v35 = vld [vmem:[%s16753_s1 + $0xb0] sm:$0xff] }
 0x35e   :  { %4407 = vmatprep.subr.mxu0 %v17260_v21  ;;  %4805 = vmatpush1.msra.mxu1 %v4768_v16  ;;  %v4364_v56 = vld [vmem:[%s16752_s0 + $0x298] sm:$0xff] }
 0x35f   :  { %v13113_v32 = vpop.f32.mrf.mxu0  ;;  %v13115_v6 = vpop.f32.mrf.mxu1  ;;  %3703 = vmatmul.mubr.f32.gmra.mxu0 %v8868_v35  ;;  %4104 = vmatmul.mubr.f32.gmra.mxu1 %v8868_v35  ;;  %v4767_v35 = vld [vmem:[%s16752_s0 + $0x2e8] sm:$0xff] }
 0x360   :  { %17272 = vst [vmem:[#allocation25_spill] sm:$0xff] %v13113_v32  ;;  %17273 = vst [vmem:[#allocation34_spill] sm:$0xff] %v13115_v6  ;;  %7803 = vmatprep.mubr.msk.f32.mxu0 %vm170_vm0, %v8869_v20  ;;  %7851 = vmatprep.mubr.msk.f32.mxu1 %vm170_vm0, %v8869_v20  ;;  %v4766_v20 = vld [vmem:[%s16752_s0 + $0x2e0] sm:$0xff] }
 0x361   :  { %v2904_v15 = vpop.f32.mrf.mxu0  ;;  %v3305_v54 = vpop.f32.mrf.mxu1  ;;  %4408 = vmatpush1.msra.mxu0 %v4365_v51  ;;  %4806 = vmatprep.subr.mxu1 %v17260_v21  ;;  %v8870_v51 = vld [vmem:[%s16753_s1 + $0xc0] sm:$0xff] }
 0x362   :  { %4409 = vmatprep.subr.mxu0 %v17260_v21  ;;  %v8871_v15 = vld [vmem:[%s16753_s1 + $0xd8] sm:$0xff]  ;;  %4807 = vmatpush1.msra.mxu1 %v4767_v35 }
 0x363   :  { %v13133_v39 = vpop.f32.mrf.mxu0  ;;  %v13135_v37 = vpop.f32.mrf.mxu1  ;;  %3708 = vmatmul.mubr.f32.gmra.mxu0 %v8870_v51  ;;  %4109 = vmatmul.mubr.f32.gmra.mxu1 %v8870_v51  ;;  %v4363_v51 = vld [vmem:[%s16752_s0 + $0x290] sm:$0xff]  ;;  %v4765_v35 = vld [vmem:[%s16752_s0 + $0x2d8] sm:$0xff] }
 0x364   :  { %7804 = vmatprep.mubr.msk.f32.mxu0 %vm170_vm0, %v8871_v15  ;;  %7852 = vmatprep.mubr.msk.f32.mxu1 %vm170_vm0, %v8871_v15  ;;  %v8873_v15 = vld [vmem:[%s16753_s1 + $0xe8] sm:$0xff] }
 0x365   :  { %v2909_v54 = vpop.f32.mrf.mxu0  ;;  %v3310_v43 = vpop.f32.mrf.mxu1  ;;  %4410 = vmatpush1.msra.mxu0 %v4364_v56  ;;  %4808 = vmatprep.subr.mxu1 %v17260_v21 }
 0x366   :  { %4411 = vmatprep.subr.mxu0 %v17260_v21  ;;  %v8872_v43 = vld [vmem:[%s16753_s1 + $0xd0] sm:$0xff]  ;;  %4809 = vmatpush1.msra.mxu1 %v4766_v20 }
 0x367   :  { %v13157_v16 = vpop.f32.mrf.mxu0  ;;  %v13159_v12 = vpop.f32.mrf.mxu1  ;;  %3713 = vmatmul.mubr.f32.gmra.mxu0 %v8872_v43  ;;  %4114 = vmatmul.mubr.f32.gmra.mxu1 %v8872_v43  ;;  %v4362_v43 = vld [vmem:[%s16752_s0 + $0x288] sm:$0xff] }
 0x368   :  { %7805 = vmatprep.mubr.msk.f32.mxu0 %vm170_vm0, %v8873_v15  ;;  %7853 = vmatprep.mubr.msk.f32.mxu1 %vm170_vm0, %v8873_v15  ;;  %v8875_v15 = vld [vmem:[%s16753_s1 + $0xf8] sm:$0xff] }
 0x369   :  { %v2914_v54 = vpop.f32.mrf.mxu0  ;;  %v3315_v42 = vpop.f32.mrf.mxu1  ;;  %4412 = vmatpush1.msra.mxu0 %v4363_v51  ;;  %4810 = vmatprep.subr.mxu1 %v17260_v21  ;;  %v4764_v51 = vld [vmem:[%s16752_s0 + $0x2d0] sm:$0xff] }
 0x36a   :  { %4413 = vmatprep.subr.mxu0 %v17260_v21  ;;  %v8874_v42 = vld [vmem:[%s16753_s1 + $0xe0] sm:$0xff]  ;;  %4811 = vmatpush1.msra.mxu1 %v4765_v35 }
 0x36b   :  { %v13181_v56 = vpop.f32.mrf.mxu0  ;;  %v13183_v24 = vpop.f32.mrf.mxu1  ;;  %3718 = vmatmul.mubr.f32.gmra.mxu0 %v8874_v42  ;;  %4119 = vmatmul.mubr.f32.gmra.mxu1 %v8874_v42  ;;  %v4361_v42 = vld [vmem:[%s16752_s0 + $0x280] sm:$0xff] }
 0x36c   :  { %7806 = vmatprep.mubr.msk.f32.mxu0 %vm170_vm0, %v8875_v15  ;;  %7854 = vmatprep.mubr.msk.f32.mxu1 %vm170_vm0, %v8875_v15  ;;  %v8877_v15 = vld [vmem:[%s16753_s1 + $0x108] sm:$0xff] }
 0x36d   :  { %v2919_v54 = vpop.f32.mrf.mxu0  ;;  %v3320_v34 = vpop.f32.mrf.mxu1  ;;  %4414 = vmatpush1.msra.mxu0 %v4362_v43  ;;  %4812 = vmatprep.subr.mxu1 %v17260_v21 }
 0x36e   :  { %4415 = vmatprep.subr.mxu0 %v17260_v21  ;;  %v8876_v34 = vld [vmem:[%s16753_s1 + $0xf0] sm:$0xff]  ;;  %4813 = vmatpush1.msra.mxu1 %v4764_v51 }
 0x36f   :  { %v13205_v20 = vpop.f32.mrf.mxu0  ;;  %v13207_v53 = vpop.f32.mrf.mxu1  ;;  %3723 = vmatmul.mubr.f32.gmra.mxu0 %v8876_v34  ;;  %4124 = vmatmul.mubr.f32.gmra.mxu1 %v8876_v34  ;;  %v4763_v34 = vld [vmem:[%s16752_s0 + $0x2c8] sm:$0xff] }
 0x370   :  { %7807 = vmatprep.mubr.msk.f32.mxu0 %vm170_vm0, %v8877_v15  ;;  %7855 = vmatprep.mubr.msk.f32.mxu1 %vm170_vm0, %v8877_v15  ;;  %v8878_v15 = vld [vmem:[%s16753_s1 + $0x100] sm:$0xff] }
 0x371   :  { %v2924_v54 = vpop.f32.mrf.mxu0  ;;  %v3325_v27 = vpop.f32.mrf.mxu1  ;;  %4416 = vmatpush1.msra.mxu0 %v4361_v42  ;;  %4814 = vmatprep.subr.mxu1 %v17260_v21  ;;  %v8879_v42 = vld [vmem:[%s16753_s1 + $0x118] sm:$0xff] }
 0x372   :  { %4433 = vmatprep.subr.mxu0 %v17260_v21  ;;  %4815 = vmatpush1.msra.mxu1 %v4763_v34  ;;  %v8881_v34 = vld [vmem:[%s16753_s1 + $0x128] sm:$0xff] }
 0x373   :  { %v13226_v43 = vpop.f32.mrf.mxu0  ;;  %v13228_v35 = vpop.f32.mrf.mxu1  ;;  %3728 = vmatmul.mubr.f32.gmra.mxu0 %v8878_v15  ;;  %4129 = vmatmul.mubr.f32.gmra.mxu1 %v8878_v15  ;;  %v4762_v15 = vld [vmem:[%s16752_s0 + $0x2c0] sm:$0xff] }
 0x374   :  { %7808 = vmatprep.mubr.msk.f32.mxu0 %vm170_vm0, %v8879_v42  ;;  %7856 = vmatprep.mubr.msk.f32.mxu1 %vm170_vm0, %v8879_v42  ;;  %v8880_v42 = vld [vmem:[%s16753_s1 + $0x110] sm:$0xff] }
 0x375   :  { %v2929_v54 = vpop.f32.mrf.mxu0  ;;  %v3330_v25 = vpop.f32.mrf.mxu1  ;;  %4434 = vmatpush2.msra.mxu0 %v12878_v0  ;;  %4816 = vmatprep.subr.mxu1 %v17260_v21 }
 0x376   :  { %4435 = vmatprep.subr.mxu0 %v17260_v21  ;;  %4817 = vmatpush1.msra.mxu1 %v4762_v15  ;;  %v8883_v15 = vld [vmem:[%s16753_s1 + $0x138] sm:$0xff] }
 0x377   :  { %v13248_v51 = vpop.f32.mrf.mxu0  ;;  %v13250_v27 = vpop.f32.mrf.mxu1  ;;  %3733 = vmatmul.mubr.f32.gmra.mxu0 %v8880_v42  ;;  %4134 = vmatmul.mubr.f32.gmra.mxu1 %v8880_v42  ;;  %v4785_v42 = vld [vmem:[%s16752_s0 + $0x378] sm:$0xff] }
 0x378   :  { %7809 = vmatprep.mubr.msk.f32.mxu0 %vm170_vm0, %v8881_v34  ;;  %7857 = vmatprep.mubr.msk.f32.mxu1 %vm170_vm0, %v8881_v34  ;;  %v8882_v34 = vld [vmem:[%s16753_s1 + $0x120] sm:$0xff] }
 0x379   :  { %v2934_v54 = vpop.f32.mrf.mxu0  ;;  %v3335_v46 = vpop.f32.mrf.mxu1  ;;  %4436 = vmatpush2.msra.mxu0 %v12899_v47  ;;  %4834 = vmatprep.subr.mxu1 %v17260_v21 }
 0x37a   :  { %4437 = vmatprep.subr.mxu0 %v17260_v21  ;;  %4835 = vmatpush2.msra.mxu1 %v4785_v42  ;;  %v8885_v42 = vld [vmem:[%s16753_s1 + $0x148] sm:$0xff] }
 0x37b   :  { %v13270_v0 = vpop.f32.mrf.mxu0  ;;  %v13272_v25 = vpop.f32.mrf.mxu1  ;;  %3738 = vmatmul.mubr.f32.gmra.mxu0 %v8882_v34  ;;  %4139 = vmatmul.mubr.f32.gmra.mxu1 %v8882_v34  ;;  %v4784_v34 = vld [vmem:[%s16752_s0 + $0x370] sm:$0xff] }
 0x37c   :  { %7810 = vmatprep.mubr.msk.f32.mxu0 %vm170_vm0, %v8883_v15  ;;  %7858 = vmatprep.mubr.msk.f32.mxu1 %vm170_vm0, %v8883_v15  ;;  %v8884_v15 = vld [vmem:[%s16753_s1 + $0x130] sm:$0xff] }
 0x37d   :  { %v2939_v54 = vpop.f32.mrf.mxu0  ;;  %v3340_v10 = vpop.f32.mrf.mxu1  ;;  %4438 = vmatpush2.msra.mxu0 %v12920_v48  ;;  %4836 = vmatprep.subr.mxu1 %v17260_v21 }
 0x37e   :  { %4439 = vmatprep.subr.mxu0 %v17260_v21  ;;  %4837 = vmatpush2.msra.mxu1 %v4784_v34  ;;  %v8887_v34 = vld [vmem:[%s16753_s1 + $0x158] sm:$0xff] }
 0x37f   :  { %v13292_v47 = vpop.f32.mrf.mxu0  ;;  %v13294_v46 = vpop.f32.mrf.mxu1  ;;  %3743 = vmatmul.mubr.f32.gmra.mxu0 %v8884_v15  ;;  %4144 = vmatmul.mubr.f32.gmra.mxu1 %v8884_v15  ;;  %v4783_v15 = vld [vmem:[%s16752_s0 + $0x368] sm:$0xff] }
 0x380   :  { %7811 = vmatprep.mubr.msk.f32.mxu0 %vm170_vm0, %v8885_v42  ;;  %7859 = vmatprep.mubr.msk.f32.mxu1 %vm170_vm0, %v8885_v42  ;;  %v8886_v42 = vld [vmem:[%s16753_s1 + $0x140] sm:$0xff] }
 0x381   :  { %v2944_v54 = vpop.f32.mrf.mxu0  ;;  %v3345_v28 = vpop.f32.mrf.mxu1  ;;  %4440 = vmatpush2.msra.mxu0 %v12941_v49  ;;  %4838 = vmatprep.subr.mxu1 %v17260_v21 }
 0x382   :  { %4441 = vmatprep.subr.mxu0 %v17260_v21  ;;  %4839 = vmatpush2.msra.mxu1 %v4783_v15  ;;  %v8889_v15 = vld [vmem:[%s16753_s1 + $0x168] sm:$0xff] }
 0x383   :  { %v13314_v48 = vpop.f32.mrf.mxu0  ;;  %v13316_v10 = vpop.f32.mrf.mxu1  ;;  %3748 = vmatmul.mubr.f32.gmra.mxu0 %v8886_v42  ;;  %4149 = vmatmul.mubr.f32.gmra.mxu1 %v8886_v42  ;;  %v4782_v42 = vld [vmem:[%s16752_s0 + $0x360] sm:$0xff] }
 0x384   :  { %7812 = vmatprep.mubr.msk.f32.mxu0 %vm170_vm0, %v8887_v34  ;;  %7860 = vmatprep.mubr.msk.f32.mxu1 %vm170_vm0, %v8887_v34  ;;  %v8888_v34 = vld [vmem:[%s16753_s1 + $0x150] sm:$0xff] }
 0x385   :  { %v2949_v54 = vpop.f32.mrf.mxu0  ;;  %v3350_v5 = vpop.f32.mrf.mxu1  ;;  %4442 = vmatpush2.msra.mxu0 %v12962_v30  ;;  %4840 = vmatprep.subr.mxu1 %v17260_v21 }
 0x386   :  { %4443 = vmatprep.subr.mxu0 %v17260_v21  ;;  %4841 = vmatpush2.msra.mxu1 %v4782_v42  ;;  %v8891_v42 = vld [vmem:[%s16753_s1 + $0x178] sm:$0xff] }
 0x387   :  { %v13336_v49 = vpop.f32.mrf.mxu0  ;;  %v13338_v28 = vpop.f32.mrf.mxu1  ;;  %3753 = vmatmul.mubr.f32.gmra.mxu0 %v8888_v34  ;;  %4154 = vmatmul.mubr.f32.gmra.mxu1 %v8888_v34  ;;  %v4781_v34 = vld [vmem:[%s16752_s0 + $0x358] sm:$0xff] }
 0x388   :  { %17274 = vst [vmem:[#allocation75_spill] sm:$0xff] %v13336_v49  ;;  %17275 = vst [vmem:[#allocation76_spill] sm:$0xff] %v13338_v28  ;;  %7813 = vmatprep.mubr.msk.f32.mxu0 %vm170_vm0, %v8889_v15  ;;  %7861 = vmatprep.mubr.msk.f32.mxu1 %vm170_vm0, %v8889_v15  ;;  %v8890_v15 = vld [vmem:[%s16753_s1 + $0x160] sm:$0xff]  ;;  %v8912_v28 = vld [vmem:[%s16753_s1 + $0x210] sm:$0xff] }
 0x389   :  { %v2954_v54 = vpop.f32.mrf.mxu0  ;;  %v3355_v23 = vpop.f32.mrf.mxu1  ;;  %4444 = vmatpush2.msra.mxu0 %v13003_v61  ;;  %4842 = vmatprep.subr.mxu1 %v17260_v21  ;;  %v8914_v49 = vld [vmem:[%s16753_s1 + $0x220] sm:$0xff] }
 0x38a   :  { %4445 = vmatprep.subr.mxu0 %v17260_v21  ;;  %4843 = vmatpush2.msra.mxu1 %v4781_v34  ;;  %v8893_v34 = vld [vmem:[%s16753_s1 + $0x188] sm:$0xff] }
 0x38b   :  { %v13358_v30 = vpop.f32.mrf.mxu0  ;;  %v13360_v5 = vpop.f32.mrf.mxu1  ;;  %3758 = vmatmul.mubr.f32.gmra.mxu0 %v8890_v15  ;;  %4159 = vmatmul.mubr.f32.gmra.mxu1 %v8890_v15  ;;  %v4780_v15 = vld [vmem:[%s16752_s0 + $0x350] sm:$0xff] }
 0x38c   :  { %17276 = vst [vmem:[#allocation31_spill] sm:$0xff] %v13358_v30  ;;  %17277 = vst [vmem:[#allocation24_spill] sm:$0xff] %v13360_v5  ;;  %7814 = vmatprep.mubr.msk.f32.mxu0 %vm170_vm0, %v8891_v42  ;;  %7862 = vmatprep.mubr.msk.f32.mxu1 %vm170_vm0, %v8891_v42  ;;  %v8892_v42 = vld [vmem:[%s16753_s1 + $0x170] sm:$0xff]  ;;  %v8910_v30 = vld [vmem:[%s16753_s1 + $0x200] sm:$0xff] }
 0x38d   :  { %v2959_v54 = vpop.f32.mrf.mxu0  ;;  %v3360_v19 = vpop.f32.mrf.mxu1  ;;  %4446 = vmatpush2.msra.mxu0 %v13033_v41  ;;  %4844 = vmatprep.subr.mxu1 %v17260_v21  ;;  %v8908_v5 = vld [vmem:[%s16753_s1 + $0x1f0] sm:$0xff] }
 0x38e   :  { %4447 = vmatprep.subr.mxu0 %v17260_v21  ;;  %4845 = vmatpush2.msra.mxu1 %v4780_v15 }
 0x38f   :  { %v13380_v61 = vpop.f32.mrf.mxu0  ;;  %v13382_v23 = vpop.f32.mrf.mxu1  ;;  %3763 = vmatmul.mubr.f32.gmra.mxu0 %v8892_v42  ;;  %4164 = vmatmul.mubr.f32.gmra.mxu1 %v8892_v42  ;;  %v4779_v42 = vld [vmem:[%s16752_s0 + $0x348] sm:$0xff] }
 0x390   :  { %17278 = vst [vmem:[#allocation26_spill] sm:$0xff] %v13380_v61  ;;  %17279 = vst [vmem:[#allocation27_spill] sm:$0xff] %v13382_v23  ;;  %7815 = vmatprep.mubr.msk.f32.mxu0 %vm170_vm0, %v8893_v34  ;;  %7863 = vmatprep.mubr.msk.f32.mxu1 %vm170_vm0, %v8893_v34  ;;  %v8894_v34 = vld [vmem:[%s16753_s1 + $0x180] sm:$0xff]  ;;  %v8904_v23 = vld [vmem:[%s16753_s1 + $0x1d0] sm:$0xff] }
 0x391   :  { %v2964_v54 = vpop.f32.mrf.mxu0  ;;  %v3365_v9 = vpop.f32.mrf.mxu1  ;;  %4448 = vmatpush2.msra.mxu0 %v13070_v59  ;;  %4846 = vmatprep.subr.mxu1 %v17260_v21  ;;  %v8906_v61 = vld [vmem:[%s16753_s1 + $0x1e0] sm:$0xff] }
 0x392   :  { %5595 = vmatprep.subr.mxu0 %v17260_v21  ;;  %v8895_v9 = vld [vmem:[%s16753_s1 + $0x198] sm:$0xff]  ;;  %4847 = vmatpush2.msra.mxu1 %v4779_v42  ;;  %v4778_v54 = vld [vmem:[%s16752_s0 + $0x340] sm:$0xff]  ;;  %v8897_v42 = vld [vmem:[%s16753_s1 + $0x1a8] sm:$0xff] }
 0x393   :  { %v13402_v41 = vpop.f32.mrf.mxu0  ;;  %v13404_v19 = vpop.f32.mrf.mxu1  ;;  %3768 = vmatmul.mubr.f32.gmra.mxu0 %v8894_v34  ;;  %4169 = vmatmul.mubr.f32.gmra.mxu1 %v8894_v34 }
 0x394   :  { %7816 = vmatprep.mubr.msk.f32.mxu0 %vm170_vm0, %v8895_v9  ;;  %7864 = vmatprep.mubr.msk.f32.mxu1 %vm170_vm0, %v8895_v9 }
 0x395   :  { %v2969_v59 = vpop.f32.mrf.mxu0  ;;  %v3370_v15 = vpop.f32.mrf.mxu1  ;;  %4848 = vmatprep.subr.mxu1 %v17260_v21 }
 0x396   :  { %4849 = vmatpush2.msra.mxu1 %v4778_v54 }
 0x397   :  { %v13418_v26 = vpop.f32.mrf.mxu0  ;;  %v13420_v34 = vpop.f32.mrf.mxu1  ;;  %3773 = vmatmul.mubr.f32.gmra.mxu0 %v8896_v63  ;;  %4174 = vmatmul.mubr.f32.gmra.mxu1 %v8896_v63  ;;  %v8898_v63 = vld [vmem:[%s16753_s1 + $0x1a0] sm:$0xff] }
 0x398   :  { %7817 = vmatprep.mubr.msk.f32.mxu0 %vm170_vm0, %v8897_v42  ;;  %7865 = vmatprep.mubr.msk.f32.mxu1 %vm170_vm0, %v8897_v42 }
 0x399   :  { %v2974_v9 = vpop.f32.mrf.mxu0  ;;  %v3375_v59 = vpop.f32.mrf.mxu1  ;;  %5820 = vmatprep.subr.mxu1 %v17260_v21 }
 0x39b   :  { %v13431_v15 = vpop.f32.mrf.mxu0  ;;  %v13433_v18 = vpop.f32.mrf.mxu1  ;;  %3778 = vmatmul.mubr.f32.gmra.mxu0 %v8898_v63  ;;  %4179 = vmatmul.mubr.f32.gmra.mxu1 %v8898_v63  ;;  %v8901_v63 = vld [vmem:[%s16753_s1 + $0x1c8] sm:$0xff] }
 0x39c   :  { %7818 = vmatprep.mubr.msk.f32.mxu0 %vm170_vm0, %v8899_v11  ;;  %7866 = vmatprep.mubr.msk.f32.mxu1 %vm170_vm0, %v8899_v11 }
 0x39d   :  { %v2979_v54 = vpop.f32.mrf.mxu0  ;;  %v3380_v42 = vpop.f32.mrf.mxu1 }
 0x39f   :  { %v13443_v9 = vpop.f32.mrf.mxu0  ;;  %v13445_v59 = vpop.f32.mrf.mxu1  ;;  %3783 = vmatmul.mubr.f32.gmra.mxu0 %v8900_v3  ;;  %4184 = vmatmul.mubr.f32.gmra.mxu1 %v8900_v3  ;;  %v8903_v3 = vld [vmem:[%s16753_s1 + $0x1d8] sm:$0xff] }
 0x3a0   :  { %7819 = vmatprep.mubr.msk.f32.mxu0 %vm170_vm0, %v8901_v63  ;;  %7867 = vmatprep.mubr.msk.f32.mxu1 %vm170_vm0, %v8901_v63 }
 0x3a1   :  { %v2984_v11 = vpop.f32.mrf.mxu0  ;;  %v3385_v54 = vpop.f32.mrf.mxu1 }
 0x3a3   :  { %v13455_v42 = vpop.f32.mrf.mxu0  ;;  %v13457_v57 = vpop.f32.mrf.mxu1  ;;  %3788 = vmatmul.mubr.f32.gmra.mxu0 %v8902_v4  ;;  %4189 = vmatmul.mubr.f32.gmra.mxu1 %v8902_v4  ;;  %v8905_v4 = vld [vmem:[%s16753_s1 + $0x1e8] sm:$0xff] }
 0x3a4   :  { %7820 = vmatprep.mubr.msk.f32.mxu0 %vm170_vm0, %v8903_v3  ;;  %7868 = vmatprep.mubr.msk.f32.mxu1 %vm170_vm0, %v8903_v3 }
 0x3a5   :  { %v2989_v63 = vpop.f32.mrf.mxu0  ;;  %v3390_v11 = vpop.f32.mrf.mxu1 }
 0x3a7   :  { %v13467_v54 = vpop.f32.mrf.mxu0  ;;  %v13469_v21 = vpop.f32.mrf.mxu1  ;;  %3793 = vmatmul.mubr.f32.gmra.mxu0 %v8904_v23  ;;  %4194 = vmatmul.mubr.f32.gmra.mxu1 %v8904_v23  ;;  %v8907_v23 = vld [vmem:[%s16753_s1 + $0x1f8] sm:$0xff] }
 0x3a8   :  { %7821 = vmatprep.mubr.msk.f32.mxu0 %vm170_vm0, %v8905_v4  ;;  %7869 = vmatprep.mubr.msk.f32.mxu1 %vm170_vm0, %v8905_v4 }
 0x3a9   :  { %v2994_v3 = vpop.f32.mrf.mxu0  ;;  %v3395_v63 = vpop.f32.mrf.mxu1 }
 0x3ab   :  { %v13479_v11 = vpop.f32.mrf.mxu0  ;;  %v13481_v6 = vpop.f32.mrf.mxu1  ;;  %3798 = vmatmul.mubr.f32.gmra.mxu0 %v8906_v61  ;;  %4199 = vmatmul.mubr.f32.gmra.mxu1 %v8906_v61  ;;  %v8909_v61 = vld [vmem:[%s16753_s1 + $0x208] sm:$0xff] }
 0x3ac   :  { %7822 = vmatprep.mubr.msk.f32.mxu0 %vm170_vm0, %v8907_v23  ;;  %7870 = vmatprep.mubr.msk.f32.mxu1 %vm170_vm0, %v8907_v23 }
 0x3ad   :  { %v2999_v4 = vpop.f32.mrf.mxu0  ;;  %v3400_v3 = vpop.f32.mrf.mxu1 }
 0x3af   :  { %v13491_v63 = vpop.f32.mrf.mxu0  ;;  %v13493_v32 = vpop.f32.mrf.mxu1  ;;  %3803 = vmatmul.mubr.f32.gmra.mxu0 %v8908_v5  ;;  %4204 = vmatmul.mubr.f32.gmra.mxu1 %v8908_v5  ;;  %v8911_v5 = vld [vmem:[%s16753_s1 + $0x218] sm:$0xff] }
 0x3b0   :  { %7823 = vmatprep.mubr.msk.f32.mxu0 %vm170_vm0, %v8909_v61  ;;  %7871 = vmatprep.mubr.msk.f32.mxu1 %vm170_vm0, %v8909_v61 }
 0x3b1   :  { %v3004_v23 = vpop.f32.mrf.mxu0  ;;  %v3405_v4 = vpop.f32.mrf.mxu1 }
 0x3b3   :  { %v13503_v3 = vpop.f32.mrf.mxu0  ;;  %v13505_v2 = vpop.f32.mrf.mxu1  ;;  %3808 = vmatmul.mubr.f32.gmra.mxu0 %v8910_v30  ;;  %4209 = vmatmul.mubr.f32.gmra.mxu1 %v8910_v30  ;;  %v8913_v30 = vld [vmem:[%s16753_s1 + $0x228] sm:$0xff] }
 0x3b4   :  { %7824 = vmatprep.mubr.msk.f32.mxu0 %vm170_vm0, %v8911_v5  ;;  %7872 = vmatprep.mubr.msk.f32.mxu1 %vm170_vm0, %v8911_v5 }
 0x3b5   :  { %v3009_v61 = vpop.f32.mrf.mxu0  ;;  %v3410_v23 = vpop.f32.mrf.mxu1 }
 0x3b7   :  { %v13515_v4 = vpop.f32.mrf.mxu0  ;;  %v13517_v13 = vpop.f32.mrf.mxu1  ;;  %3813 = vmatmul.mubr.f32.gmra.mxu0 %v8912_v28  ;;  %4214 = vmatmul.mubr.f32.gmra.mxu1 %v8912_v28  ;;  %v8915_v28 = vld [vmem:[%s16753_s1 + $0x238] sm:$0xff] }
 0x3b8   :  { %17280 = vst [vmem:[#allocation51_spill] sm:$0xff] %v13515_v4  ;;  %17281 = vst [vmem:[#allocation52_spill] sm:$0xff] %v13517_v13  ;;  %7825 = vmatprep.mubr.msk.f32.mxu0 %vm170_vm0, %v8913_v30  ;;  %7873 = vmatprep.mubr.msk.f32.mxu1 %vm170_vm0, %v8913_v30  ;;  %v8919_v13 = vld [vmem:[%s16753_s1 + $0x258] sm:$0xff] }
 0x3b9   :  { %v3014_v5 = vpop.f32.mrf.mxu0  ;;  %v3415_v61 = vpop.f32.mrf.mxu1 }
 0x3bb   :  { %v13527_v23 = vpop.f32.mrf.mxu0  ;;  %v13529_v1 = vpop.f32.mrf.mxu1  ;;  %3818 = vmatmul.mubr.f32.gmra.mxu0 %v8914_v49  ;;  %4219 = vmatmul.mubr.f32.gmra.mxu1 %v8914_v49  ;;  %v8917_v49 = vld [vmem:[%s16753_s1 + $0x248] sm:$0xff] }
 0x3bc   :  { %17282 = vst [vmem:[#allocation20_spill] sm:$0xff] %v13527_v23  ;;  %17283 = vst [vmem:[#allocation30_spill] sm:$0xff] %v13529_v1  ;;  %7826 = vmatprep.mubr.msk.f32.mxu0 %vm170_vm0, %v8915_v28  ;;  %7874 = vmatprep.mubr.msk.f32.mxu1 %vm170_vm0, %v8915_v28  ;;  %v8916_v1 = vld [vmem:[%s16753_s1 + $0x230] sm:$0xff] }
 0x3bd   :  { %v3019_v30 = vpop.f32.mrf.mxu0  ;;  %v3420_v5 = vpop.f32.mrf.mxu1 }
 0x3bf   :  { %v13539_v61 = vpop.f32.mrf.mxu0  ;;  %v13541_v23 = vpop.f32.mrf.mxu1  ;;  %3823 = vmatmul.mubr.f32.gmra.mxu0 %v8916_v1  ;;  %4224 = vmatmul.mubr.f32.gmra.mxu1 %v8916_v1 }
 0x3c0   :  { %17284 = vst [vmem:[#allocation32_spill] sm:$0xff] %v13539_v61  ;;  %17285 = vst [vmem:[#allocation8_spill] sm:$0xff] %v13541_v23  ;;  %7827 = vmatprep.mubr.msk.f32.mxu0 %vm170_vm0, %v8917_v49  ;;  %7875 = vmatprep.mubr.msk.f32.mxu1 %vm170_vm0, %v8917_v49  ;;  %v8918_v23 = vld [vmem:[%s16753_s1 + $0x240] sm:$0xff] }
 0x3c1   :  { %v3024_v28 = vpop.f32.mrf.mxu0  ;;  %v3425_v30 = vpop.f32.mrf.mxu1 }
 0x3c2   :  { %v17286_v30 = vmax.f32 %v12880_v62, %v13133_v39  ;;  %v8921_v39 = vld [vmem:[%s16753_s1 + $0x268] sm:$0xff] }
 0x3c3   :  { %v3027_v5 = vpop.f32.mrf.mxu0  ;;  %v3428_v61 = vpop.f32.mrf.mxu1  ;;  %3828 = vmatmul.mubr.f32.gmra.mxu0 %v8918_v23  ;;  %4229 = vmatmul.mubr.f32.gmra.mxu1 %v8918_v23 }
 0x3c4   :  { %v3098_v1 = vmax.f32 %v13402_v41, %v3027_v5  ;;  %v3499_v45 = vmax.f32 %v13404_v19, %v3428_v61  ;;  %7828 = vmatprep.mubr.msk.f32.mxu0 %vm170_vm0, %v8919_v13  ;;  %7876 = vmatprep.mubr.msk.f32.mxu1 %vm170_vm0, %v8919_v13  ;;  %v17288_v41 = vmax.f32 %v12882_v22, %v13135_v37  ;;  %v8920_v5 = vld [vmem:[%s16753_s1 + $0x250] sm:$0xff] }
 0x3c5   :  { %v3029_v49 = vpop.f32.mrf.mxu0  ;;  %v3430_v28 = vpop.f32.mrf.mxu1  ;;  %v17290_v22 = vmax.f32 %v12901_v33, %v13157_v16  ;;  %v8923_v33 = vld [vmem:[%s16753_s1 + $0x278] sm:$0xff]  ;;  %v17294_v16 = vmax.f32 %v12922_v50, %v13181_v56  ;;  %v8925_v50 = vld [vmem:[%s16753_s1 + $0x288] sm:$0xff]  ;;  %v17298_v56 = vmax.f32 %v12943_v36, %v13205_v20 }
 0x3c6   :  { %v13564_v4 = vmax.f32 %v17286_v30, %v3098_v1  ;;  %v13569_v23 = vmax.f32 %v17288_v41, %v3499_v45  ;;  %v8922_v30 = vld [vmem:[%s16753_s1 + $0x260] sm:$0xff] }
 0x3c7   :  { %v3032_v19 = vpop.f32.mrf.mxu0  ;;  %v3433_v61 = vpop.f32.mrf.mxu1  ;;  %3833 = vmatmul.mubr.f32.gmra.mxu0 %v8920_v5  ;;  %4234 = vmatmul.mubr.f32.gmra.mxu1 %v8920_v5 }
 0x3c8   :  { %17287 = vst [vmem:[#allocation22_spill] sm:$0xff] %v13564_v4  ;;  %17289 = vst [vmem:[#allocation36_spill] sm:$0xff] %v13569_v23  ;;  %v3099_v13 = vmax.f32 %v13418_v26, %v3032_v19  ;;  %v3500_v49 = vmax.f32 %v13420_v34, %v3433_v61  ;;  %7829 = vmatprep.mubr.msk.f32.mxu0 %vm170_vm0, %v8921_v39  ;;  %7877 = vmatprep.mubr.msk.f32.mxu1 %vm170_vm0, %v8921_v39 }
 0x3c9   :  { %v3034_v37 = vpop.f32.mrf.mxu0  ;;  %v3435_v62 = vpop.f32.mrf.mxu1  ;;  %v17292_v26 = vmax.f32 %v12903_v40, %v13159_v12 }
 0x3ca   :  { %v13584_v45 = vmax.f32 %v17290_v22, %v3099_v13 }
 0x3cb   :  { %v13589_v1 = vmax.f32 %v17292_v26, %v3500_v49  ;;  %v3037_v34 = vpop.f32.mrf.mxu0  ;;  %v3438_v28 = vpop.f32.mrf.mxu1  ;;  %3838 = vmatmul.mubr.f32.gmra.mxu0 %v8922_v30  ;;  %4239 = vmatmul.mubr.f32.gmra.mxu1 %v8922_v30  ;;  %v8924_v49 = vld [vmem:[%s16753_s1 + $0x270] sm:$0xff] }
 0x3cc   :  { %17291 = vst [vmem:[#allocation95_spill] sm:$0xff] %v13584_v45  ;;  %v3100_v41 = vmax.f32 %v13431_v15, %v3037_v34  ;;  %v3501_v19 = vmax.f32 %v13433_v18, %v3438_v28  ;;  %7830 = vmatprep.mubr.msk.f32.mxu0 %vm170_vm0, %v8923_v33  ;;  %7878 = vmatprep.mubr.msk.f32.mxu1 %vm170_vm0, %v8923_v33  ;;  %v8926_v34 = vld [vmem:[%s16753_s1 + $0x280] sm:$0xff]  ;;  %v13634_v28 = vpop.permute.xlu0 %673  ;;  %v17429_v45 = vld [vmem:[#allocation42_spill] sm:$0xff] }
 0x3cd   :  { %17293 = vst [vmem:[#allocation96_spill] sm:$0xff] %v13589_v1  ;;  %v3039_v12 = vpop.f32.mrf.mxu0  ;;  %v3440_v40 = vpop.f32.mrf.mxu1  ;;  %v17296_v15 = vmax.f32 %v12924_v44, %v13183_v24  ;;  %17302 = vst [vmem:[#allocation101_spill] sm:$0xff] %v13634_v28  ;;  %v17406_v1 = vld [vmem:[#allocation78_spill] sm:$0xff] }
 0x3ce   :  { %v13604_v61 = vmax.f32 %v17294_v16, %v3100_v41  ;;  %v13643_v41 = vpop.permute.xlu1 %663  ;;  %v8928_v16 = vld [vmem:[%s16753_s1 + $0x290] sm:$0xff] }
 0x3cf   :  { %v13609_v5 = vmax.f32 %v17296_v15, %v3501_v19  ;;  %v3042_v18 = vpop.f32.mrf.mxu0  ;;  %v3443_v13 = vpop.f32.mrf.mxu1  ;;  %3843 = vmatmul.mubr.f32.gmra.mxu0 %v8924_v49  ;;  %4244 = vmatmul.mubr.f32.gmra.mxu1 %v8924_v49  ;;  %17303 = vst [vmem:[#allocation102_spill] sm:$0xff] %v13643_v41  ;;  %v17304_v19 = vmax.f32 %v12964_v14, %v13226_v43  ;;  %v8929_v14 = vld [vmem:[%s16753_s1 + $0x2a8] sm:$0xff] }
 0x3d0   :  { %17295 = vst [vmem:[#allocation97_spill] sm:$0xff] %v13604_v61  ;;  %v3101_v39 = vmax.f32 %v13443_v9, %v3042_v18  ;;  %v3502_v37 = vmax.f32 %v13445_v59, %v3443_v13  ;;  %7831 = vmatprep.mubr.msk.f32.mxu0 %vm170_vm0, %v8925_v50  ;;  %7879 = vmatprep.mubr.msk.f32.mxu1 %vm170_vm0, %v8925_v50  ;;  %v13665_v43 = vpop.permute.xlu0 %668  ;;  %v8930_v50 = vld [vmem:[%s16753_s1 + $0x2a0] sm:$0xff] }
 0x3d1   :  { %17297 = vst [vmem:[#allocation98_spill] sm:$0xff] %v13609_v5  ;;  %v3044_v24 = vpop.f32.mrf.mxu0  ;;  %v3445_v44 = vpop.f32.mrf.mxu1  ;;  %v17300_v9 = vmax.f32 %v12945_v52, %v13207_v53  ;;  %v8927_v53 = vld [vmem:[%s16753_s1 + $0x298] sm:$0xff]  ;;  %17308 = vst [vmem:[#allocation105_spill] sm:$0xff] %v13665_v43  ;;  %v17309_v13 = vmax.f32 %v12982_v8, %v13248_v51 }
 0x3d2   :  { %v13624_v62 = vmax.f32 %v17298_v56, %v3101_v39  ;;  %v13680_v24 = vpop.permute.xlu1 %658  ;;  %v17314_v56 = vmax.f32 %v13005_v7, %v13270_v0 }
 0x3d3   :  { %v13629_v22 = vmax.f32 %v17300_v9, %v3502_v37  ;;  %v3047_v59 = vpop.f32.mrf.mxu0  ;;  %v3448_v26 = vpop.f32.mrf.mxu1  ;;  %3848 = vmatmul.mubr.f32.gmra.mxu0 %v8926_v34  ;;  %4249 = vmatmul.mubr.f32.gmra.mxu1 %v8926_v34  ;;  %17313 = vst [vmem:[#allocation108_spill] sm:$0xff] %v13680_v24  ;;  %v8932_v34 = vld [vmem:[%s16753_s1 + $0x2b0] sm:$0xff]  ;;  %v2721_v5 = vadd.f32 %v17406_v1, %v13680_v24  ;;  %v17409_v1 = vld [vmem:[#allocation59_spill] sm:$0xff] }
 0x3d4   :  { %17299 = vst [vmem:[#allocation99_spill] sm:$0xff] %v13624_v62  ;;  %v3102_v30 = vmax.f32 %v13455_v42, %v3047_v59  ;;  %v3503_v36 = vmax.f32 %v13457_v57, %v3448_v26  ;;  %7832 = vmatprep.mubr.msk.f32.mxu0 %vm170_vm0, %v8927_v53  ;;  %7880 = vmatprep.mubr.msk.f32.mxu1 %vm170_vm0, %v8927_v53 }
 0x3d5   :  { %17301 = vst [vmem:[#allocation100_spill] sm:$0xff] %v13629_v22  ;;  %v3049_v52 = vpop.f32.mrf.mxu0  ;;  %v3450_v20 = vpop.f32.mrf.mxu1  ;;  %v17306_v57 = vmax.f32 %v12966_v38, %v13228_v35 }
 0x3d6   :  { %v13648_v33 = vmax.f32 %v17304_v19, %v3102_v30  ;;  %v13702_v30 = vpop.permute.xlu0 %713  ;;  %v13713_v20 = vpop.permute.xlu1 %708  ;;  %v17321_v19 = vld [vmem:[#allocation23_spill] sm:$0xff] }
 0x3d7   :  { %v13653_v42 = vmax.f32 %v17306_v57, %v3503_v36  ;;  %v3052_v12 = vpop.f32.mrf.mxu0  ;;  %v3453_v40 = vpop.f32.mrf.mxu1  ;;  %3853 = vmatmul.mubr.f32.gmra.mxu0 %v8928_v16  ;;  %4254 = vmatmul.mubr.f32.gmra.mxu1 %v8928_v16  ;;  %17318 = vst [vmem:[#allocation111_spill] sm:$0xff] %v13702_v30  ;;  %v17326_v16 = vld [vmem:[#allocation14_spill] sm:$0xff] }
 0x3d8   :  { %17305 = vst [vmem:[#allocation103_spill] sm:$0xff] %v13648_v33  ;;  %v3103_v15 = vmax.f32 %v13467_v54, %v3052_v12  ;;  %v3504_v18 = vmax.f32 %v13469_v21, %v3453_v40  ;;  %7833 = vmatprep.mubr.msk.f32.mxu0 %vm170_vm0, %v8929_v14  ;;  %7881 = vmatprep.mubr.msk.f32.mxu1 %vm170_vm0, %v8929_v14 }
 0x3d9   :  { %17307 = vst [vmem:[#allocation104_spill] sm:$0xff] %v13653_v42  ;;  %v3054_v38 = vpop.f32.mrf.mxu0  ;;  %v3455_v35 = vpop.f32.mrf.mxu1  ;;  %v17311_v21 = vmax.f32 %v12984_v58, %v13250_v27  ;;  %v8931_v58 = vld [vmem:[%s16753_s1 + $0x2b8] sm:$0xff]  ;;  %v17324_v12 = vmax.f32 %v13025_v17, %v13294_v46  ;;  %v17411_v42 = vld [vmem:[#allocation57_spill] sm:$0xff] }
 0x3da   :  { %v13670_v49 = vmax.f32 %v17309_v13, %v3103_v15  ;;  %v1119_v15 = vadd.f32 %v17326_v16, %v13665_v43  ;;  %v8934_v38 = vld [vmem:[%s16753_s1 + $0x2c0] sm:$0xff]  ;;  %v8935_v46 = vld [vmem:[%s16753_s1 + $0x2d8] sm:$0xff] }
 0x3db   :  { %v13675_v54 = vmax.f32 %v17311_v21, %v3504_v18  ;;  %v3057_v39 = vpop.f32.mrf.mxu0  ;;  %v3458_v37 = vpop.f32.mrf.mxu1  ;;  %3858 = vmatmul.mubr.f32.gmra.mxu0 %v8930_v50  ;;  %4259 = vmatmul.mubr.f32.gmra.mxu1 %v8930_v50 }
 0x3dc   :  { %17310 = vst [vmem:[#allocation106_spill] sm:$0xff] %v13670_v49  ;;  %v3104_v44 = vmax.f32 %v13479_v11, %v3057_v39  ;;  %v3505_v8 = vmax.f32 %v13481_v6, %v3458_v37  ;;  %7834 = vmatprep.mubr.msk.f32.mxu0 %vm170_vm0, %v8931_v58  ;;  %7882 = vmatprep.mubr.msk.f32.mxu1 %vm170_vm0, %v8931_v58  ;;  %v13741_v39 = vpop.permute.xlu0 %703 }
 0x3dd   :  { %17312 = vst [vmem:[#allocation107_spill] sm:$0xff] %v13675_v54  ;;  %v3059_v27 = vpop.f32.mrf.mxu0  ;;  %v3460_v51 = vpop.f32.mrf.mxu1  ;;  %v17316_v11 = vmax.f32 %v13007_v60, %v13272_v25  ;;  %v8933_v60 = vld [vmem:[%s16753_s1 + $0x2c8] sm:$0xff]  ;;  %17328 = vst [vmem:[#allocation14_spill] sm:$0xff] %v13741_v39  ;;  %v17329_v37 = vmax.f32 %v13050_v31, %v13314_v48 }
 0x3de   :  { %v13692_v9 = vmax.f32 %v17314_v56, %v3104_v44  ;;  %v17319_v25 = vld [vmem:[#allocation16_spill] sm:$0xff]  ;;  %v8936_v51 = vld [vmem:[%s16753_s1 + $0x2d0] sm:$0xff]  ;;  %v13758_v31 = vpop.permute.xlu1 %698 }
 0x3df   :  { %v13697_v59 = vmax.f32 %v17316_v11, %v3505_v8  ;;  %v3062_v6 = vpop.f32.mrf.mxu0  ;;  %v3463_v26 = vpop.f32.mrf.mxu1  ;;  %3863 = vmatmul.mubr.f32.gmra.mxu0 %v8932_v34  ;;  %4264 = vmatmul.mubr.f32.gmra.mxu1 %v8932_v34  ;;  %v1120_v0 = vadd.f32 %v17319_v25, %v13634_v28  ;;  %17320 = vst [vmem:[#allocation16_spill] sm:$0xff] %v13713_v20  ;;  %v17333_v44 = vld [vmem:[#allocation12_spill] sm:$0xff]  ;;  %v17338_v34 = vld [vmem:[#allocation10_spill] sm:$0xff] }
 0x3e0   :  { %17315 = vst [vmem:[#allocation109_spill] sm:$0xff] %v13692_v9  ;;  %v3105_v36 = vmax.f32 %v13491_v63, %v3062_v6  ;;  %v3506_v7 = vmax.f32 %v13493_v32, %v3463_v26  ;;  %7835 = vmatprep.mubr.msk.f32.mxu0 %vm170_vm0, %v8933_v60  ;;  %7883 = vmatprep.mubr.msk.f32.mxu1 %vm170_vm0, %v8933_v60  ;;  %17334 = vst [vmem:[#allocation12_spill] sm:$0xff] %v13758_v31  ;;  %v17335_v48 = vld [vmem:[#allocation48_spill] sm:$0xff]  ;;  %v17339_v25 = vld [vmem:[#allocation70_spill] sm:$0xff] }
 0x3e1   :  { %17317 = vst [vmem:[#allocation110_spill] sm:$0xff] %v13697_v59  ;;  %v3064_v53 = vpop.f32.mrf.mxu0  ;;  %v3465_v52 = vpop.f32.mrf.mxu1  ;;  %v1930_v63 = vadd.f32 %v17321_v19, %v13702_v30  ;;  %v17322_v32 = vmax.f32 %v13023_v55, %v13292_v47  ;;  %v17327_v55 = vld [vmem:[#allocation35_spill] sm:$0xff]  ;;  %8211 = vtanh.f32 %v1120_v0  ;;  %v1118_v8 = vadd.f32 %v17333_v44, %v13643_v41  ;;  %v17337_v11 = vld [vmem:[#allocation52_spill] sm:$0xff] }
 0x3e2   :  { %v13725_v40 = vmax.f32 %v17324_v12, %v3506_v7  ;;  %v1929_v47 = vadd.f32 %v17327_v55, %v13713_v20  ;;  %v1928_v56 = vadd.f32 %v17335_v48, %v13741_v39  ;;  %v8937_v26 = vld [vmem:[%s16753_s1 + $0x2e8] sm:$0xff]  ;;  %v1927_v0 = vadd.f32 %v17339_v25, %v13758_v31  ;;  %v17340_v53 = vld [vmem:[#allocation73_spill] sm:$0xff]  ;;  %v17341_v52 = vld [vmem:[#allocation75_spill] sm:$0xff]  ;;  %v13786_v55 = vpop.permute.xlu0 %693 }
 0x3e3   :  { %v13720_v57 = vmax.f32 %v17322_v32, %v3105_v36  ;;  %v3067_v18 = vpop.f32.mrf.mxu0  ;;  %v3468_v14 = vpop.f32.mrf.mxu1  ;;  %3868 = vmatmul.mubr.f32.gmra.mxu0 %v8934_v38  ;;  %4269 = vmatmul.mubr.f32.gmra.mxu1 %v8934_v38  ;;  %8213 = vtanh.f32 %v1930_v63  ;;  %v1117_v36 = vadd.f32 %v17338_v34, %v13680_v24  ;;  %v17342_v19 = vmax.f32 %v17340_v53, %v17341_v52  ;;  %v17344_v32 = vld [vmem:[#allocation74_spill] sm:$0xff]  ;;  %v17345_v12 = vld [vmem:[#allocation76_spill] sm:$0xff]  ;;  %v8938_v38 = vld [vmem:[%s16753_s1 + $0x2e0] sm:$0xff] }
 0x3e4   :  { %17325 = vst [vmem:[#allocation112_spill] sm:$0xff] %v13725_v40  ;;  %v3106_v35 = vmax.f32 %v13503_v3, %v3067_v18  ;;  %v3507_v17 = vmax.f32 %v13505_v2, %v3468_v14  ;;  %7836 = vmatprep.mubr.msk.f32.mxu0 %vm170_vm0, %v8935_v46  ;;  %7884 = vmatprep.mubr.msk.f32.mxu1 %vm170_vm0, %v8935_v46  ;;  %8215 = vtanh.f32 %v1119_v15  ;;  %17348 = vst [vmem:[#allocation52_spill] sm:$0xff] %v13786_v55  ;;  %v17355_v48 = vld [vmem:[#allocation31_spill] sm:$0xff]  ;;  %v17362_v34 = vld [vmem:[#allocation17_spill] sm:$0xff] }
 0x3e5   :  { %17323 = vst [vmem:[#allocation23_spill] sm:$0xff] %v13720_v57  ;;  %v3069_v13 = vpop.f32.mrf.mxu0  ;;  %v3470_v21 = vpop.f32.mrf.mxu1  ;;  %v17331_v2 = vmax.f32 %v13052_v29, %v13316_v10  ;;  %8217 = vtanh.f32 %v1929_v47  ;;  %v17336_v29 = vld [vmem:[#allocation51_spill] sm:$0xff]  ;;  %v17346_v16 = vmax.f32 %v17344_v32, %v17345_v12  ;;  %v17349_v47 = vld [vmem:[#allocation20_spill] sm:$0xff]  ;;  %v8940_v25 = vld [vmem:[%s16753_s1 + $0x2f0] sm:$0xff] }
 0x3e6   :  { %v13746_v3 = vmax.f32 %v17329_v37, %v3106_v35  ;;  %8219 = vtanh.f32 %v1118_v8  ;;  %v8939_v13 = vld [vmem:[%s16753_s1 + $0x2f8] sm:$0xff]  ;;  %v13797_v8 = vpop.permute.xlu1 %688  ;;  %v17364_v52 = vld [vmem:[#allocation32_spill] sm:$0xff]  ;;  %v8984_v57 = vld [vmem:[%s16753_s1 + $0x150] sm:$0xff] }
 0x3e7   :  { %v13751_v50 = vmax.f32 %v17331_v2, %v3507_v17  ;;  %v3072_v58 = vpop.f32.mrf.mxu0  ;;  %v3473_v27 = vpop.f32.mrf.mxu1  ;;  %3873 = vmatmul.mubr.f32.gmra.mxu0 %v8936_v51  ;;  %4274 = vmatmul.mubr.f32.gmra.mxu1 %v8936_v51  ;;  %8221 = vtanh.f32 %v1928_v56  ;;  %v17350_v17 = vld [vmem:[#allocation30_spill] sm:$0xff]  ;;  %17352 = vst [vmem:[#allocation10_spill] sm:$0xff] %v13797_v8  ;;  %v17354_v51 = vld [vmem:[#allocation19_spill] sm:$0xff]  ;;  %v17365_v32 = vld [vmem:[#allocation8_spill] sm:$0xff] }
 0x3e8   :  { %17330 = vst [vmem:[#allocation35_spill] sm:$0xff] %v13746_v3  ;;  %v3107_v10 = vmax.f32 %v17336_v29, %v3072_v58  ;;  %v3508_v6 = vmax.f32 %v17337_v11, %v3473_v27  ;;  %7837 = vmatprep.mubr.msk.f32.mxu0 %vm170_vm0, %v8937_v26  ;;  %7885 = vmatprep.mubr.msk.f32.mxu1 %vm170_vm0, %v8937_v26  ;;  %8223 = vtanh.f32 %v1117_v36  ;;  %v17351_v21 = vld [vmem:[#allocation18_spill] sm:$0xff]  ;;  %v17353_v58 = vld [vmem:[#allocation68_spill] sm:$0xff] }
 0x3e9   :  { %17332 = vst [vmem:[#allocation113_spill] sm:$0xff] %v13751_v50  ;;  %v3074_v7 = vpop.f32.mrf.mxu0  ;;  %v3475_v60 = vpop.f32.mrf.mxu1  ;;  %v727_v37 = vadd.f32 %v13702_v30, %v17351_v21  ;;  %v1926_v27 = vadd.f32 %v17353_v58, %v13786_v55  ;;  %8225 = vtanh.f32 %v1927_v0  ;;  %v17356_v56 = vmax.f32 %v17354_v51, %v17355_v48  ;;  %v17359_v11 = vld [vmem:[#allocation24_spill] sm:$0xff]  ;;  %v17363_v0 = vld [vmem:[#allocation66_spill] sm:$0xff] }
 0x3ea   :  { %v13776_v63 = vmax.f32 %v17342_v19, %v3107_v10  ;;  %v13781_v15 = vmax.f32 %v17346_v16, %v3508_v6  ;;  %v17358_v10 = vld [vmem:[#allocation21_spill] sm:$0xff]  ;;  %v726_v36 = vadd.f32 %v13713_v20, %v17362_v34  ;;  %v1925_v53 = vadd.f32 %v17363_v0, %v13797_v8  ;;  %v8941_v16 = vld [vmem:[%s16753_s1 + $0x8] sm:$0xff]  ;;  %v17371_v21 = vld [vmem:[#allocation34_spill] sm:$0xff] }
 0x3eb   :  { %v3077_v18 = vpop.f32.mrf.mxu0  ;;  %v3478_v14 = vpop.f32.mrf.mxu1  ;;  %3878 = vmatmul.mubr.f32.gmra.mxu0 %v8938_v38  ;;  %4279 = vmatmul.mubr.f32.gmra.mxu1 %v8938_v38  ;;  %v17360_v6 = vmax.f32 %v17358_v10, %v17359_v11  ;;  %8227 = vtanh.f32 %v727_v37  ;;  %v17375_v37 = vld [vmem:[#allocation3_spill] sm:$0xff]  ;;  %v17377_v34 = vld [vmem:[#allocation64_spill] sm:$0xff]  ;;  %v17379_v0 = vmov 0.0  }
 0x3ec   :  { %17343 = vst [vmem:[#allocation48_spill] sm:$0xff] %v13776_v63  ;;  %17347 = vst [vmem:[#allocation51_spill] sm:$0xff] %v13781_v15  ;;  %v3108_v35 = vmax.f32 %v17349_v47, %v3077_v18  ;;  %v3509_v46 = vmax.f32 %v17350_v17, %v3478_v14  ;;  %7838 = vmatprep.mubr.msk.f32.mxu0 %vm170_vm0, %v8939_v13  ;;  %7886 = vmatprep.mubr.msk.f32.mxu1 %vm170_vm0, %v8939_v13  ;;  %v13825_v47 = vpop.permute.xlu0 %683  ;;  %8229 = vtanh.f32 %v1926_v27  ;;  %v17368_v17 = vld [vmem:[#allocation26_spill] sm:$0xff]  ;;  %v8942_v27 = vld [vmem:[%s16753_s1] sm:$0xff] }
 0x3ed   :  { %v3079_v2 = vpop.f32.mrf.mxu0  ;;  %v3480_v44 = vpop.f32.mrf.mxu1  ;;  %17366 = vst [vmem:[#allocation75_spill] sm:$0xff] %v13825_v47  ;;  %v725_v48 = vadd.f32 %v13741_v39, %v17375_v37  ;;  %8231 = vtanh.f32 %v726_v36  ;;  %v17420_v15 = vld [vmem:[#allocation91_spill] sm:$0xff] }
 0x3ee   :  { %v13804_v29 = vmax.f32 %v17356_v56, %v3108_v35  ;;  %v13809_v26 = vmax.f32 %v17360_v6, %v3509_v46  ;;  %v8212_v38 = vpop.eup %8211  ;;  %v17367_v35 = vld [vmem:[#allocation25_spill] sm:$0xff]  ;;  %v17372_v2 = vld [vmem:[#allocation27_spill] sm:$0xff]  ;;  %v13846_v6 = vpop.permute.xlu1 %678  ;;  %8233 = vtanh.f32 %v1925_v53  ;;  %v8943_v53 = vld [vmem:[%s16753_s1 + $0x18] sm:$0xff] }
 0x3ef   :  { %v3082_v7 = vpop.f32.mrf.mxu0  ;;  %v3483_v60 = vpop.f32.mrf.mxu1  ;;  %3883 = vmatmul.mubr.f32.gmra.mxu0 %v8940_v25  ;;  %4284 = vmatmul.mubr.f32.gmra.mxu1 %v8940_v25  ;;  %v17369_v46 = vmax.f32 %v17367_v35, %v17368_v17  ;;  %v17373_v44 = vmax.f32 %v17371_v21, %v17372_v2  ;;  %17376 = vst [vmem:[#allocation20_spill] sm:$0xff] %v13846_v6  ;;  %8235 = vtanh.f32 %v725_v48  ;;  %v17381_v35 = vld [vmem:[#allocation43_spill] sm:$0xff] }
 0x3f0   :  { %17357 = vst [vmem:[#allocation70_spill] sm:$0xff] %v13804_v29  ;;  %17361 = vst [vmem:[#allocation73_spill] sm:$0xff] %v13809_v26  ;;  %v3109_v19 = vmax.f32 %v17364_v52, %v3082_v7  ;;  %v3510_v12 = vmax.f32 %v17365_v32, %v3483_v60  ;;  %7887 = vmatprep.mubr.msk.f32.mxu0 %vm170_vm0, %v8941_v16  ;;  %7935 = vmatprep.mubr.msk.f32.mxu1 %vm170_vm0, %v8941_v16  ;;  %v8214_v51 = vpop.eup %8213  ;;  %v17378_v60 = vld [vmem:[#allocation45_spill] sm:$0xff]  ;;  %v17380_v32 = vld [vmem:[#allocation62_spill] sm:$0xff] }
 0x3f1   :  { %v3084_v18 = vpop.f32.mrf.mxu0  ;;  %v3485_v14 = vpop.f32.mrf.mxu1  ;;  %v1924_v7 = vadd.f32 %v17377_v34, %v13825_v47  ;;  %v724_v25 = vadd.f32 %v13758_v31, %v17378_v60  ;;  %v723_v17 = vadd.f32 %v13786_v55, %v17381_v35  ;;  %v17421_v26 = vld [vmem:[#allocation28_spill] sm:$0xff] }
 0x3f2   :  { %v13830_v13 = vmax.f32 %v17369_v46, %v3109_v19  ;;  %v13835_v58 = vmax.f32 %v17373_v44, %v3510_v12  ;;  %v8216_v11 = vpop.eup %8215  ;;  %v1923_v12 = vadd.f32 %v17380_v32, %v13846_v6  ;;  %v8944_v46 = vld [vmem:[%s16753_s1 + $0x10] sm:$0xff] }
 0x3f3   :  { %v13839_v56 = vpop.f32.mrf.mxu0  ;;  %v13841_v10 = vpop.f32.mrf.mxu1  ;;  %4450 = vmatmul.mubr.f32.vlgmr.msra.gmra.mxu0 %v8942_v27  ;;  %4851 = vmatmul.mubr.f32.vlgmr.msra.gmra.mxu1 %v8942_v27  ;;  %8237 = vtanh.f32 %v1924_v7  ;;  %v17383_v27 = vld [vmem:[#allocation41_spill] sm:$0xff] }
 0x3f4   :  { %17370 = vst [vmem:[#allocation74_spill] sm:$0xff] %v13830_v13  ;;  %17374 = vst [vmem:[#allocation76_spill] sm:$0xff] %v13835_v58  ;;  %5596 = vmatpush1.msra.mxu0 %v8212_v38  ;;  %5821 = vmatpush1.msra.mxu1 %v8214_v51  ;;  %v8218_v36 = vpop.eup %8217  ;;  %8239 = vtanh.f32 %v724_v25  ;;  %v17382_v51 = vld [vmem:[#allocation60_spill] sm:$0xff] }
 0x3f5   :  { %5597 = vmatprep.subr.mxu0 %v17379_v0  ;;  %5822 = vmatprep.subr.mxu1 %v17379_v0  ;;  %v3651_v52 = vpop.f32.mrf.mxu0  ;;  %v4052_v19 = vpop.f32.mrf.mxu1  ;;  %v1922_v37 = vadd.f32 %v17382_v51, %v13634_v28  ;;  %8241 = vtanh.f32 %v1923_v12  ;;  %v8945_v25 = vld [vmem:[%s16753_s1 + $0x28] sm:$0xff]  ;;  %v17387_v51 = vld [vmem:[#allocation37_spill] sm:$0xff] }
 0x3f6   :  { %5598 = vmatpush1.msra.mxu0 %v8216_v11  ;;  %5823 = vmatpush1.msra.mxu1 %v8218_v36  ;;  %v8220_v14 = vpop.eup %8219  ;;  %v722_v11 = vadd.f32 %v13797_v8, %v17383_v27  ;;  %v17384_v36 = vld [vmem:[#allocation58_spill] sm:$0xff]  ;;  %8243 = vtanh.f32 %v723_v17 }
 0x3f7   :  { %7888 = vmatprep.mubr.msk.f32.mxu0 %vm170_vm0, %v8943_v53  ;;  %7936 = vmatprep.mubr.msk.f32.mxu1 %vm170_vm0, %v8943_v53  ;;  %v13861_v16 = vpop.f32.mrf.mxu0  ;;  %v13863_v18 = vpop.f32.mrf.mxu1  ;;  %v1921_v60 = vadd.f32 %v17384_v36, %v13665_v43  ;;  %8245 = vtanh.f32 %v1922_v37  ;;  %v17385_v53 = vld [vmem:[#allocation39_spill] sm:$0xff]  ;;  %v720_v37 = vadd.f32 %v13846_v6, %v17387_v51 }
 0x3f8   :  { %5599 = vmatprep.subr.mxu0 %v17379_v0  ;;  %5824 = vmatprep.subr.mxu1 %v17379_v0  ;;  %v8222_v38 = vpop.eup %8221  ;;  %8247 = vtanh.f32 %v722_v11  ;;  %v17388_v11 = vld [vmem:[#allocation54_spill] sm:$0xff] }
 0x3f9   :  { %4455 = vmatmul.mubr.f32.gmra.mxu0 %v8944_v46  ;;  %4856 = vmatmul.mubr.f32.gmra.mxu1 %v8944_v46  ;;  %v3656_v21 = vpop.f32.mrf.mxu0  ;;  %v4057_v2 = vpop.f32.mrf.mxu1  ;;  %8249 = vtanh.f32 %v1921_v60  ;;  %v1919_v36 = vadd.f32 %v17388_v11, %v13680_v24  ;;  %v8947_v60 = vld [vmem:[%s16753_s1 + $0x38] sm:$0xff] }
 0x3fa   :  { %v8224_v44 = vpop.eup %8223  ;;  %5600 = vmatpush1.msra.mxu0 %v8220_v14  ;;  %5825 = vmatpush1.msra.mxu1 %v8222_v38  ;;  %v721_v14 = vadd.f32 %v13825_v47, %v17385_v53  ;;  %v8946_v38 = vld [vmem:[%s16753_s1 + $0x20] sm:$0xff]  ;;  %v17386_v21 = vld [vmem:[#allocation56_spill] sm:$0xff] }
 0x3fb   :  { %v8226_v48 = vpop.eup %8225  ;;  %5601 = vmatprep.subr.mxu0 %v17379_v0  ;;  %5826 = vmatprep.subr.mxu1 %v17379_v0  ;;  %v13878_v34 = vpop.f32.mrf.mxu0  ;;  %v1920_v2 = vadd.f32 %v17386_v21, %v13643_v41 }
 0x3fc   :  { %v13880_v7 = vpop.f32.mrf.mxu1  ;;  %5602 = vmatpush1.msra.mxu0 %v8224_v44  ;;  %5827 = vmatpush1.msra.mxu1 %v8226_v48  ;;  %v8228_v32 = vpop.eup %8227  ;;  %8251 = vtanh.f32 %v721_v14  ;;  %v8948_v14 = vld [vmem:[%s16753_s1 + $0x30] sm:$0xff] }
 0x3fd   :  { %7889 = vmatprep.mubr.msk.f32.mxu0 %vm170_vm0, %v8945_v25  ;;  %7937 = vmatprep.mubr.msk.f32.mxu1 %vm170_vm0, %v8945_v25  ;;  %v3661_v52 = vpop.f32.mrf.mxu0  ;;  %v8230_v12 = vpop.eup %8229  ;;  %8253 = vtanh.f32 %v1920_v2  ;;  %v17390_v2 = vld [vmem:[#allocation6_spill] sm:$0xff] }
 0x3fe   :  { %v4062_v19 = vpop.f32.mrf.mxu1  ;;  %5603 = vmatprep.subr.mxu0 %v17379_v0  ;;  %5828 = vmatprep.subr.mxu1 %v17379_v0  ;;  %v8232_v46 = vpop.eup %8231  ;;  %8255 = vtanh.f32 %v720_v37 }
 0x3ff   :  { %4460 = vmatmul.mubr.f32.gmra.mxu0 %v8946_v38  ;;  %4861 = vmatmul.mubr.f32.gmra.mxu1 %v8946_v38  ;;  %v13896_v35 = vpop.f32.mrf.mxu0  ;;  %v8234_v44 = vpop.eup %8233  ;;  %8257 = vtanh.f32 %v1919_v36 }
 0x400   :  { %v13898_v17 = vpop.f32.mrf.mxu1  ;;  %5604 = vmatpush1.msra.mxu0 %v8228_v32  ;;  %5829 = vmatpush1.msra.mxu1 %v8230_v12  ;;  %v8236_v19 = vpop.eup %8235  ;;  %v17389_v12 = vld [vmem:[#allocation15_spill] sm:$0xff] }
 0x401   :  { %5605 = vmatprep.subr.mxu0 %v17379_v0  ;;  %5830 = vmatprep.subr.mxu1 %v17379_v0  ;;  %v3666_v48 = vpop.f32.mrf.mxu0  ;;  %v8238_v32 = vpop.eup %8237  ;;  %v719_v53 = vadd.f32 %v13634_v28, %v17389_v12 }
 0x402   :  { %v4067_v27 = vpop.f32.mrf.mxu1  ;;  %5606 = vmatpush1.msra.mxu0 %v8232_v46  ;;  %5831 = vmatpush1.msra.mxu1 %v8234_v44  ;;  %v8240_v21 = vpop.eup %8239  ;;  %v1529_v44 = vadd.f32 %v17390_v2, %v13702_v30  ;;  %v17391_v48 = vld [vmem:[#allocation13_spill] sm:$0xff] }
 0x403   :  { %7890 = vmatprep.mubr.msk.f32.mxu0 %vm170_vm0, %v8947_v60  ;;  %7938 = vmatprep.mubr.msk.f32.mxu1 %vm170_vm0, %v8947_v60  ;;  %v13913_v25 = vpop.f32.mrf.mxu0  ;;  %v8242_v51 = vpop.eup %8241  ;;  %v718_v27 = vadd.f32 %v13665_v43, %v17391_v48  ;;  %v17392_v60 = vld [vmem:[#allocation5_spill] sm:$0xff]  ;;  %8259 = vtanh.f32 %v719_v53  ;;  %v17394_v48 = vld [vmem:[#allocation47_spill] sm:$0xff] }
 0x404   :  { %v13915_v52 = vpop.f32.mrf.mxu1  ;;  %5607 = vmatprep.subr.mxu0 %v17379_v0  ;;  %5832 = vmatprep.subr.mxu1 %v17379_v0  ;;  %v1528_v36 = vadd.f32 %v17392_v60, %v13713_v20  ;;  %8261 = vtanh.f32 %v1529_v44  ;;  %v1527_v60 = vadd.f32 %v17394_v48, %v13741_v39 }
 0x405   :  { %4465 = vmatmul.mubr.f32.gmra.mxu0 %v8948_v14  ;;  %4866 = vmatmul.mubr.f32.gmra.mxu1 %v8948_v14  ;;  %v3671_v38 = vpop.f32.mrf.mxu0  ;;  %v8244_v14 = vpop.eup %8243  ;;  %8263 = vtanh.f32 %v718_v27 }
 0x406   :  { %v4072_v46 = vpop.f32.mrf.mxu1  ;;  %5608 = vmatpush1.msra.mxu0 %v8236_v19  ;;  %5833 = vmatpush1.msra.mxu1 %v8238_v32  ;;  %v8949_v19 = vld [vmem:[%s16753_s1 + $0x48] sm:$0xff]  ;;  %v8246_v38 = vpop.eup %8245  ;;  %8265 = vtanh.f32 %v1528_v36  ;;  %v8951_v36 = vld [vmem:[%s16753_s1 + $0x58] sm:$0xff] }
 0x407   :  { %5609 = vmatprep.subr.mxu0 %v17379_v0  ;;  %5834 = vmatprep.subr.mxu1 %v17379_v0  ;;  %v13930_v37 = vpop.f32.mrf.mxu0  ;;  %v17393_v46 = vld [vmem:[#allocation11_spill] sm:$0xff]  ;;  %v8248_v44 = vpop.eup %8247 }
 0x408   :  { %v13932_v11 = vpop.f32.mrf.mxu1  ;;  %5610 = vmatpush1.msra.mxu0 %v8240_v21  ;;  %5835 = vmatpush1.msra.mxu1 %v8242_v51  ;;  %v717_v53 = vadd.f32 %v13643_v41, %v17393_v46  ;;  %v8950_v21 = vld [vmem:[%s16753_s1 + $0x40] sm:$0xff] }
 0x409   :  { %7891 = vmatprep.mubr.msk.f32.mxu0 %vm170_vm0, %v8949_v19  ;;  %7939 = vmatprep.mubr.msk.f32.mxu1 %vm170_vm0, %v8949_v19  ;;  %v3676_v32 = vpop.f32.mrf.mxu0  ;;  %v8250_v19 = vpop.eup %8249 }
 0x40a   :  { %v4077_v12 = vpop.f32.mrf.mxu1  ;;  %5611 = vmatprep.subr.mxu0 %v17379_v0  ;;  %5836 = vmatprep.subr.mxu1 %v17379_v0  ;;  %v17395_v32 = vld [vmem:[#allocation9_spill] sm:$0xff]  ;;  %8267 = vtanh.f32 %v717_v53  ;;  %v8252_v48 = vpop.eup %8251  ;;  %v17397_v53 = vld [vmem:[#allocation67_spill] sm:$0xff] }
 0x40b   :  { %4470 = vmatmul.mubr.f32.gmra.mxu0 %v8950_v21  ;;  %4871 = vmatmul.mubr.f32.gmra.mxu1 %v8950_v21  ;;  %v13948_v2 = vpop.f32.mrf.mxu0  ;;  %v716_v27 = vadd.f32 %v13680_v24, %v17395_v32  ;;  %v17396_v21 = vld [vmem:[#allocation69_spill] sm:$0xff]  ;;  %8269 = vtanh.f32 %v1527_v60  ;;  %v17398_v60 = vld [vmem:[#allocation84_spill] sm:$0xff] }
 0x40c   :  { %v13950_v51 = vpop.f32.mrf.mxu1  ;;  %5612 = vmatpush1.msra.mxu0 %v8244_v14  ;;  %5837 = vmatpush1.msra.mxu1 %v8246_v38  ;;  %v1526_v3 = vadd.f32 %v17396_v21, %v13758_v31  ;;  %v8952_v32 = vld [vmem:[%s16753_s1 + $0x50] sm:$0xff] }
 0x40d   :  { %5613 = vmatprep.subr.mxu0 %v17379_v0  ;;  %5838 = vmatprep.subr.mxu1 %v17379_v0  ;;  %v3681_v12 = vpop.f32.mrf.mxu0  ;;  %8271 = vtanh.f32 %v716_v27  ;;  %v17399_v27 = vld [vmem:[#allocation65_spill] sm:$0xff] }
 0x40e   :  { %v4082_v46 = vpop.f32.mrf.mxu1  ;;  %5614 = vmatpush1.msra.mxu0 %v8248_v44  ;;  %5839 = vmatpush1.msra.mxu1 %v8250_v19  ;;  %v8254_v44 = vpop.eup %8253  ;;  %v1525_v19 = vadd.f32 %v17397_v53, %v13786_v55  ;;  %8273 = vtanh.f32 %v1526_v3  ;;  %v1524_v29 = vadd.f32 %v17399_v27, %v13797_v8 }
 0x40f   :  { %7892 = vmatprep.mubr.msk.f32.mxu0 %vm170_vm0, %v8951_v36  ;;  %7940 = vmatprep.mubr.msk.f32.mxu1 %vm170_vm0, %v8951_v36  ;;  %v13965_v14 = vpop.f32.mrf.mxu0  ;;  %v8256_v21 = vpop.eup %8255  ;;  %v2724_v36 = vadd.f32 %v17398_v60, %v13634_v28 }
 0x410   :  { %v13967_v38 = vpop.f32.mrf.mxu1  ;;  %5615 = vmatprep.subr.mxu0 %v17379_v0  ;;  %5840 = vmatprep.subr.mxu1 %v17379_v0  ;;  %v8258_v63 = vpop.eup %8257  ;;  %8275 = vtanh.f32 %v1525_v19 }
 0x411   :  { %4475 = vmatmul.mubr.f32.gmra.mxu0 %v8952_v32  ;;  %4876 = vmatmul.mubr.f32.gmra.mxu1 %v8952_v32  ;;  %v3686_v12 = vpop.f32.mrf.mxu0  ;;  %v8260_v60 = vpop.eup %8259  ;;  %8277 = vtanh.f32 %v2724_v36 }
 0x412   :  { %v4087_v46 = vpop.f32.mrf.mxu1  ;;  %5616 = vmatpush1.msra.mxu0 %v8252_v48  ;;  %5841 = vmatpush1.msra.mxu1 %v8254_v44  ;;  %v17400_v12 = vld [vmem:[#allocation82_spill] sm:$0xff]  ;;  %v8953_v48 = vld [vmem:[%s16753_s1 + $0x68] sm:$0xff]  ;;  %v8262_v27 = vpop.eup %8261  ;;  %8279 = vtanh.f32 %v1524_v29  ;;  %v17405_v29 = vld [vmem:[#allocation61_spill] sm:$0xff] }
 0x413   :  { %5617 = vmatprep.subr.mxu0 %v17379_v0  ;;  %5842 = vmatprep.subr.mxu1 %v17379_v0  ;;  %v13982_v53 = vpop.f32.mrf.mxu0  ;;  %v2723_v3 = vadd.f32 %v17400_v12, %v13665_v43  ;;  %v8264_v36 = vpop.eup %8263 }
 0x414   :  { %v13984_v32 = vpop.f32.mrf.mxu1  ;;  %5618 = vmatpush1.msra.mxu0 %v8256_v21  ;;  %5843 = vmatpush1.msra.mxu1 %v8258_v63  ;;  %v17401_v63 = vld [vmem:[#allocation63_spill] sm:$0xff]  ;;  %v8266_v13 = vpop.eup %8265 }
 0x415   :  { %7893 = vmatprep.mubr.msk.f32.mxu0 %vm170_vm0, %v8953_v48  ;;  %7941 = vmatprep.mubr.msk.f32.mxu1 %vm170_vm0, %v8953_v48  ;;  %v3691_v44 = vpop.f32.mrf.mxu0  ;;  %v1523_v19 = vadd.f32 %v17401_v63, %v13825_v47  ;;  %v8954_v21 = vld [vmem:[%s16753_s1 + $0x60] sm:$0xff]  ;;  %8281 = vtanh.f32 %v2723_v3  ;;  %v1522_v63 = vadd.f32 %v17405_v29, %v13846_v6  ;;  %v8955_v3 = vld [vmem:[%s16753_s1 + $0x78] sm:$0xff] }
 0x416   :  { %v4092_v46 = vpop.f32.mrf.mxu1  ;;  %5619 = vmatprep.subr.mxu0 %v17379_v0  ;;  %5844 = vmatprep.subr.mxu1 %v17379_v0  ;;  %v17404_v44 = vld [vmem:[#allocation80_spill] sm:$0xff] }
 0x417   :  { %4480 = vmatmul.mubr.f32.gmra.mxu0 %v8954_v21  ;;  %4881 = vmatmul.mubr.f32.gmra.mxu1 %v8954_v21  ;;  %v14000_v12 = vpop.f32.mrf.mxu0  ;;  %v2722_v46 = vadd.f32 %v17404_v44, %v13643_v41  ;;  %8283 = vtanh.f32 %v1523_v19  ;;  %v8268_v44 = vpop.eup %8267  ;;  %v8956_v19 = vld [vmem:[%s16753_s1 + $0x70] sm:$0xff] }
 0x418   :  { %17402 = vst [vmem:[#allocation30_spill] sm:$0xff] %v14000_v12  ;;  %v14002_v48 = vpop.f32.mrf.mxu1  ;;  %5620 = vmatpush1.msra.mxu0 %v8260_v60  ;;  %5845 = vmatpush1.msra.mxu1 %v8262_v27 }
 0x419   :  { %17403 = vst [vmem:[#allocation18_spill] sm:$0xff] %v14002_v48  ;;  %5621 = vmatprep.subr.mxu0 %v17379_v0  ;;  %5846 = vmatprep.subr.mxu1 %v17379_v0  ;;  %v3696_v21 = vpop.f32.mrf.mxu0  ;;  %8285 = vtanh.f32 %v2722_v46  ;;  %v17410_v46 = vld [vmem:[#allocation50_spill] sm:$0xff] }
 0x41a   :  { %v4097_v23 = vpop.f32.mrf.mxu1  ;;  %5622 = vmatpush1.msra.mxu0 %v8264_v36  ;;  %5847 = vmatpush1.msra.mxu1 %v8266_v13  ;;  %v1521_v13 = vadd.f32 %v17409_v1, %v13634_v28  ;;  %8287 = vtanh.f32 %v1522_v63  ;;  %v1520_v1 = vadd.f32 %v17411_v42, %v13665_v43 }
 0x41b   :  { %7894 = vmatprep.mubr.msk.f32.mxu0 %vm170_vm0, %v8955_v3  ;;  %7942 = vmatprep.mubr.msk.f32.mxu1 %vm170_vm0, %v8955_v3  ;;  %v14017_v60 = vpop.f32.mrf.mxu0  ;;  %v8270_v23 = vpop.eup %8269  ;;  %8289 = vtanh.f32 %v2721_v5  ;;  %v2331_v3 = vadd.f32 %v17410_v46, %v13702_v30 }
 0x41c   :  { %17407 = vst [vmem:[#allocation68_spill] sm:$0xff] %v14017_v60  ;;  %v14019_v27 = vpop.f32.mrf.mxu1  ;;  %5623 = vmatprep.subr.mxu0 %v17379_v0  ;;  %5848 = vmatprep.subr.mxu1 %v17379_v0  ;;  %v8272_v21 = vpop.eup %8271  ;;  %8291 = vtanh.f32 %v1521_v13 }
 0x41d   :  { %17408 = vst [vmem:[#allocation19_spill] sm:$0xff] %v14019_v27  ;;  %4485 = vmatmul.mubr.f32.gmra.mxu0 %v8956_v19  ;;  %4886 = vmatmul.mubr.f32.gmra.mxu1 %v8956_v19  ;;  %v3701_v36 = vpop.f32.mrf.mxu0  ;;  %v8274_v22 = vpop.eup %8273  ;;  %8293 = vtanh.f32 %v2331_v3 }
 0x41e   :  { %v4102_v29 = vpop.f32.mrf.mxu1  ;;  %5624 = vmatpush1.msra.mxu0 %v8268_v44  ;;  %5849 = vmatpush1.msra.mxu1 %v8270_v23  ;;  %v17414_v36 = vld [vmem:[#allocation49_spill] sm:$0xff]  ;;  %v8957_v44 = vld [vmem:[%s16753_s1 + $0x88] sm:$0xff]  ;;  %8295 = vtanh.f32 %v1520_v1 }
 0x41f   :  { %5625 = vmatprep.subr.mxu0 %v17379_v0  ;;  %5850 = vmatprep.subr.mxu1 %v17379_v0  ;;  %v14034_v63 = vpop.f32.mrf.mxu0  ;;  %v2330_v5 = vadd.f32 %v17414_v36, %v13713_v20  ;;  %v8276_v29 = vpop.eup %8275 }
 0x420   :  { %17412 = vst [vmem:[#allocation31_spill] sm:$0xff] %v14034_v63  ;;  %v14036_v19 = vpop.f32.mrf.mxu1  ;;  %5626 = vmatpush1.msra.mxu0 %v8272_v21  ;;  %5851 = vmatpush1.msra.mxu1 %v8274_v22  ;;  %v8278_v46 = vpop.eup %8277  ;;  %v17415_v22 = vld [vmem:[#allocation55_spill] sm:$0xff] }
 0x421   :  { %17413 = vst [vmem:[#allocation21_spill] sm:$0xff] %v14036_v19  ;;  %7895 = vmatprep.mubr.msk.f32.mxu0 %vm170_vm0, %v8957_v44  ;;  %7943 = vmatprep.mubr.msk.f32.mxu1 %vm170_vm0, %v8957_v44  ;;  %v3706_v42 = vpop.f32.mrf.mxu0  ;;  %v1519_v13 = vadd.f32 %v17415_v22, %v13643_v41  ;;  %v8958_v21 = vld [vmem:[%s16753_s1 + $0x80] sm:$0xff]  ;;  %v8280_v3 = vpop.eup %8279  ;;  %8297 = vtanh.f32 %v2330_v5  ;;  %v17418_v5 = vld [vmem:[#allocation93_spill] sm:$0xff] }
 0x422   :  { %v4107_v23 = vpop.f32.mrf.mxu1  ;;  %5627 = vmatprep.subr.mxu0 %v17379_v0  ;;  %5852 = vmatprep.subr.mxu1 %v17379_v0  ;;  %v17416_v42 = vld [vmem:[#allocation71_spill] sm:$0xff]  ;;  %v8282_v54 = vpop.eup %8281 }
 0x423   :  { %4490 = vmatmul.mubr.f32.gmra.mxu0 %v8958_v21  ;;  %4891 = vmatmul.mubr.f32.gmra.mxu1 %v8958_v21  ;;  %v14052_v36 = vpop.f32.mrf.mxu0  ;;  %v2329_v23 = vadd.f32 %v17416_v42, %v13741_v39  ;;  %v17417_v21 = vld [vmem:[#allocation53_spill] sm:$0xff]  ;;  %8299 = vtanh.f32 %v1519_v13 }
 0x424   :  { %v14054_v44 = vpop.f32.mrf.mxu1  ;;  %5628 = vmatpush2.msra.mxu0 %v8276_v29  ;;  %5853 = vmatpush2.msra.mxu1 %v8278_v46  ;;  %v1518_v59 = vadd.f32 %v17417_v21, %v13680_v24  ;;  %v2328_v29 = vadd.f32 %v17418_v5, %v13758_v31  ;;  %v8959_v46 = vld [vmem:[%s16753_s1 + $0x98] sm:$0xff] }
 0x425   :  { %5629 = vmatprep.subr.mxu0 %v17379_v0  ;;  %5854 = vmatprep.subr.mxu1 %v17379_v0  ;;  %v3711_v40 = vpop.f32.mrf.mxu0  ;;  %8301 = vtanh.f32 %v2329_v23 }
 0x426   :  { %v4112_v50 = vpop.f32.mrf.mxu1  ;;  %5630 = vmatpush2.msra.mxu0 %v8280_v3  ;;  %5855 = vmatpush2.msra.mxu1 %v8282_v54  ;;  %v8284_v40 = vpop.eup %8283  ;;  %v17419_v3 = vld [vmem:[#allocation29_spill] sm:$0xff]  ;;  %8303 = vtanh.f32 %v1518_v59  ;;  %v2327_v54 = vadd.f32 %v17420_v15, %v13786_v55 }
 0x427   :  { %7896 = vmatprep.mubr.msk.f32.mxu0 %vm170_vm0, %v8959_v46  ;;  %7944 = vmatprep.mubr.msk.f32.mxu1 %vm170_vm0, %v8959_v46  ;;  %v14073_v42 = vpop.f32.mrf.mxu0  ;;  %v8286_v13 = vpop.eup %8285  ;;  %v1128_v5 = vadd.f32 %v17419_v3, %v13702_v30  ;;  %v8960_v46 = vld [vmem:[%s16753_s1 + $0x90] sm:$0xff]  ;;  %8305 = vtanh.f32 %v2328_v29  ;;  %v1127_v3 = vadd.f32 %v17421_v26, %v13713_v20  ;;  %v8961_v26 = vld [vmem:[%s16753_s1 + $0xa8] sm:$0xff]  ;;  %v8962_v29 = vld [vmem:[%s16753_s1 + $0xa0] sm:$0xff] }
 0x428   :  { %v14075_v21 = vpop.f32.mrf.mxu1  ;;  %5631 = vmatprep.subr.mxu0 %v17379_v0  ;;  %5856 = vmatprep.subr.mxu1 %v17379_v0  ;;  %v8288_v1 = vpop.eup %8287 }
 0x429   :  { %4495 = vmatmul.mubr.f32.gmra.mxu0 %v8960_v46  ;;  %4896 = vmatmul.mubr.f32.gmra.mxu1 %v8960_v46  ;;  %v3716_v23 = vpop.f32.mrf.mxu0  ;;  %v8290_v50 = vpop.eup %8289  ;;  %8307 = vtanh.f32 %v1128_v5 }
 0x42a   :  { %v4117_v22 = vpop.f32.mrf.mxu1  ;;  %5632 = vmatpush2.msra.mxu0 %v8284_v40  ;;  %5857 = vmatpush2.msra.mxu1 %v8286_v13  ;;  %8309 = vtanh.f32 %v2327_v54 }
 0x42b   :  { %5633 = vmatprep.subr.mxu0 %v17379_v0  ;;  %5858 = vmatprep.subr.mxu1 %v17379_v0  ;;  %v14094_v59 = vpop.f32.mrf.mxu0  ;;  %v17422_v22 = vld [vmem:[#allocation89_spill] sm:$0xff]  ;;  %8311 = vtanh.f32 %v1127_v3 }
 0x42c   :  { %v14096_v46 = vpop.f32.mrf.mxu1  ;;  %v2326_v23 = vadd.f32 %v17422_v22, %v13797_v8  ;;  %5634 = vmatpush2.msra.mxu0 %v8288_v1  ;;  %5859 = vmatpush2.msra.mxu1 %v8290_v50  ;;  %v8292_v22 = vpop.eup %8291  ;;  %v17423_v50 = vld [vmem:[#allocation4_spill] sm:$0xff] }
 0x42d   :  { %7897 = vmatprep.mubr.msk.f32.mxu0 %vm170_vm0, %v8961_v26  ;;  %7945 = vmatprep.mubr.msk.f32.mxu1 %vm170_vm0, %v8961_v26  ;;  %v3721_v40 = vpop.f32.mrf.mxu0  ;;  %v8294_v1 = vpop.eup %8293  ;;  %v1126_v5 = vadd.f32 %v17423_v50, %v13741_v39 }
 0x42e   :  { %v4122_v13 = vpop.f32.mrf.mxu1  ;;  %5635 = vmatprep.subr.mxu0 %v17379_v0  ;;  %5860 = vmatprep.subr.mxu1 %v17379_v0  ;;  %v8296_v54 = vpop.eup %8295  ;;  %8313 = vtanh.f32 %v2326_v23  ;;  %v17426_v23 = vld [vmem:[#allocation85_spill] sm:$0xff] }
 0x42f   :  { %4500 = vmatmul.mubr.f32.gmra.mxu0 %v8962_v29  ;;  %4901 = vmatmul.mubr.f32.gmra.mxu1 %v8962_v29  ;;  %v14116_v26 = vpop.f32.mrf.mxu0  ;;  %v17424_v13 = vld [vmem:[#allocation87_spill] sm:$0xff]  ;;  %v8298_v58 = vpop.eup %8297  ;;  %v17425_v29 = vld [vmem:[#allocation46_spill] sm:$0xff]  ;;  %8315 = vtanh.f32 %v1126_v5 }
 0x430   :  { %v14118_v40 = vpop.f32.mrf.mxu1  ;;  %v2325_v15 = vadd.f32 %v17424_v13, %v13825_v47  ;;  %5636 = vmatpush2.msra.mxu0 %v8292_v22  ;;  %5861 = vmatpush2.msra.mxu1 %v8294_v1  ;;  %v1125_v39 = vadd.f32 %v17425_v29, %v13758_v31  ;;  %v2324_v22 = vadd.f32 %v17426_v23, %v13846_v6  ;;  %v8963_v1 = vld [vmem:[%s16753_s1 + $0xb8] sm:$0xff]  ;;  %v17428_v31 = vld [vmem:[#allocation83_spill] sm:$0xff] }
 0x431   :  { %5637 = vmatprep.subr.mxu0 %v17379_v0  ;;  %5862 = vmatprep.subr.mxu1 %v17379_v0  ;;  %v3726_v4 = vpop.f32.mrf.mxu0 }
 0x432   :  { %v4127_v20 = vpop.f32.mrf.mxu1  ;;  %5638 = vmatpush2.msra.mxu0 %v8296_v54  ;;  %5863 = vmatpush2.msra.mxu1 %v8298_v58  ;;  %v8300_v4 = vpop.eup %8299  ;;  %8317 = vtanh.f32 %v2325_v15  ;;  %v17427_v54 = vld [vmem:[#allocation44_spill] sm:$0xff] }
 0x433   :  { %7898 = vmatprep.mubr.msk.f32.mxu0 %vm170_vm0, %v8963_v1  ;;  %7946 = vmatprep.mubr.msk.f32.mxu1 %vm170_vm0, %v8963_v1  ;;  %v14137_v13 = vpop.f32.mrf.mxu0  ;;  %v8302_v5 = vpop.eup %8301  ;;  %v1124_v23 = vadd.f32 %v17427_v54, %v13786_v55  ;;  %8319 = vtanh.f32 %v1125_v39  ;;  %v8964_v1 = vld [vmem:[%s16753_s1 + $0xb0] sm:$0xff]  ;;  %v2323_v20 = vadd.f32 %v17428_v31, %v13634_v28  ;;  %v1123_v54 = vadd.f32 %v17429_v45, %v13797_v8  ;;  %v8965_v45 = vld [vmem:[%s16753_s1 + $0xc8] sm:$0xff]  ;;  %v8982_v8 = vld [vmem:[%s16753_s1 + $0x140] sm:$0xff] }
 0x434   :  { %v14139_v29 = vpop.f32.mrf.mxu1  ;;  %5639 = vmatprep.subr.mxu0 %v17379_v0  ;;  %5864 = vmatprep.subr.mxu1 %v17379_v0  ;;  %v8304_v3 = vpop.eup %8303  ;;  %8321 = vtanh.f32 %v2324_v22  ;;  %v8966_v22 = vld [vmem:[%s16753_s1 + $0xc0] sm:$0xff] }
 0x435   :  { %4505 = vmatmul.mubr.f32.gmra.mxu0 %v8964_v1  ;;  %4906 = vmatmul.mubr.f32.gmra.mxu1 %v8964_v1  ;;  %v3731_v15 = vpop.f32.mrf.mxu0  ;;  %v8306_v58 = vpop.eup %8305  ;;  %8323 = vtanh.f32 %v1124_v23 }
 0x436   :  { %v4132_v50 = vpop.f32.mrf.mxu1  ;;  %5640 = vmatpush2.msra.mxu0 %v8300_v4  ;;  %5865 = vmatpush2.msra.mxu1 %v8302_v5  ;;  %8325 = vtanh.f32 %v2323_v20 }
 0x437   :  { %5641 = vmatprep.subr.mxu0 %v17379_v0  ;;  %5866 = vmatprep.subr.mxu1 %v17379_v0  ;;  %v14158_v39 = vpop.f32.mrf.mxu0  ;;  %v17430_v50 = vld [vmem:[#allocation81_spill] sm:$0xff]  ;;  %8327 = vtanh.f32 %v1123_v54 }
 0x438   :  { %v14160_v1 = vpop.f32.mrf.mxu1  ;;  %v2322_v15 = vadd.f32 %v17430_v50, %v13665_v43  ;;  %5642 = vmatpush2.msra.mxu0 %v8304_v3  ;;  %5867 = vmatpush2.msra.mxu1 %v8306_v58  ;;  %v8308_v50 = vpop.eup %8307  ;;  %v17431_v58 = vld [vmem:[#allocation40_spill] sm:$0xff]  ;;  %v8980_v43 = vld [vmem:[%s16753_s1 + $0x130] sm:$0xff] }
 0x439   :  { %7899 = vmatprep.mubr.msk.f32.mxu0 %vm170_vm0, %v8965_v45  ;;  %7947 = vmatprep.mubr.msk.f32.mxu1 %vm170_vm0, %v8965_v45  ;;  %v3736_v4 = vpop.f32.mrf.mxu0  ;;  %v8310_v3 = vpop.eup %8309  ;;  %v1122_v23 = vadd.f32 %v17431_v58, %v13825_v47 }
 0x43a   :  { %v4137_v5 = vpop.f32.mrf.mxu1  ;;  %5643 = vmatprep.subr.mxu0 %v17379_v0  ;;  %5868 = vmatprep.subr.mxu1 %v17379_v0  ;;  %v8312_v20 = vpop.eup %8311  ;;  %8329 = vtanh.f32 %v2322_v15  ;;  %v17434_v15 = vld [vmem:[#allocation77_spill] sm:$0xff] }
 0x43b   :  { %4510 = vmatmul.mubr.f32.gmra.mxu0 %v8966_v22  ;;  %4911 = vmatmul.mubr.f32.gmra.mxu1 %v8966_v22  ;;  %v14180_v45 = vpop.f32.mrf.mxu0  ;;  %v17432_v5 = vld [vmem:[#allocation79_spill] sm:$0xff]  ;;  %v8314_v61 = vpop.eup %8313  ;;  %v17433_v22 = vld [vmem:[#allocation38_spill] sm:$0xff]  ;;  %8331 = vtanh.f32 %v1122_v23 }
 0x43c   :  { %v14182_v4 = vpop.f32.mrf.mxu1  ;;  %v2321_v31 = vadd.f32 %v17432_v5, %v13643_v41  ;;  %5644 = vmatpush2.msra.mxu0 %v8308_v50  ;;  %5869 = vmatpush2.msra.mxu1 %v8310_v3  ;;  %v1121_v62 = vadd.f32 %v17433_v22, %v13846_v6  ;;  %v2320_v50 = vadd.f32 %v17434_v15, %v13680_v24  ;;  %v8967_v3 = vld [vmem:[%s16753_s1 + $0xd8] sm:$0xff] }
 0x43d   :  { %5645 = vmatprep.subr.mxu0 %v17379_v0  ;;  %5870 = vmatprep.subr.mxu1 %v17379_v0  ;;  %v3741_v30 = vpop.f32.mrf.mxu0 }
 0x43e   :  { %v4142_v33 = vpop.f32.mrf.mxu1  ;;  %5646 = vmatpush2.msra.mxu0 %v8312_v20  ;;  %5871 = vmatpush2.msra.mxu1 %v8314_v61  ;;  %v8316_v30 = vpop.eup %8315  ;;  %8333 = vtanh.f32 %v2321_v31  ;;  %v8968_v20 = vld [vmem:[%s16753_s1 + $0xd0] sm:$0xff] }
 0x43f   :  { %7900 = vmatprep.mubr.msk.f32.mxu0 %vm170_vm0, %v8967_v3  ;;  %7948 = vmatprep.mubr.msk.f32.mxu1 %vm170_vm0, %v8967_v3  ;;  %v14201_v5 = vpop.f32.mrf.mxu0  ;;  %v8318_v23 = vpop.eup %8317  ;;  %8335 = vtanh.f32 %v1121_v62 }
 0x440   :  { %v14203_v22 = vpop.f32.mrf.mxu1  ;;  %5647 = vmatprep.subr.mxu0 %v17379_v0  ;;  %5872 = vmatprep.subr.mxu1 %v17379_v0  ;;  %v8320_v3 = vpop.eup %8319  ;;  %8337 = vtanh.f32 %v2320_v50  ;;  %v8969_v50 = vld [vmem:[%s16753_s1 + $0xe8] sm:$0xff] }
 0x441   :  { %4515 = vmatmul.mubr.f32.gmra.mxu0 %v8968_v20  ;;  %4916 = vmatmul.mubr.f32.gmra.mxu1 %v8968_v20  ;;  %v3746_v15 = vpop.f32.mrf.mxu0  ;;  %v8322_v58 = vpop.eup %8321 }
 0x442   :  { %v4147_v31 = vpop.f32.mrf.mxu1  ;;  %5648 = vmatpush2.msra.mxu0 %v8316_v30  ;;  %5873 = vmatpush2.msra.mxu1 %v8318_v23 }
 0x443   :  { %5649 = vmatprep.subr.mxu0 %v17379_v0  ;;  %5874 = vmatprep.subr.mxu1 %v17379_v0  ;;  %v14216_v33 = vpop.f32.mrf.mxu0  ;;  %v8324_v31 = vpop.eup %8323 }
 0x444   :  { %v14218_v62 = vpop.f32.mrf.mxu1  ;;  %5650 = vmatpush2.msra.mxu0 %v8320_v3  ;;  %5875 = vmatpush2.msra.mxu1 %v8322_v58  ;;  %v8326_v58 = vpop.eup %8325  ;;  %v8970_v3 = vld [vmem:[%s16753_s1 + $0xe0] sm:$0xff] }
 0x445   :  { %17435 = vst [vmem:[#allocation24_spill] sm:$0xff] %v14218_v62  ;;  %7901 = vmatprep.mubr.msk.f32.mxu0 %vm170_vm0, %v8969_v50  ;;  %7949 = vmatprep.mubr.msk.f32.mxu1 %vm170_vm0, %v8969_v50  ;;  %v3751_v30 = vpop.f32.mrf.mxu0  ;;  %v8328_v61 = vpop.eup %8327 }
 0x446   :  { %v4152_v23 = vpop.f32.mrf.mxu1  ;;  %5651 = vmatprep.subr.mxu0 %v17379_v0  ;;  %5876 = vmatprep.subr.mxu1 %v17379_v0 }
 0x447   :  { %4520 = vmatmul.mubr.f32.gmra.mxu0 %v8970_v3  ;;  %4921 = vmatmul.mubr.f32.gmra.mxu1 %v8970_v3  ;;  %v14234_v15 = vpop.f32.mrf.mxu0  ;;  %v8330_v23 = vpop.eup %8329 }
 0x448   :  { %17436 = vst [vmem:[#allocation17_spill] sm:$0xff] %v14234_v15  ;;  %v14236_v20 = vpop.f32.mrf.mxu1  ;;  %5652 = vmatpush2.msra.mxu0 %v8324_v31  ;;  %5877 = vmatpush2.msra.mxu1 %v8326_v58  ;;  %v8971_v31 = vld [vmem:[%s16753_s1 + $0xf8] sm:$0xff]  ;;  %v8332_v50 = vpop.eup %8331  ;;  %v8996_v15 = vld [vmem:[%s16753_s1 + $0x1b0] sm:$0xff] }
 0x449   :  { %17437 = vst [vmem:[#allocation66_spill] sm:$0xff] %v14236_v20  ;;  %5653 = vmatprep.subr.mxu0 %v17379_v0  ;;  %5878 = vmatprep.subr.mxu1 %v17379_v0  ;;  %v3756_v54 = vpop.f32.mrf.mxu0  ;;  %v8994_v20 = vld [vmem:[%s16753_s1 + $0x1a0] sm:$0xff] }
 0x44a   :  { %v4157_v3 = vpop.f32.mrf.mxu1  ;;  %5654 = vmatpush2.msra.mxu0 %v8328_v61  ;;  %5879 = vmatpush2.msra.mxu1 %v8330_v23 }
 0x44b   :  { %7902 = vmatprep.mubr.msk.f32.mxu0 %vm170_vm0, %v8971_v31  ;;  %7950 = vmatprep.mubr.msk.f32.mxu1 %vm170_vm0, %v8971_v31  ;;  %v14249_v58 = vpop.f32.mrf.mxu0  ;;  %v8334_v23 = vpop.eup %8333  ;;  %v8972_v3 = vld [vmem:[%s16753_s1 + $0xf0] sm:$0xff] }
 0x44c   :  { %17438 = vst [vmem:[#allocation32_spill] sm:$0xff] %v14249_v58  ;;  %v14251_v30 = vpop.f32.mrf.mxu1  ;;  %5655 = vmatprep.subr.mxu0 %v17379_v0  ;;  %5880 = vmatprep.subr.mxu1 %v17379_v0  ;;  %v8336_v6 = vpop.eup %8335  ;;  %v8992_v58 = vld [vmem:[%s16753_s1 + $0x190] sm:$0xff] }
 0x44d   :  { %17439 = vst [vmem:[#allocation8_spill] sm:$0xff] %v14251_v30  ;;  %4525 = vmatmul.mubr.f32.gmra.mxu0 %v8972_v3  ;;  %4926 = vmatmul.mubr.f32.gmra.mxu1 %v8972_v3  ;;  %v3761_v31 = vpop.f32.mrf.mxu0  ;;  %v8338_v41 = vpop.eup %8337  ;;  %v8990_v30 = vld [vmem:[%s16753_s1 + $0x180] sm:$0xff] }
 0x44e   :  { %v4162_v24 = vpop.f32.mrf.mxu1  ;;  %5656 = vmatpush2.msra.mxu0 %v8332_v50  ;;  %5881 = vmatpush2.msra.mxu1 %v8334_v23  ;;  %v8973_v50 = vld [vmem:[%s16753_s1 + $0x108] sm:$0xff] }
 0x44f   :  { %5657 = vmatprep.subr.mxu0 %v17379_v0  ;;  %5882 = vmatprep.subr.mxu1 %v17379_v0  ;;  %v14264_v54 = vpop.f32.mrf.mxu0 }
 0x450   :  { %17440 = vst [vmem:[#allocation25_spill] sm:$0xff] %v14264_v54  ;;  %v14266_v61 = vpop.f32.mrf.mxu1  ;;  %5658 = vmatpush2.msra.mxu0 %v8336_v6  ;;  %5883 = vmatpush2.msra.mxu1 %v8338_v41  ;;  %v8974_v41 = vld [vmem:[%s16753_s1 + $0x100] sm:$0xff]  ;;  %v8975_v6 = vld [vmem:[%s16753_s1 + $0x118] sm:$0xff]  ;;  %v8988_v54 = vld [vmem:[%s16753_s1 + $0x170] sm:$0xff] }
 0x451   :  { %17441 = vst [vmem:[#allocation26_spill] sm:$0xff] %v14266_v61  ;;  %7903 = vmatprep.mubr.msk.f32.mxu0 %vm170_vm0, %v8973_v50  ;;  %7951 = vmatprep.mubr.msk.f32.mxu1 %vm170_vm0, %v8973_v50  ;;  %v3766_v23 = vpop.f32.mrf.mxu0  ;;  %v8986_v61 = vld [vmem:[%s16753_s1 + $0x160] sm:$0xff] }
 0x452   :  { %v4167_v3 = vpop.f32.mrf.mxu1  ;;  %4530 = vmatmul.mubr.f32.gmra.mxu0 %v8974_v41  ;;  %4931 = vmatmul.mubr.f32.gmra.mxu1 %v8974_v41  ;;  %v8977_v41 = vld [vmem:[%s16753_s1 + $0x128] sm:$0xff] }
 0x453   :  { %7904 = vmatprep.mubr.msk.f32.mxu0 %vm170_vm0, %v8975_v6  ;;  %7952 = vmatprep.mubr.msk.f32.mxu1 %vm170_vm0, %v8975_v6  ;;  %v14285_v31 = vpop.f32.mrf.mxu0  ;;  %v8976_v3 = vld [vmem:[%s16753_s1 + $0x110] sm:$0xff] }
 0x454   :  { %v14287_v24 = vpop.f32.mrf.mxu1  ;;  %6045 = vmatprep.subr.mxu0 %v17379_v0  ;;  %6270 = vmatprep.subr.mxu1 %v17379_v0  ;;  %v8978_v0 = vld [vmem:[%s16753_s1 + $0x120] sm:$0xff] }
 0x455   :  { %v3771_v50 = vpop.f32.mrf.mxu0 }
 0x456   :  { %v4172_v23 = vpop.f32.mrf.mxu1  ;;  %4535 = vmatmul.mubr.f32.gmra.mxu0 %v8976_v3  ;;  %4936 = vmatmul.mubr.f32.gmra.mxu1 %v8976_v3  ;;  %v8979_v3 = vld [vmem:[%s16753_s1 + $0x138] sm:$0xff] }
 0x457   :  { %7905 = vmatprep.mubr.msk.f32.mxu0 %vm170_vm0, %v8977_v41  ;;  %7953 = vmatprep.mubr.msk.f32.mxu1 %vm170_vm0, %v8977_v41  ;;  %v14299_v6 = vpop.f32.mrf.mxu0 }
 0x458   :  { %v14301_v49 = vpop.f32.mrf.mxu1 }
 0x459   :  { %v3776_v50 = vpop.f32.mrf.mxu0 }
 0x45a   :  { %v4177_v23 = vpop.f32.mrf.mxu1  ;;  %4540 = vmatmul.mubr.f32.gmra.mxu0 %v8978_v0  ;;  %4941 = vmatmul.mubr.f32.gmra.mxu1 %v8978_v0  ;;  %v8981_v0 = vld [vmem:[%s16753_s1 + $0x148] sm:$0xff] }
 0x45b   :  { %7906 = vmatprep.mubr.msk.f32.mxu0 %vm170_vm0, %v8979_v3  ;;  %7954 = vmatprep.mubr.msk.f32.mxu1 %vm170_vm0, %v8979_v3  ;;  %v14311_v41 = vpop.f32.mrf.mxu0 }
 0x45c   :  { %v14313_v47 = vpop.f32.mrf.mxu1 }
 0x45d   :  { %v3781_v50 = vpop.f32.mrf.mxu0 }
 0x45e   :  { %v4182_v23 = vpop.f32.mrf.mxu1  ;;  %4545 = vmatmul.mubr.f32.gmra.mxu0 %v8980_v43  ;;  %4946 = vmatmul.mubr.f32.gmra.mxu1 %v8980_v43  ;;  %v8983_v43 = vld [vmem:[%s16753_s1 + $0x158] sm:$0xff] }
 0x45f   :  { %7907 = vmatprep.mubr.msk.f32.mxu0 %vm170_vm0, %v8981_v0  ;;  %7955 = vmatprep.mubr.msk.f32.mxu1 %vm170_vm0, %v8981_v0  ;;  %v14323_v3 = vpop.f32.mrf.mxu0 }
 0x460   :  { %v14325_v9 = vpop.f32.mrf.mxu1 }
 0x461   :  { %v3786_v50 = vpop.f32.mrf.mxu0 }
 0x462   :  { %v4187_v23 = vpop.f32.mrf.mxu1  ;;  %4550 = vmatmul.mubr.f32.gmra.mxu0 %v8982_v8  ;;  %4951 = vmatmul.mubr.f32.gmra.mxu1 %v8982_v8  ;;  %v8985_v8 = vld [vmem:[%s16753_s1 + $0x168] sm:$0xff] }
 0x463   :  { %7908 = vmatprep.mubr.msk.f32.mxu0 %vm170_vm0, %v8983_v43  ;;  %7956 = vmatprep.mubr.msk.f32.mxu1 %vm170_vm0, %v8983_v43  ;;  %v14335_v0 = vpop.f32.mrf.mxu0 }
 0x464   :  { %v14337_v28 = vpop.f32.mrf.mxu1 }
 0x465   :  { %v3791_v50 = vpop.f32.mrf.mxu0 }
 0x466   :  { %v4192_v23 = vpop.f32.mrf.mxu1  ;;  %4555 = vmatmul.mubr.f32.gmra.mxu0 %v8984_v57  ;;  %4956 = vmatmul.mubr.f32.gmra.mxu1 %v8984_v57  ;;  %v8987_v57 = vld [vmem:[%s16753_s1 + $0x178] sm:$0xff] }
 0x467   :  { %7909 = vmatprep.mubr.msk.f32.mxu0 %vm170_vm0, %v8985_v8  ;;  %7957 = vmatprep.mubr.msk.f32.mxu1 %vm170_vm0, %v8985_v8  ;;  %v14347_v43 = vpop.f32.mrf.mxu0 }
 0x468   :  { %v14349_v55 = vpop.f32.mrf.mxu1 }
 0x469   :  { %v3796_v50 = vpop.f32.mrf.mxu0 }
 0x46a   :  { %v4197_v23 = vpop.f32.mrf.mxu1  ;;  %4560 = vmatmul.mubr.f32.gmra.mxu0 %v8986_v61  ;;  %4961 = vmatmul.mubr.f32.gmra.mxu1 %v8986_v61  ;;  %v8989_v61 = vld [vmem:[%s16753_s1 + $0x188] sm:$0xff] }
 0x46b   :  { %7910 = vmatprep.mubr.msk.f32.mxu0 %vm170_vm0, %v8987_v57  ;;  %7958 = vmatprep.mubr.msk.f32.mxu1 %vm170_vm0, %v8987_v57  ;;  %v14359_v8 = vpop.f32.mrf.mxu0 }
 0x46c   :  { %v14361_v19 = vpop.f32.mrf.mxu1 }
 0x46d   :  { %v3801_v50 = vpop.f32.mrf.mxu0 }
 0x46e   :  { %v4202_v23 = vpop.f32.mrf.mxu1  ;;  %4565 = vmatmul.mubr.f32.gmra.mxu0 %v8988_v54  ;;  %4966 = vmatmul.mubr.f32.gmra.mxu1 %v8988_v54  ;;  %v8991_v54 = vld [vmem:[%s16753_s1 + $0x198] sm:$0xff] }
 0x46f   :  { %7911 = vmatprep.mubr.msk.f32.mxu0 %vm170_vm0, %v8989_v61  ;;  %7959 = vmatprep.mubr.msk.f32.mxu1 %vm170_vm0, %v8989_v61  ;;  %v14371_v57 = vpop.f32.mrf.mxu0 }
 0x470   :  { %v14373_v63 = vpop.f32.mrf.mxu1 }
 0x471   :  { %v3806_v50 = vpop.f32.mrf.mxu0 }
 0x472   :  { %v4207_v23 = vpop.f32.mrf.mxu1  ;;  %4570 = vmatmul.mubr.f32.gmra.mxu0 %v8990_v30  ;;  %4971 = vmatmul.mubr.f32.gmra.mxu1 %v8990_v30  ;;  %v8993_v30 = vld [vmem:[%s16753_s1 + $0x1a8] sm:$0xff] }
 0x473   :  { %7912 = vmatprep.mubr.msk.f32.mxu0 %vm170_vm0, %v8991_v54  ;;  %7960 = vmatprep.mubr.msk.f32.mxu1 %vm170_vm0, %v8991_v54  ;;  %v14383_v61 = vpop.f32.mrf.mxu0 }
 0x474   :  { %v14385_v27 = vpop.f32.mrf.mxu1 }
 0x475   :  { %v3811_v50 = vpop.f32.mrf.mxu0 }
 0x476   :  { %v4212_v23 = vpop.f32.mrf.mxu1  ;;  %4575 = vmatmul.mubr.f32.gmra.mxu0 %v8992_v58  ;;  %4976 = vmatmul.mubr.f32.gmra.mxu1 %v8992_v58  ;;  %v8995_v58 = vld [vmem:[%s16753_s1 + $0x1b8] sm:$0xff] }
 0x477   :  { %7913 = vmatprep.mubr.msk.f32.mxu0 %vm170_vm0, %v8993_v30  ;;  %7961 = vmatprep.mubr.msk.f32.mxu1 %vm170_vm0, %v8993_v30  ;;  %v14395_v54 = vpop.f32.mrf.mxu0 }
 0x478   :  { %17442 = vst [vmem:[#allocation34_spill] sm:$0xff] %v14395_v54  ;;  %v14397_v60 = vpop.f32.mrf.mxu1 }
 0x479   :  { %17443 = vst [vmem:[#allocation27_spill] sm:$0xff] %v14397_v60  ;;  %v3816_v50 = vpop.f32.mrf.mxu0  ;;  %v17448_v60 = vmax.f32 %v13839_v56, %v14052_v36 }
 0x47a   :  { %v4217_v23 = vpop.f32.mrf.mxu1  ;;  %4580 = vmatmul.mubr.f32.gmra.mxu0 %v8994_v20  ;;  %4981 = vmatmul.mubr.f32.gmra.mxu1 %v8994_v20  ;;  %v8997_v20 = vld [vmem:[%s16753_s1 + $0x1c8] sm:$0xff] }
 0x47b   :  { %7914 = vmatprep.mubr.msk.f32.mxu0 %vm170_vm0, %v8995_v58  ;;  %7962 = vmatprep.mubr.msk.f32.mxu1 %vm170_vm0, %v8995_v58  ;;  %v14407_v30 = vpop.f32.mrf.mxu0 }
 0x47c   :  { %17444 = vst [vmem:[#allocation3_spill] sm:$0xff] %v14407_v30  ;;  %v14409_v48 = vpop.f32.mrf.mxu1 }
 0x47d   :  { %17445 = vst [vmem:[#allocation64_spill] sm:$0xff] %v14409_v48  ;;  %v3821_v50 = vpop.f32.mrf.mxu0  ;;  %v8998_v48 = vld [vmem:[%s16753_s1 + $0x1c0] sm:$0xff] }
 0x47e   :  { %v4222_v23 = vpop.f32.mrf.mxu1  ;;  %4585 = vmatmul.mubr.f32.gmra.mxu0 %v8996_v15  ;;  %4986 = vmatmul.mubr.f32.gmra.mxu1 %v8996_v15  ;;  %v8999_v15 = vld [vmem:[%s16753_s1 + $0x1d8] sm:$0xff] }
 0x47f   :  { %7915 = vmatprep.mubr.msk.f32.mxu0 %vm170_vm0, %v8997_v20  ;;  %7963 = vmatprep.mubr.msk.f32.mxu1 %vm170_vm0, %v8997_v20  ;;  %v14419_v58 = vpop.f32.mrf.mxu0 }
 0x480   :  { %17446 = vst [vmem:[#allocation45_spill] sm:$0xff] %v14419_v58  ;;  %v14421_v30 = vpop.f32.mrf.mxu1 }
 0x481   :  { %17447 = vst [vmem:[#allocation62_spill] sm:$0xff] %v14421_v30  ;;  %v3826_v50 = vpop.f32.mrf.mxu0 }
 0x482   :  { %v4227_v23 = vpop.f32.mrf.mxu1  ;;  %4590 = vmatmul.mubr.f32.gmra.mxu0 %v8998_v48  ;;  %4991 = vmatmul.mubr.f32.gmra.mxu1 %v8998_v48  ;;  %v9000_v48 = vld [vmem:[%s16753_s1 + $0x1d0] sm:$0xff] }
 0x483   :  { %7916 = vmatprep.mubr.msk.f32.mxu0 %vm170_vm0, %v8999_v15  ;;  %7964 = vmatprep.mubr.msk.f32.mxu1 %vm170_vm0, %v8999_v15  ;;  %v3829_v20 = vpop.f32.mrf.mxu0  ;;  %v17449_v15 = vmax.f32 %v13841_v10, %v14054_v44  ;;  %v9002_v10 = vld [vmem:[%s16753_s1 + $0x1e0] sm:$0xff]  ;;  %v17450_v44 = vmax.f32 %v13861_v16, %v14073_v42 }
 0x484   :  { %v4230_v58 = vpop.f32.mrf.mxu1  ;;  %v3900_v30 = vmax.f32 %v14285_v31, %v3829_v20  ;;  %v17451_v20 = vmax.f32 %v13863_v18, %v14075_v21  ;;  %v9004_v18 = vld [vmem:[%s16753_s1 + $0x1f0] sm:$0xff]  ;;  %v17452_v21 = vmax.f32 %v13878_v34, %v14094_v59 }
 0x485   :  { %v4301_v50 = vmax.f32 %v14287_v24, %v4230_v58  ;;  %v3831_v23 = vpop.f32.mrf.mxu0 }
 0x486   :  { %v4232_v12 = vpop.f32.mrf.mxu1  ;;  %4595 = vmatmul.mubr.f32.gmra.mxu0 %v9000_v48  ;;  %4996 = vmatmul.mubr.f32.gmra.mxu1 %v9000_v48  ;;  %v14439_v54 = vmax.f32 %v17448_v60, %v3900_v30 }
 0x487   :  { %v14444_v62 = vmax.f32 %v17449_v15, %v4301_v50  ;;  %v9001_v12 = vld [vmem:[%s16753_s1 + $0x1e8] sm:$0xff]  ;;  %v3834_v24 = vpop.f32.mrf.mxu0 }
 0x488   :  { %7917 = vmatprep.mubr.msk.f32.mxu0 %vm170_vm0, %v9001_v12  ;;  %7965 = vmatprep.mubr.msk.f32.mxu1 %vm170_vm0, %v9001_v12  ;;  %v4235_v31 = vpop.f32.mrf.mxu1  ;;  %v3901_v58 = vmax.f32 %v14299_v6, %v3834_v24  ;;  %v17453_v24 = vmax.f32 %v13880_v7, %v14096_v46  ;;  %v9006_v7 = vld [vmem:[%s16753_s1 + $0x200] sm:$0xff]  ;;  %v17454_v46 = vmax.f32 %v13896_v35, %v14116_v26 }
 0x489   :  { %v4302_v56 = vmax.f32 %v14301_v49, %v4235_v31  ;;  %v3836_v60 = vpop.f32.mrf.mxu0  ;;  %v9003_v49 = vld [vmem:[%s16753_s1 + $0x1f8] sm:$0xff] }
 0x48a   :  { %v4237_v36 = vpop.f32.mrf.mxu1  ;;  %4600 = vmatmul.mubr.f32.gmra.mxu0 %v9002_v10  ;;  %5001 = vmatmul.mubr.f32.gmra.mxu1 %v9002_v10  ;;  %v14459_v30 = vmax.f32 %v17450_v44, %v3901_v58  ;;  %v17455_v10 = vmax.f32 %v13898_v17, %v14118_v40  ;;  %v9008_v17 = vld [vmem:[%s16753_s1 + $0x210] sm:$0xff]  ;;  %v17456_v40 = vmax.f32 %v13913_v25, %v14137_v13 }
 0x48b   :  { %v14464_v50 = vmax.f32 %v17451_v20, %v4302_v56  ;;  %7918 = vmatprep.mubr.msk.f32.mxu0 %vm170_vm0, %v9003_v49  ;;  %7966 = vmatprep.mubr.msk.f32.mxu1 %vm170_vm0, %v9003_v49  ;;  %v3839_v6 = vpop.f32.mrf.mxu0 }
 0x48c   :  { %v4240_v23 = vpop.f32.mrf.mxu1  ;;  %v3902_v48 = vmax.f32 %v14311_v41, %v3839_v6 }
 0x48d   :  { %v4303_v16 = vmax.f32 %v14313_v47, %v4240_v23  ;;  %v3841_v42 = vpop.f32.mrf.mxu0  ;;  %v9005_v47 = vld [vmem:[%s16753_s1 + $0x208] sm:$0xff] }
 0x48e   :  { %v4242_v15 = vpop.f32.mrf.mxu1  ;;  %4605 = vmatmul.mubr.f32.gmra.mxu0 %v9004_v18  ;;  %5006 = vmatmul.mubr.f32.gmra.mxu1 %v9004_v18  ;;  %v14479_v12 = vmax.f32 %v17452_v21, %v3902_v48  ;;  %v17457_v48 = vmax.f32 %v13915_v52, %v14139_v29  ;;  %v9010_v52 = vld [vmem:[%s16753_s1 + $0x220] sm:$0xff]  ;;  %v17459_v29 = vmax.f32 %v13930_v37, %v14158_v39 }
 0x48f   :  { %v14484_v31 = vmax.f32 %v17453_v24, %v4303_v16  ;;  %7919 = vmatprep.mubr.msk.f32.mxu0 %vm170_vm0, %v9005_v47  ;;  %7967 = vmatprep.mubr.msk.f32.mxu1 %vm170_vm0, %v9005_v47  ;;  %v3844_v41 = vpop.f32.mrf.mxu0  ;;  %v17460_v24 = vmax.f32 %v13932_v11, %v14160_v1  ;;  %v9012_v11 = vld [vmem:[%s16753_s1 + $0x230] sm:$0xff]  ;;  %v17462_v1 = vmax.f32 %v13948_v2, %v14180_v45 }
 0x490   :  { %v4245_v58 = vpop.f32.mrf.mxu1  ;;  %v3903_v56 = vmax.f32 %v14323_v3, %v3844_v41 }
 0x491   :  { %v4304_v34 = vmax.f32 %v14325_v9, %v4245_v58  ;;  %v3846_v59 = vpop.f32.mrf.mxu0  ;;  %v9007_v9 = vld [vmem:[%s16753_s1 + $0x218] sm:$0xff] }
 0x492   :  { %v4247_v60 = vpop.f32.mrf.mxu1  ;;  %4610 = vmatmul.mubr.f32.gmra.mxu0 %v9006_v7  ;;  %5011 = vmatmul.mubr.f32.gmra.mxu1 %v9006_v7  ;;  %v14499_v36 = vmax.f32 %v17454_v46, %v3903_v56  ;;  %v17463_v59 = vmax.f32 %v13950_v51, %v14182_v4  ;;  %v9014_v51 = vld [vmem:[%s16753_s1 + $0x240] sm:$0xff]  ;;  %v17465_v4 = vmax.f32 %v13965_v14, %v14201_v5 }
 0x493   :  { %v14504_v44 = vmax.f32 %v17455_v10, %v4304_v34  ;;  %7920 = vmatprep.mubr.msk.f32.mxu0 %vm170_vm0, %v9007_v9  ;;  %7968 = vmatprep.mubr.msk.f32.mxu1 %vm170_vm0, %v9007_v9  ;;  %v3849_v3 = vpop.f32.mrf.mxu0 }
 0x494   :  { %v4250_v20 = vpop.f32.mrf.mxu1  ;;  %v3904_v49 = vmax.f32 %v14335_v0, %v3849_v3  ;;  %v17466_v3 = vmax.f32 %v13967_v38, %v14203_v22  ;;  %v9016_v38 = vld [vmem:[%s16753_s1 + $0x250] sm:$0xff]  ;;  %v17468_v22 = vmax.f32 %v13982_v53, %v14216_v33  ;;  %v17473_v53 = vld [vmem:[#allocation27_spill] sm:$0xff] }
 0x495   :  { %v4305_v35 = vmax.f32 %v14337_v28, %v4250_v20  ;;  %v3851_v26 = vpop.f32.mrf.mxu0  ;;  %v9009_v28 = vld [vmem:[%s16753_s1 + $0x228] sm:$0xff] }
 0x496   :  { %v4252_v6 = vpop.f32.mrf.mxu1  ;;  %4615 = vmatmul.mubr.f32.gmra.mxu0 %v9008_v17  ;;  %5016 = vmatmul.mubr.f32.gmra.mxu1 %v9008_v17  ;;  %v14519_v23 = vmax.f32 %v17456_v40, %v3904_v49  ;;  %v17469_v17 = vld [vmem:[#allocation24_spill] sm:$0xff] }
 0x497   :  { %v14524_v16 = vmax.f32 %v17457_v48, %v4305_v35  ;;  %7921 = vmatprep.mubr.msk.f32.mxu0 %vm170_vm0, %v9009_v28  ;;  %7969 = vmatprep.mubr.msk.f32.mxu1 %vm170_vm0, %v9009_v28  ;;  %v3854_v0 = vpop.f32.mrf.mxu0  ;;  %v17470_v40 = vmax.f32 %v13984_v32, %v17469_v17  ;;  %v9018_v32 = vld [vmem:[%s16753_s1 + $0x260] sm:$0xff] }
 0x498   :  { %v4255_v42 = vpop.f32.mrf.mxu1  ;;  %v3905_v15 = vmax.f32 %v14347_v43, %v3854_v0  ;;  %v17472_v0 = vld [vmem:[#allocation34_spill] sm:$0xff] }
 0x499   :  { %17458 = vst [vmem:[#allocation43_spill] sm:$0xff] %v14524_v16  ;;  %v4306_v25 = vmax.f32 %v14349_v55, %v4255_v42  ;;  %v3856_v13 = vpop.f32.mrf.mxu0  ;;  %v9011_v55 = vld [vmem:[%s16753_s1 + $0x238] sm:$0xff]  ;;  %v17551_v16 = vld [vmem:[#allocation35_spill] sm:$0xff] }
 0x49a   :  { %v4257_v18 = vpop.f32.mrf.mxu1  ;;  %4620 = vmatmul.mubr.f32.gmra.mxu0 %v9010_v52  ;;  %5021 = vmatmul.mubr.f32.gmra.mxu1 %v9010_v52  ;;  %v14539_v21 = vmax.f32 %v17459_v29, %v3905_v15  ;;  %v17474_v13 = vld [vmem:[#allocation30_spill] sm:$0xff] }
 0x49b   :  { %v14544_v47 = vmax.f32 %v17460_v24, %v4306_v25  ;;  %7922 = vmatprep.mubr.msk.f32.mxu0 %vm170_vm0, %v9011_v55  ;;  %7970 = vmatprep.mubr.msk.f32.mxu1 %vm170_vm0, %v9011_v55  ;;  %v3859_v43 = vpop.f32.mrf.mxu0  ;;  %v17475_v18 = vld [vmem:[#allocation17_spill] sm:$0xff]  ;;  %v17477_v24 = vld [vmem:[#allocation18_spill] sm:$0xff] }
 0x49c   :  { %v4260_v41 = vpop.f32.mrf.mxu1  ;;  %v3906_v58 = vmax.f32 %v14359_v8, %v3859_v43  ;;  %v17476_v52 = vmax.f32 %v17474_v13, %v17475_v18  ;;  %v17478_v55 = vld [vmem:[#allocation66_spill] sm:$0xff] }
 0x49d   :  { %17461 = vst [vmem:[#allocation60_spill] sm:$0xff] %v14544_v47  ;;  %v4307_v37 = vmax.f32 %v14361_v19, %v4260_v41  ;;  %v3861_v39 = vpop.f32.mrf.mxu0  ;;  %v9013_v19 = vld [vmem:[%s16753_s1 + $0x248] sm:$0xff]  ;;  %v17479_v43 = vmax.f32 %v17477_v24, %v17478_v55  ;;  %v9024_v24 = vld [vmem:[%s16753_s1 + $0x290] sm:$0xff] }
 0x49e   :  { %v4262_v56 = vpop.f32.mrf.mxu1  ;;  %4625 = vmatmul.mubr.f32.gmra.mxu0 %v9012_v11  ;;  %5026 = vmatmul.mubr.f32.gmra.mxu1 %v9012_v11  ;;  %v14559_v34 = vmax.f32 %v17462_v1, %v3906_v58  ;;  %v9019_v58 = vld [vmem:[%s16753_s1 + $0x278] sm:$0xff]  ;;  %v17482_v1 = vld [vmem:[#allocation64_spill] sm:$0xff] }
 0x49f   :  { %v14564_v60 = vmax.f32 %v17463_v59, %v4307_v37  ;;  %7923 = vmatprep.mubr.msk.f32.mxu0 %vm170_vm0, %v9013_v19  ;;  %7971 = vmatprep.mubr.msk.f32.mxu1 %vm170_vm0, %v9013_v19  ;;  %v3864_v8 = vpop.f32.mrf.mxu0  ;;  %v17481_v56 = vld [vmem:[#allocation3_spill] sm:$0xff]  ;;  %v9025_v55 = vld [vmem:[%s16753_s1 + $0x2a8] sm:$0xff] }
 0x4a0   :  { %v4265_v7 = vpop.f32.mrf.mxu1  ;;  %v3907_v46 = vmax.f32 %v14371_v57, %v3864_v8 }
 0x4a1   :  { %17464 = vst [vmem:[#allocation41_spill] sm:$0xff] %v14564_v60  ;;  %v4308_v2 = vmax.f32 %v14373_v63, %v4265_v7  ;;  %v3866_v45 = vpop.f32.mrf.mxu0  ;;  %v9015_v63 = vld [vmem:[%s16753_s1 + $0x258] sm:$0xff]  ;;  %v9020_v7 = vld [vmem:[%s16753_s1 + $0x270] sm:$0xff] }
 0x4a2   :  { %v4267_v10 = vpop.f32.mrf.mxu1  ;;  %4630 = vmatmul.mubr.f32.gmra.mxu0 %v9014_v51  ;;  %5031 = vmatmul.mubr.f32.gmra.mxu1 %v9014_v51  ;;  %v14579_v9 = vmax.f32 %v17465_v4, %v3907_v46  ;;  %v17483_v46 = vld [vmem:[#allocation68_spill] sm:$0xff]  ;;  %v17486_v51 = vld [vmem:[#allocation19_spill] sm:$0xff] }
 0x4a3   :  { %v14584_v20 = vmax.f32 %v17466_v3, %v4308_v2  ;;  %7924 = vmatprep.mubr.msk.f32.mxu0 %vm170_vm0, %v9015_v63  ;;  %7972 = vmatprep.mubr.msk.f32.mxu1 %vm170_vm0, %v9015_v63  ;;  %v3869_v57 = vpop.f32.mrf.mxu0  ;;  %v17484_v2 = vld [vmem:[#allocation32_spill] sm:$0xff] }
 0x4a4   :  { %v4270_v49 = vpop.f32.mrf.mxu1  ;;  %v3908_v35 = vmax.f32 %v14383_v61, %v3869_v57  ;;  %v17485_v45 = vmax.f32 %v17483_v46, %v17484_v2  ;;  %v17487_v4 = vld [vmem:[#allocation8_spill] sm:$0xff]  ;;  %v17500_v46 = vld [vmem:[#allocation23_spill] sm:$0xff] }
 0x4a5   :  { %17467 = vst [vmem:[#allocation58_spill] sm:$0xff] %v14584_v20  ;;  %v4309_v14 = vmax.f32 %v14385_v27, %v4270_v49  ;;  %v3871_v5 = vpop.f32.mrf.mxu0  ;;  %v9017_v27 = vld [vmem:[%s16753_s1 + $0x268] sm:$0xff]  ;;  %v17488_v3 = vmax.f32 %v17486_v51, %v17487_v4 }
 0x4a6   :  { %v4272_v26 = vpop.f32.mrf.mxu1  ;;  %4635 = vmatmul.mubr.f32.gmra.mxu0 %v9016_v38  ;;  %5036 = vmatmul.mubr.f32.gmra.mxu1 %v9016_v38  ;;  %v14599_v6 = vmax.f32 %v17468_v22, %v3908_v35  ;;  %v9021_v57 = vld [vmem:[%s16753_s1 + $0x288] sm:$0xff] }
 0x4a7   :  { %v14604_v48 = vmax.f32 %v17470_v40, %v4309_v14  ;;  %7925 = vmatprep.mubr.msk.f32.mxu0 %vm170_vm0, %v9017_v27  ;;  %7973 = vmatprep.mubr.msk.f32.mxu1 %vm170_vm0, %v9017_v27  ;;  %v3874_v61 = vpop.f32.mrf.mxu0  ;;  %v17490_v14 = vld [vmem:[#allocation45_spill] sm:$0xff]  ;;  %v17491_v26 = vld [vmem:[#allocation62_spill] sm:$0xff]  ;;  %v9022_v40 = vld [vmem:[%s16753_s1 + $0x280] sm:$0xff] }
 0x4a8   :  { %v4275_v28 = vpop.f32.mrf.mxu1  ;;  %v3909_v42 = vmax.f32 %v17472_v0, %v3874_v61  ;;  %v17492_v27 = vld [vmem:[#allocation31_spill] sm:$0xff]  ;;  %v17493_v61 = vld [vmem:[#allocation25_spill] sm:$0xff] }
 0x4a9   :  { %17471 = vst [vmem:[#allocation39_spill] sm:$0xff] %v14604_v48  ;;  %v4310_v33 = vmax.f32 %v17473_v53, %v4275_v28  ;;  %v3876_v15 = vpop.f32.mrf.mxu0  ;;  %v17494_v28 = vmax.f32 %v17492_v27, %v17493_v61  ;;  %v17496_v53 = vld [vmem:[#allocation26_spill] sm:$0xff] }
 0x4aa   :  { %v4277_v25 = vpop.f32.mrf.mxu1  ;;  %4640 = vmatmul.mubr.f32.gmra.mxu0 %v9018_v32  ;;  %5041 = vmatmul.mubr.f32.gmra.mxu1 %v9018_v32  ;;  %v14619_v29 = vmax.f32 %v17476_v52, %v3909_v42  ;;  %v17495_v42 = vld [vmem:[#allocation21_spill] sm:$0xff]  ;;  %v17507_v61 = vld [vmem:[#allocation102_spill] sm:$0xff] }
 0x4ab   :  { %v14624_v41 = vmax.f32 %v17479_v43, %v4310_v33  ;;  %7926 = vmatprep.mubr.msk.f32.mxu0 %vm170_vm0, %v9019_v58  ;;  %7974 = vmatprep.mubr.msk.f32.mxu1 %vm170_vm0, %v9019_v58  ;;  %v3879_v37 = vpop.f32.mrf.mxu0  ;;  %v17497_v33 = vmax.f32 %v17495_v42, %v17496_v53  ;;  %v9023_v25 = vld [vmem:[%s16753_s1 + $0x298] sm:$0xff]  ;;  %v17508_v42 = vld [vmem:[#allocation20_spill] sm:$0xff]  ;;  %v17509_v53 = vld [vmem:[#allocation103_spill] sm:$0xff] }
 0x4ac   :  { %v4280_v39 = vpop.f32.mrf.mxu1  ;;  %v3910_v11 = vmax.f32 %v17481_v56, %v3879_v37  ;;  %v9026_v37 = vld [vmem:[%s16753_s1 + $0x2a0] sm:$0xff] }
 0x4ad   :  { %17480 = vst [vmem:[#allocation56_spill] sm:$0xff] %v14624_v41  ;;  %v4311_v59 = vmax.f32 %v17482_v1, %v4280_v39  ;;  %v3881_v19 = vpop.f32.mrf.mxu0  ;;  %v9027_v39 = vld [vmem:[%s16753_s1 + $0x2b8] sm:$0xff]  ;;  %v9028_v1 = vld [vmem:[%s16753_s1 + $0x2b0] sm:$0xff] }
 0x4ae   :  { %v4282_v8 = vpop.f32.mrf.mxu1  ;;  %4645 = vmatmul.mubr.f32.gmra.mxu0 %v9020_v7  ;;  %5046 = vmatmul.mubr.f32.gmra.mxu1 %v9020_v7  ;;  %v14639_v10 = vmax.f32 %v17485_v45, %v3910_v11  ;;  %v17499_v7 = vld [vmem:[#allocation52_spill] sm:$0xff]  ;;  %v17501_v45 = vld [vmem:[#allocation101_spill] sm:$0xff] }
 0x4af   :  { %v14644_v63 = vmax.f32 %v17488_v3, %v4311_v59  ;;  %7927 = vmatprep.mubr.msk.f32.mxu0 %vm170_vm0, %v9021_v57  ;;  %7975 = vmatprep.mubr.msk.f32.mxu1 %vm170_vm0, %v9021_v57  ;;  %v3884_v49 = vpop.f32.mrf.mxu0  ;;  %v9029_v59 = vld [vmem:[%s16753_s1 + $0x2c8] sm:$0xff]  ;;  %v3129_v2 = vadd.f32 %v17500_v46, %v17499_v7  ;;  %v4328_v51 = vadd.f32 %v14504_v44, %v17501_v45  ;;  %v17502_v57 = vld [vmem:[#allocation10_spill] sm:$0xff]  ;;  %v17505_v44 = vld [vmem:[#allocation75_spill] sm:$0xff] }
 0x4b0   :  { %v4285_v35 = vpop.f32.mrf.mxu1  ;;  %v3911_v5 = vmax.f32 %v17490_v14, %v3884_v49  ;;  %v17503_v49 = vld [vmem:[#allocation109_spill] sm:$0xff]  ;;  %v9030_v14 = vld [vmem:[%s16753_s1 + $0x2c0] sm:$0xff]  ;;  %v5310_v46 = vld [vmem:[%s16757_s3 + $0x18] sm:$0xff] }
 0x4b1   :  { %17489 = vst [vmem:[#allocation37_spill] sm:$0xff] %v14644_v63  ;;  %v4312_v38 = vmax.f32 %v17491_v26, %v4285_v35  ;;  %v3886_v22 = vpop.f32.mrf.mxu0  ;;  %v3128_v35 = vadd.f32 %v17503_v49, %v17502_v57  ;;  %8339 = vtanh.f32 %v3129_v2  ;;  %v17513_v2 = vld [vmem:[#allocation97_spill] sm:$0xff] }
 0x4b2   :  { %v4287_v17 = vpop.f32.mrf.mxu1  ;;  %4650 = vmatmul.mubr.f32.gmra.mxu0 %v9022_v40  ;;  %5051 = vmatmul.mubr.f32.gmra.mxu1 %v9022_v40  ;;  %v14659_v0 = vmax.f32 %v17494_v28, %v3911_v5  ;;  %v17504_v5 = vld [vmem:[#allocation105_spill] sm:$0xff]  ;;  %v17506_v22 = vld [vmem:[#allocation106_spill] sm:$0xff]  ;;  %8341 = vtanh.f32 %v4328_v51 }
 0x4b3   :  { %v14664_v15 = vmax.f32 %v17497_v33, %v4312_v38  ;;  %7928 = vmatprep.mubr.msk.f32.mxu0 %vm170_vm0, %v9023_v25  ;;  %7976 = vmatprep.mubr.msk.f32.mxu1 %vm170_vm0, %v9023_v25  ;;  %v14671_v32 = vpop.f32.mrf.mxu0  ;;  %v4327_v26 = vadd.f32 %v14484_v31, %v17504_v5  ;;  %v9031_v38 = vld [vmem:[%s16753_s1 + $0x2d8] sm:$0xff]  ;;  %v3127_v17 = vadd.f32 %v17506_v22, %v17505_v44  ;;  %8343 = vtanh.f32 %v3128_v35  ;;  %v9032_v28 = vld [vmem:[%s16753_s1 + $0x2d0] sm:$0xff]  ;;  %v9033_v25 = vld [vmem:[%s16753_s1 + $0x2e8] sm:$0xff] }
 0x4b4   :  { %v14673_v13 = vpop.f32.mrf.mxu1  ;;  %v4326_v31 = vadd.f32 %v14464_v50, %v17507_v61  ;;  %v3126_v33 = vadd.f32 %v17509_v53, %v17508_v42  ;;  %v3124_v51 = vadd.f32 %v17513_v2, %v17504_v5  ;;  %v9036_v49 = vld [vmem:[%s16753_s1 + $0x2f0] sm:$0xff]  ;;  %v17514_v35 = vld [vmem:[#allocation95_spill] sm:$0xff]  ;;  %v17515_v22 = vld [vmem:[#allocation16_spill] sm:$0xff] }
 0x4b5   :  { %17498 = vst [vmem:[#allocation54_spill] sm:$0xff] %v14664_v15  ;;  %v4453_v18 = vpop.f32.mrf.mxu0  ;;  %8345 = vtanh.f32 %v4327_v26  ;;  %v5307_v26 = vld [vmem:[%s16757_s3] sm:$0xff] }
 0x4b6   :  { %v4854_v52 = vpop.f32.mrf.mxu1  ;;  %4655 = vmatmul.mubr.f32.gmra.mxu0 %v9024_v24  ;;  %5056 = vmatmul.mubr.f32.gmra.mxu1 %v9024_v24  ;;  %8347 = vtanh.f32 %v3127_v17  ;;  %v3934_v17 = vadd.f32 %v14639_v10, %v17515_v22  ;;  %v5317_v10 = vld [vmem:[%s16757_s3 + $0x50] sm:$0xff] }
 0x4b7   :  { %7929 = vmatprep.mubr.msk.f32.mxu0 %vm170_vm0, %v9025_v55  ;;  %7977 = vmatprep.mubr.msk.f32.mxu1 %vm170_vm0, %v9025_v55  ;;  %v17510_v52 = vld [vmem:[#allocation108_spill] sm:$0xff]  ;;  %8349 = vtanh.f32 %v4326_v31  ;;  %v9034_v55 = vld [vmem:[%s16753_s1 + $0x2e0] sm:$0xff] }
 0x4b8   :  { %v4325_v24 = vadd.f32 %v14444_v62, %v17510_v52  ;;  %8351 = vtanh.f32 %v3126_v33 }
 0x4b9   :  { %v14683_v43 = vpop.f32.mrf.mxu0  ;;  %v14685_v58 = vpop.f32.mrf.mxu1 }
 0x4ba   :  { %4660 = vmatmul.mubr.f32.gmra.mxu0 %v9026_v37  ;;  %5061 = vmatmul.mubr.f32.gmra.mxu1 %v9026_v37  ;;  %v17511_v37 = vld [vmem:[#allocation111_spill] sm:$0xff]  ;;  %8353 = vtanh.f32 %v4325_v24 }
 0x4bb   :  { %7930 = vmatprep.mubr.msk.f32.mxu0 %vm170_vm0, %v9027_v39  ;;  %7978 = vmatprep.mubr.msk.f32.mxu1 %vm170_vm0, %v9027_v39  ;;  %v4458_v56 = vpop.f32.mrf.mxu0  ;;  %v4859_v11 = vpop.f32.mrf.mxu1  ;;  %v3935_v39 = vadd.f32 %v14659_v0, %v17511_v37  ;;  %v5308_v0 = vld [vmem:[%s16757_s3 + $0x8] sm:$0xff]  ;;  %v17517_v24 = vld [vmem:[#allocation7_spill] sm:$0xff] }
 0x4bc   :  { %v17512_v56 = vld [vmem:[#allocation99_spill] sm:$0xff] }
 0x4bd   :  { %v3125_v11 = vadd.f32 %v17512_v56, %v17501_v45  ;;  %8355 = vtanh.f32 %v3935_v39 }
 0x4be   :  { %4665 = vmatmul.mubr.f32.gmra.mxu0 %v9028_v1  ;;  %5066 = vmatmul.mubr.f32.gmra.mxu1 %v9028_v1  ;;  %v9035_v1 = vld [vmem:[%s16753_s1 + $0x2f8] sm:$0xff]  ;;  %v8340_v31 = vpop.eup %8339 }
 0x4bf   :  { %7931 = vmatprep.mubr.msk.f32.mxu0 %vm170_vm0, %v9029_v59  ;;  %7979 = vmatprep.mubr.msk.f32.mxu1 %vm170_vm0, %v9029_v59  ;;  %v14703_v19 = vpop.f32.mrf.mxu0  ;;  %v14705_v8 = vpop.f32.mrf.mxu1  ;;  %8357 = vtanh.f32 %v3125_v11 }
 0x4c0   :  { %8359 = vtanh.f32 %v3124_v51 }
 0x4c1   :  { %v4463_v4 = vpop.f32.mrf.mxu0  ;;  %v4864_v3 = vpop.f32.mrf.mxu1 }
 0x4c2   :  { %4670 = vmatmul.mubr.f32.gmra.mxu0 %v9030_v14  ;;  %5071 = vmatmul.mubr.f32.gmra.mxu1 %v9030_v14  ;;  %v3123_v14 = vadd.f32 %v17514_v35, %v17507_v61 }
 0x4c3   :  { %7932 = vmatprep.mubr.msk.f32.mxu0 %vm170_vm0, %v9031_v38  ;;  %7980 = vmatprep.mubr.msk.f32.mxu1 %vm170_vm0, %v9031_v38  ;;  %v5309_v38 = vld [vmem:[%s16757_s3 + $0x10] sm:$0xff] }
 0x4c4   :  { %8361 = vtanh.f32 %v3123_v14 }
 0x4c5   :  { %v14725_v40 = vpop.f32.mrf.mxu0  ;;  %v14727_v27 = vpop.f32.mrf.mxu1  ;;  %8363 = vtanh.f32 %v3934_v17 }
 0x4c6   :  { %4675 = vmatmul.mubr.f32.gmra.mxu0 %v9032_v28  ;;  %5076 = vmatmul.mubr.f32.gmra.mxu1 %v9032_v28  ;;  %v17516_v28 = vld [vmem:[#allocation22_spill] sm:$0xff] }
 0x4c7   :  { %7933 = vmatprep.mubr.msk.f32.mxu0 %vm170_vm0, %v9033_v25  ;;  %7981 = vmatprep.mubr.msk.f32.mxu1 %vm170_vm0, %v9033_v25  ;;  %v4468_v18 = vpop.f32.mrf.mxu0  ;;  %v4869_v50 = vpop.f32.mrf.mxu1  ;;  %v3122_v53 = vadd.f32 %v17516_v28, %v17510_v52 }
 0x4c8   :  { %v8342_v18 = vpop.eup %8341 }
 0x4c9   :  { %v8344_v50 = vpop.eup %8343  ;;  %8365 = vtanh.f32 %v3122_v53  ;;  %v17522_v53 = vld [vmem:[#allocation12_spill] sm:$0xff] }
 0x4ca   :  { %4680 = vmatmul.mubr.f32.gmra.mxu0 %v9034_v55  ;;  %5081 = vmatmul.mubr.f32.gmra.mxu1 %v9034_v55  ;;  %v2732_v55 = vadd.f32 %v17517_v24, %v17511_v37  ;;  %v8346_v11 = vpop.eup %8345 }
 0x4cb   :  { %7934 = vmatprep.mubr.msk.f32.mxu0 %vm170_vm0, %v9035_v1  ;;  %7982 = vmatprep.mubr.msk.f32.mxu1 %vm170_vm0, %v9035_v1  ;;  %v14755_v62 = vpop.f32.mrf.mxu0  ;;  %v14757_v59 = vpop.f32.mrf.mxu1  ;;  %v17518_v1 = vmov 0.0  }
 0x4cc   :  { %v8348_v51 = vpop.eup %8347  ;;  %8367 = vtanh.f32 %v2732_v55 }
 0x4cd   :  { %v4473_v4 = vpop.f32.mrf.mxu0  ;;  %v4874_v3 = vpop.f32.mrf.mxu1 }
 0x4ce   :  { %4685 = vmatmul.mubr.f32.gmra.mxu0 %v9036_v49  ;;  %5086 = vmatmul.mubr.f32.gmra.mxu1 %v9036_v49  ;;  %v17520_v4 = vld [vmem:[#allocation14_spill] sm:$0xff]  ;;  %v17521_v3 = vld [vmem:[#allocation72_spill] sm:$0xff]  ;;  %v8350_v35 = vpop.eup %8349 }
 0x4cf   :  { %5659 = vmatprep.mubr.f32.mxu0 %v5308_v0  ;;  %5884 = vmatprep.mubr.f32.mxu1 %v5310_v46  ;;  %v5316_v0 = vld [vmem:[%s16757_s3 + $0x48] sm:$0xff]  ;;  %v17519_v46 = vld [vmem:[#allocation33_spill] sm:$0xff]  ;;  %v2730_v49 = vadd.f32 %v17521_v3, %v17520_v4  ;;  %v3933_v14 = vadd.f32 %v14619_v29, %v17520_v4  ;;  %v8352_v17 = vpop.eup %8351 }
 0x4d0   :  { %v2731_v2 = vadd.f32 %v17519_v46, %v17515_v22  ;;  %v8354_v28 = vpop.eup %8353  ;;  %v5325_v29 = vld [vmem:[%s16757_s3 + $0x90] sm:$0xff] }
 0x4d1   :  { %v14782_v33 = vpop.f32.mrf.mxu0  ;;  %v14784_v25 = vpop.f32.mrf.mxu1 }
 0x4d2   :  { %5660 = vmatmul.mubr.f32.vlgmr.msra.gmra.mxu0 %v5307_v26  ;;  %5885 = vmatmul.mubr.f32.vlgmr.msra.gmra.mxu1 %v5309_v38  ;;  %8369 = vtanh.f32 %v2731_v2 }
 0x4d3   :  { %6046 = vmatpush1.msra.mxu0 %v8340_v31  ;;  %6271 = vmatpush1.msra.mxu1 %v8342_v18  ;;  %v4478_v39 = vpop.f32.mrf.mxu0  ;;  %v4879_v56 = vpop.f32.mrf.mxu1  ;;  %v5326_v31 = vld [vmem:[%s16757_s3 + $0x98] sm:$0xff]  ;;  %8371 = vtanh.f32 %v2730_v49 }
 0x4d4   :  { %6047 = vmatprep.subr.mxu0 %v17518_v1  ;;  %6272 = vmatprep.subr.mxu1 %v17518_v1  ;;  %v17523_v18 = vld [vmem:[#allocation94_spill] sm:$0xff]  ;;  %v5335_v39 = vld [vmem:[%s16757_s3 + $0xe0] sm:$0xff]  ;;  %v8356_v56 = vpop.eup %8355  ;;  %8373 = vtanh.f32 %v3933_v14  ;;  %v3931_v14 = vadd.f32 %v14579_v9, %v17499_v7 }
 0x4d5   :  { %6048 = vmatpush1.msra.mxu0 %v8344_v50  ;;  %6273 = vmatpush1.msra.mxu1 %v8346_v11  ;;  %v2729_v50 = vadd.f32 %v17523_v18, %v17522_v53  ;;  %v8358_v11 = vpop.eup %8357  ;;  %v5319_v9 = vld [vmem:[%s16757_s3 + $0x60] sm:$0xff] }
 0x4d6   :  { %5664 = vmatprep.mubr.f32.mxu0 %v5317_v10  ;;  %6049 = vmatprep.subr.mxu0 %v17518_v1  ;;  %v3932_v10 = vadd.f32 %v14599_v6, %v17522_v53  ;;  %v17525_v6 = vld [vmem:[#allocation90_spill] sm:$0xff] }
 0x4d7   :  { %6274 = vmatprep.subr.mxu1 %v17518_v1  ;;  %5665 = vmatmul.mubr.f32.gmra.mxu0 %v5316_v0  ;;  %v14804_v26 = vpop.f32.mrf.mxu0  ;;  %v14806_v38 = vpop.f32.mrf.mxu1  ;;  %v17524_v0 = vld [vmem:[#allocation92_spill] sm:$0xff]  ;;  %v2727_v2 = vadd.f32 %v17525_v6, %v17502_v57  ;;  %8375 = vtanh.f32 %v2729_v50  ;;  %v3930_v50 = vadd.f32 %v14559_v34, %v17502_v57  ;;  %v5353_v34 = vld [vmem:[%s16757_s3 + $0x170] sm:$0xff] }
 0x4d8   :  { %6050 = vmatpush1.msra.mxu0 %v8348_v51  ;;  %6275 = vmatpush1.msra.mxu1 %v8350_v35  ;;  %v2728_v46 = vadd.f32 %v17524_v0, %v17499_v7  ;;  %v5334_v51 = vld [vmem:[%s16757_s3 + $0xd8] sm:$0xff]  ;;  %v8360_v35 = vpop.eup %8359  ;;  %8377 = vtanh.f32 %v3932_v10  ;;  %v17526_v10 = vld [vmem:[#allocation88_spill] sm:$0xff] }
 0x4d9   :  { %6051 = vmatprep.subr.mxu0 %v17518_v1  ;;  %6276 = vmatprep.subr.mxu1 %v17518_v1  ;;  %v4483_v24 = vpop.f32.mrf.mxu0  ;;  %v4884_v55 = vpop.f32.mrf.mxu1 }
 0x4da   :  { %6052 = vmatpush1.msra.mxu0 %v8352_v17  ;;  %6277 = vmatpush1.msra.mxu1 %v8354_v28  ;;  %v5344_v17 = vld [vmem:[%s16757_s3 + $0x128] sm:$0xff]  ;;  %v8362_v18 = vpop.eup %8361  ;;  %8379 = vtanh.f32 %v2728_v46  ;;  %v5343_v24 = vld [vmem:[%s16757_s3 + $0x120] sm:$0xff] }
 0x4db   :  { %5669 = vmatprep.mubr.f32.mxu0 %v5326_v31  ;;  %6053 = vmatprep.subr.mxu0 %v17518_v1  ;;  %8381 = vtanh.f32 %v2727_v2  ;;  %v3929_v2 = vadd.f32 %v14539_v21, %v17505_v44  ;;  %v3928_v21 = vadd.f32 %v14519_v23, %v17508_v42  ;;  %v5362_v23 = vld [vmem:[%s16757_s3 + $0x1b8] sm:$0xff] }
 0x4dc   :  { %5670 = vmatmul.mubr.f32.gmra.mxu0 %v5325_v29  ;;  %6278 = vmatprep.subr.mxu1 %v17518_v1  ;;  %v8364_v29 = vpop.eup %8363  ;;  %8383 = vtanh.f32 %v3931_v14 }
 0x4dd   :  { %6054 = vmatpush1.msra.mxu0 %v8358_v11  ;;  %5674 = vmatprep.mubr.f32.mxu0 %v5335_v39  ;;  %v14832_v3 = vpop.f32.mrf.mxu0  ;;  %v14834_v49 = vpop.f32.mrf.mxu1  ;;  %v2726_v39 = vadd.f32 %v17526_v10, %v17505_v44  ;;  %8385 = vtanh.f32 %v3930_v50  ;;  %v17530_v50 = vld [vmem:[#allocation76_spill] sm:$0xff] }
 0x4de   :  { %6055 = vmatprep.subr.mxu0 %v17518_v1  ;;  %6279 = vmatpush1.msra.mxu1 %v8356_v56  ;;  %v8366_v55 = vpop.eup %8365  ;;  %v17527_v56 = vld [vmem:[#allocation86_spill] sm:$0xff] }
 0x4df   :  { %6056 = vmatpush1.msra.mxu0 %v8360_v35  ;;  %6280 = vmatprep.subr.mxu1 %v17518_v1  ;;  %v4488_v31 = vpop.f32.mrf.mxu0  ;;  %v4889_v28 = vpop.f32.mrf.mxu1  ;;  %v2725_v11 = vadd.f32 %v17527_v56, %v17508_v42  ;;  %v5352_v35 = vld [vmem:[%s16757_s3 + $0x168] sm:$0xff]  ;;  %8387 = vtanh.f32 %v2726_v39  ;;  %v5361_v56 = vld [vmem:[%s16757_s3 + $0x1b0] sm:$0xff] }
 0x4e0   :  { %6057 = vmatprep.subr.mxu0 %v17518_v1  ;;  %5675 = vmatmul.mubr.f32.gmra.mxu0 %v5334_v51  ;;  %v8368_v6 = vpop.eup %8367  ;;  %v5318_v51 = vld [vmem:[%s16757_s3 + $0x58] sm:$0xff] }
 0x4e1   :  { %6058 = vmatpush1.msra.mxu0 %v8362_v18  ;;  %5679 = vmatprep.mubr.f32.mxu0 %v5344_v17  ;;  %v8370_v31 = vpop.eup %8369  ;;  %8389 = vtanh.f32 %v2725_v11  ;;  %v5328_v11 = vld [vmem:[%s16757_s3 + $0xa8] sm:$0xff] }
 0x4e2   :  { %6059 = vmatprep.subr.mxu0 %v17518_v1  ;;  %6281 = vmatpush1.msra.mxu1 %v8364_v29  ;;  %v8372_v28 = vpop.eup %8371  ;;  %8391 = vtanh.f32 %v3929_v2  ;;  %v17531_v29 = vld [vmem:[#allocation73_spill] sm:$0xff] }
 0x4e3   :  { %6060 = vmatpush1.msra.mxu0 %v8366_v55  ;;  %5889 = vmatprep.mubr.f32.mxu1 %v5319_v9  ;;  %v14860_v0 = vpop.f32.mrf.mxu0  ;;  %v14862_v46 = vpop.f32.mrf.mxu1  ;;  %v3534_v9 = vadd.f32 %v17530_v50, %v17511_v37  ;;  %8393 = vtanh.f32 %v3928_v21 }
 0x4e4   :  { %17528 = vst [vmem:[#allocation15_spill] sm:$0xff] %v14860_v0  ;;  %17529 = vst [vmem:[#allocation6_spill] sm:$0xff] %v14862_v46  ;;  %6061 = vmatprep.subr.mxu0 %v17518_v1  ;;  %5680 = vmatmul.mubr.f32.gmra.mxu0 %v5343_v24  ;;  %v8374_v18 = vpop.eup %8373  ;;  %v3533_v24 = vadd.f32 %v17531_v29, %v17515_v22  ;;  %v3925_v29 = vadd.f32 %v14459_v30, %v17507_v61 }
 0x4e5   :  { %6062 = vmatpush1.msra.mxu0 %v8368_v6  ;;  %5684 = vmatprep.mubr.f32.mxu0 %v5353_v34  ;;  %v4493_v14 = vpop.f32.mrf.mxu0  ;;  %v4894_v17 = vpop.f32.mrf.mxu1  ;;  %v3927_v34 = vadd.f32 %v14499_v36, %v17501_v45  ;;  %8395 = vtanh.f32 %v3534_v9  ;;  %v3926_v36 = vadd.f32 %v14479_v12, %v17504_v5  ;;  %v5371_v12 = vld [vmem:[%s16757_s3 + $0x200] sm:$0xff]  ;;  %v3924_v30 = vadd.f32 %v14439_v54, %v17510_v52  ;;  %v5380_v54 = vld [vmem:[%s16757_s3 + $0x248] sm:$0xff] }
 0x4e6   :  { %6063 = vmatprep.subr.mxu0 %v17518_v1  ;;  %6282 = vmatprep.subr.mxu1 %v17518_v1  ;;  %v8376_v39 = vpop.eup %8375  ;;  %8397 = vtanh.f32 %v3533_v24  ;;  %v5370_v24 = vld [vmem:[%s16757_s3 + $0x1f8] sm:$0xff] }
 0x4e7   :  { %6064 = vmatpush1.msra.mxu0 %v8370_v31  ;;  %5890 = vmatmul.mubr.f32.gmra.mxu1 %v5318_v51  ;;  %v8378_v6 = vpop.eup %8377  ;;  %v17534_v31 = vld [vmem:[#allocation51_spill] sm:$0xff]  ;;  %8399 = vtanh.f32 %v3927_v34 }
 0x4e8   :  { %6065 = vmatprep.subr.mxu0 %v17518_v1  ;;  %5685 = vmatmul.mubr.f32.gmra.mxu0 %v5352_v35  ;;  %v5327_v35 = vld [vmem:[%s16757_s3 + $0xa0] sm:$0xff]  ;;  %v8380_v14 = vpop.eup %8379  ;;  %v3532_v21 = vadd.f32 %v17534_v31, %v17520_v4  ;;  %8401 = vtanh.f32 %v3926_v36  ;;  %v17538_v36 = vld [vmem:[#allocation112_spill] sm:$0xff] }
 0x4e9   :  { %6066 = vmatpush1.msra.mxu0 %v8372_v28  ;;  %6283 = vmatpush1.msra.mxu1 %v8374_v18  ;;  %v14885_v55 = vpop.f32.mrf.mxu0  ;;  %v14887_v10 = vpop.f32.mrf.mxu1  ;;  %v17535_v18 = vld [vmem:[#allocation113_spill] sm:$0xff] }
 0x4ea   :  { %17532 = vst [vmem:[#allocation13_spill] sm:$0xff] %v14885_v55  ;;  %17533 = vst [vmem:[#allocation5_spill] sm:$0xff] %v14887_v10  ;;  %6067 = vmatprep.subr.mxu0 %v17518_v1  ;;  %6284 = vmatprep.subr.mxu1 %v17518_v1  ;;  %v8382_v17 = vpop.eup %8381  ;;  %v3531_v50 = vadd.f32 %v17535_v18, %v17522_v53  ;;  %8403 = vtanh.f32 %v3532_v21  ;;  %v17541_v21 = vld [vmem:[#allocation110_spill] sm:$0xff] }
 0x4eb   :  { %6068 = vmatpush1.msra.mxu0 %v8376_v39  ;;  %5689 = vmatprep.mubr.f32.mxu0 %v5362_v23  ;;  %v4498_v2 = vpop.f32.mrf.mxu0  ;;  %v4899_v51 = vpop.f32.mrf.mxu1  ;;  %v5337_v39 = vld [vmem:[%s16757_s3 + $0xf0] sm:$0xff]  ;;  %v5346_v18 = vld [vmem:[%s16757_s3 + $0x138] sm:$0xff] }
 0x4ec   :  { %6069 = vmatprep.subr.mxu0 %v17518_v1  ;;  %6285 = vmatpush1.msra.mxu1 %v8378_v6  ;;  %v8384_v28 = vpop.eup %8383  ;;  %v5336_v6 = vld [vmem:[%s16757_s3 + $0xe8] sm:$0xff]  ;;  %8405 = vtanh.f32 %v3531_v50 }
 0x4ed   :  { %5690 = vmatmul.mubr.f32.gmra.mxu0 %v5361_v56  ;;  %5894 = vmatprep.mubr.f32.mxu1 %v5328_v11  ;;  %v8386_v34 = vpop.eup %8385  ;;  %8407 = vtanh.f32 %v3925_v29 }
 0x4ee   :  { %6070 = vmatpush1.msra.mxu0 %v8380_v14  ;;  %6286 = vmatprep.subr.mxu1 %v17518_v1  ;;  %v8388_v2 = vpop.eup %8387  ;;  %8409 = vtanh.f32 %v3924_v30 }
 0x4ef   :  { %5895 = vmatmul.mubr.f32.gmra.mxu1 %v5327_v35  ;;  %6071 = vmatprep.subr.mxu0 %v17518_v1  ;;  %v14914_v9 = vpop.f32.mrf.mxu0  ;;  %v14916_v23 = vpop.f32.mrf.mxu1  ;;  %v3530_v35 = vadd.f32 %v17538_v36, %v17499_v7 }
 0x4f0   :  { %17536 = vst [vmem:[#allocation11_spill] sm:$0xff] %v14914_v9  ;;  %17537 = vst [vmem:[#allocation47_spill] sm:$0xff] %v14916_v23  ;;  %6287 = vmatpush1.msra.mxu1 %v8384_v28  ;;  %6072 = vmatpush1.msra.mxu0 %v8382_v17  ;;  %v8390_v51 = vpop.eup %8389  ;;  %v5379_v28 = vld [vmem:[%s16757_s3 + $0x240] sm:$0xff] }
 0x4f1   :  { %6288 = vmatprep.subr.mxu1 %v17518_v1  ;;  %5694 = vmatprep.mubr.f32.mxu0 %v5371_v12  ;;  %v4503_v56 = vpop.f32.mrf.mxu0  ;;  %v4904_v11 = vpop.f32.mrf.mxu1  ;;  %v3529_v12 = vadd.f32 %v17541_v21, %v17502_v57  ;;  %8411 = vtanh.f32 %v3530_v35 }
 0x4f2   :  { %6073 = vmatprep.subr.mxu0 %v17518_v1  ;;  %6289 = vmatpush1.msra.mxu1 %v8386_v34  ;;  %v8392_v14 = vpop.eup %8391  ;;  %v5345_v56 = vld [vmem:[%s16757_s3 + $0x130] sm:$0xff] }
 0x4f3   :  { %5695 = vmatmul.mubr.f32.gmra.mxu0 %v5370_v24  ;;  %5899 = vmatprep.mubr.f32.mxu1 %v5337_v39  ;;  %v8394_v50 = vpop.eup %8393  ;;  %v17542_v39 = vld [vmem:[#allocation107_spill] sm:$0xff]  ;;  %8413 = vtanh.f32 %v3529_v12  ;;  %v5388_v12 = vld [vmem:[%s16757_s3 + $0x288] sm:$0xff] }
 0x4f4   :  { %6074 = vmatpush1.msra.mxu0 %v8388_v2  ;;  %6290 = vmatprep.subr.mxu1 %v17518_v1  ;;  %v3528_v34 = vadd.f32 %v17542_v39, %v17505_v44  ;;  %v8396_v11 = vpop.eup %8395 }
 0x4f5   :  { %5900 = vmatmul.mubr.f32.gmra.mxu1 %v5336_v6  ;;  %6075 = vmatprep.subr.mxu0 %v17518_v1  ;;  %v14940_v17 = vpop.f32.mrf.mxu0  ;;  %v14942_v31 = vpop.f32.mrf.mxu1  ;;  %v17543_v6 = vld [vmem:[#allocation104_spill] sm:$0xff] }
 0x4f6   :  { %17539 = vst [vmem:[#allocation9_spill] sm:$0xff] %v14940_v17  ;;  %17540 = vst [vmem:[#allocation69_spill] sm:$0xff] %v14942_v31  ;;  %6291 = vmatpush1.msra.mxu1 %v8392_v14  ;;  %6076 = vmatpush1.msra.mxu0 %v8390_v51  ;;  %v8398_v30 = vpop.eup %8397  ;;  %v3527_v2 = vadd.f32 %v17543_v6, %v17508_v42  ;;  %v5389_v51 = vld [vmem:[%s16757_s3 + $0x290] sm:$0xff]  ;;  %v17544_v14 = vld [vmem:[#allocation100_spill] sm:$0xff]  ;;  %8415 = vtanh.f32 %v3528_v34 }
 0x4f7   :  { %6292 = vmatprep.subr.mxu1 %v17518_v1  ;;  %5699 = vmatprep.mubr.f32.mxu0 %v5380_v54  ;;  %v4508_v29 = vpop.f32.mrf.mxu0  ;;  %v4909_v24 = vpop.f32.mrf.mxu1  ;;  %v3526_v21 = vadd.f32 %v17544_v14, %v17501_v45  ;;  %v5354_v34 = vld [vmem:[%s16757_s3 + $0x178] sm:$0xff] }
 0x4f8   :  { %6077 = vmatprep.subr.mxu0 %v17518_v1  ;;  %6293 = vmatpush1.msra.mxu1 %v8394_v50  ;;  %v8400_v36 = vpop.eup %8399  ;;  %v17545_v24 = vld [vmem:[#allocation98_spill] sm:$0xff]  ;;  %8417 = vtanh.f32 %v3527_v2 }
 0x4f9   :  { %5700 = vmatmul.mubr.f32.gmra.mxu0 %v5379_v28  ;;  %5904 = vmatprep.mubr.f32.mxu1 %v5346_v18  ;;  %v5355_v28 = vld [vmem:[%s16757_s3 + $0x180] sm:$0xff]  ;;  %v8402_v18 = vpop.eup %8401  ;;  %v3525_v39 = vadd.f32 %v17545_v24, %v17504_v5  ;;  %8419 = vtanh.f32 %v3526_v21  ;;  %v5398_v2 = vld [vmem:[%s16757_s3 + $0x2d8] sm:$0xff]  ;;  %v5397_v21 = vld [vmem:[%s16757_s3 + $0x2d0] sm:$0xff] }
 0x4fa   :  { %6078 = vmatpush2.msra.mxu0 %v8396_v11  ;;  %6294 = vmatprep.subr.mxu1 %v17518_v1  ;;  %v5534_v45 = vld [vmem:[%s16757_s3 + $0x718] sm:$0xff] }
 0x4fb   :  { %5905 = vmatmul.mubr.f32.gmra.mxu1 %v5345_v56  ;;  %6079 = vmatprep.subr.mxu0 %v17518_v1  ;;  %v14966_v35 = vpop.f32.mrf.mxu0  ;;  %v14968_v54 = vpop.f32.mrf.mxu1  ;;  %8421 = vtanh.f32 %v3525_v39 }
 0x4fc   :  { %6295 = vmatpush1.msra.mxu1 %v8400_v36  ;;  %6080 = vmatpush2.msra.mxu0 %v8398_v30  ;;  %v8404_v56 = vpop.eup %8403  ;;  %v17546_v30 = vld [vmem:[#allocation96_spill] sm:$0xff]  ;;  %v5091_v0 = vmax.f32 %v14673_v13, %v14968_v54 }
 0x4fd   :  { %6296 = vmatprep.subr.mxu1 %v17518_v1  ;;  %5704 = vmatprep.mubr.f32.mxu0 %v5389_v51  ;;  %v4513_v50 = vpop.f32.mrf.mxu0  ;;  %v4914_v29 = vpop.f32.mrf.mxu1  ;;  %v3524_v6 = vadd.f32 %v17546_v30, %v17507_v61  ;;  %v5516_v61 = vld [vmem:[%s16757_s3 + $0x688] sm:$0xff] }
 0x4fe   :  { %6081 = vmatprep.subr.mxu0 %v17518_v1  ;;  %6297 = vmatpush1.msra.mxu1 %v8402_v18  ;;  %v8406_v11 = vpop.eup %8405  ;;  %v5364_v18 = vld [vmem:[%s16757_s3 + $0x1c8] sm:$0xff]  ;;  %v5363_v29 = vld [vmem:[%s16757_s3 + $0x1c0] sm:$0xff] }
 0x4ff   :  { %5705 = vmatmul.mubr.f32.gmra.mxu0 %v5388_v12  ;;  %5909 = vmatprep.mubr.f32.mxu1 %v5355_v28  ;;  %v8408_v51 = vpop.eup %8407  ;;  %v17547_v12 = vld [vmem:[#allocation36_spill] sm:$0xff]  ;;  %8423 = vtanh.f32 %v3524_v6  ;;  %v17549_v6 = vld [vmem:[#allocation70_spill] sm:$0xff] }
 0x500   :  { %6082 = vmatpush2.msra.mxu0 %v8404_v56  ;;  %6298 = vmatprep.subr.mxu1 %v17518_v1  ;;  %v3523_v28 = vadd.f32 %v17547_v12, %v17510_v52  ;;  %v8410_v50 = vpop.eup %8409  ;;  %v5406_v12 = vld [vmem:[%s16757_s3 + $0x318] sm:$0xff] }
 0x501   :  { %5910 = vmatmul.mubr.f32.gmra.mxu1 %v5354_v34  ;;  %6083 = vmatprep.subr.mxu0 %v17518_v1  ;;  %v14992_v36 = vpop.f32.mrf.mxu0  ;;  %v14994_v14 = vpop.f32.mrf.mxu1  ;;  %v17548_v34 = vld [vmem:[#allocation74_spill] sm:$0xff] }
 0x502   :  { %6299 = vmatpush1.msra.mxu1 %v8408_v51  ;;  %6084 = vmatpush2.msra.mxu0 %v8406_v11  ;;  %v3133_v56 = vadd.f32 %v17548_v34, %v17511_v37  ;;  %v5407_v11 = vld [vmem:[%s16757_s3 + $0x320] sm:$0xff]  ;;  %v8412_v30 = vpop.eup %8411  ;;  %8425 = vtanh.f32 %v3523_v28  ;;  %v3132_v51 = vadd.f32 %v17549_v6, %v17515_v22  ;;  %v5498_v37 = vld [vmem:[%s16757_s3 + $0x5f8] sm:$0xff] }
 0x503   :  { %6300 = vmatprep.subr.mxu1 %v17518_v1  ;;  %5709 = vmatprep.mubr.f32.mxu0 %v5398_v2  ;;  %v4518_v24 = vpop.f32.mrf.mxu0  ;;  %v4919_v39 = vpop.f32.mrf.mxu1  ;;  %v5373_v2 = vld [vmem:[%s16757_s3 + $0x210] sm:$0xff] }
 0x504   :  { %6085 = vmatprep.subr.mxu0 %v17518_v1  ;;  %6301 = vmatpush1.msra.mxu1 %v8410_v50  ;;  %v8414_v50 = vpop.eup %8413  ;;  %v17550_v24 = vld [vmem:[#allocation48_spill] sm:$0xff]  ;;  %8427 = vtanh.f32 %v3133_v56  ;;  %v5415_v56 = vld [vmem:[%s16757_s3 + $0x360] sm:$0xff] }
 0x505   :  { %5710 = vmatmul.mubr.f32.gmra.mxu0 %v5397_v21  ;;  %5914 = vmatprep.mubr.f32.mxu1 %v5364_v18  ;;  %v5372_v21 = vld [vmem:[%s16757_s3 + $0x208] sm:$0xff]  ;;  %v3131_v39 = vadd.f32 %v17550_v24, %v17520_v4  ;;  %v8416_v34 = vpop.eup %8415  ;;  %v3130_v24 = vadd.f32 %v17551_v16, %v17522_v53  ;;  %8429 = vtanh.f32 %v3132_v51  ;;  %v5425_v16 = vld [vmem:[%s16757_s3 + $0x3b0] sm:$0xff] }
 0x506   :  { %6086 = vmatpush2.msra.mxu0 %v8412_v30  ;;  %5915 = vmatmul.mubr.f32.gmra.mxu1 %v5363_v29  ;;  %v5416_v29 = vld [vmem:[%s16757_s3 + $0x368] sm:$0xff] }
 0x507   :  { %6087 = vmatprep.subr.mxu0 %v17518_v1  ;;  %5714 = vmatprep.mubr.f32.mxu0 %v5407_v11  ;;  %v15026_v18 = vpop.f32.mrf.mxu0  ;;  %v15028_v28 = vpop.f32.mrf.mxu1  ;;  %v5382_v11 = vld [vmem:[%s16757_s3 + $0x258] sm:$0xff]  ;;  %8431 = vtanh.f32 %v3131_v39  ;;  %v5424_v39 = vld [vmem:[%s16757_s3 + $0x3a8] sm:$0xff] }
 0x508   :  { %6088 = vmatpush2.msra.mxu0 %v8414_v50  ;;  %5919 = vmatprep.mubr.f32.mxu1 %v5373_v2  ;;  %v8418_v2 = vpop.eup %8417  ;;  %v5391_v50 = vld [vmem:[%s16757_s3 + $0x2a0] sm:$0xff]  ;;  %8433 = vtanh.f32 %v3130_v24  ;;  %v5434_v24 = vld [vmem:[%s16757_s3 + $0x3f8] sm:$0xff] }
 0x509   :  { %6089 = vmatprep.subr.mxu0 %v17518_v1  ;;  %5715 = vmatmul.mubr.f32.gmra.mxu0 %v5406_v12  ;;  %v4523_v30 = vpop.f32.mrf.mxu0  ;;  %v4924_v6 = vpop.f32.mrf.mxu1  ;;  %v5381_v12 = vld [vmem:[%s16757_s3 + $0x250] sm:$0xff] }
 0x50a   :  { %6090 = vmatpush2.msra.mxu0 %v8416_v34  ;;  %5920 = vmatmul.mubr.f32.gmra.mxu1 %v5372_v21  ;;  %v8420_v51 = vpop.eup %8419 }
 0x50b   :  { %6091 = vmatprep.subr.mxu0 %v17518_v1  ;;  %5719 = vmatprep.mubr.f32.mxu0 %v5416_v29  ;;  %v8422_v34 = vpop.eup %8421 }
 0x50c   :  { %6092 = vmatpush2.msra.mxu0 %v8418_v2  ;;  %5924 = vmatprep.mubr.f32.mxu1 %v5382_v11  ;;  %v5390_v11 = vld [vmem:[%s16757_s3 + $0x298] sm:$0xff]  ;;  %v5400_v2 = vld [vmem:[%s16757_s3 + $0x2e8] sm:$0xff] }
 0x50d   :  { %6093 = vmatprep.subr.mxu0 %v17518_v1  ;;  %5720 = vmatmul.mubr.f32.gmra.mxu0 %v5415_v56  ;;  %v15055_v21 = vpop.f32.mrf.mxu0  ;;  %v15057_v29 = vpop.f32.mrf.mxu1 }
 0x50e   :  { %6094 = vmatpush2.msra.mxu0 %v8420_v51  ;;  %5925 = vmatmul.mubr.f32.gmra.mxu1 %v5381_v12  ;;  %v8424_v56 = vpop.eup %8423  ;;  %v5433_v12 = vld [vmem:[%s16757_s3 + $0x3f0] sm:$0xff] }
 0x50f   :  { %6095 = vmatprep.subr.mxu0 %v17518_v1  ;;  %5724 = vmatprep.mubr.f32.mxu0 %v5425_v16  ;;  %v4528_v30 = vpop.f32.mrf.mxu0  ;;  %v4929_v6 = vpop.f32.mrf.mxu1 }
 0x510   :  { %6096 = vmatpush2.msra.mxu0 %v8422_v34  ;;  %5929 = vmatprep.mubr.f32.mxu1 %v5391_v50  ;;  %v8426_v50 = vpop.eup %8425  ;;  %v5443_v34 = vld [vmem:[%s16757_s3 + $0x440] sm:$0xff] }
 0x511   :  { %6097 = vmatprep.subr.mxu0 %v17518_v1  ;;  %5725 = vmatmul.mubr.f32.gmra.mxu0 %v5424_v39  ;;  %v5399_v39 = vld [vmem:[%s16757_s3 + $0x2e0] sm:$0xff]  ;;  %v8428_v6 = vpop.eup %8427 }
 0x512   :  { %6098 = vmatpush2.msra.mxu0 %v8424_v56  ;;  %5930 = vmatmul.mubr.f32.gmra.mxu1 %v5390_v11  ;;  %v15076_v16 = vpop.f32.mrf.mxu0  ;;  %v15078_v51 = vpop.f32.mrf.mxu1  ;;  %v5442_v56 = vld [vmem:[%s16757_s3 + $0x438] sm:$0xff] }
 0x513   :  { %6099 = vmatprep.subr.mxu0 %v17518_v1  ;;  %5729 = vmatprep.mubr.f32.mxu0 %v5434_v24  ;;  %v5409_v24 = vld [vmem:[%s16757_s3 + $0x330] sm:$0xff] }
 0x514   :  { %6100 = vmatpush2.msra.mxu0 %v8426_v50  ;;  %5934 = vmatprep.mubr.f32.mxu1 %v5400_v2  ;;  %v4533_v11 = vpop.f32.mrf.mxu0  ;;  %v4934_v30 = vpop.f32.mrf.mxu1 }
 0x515   :  { %6101 = vmatprep.subr.mxu0 %v17518_v1  ;;  %5730 = vmatmul.mubr.f32.gmra.mxu0 %v5433_v12  ;;  %v8430_v11 = vpop.eup %8429  ;;  %v5408_v12 = vld [vmem:[%s16757_s3 + $0x328] sm:$0xff] }
 0x516   :  { %6102 = vmatpush2.msra.mxu0 %v8428_v6  ;;  %5935 = vmatmul.mubr.f32.gmra.mxu1 %v5399_v39  ;;  %v15094_v2 = vpop.f32.mrf.mxu0  ;;  %v15096_v50 = vpop.f32.mrf.mxu1  ;;  %v5452_v39 = vld [vmem:[%s16757_s3 + $0x488] sm:$0xff] }
 0x517   :  { %6103 = vmatprep.subr.mxu0 %v17518_v1  ;;  %5734 = vmatprep.mubr.f32.mxu0 %v5443_v34  ;;  %v8432_v47 = vpop.eup %8431  ;;  %v5418_v34 = vld [vmem:[%s16757_s3 + $0x378] sm:$0xff] }
 0x518   :  { %6104 = vmatpush2.msra.mxu0 %v8430_v11  ;;  %5939 = vmatprep.mubr.f32.mxu1 %v5409_v24  ;;  %v4538_v30 = vpop.f32.mrf.mxu0  ;;  %v4939_v6 = vpop.f32.mrf.mxu1  ;;  %v5451_v24 = vld [vmem:[%s16757_s3 + $0x480] sm:$0xff] }
 0x519   :  { %6105 = vmatprep.subr.mxu0 %v17518_v1  ;;  %5735 = vmatmul.mubr.f32.gmra.mxu0 %v5442_v56  ;;  %v8434_v30 = vpop.eup %8433  ;;  %v5417_v56 = vld [vmem:[%s16757_s3 + $0x370] sm:$0xff] }
 0x51a   :  { %6106 = vmatpush2.msra.mxu0 %v8432_v47  ;;  %5940 = vmatmul.mubr.f32.gmra.mxu1 %v5408_v12  ;;  %v15112_v11 = vpop.f32.mrf.mxu0  ;;  %v15114_v60 = vpop.f32.mrf.mxu1  ;;  %v5461_v47 = vld [vmem:[%s16757_s3 + $0x4d0] sm:$0xff]  ;;  %v5427_v12 = vld [vmem:[%s16757_s3 + $0x3c0] sm:$0xff] }
 0x51b   :  { %6107 = vmatprep.subr.mxu0 %v17518_v1  ;;  %5739 = vmatprep.mubr.f32.mxu0 %v5452_v39  ;;  %v5460_v39 = vld [vmem:[%s16757_s3 + $0x4c8] sm:$0xff] }
 0x51c   :  { %6108 = vmatpush2.msra.mxu0 %v8434_v30  ;;  %5944 = vmatprep.mubr.f32.mxu1 %v5418_v34  ;;  %v4543_v6 = vpop.f32.mrf.mxu0  ;;  %v4944_v20 = vpop.f32.mrf.mxu1  ;;  %v5426_v34 = vld [vmem:[%s16757_s3 + $0x3b8] sm:$0xff]  ;;  %v5435_v30 = vld [vmem:[%s16757_s3 + $0x400] sm:$0xff] }
 0x51d   :  { %5740 = vmatmul.mubr.f32.gmra.mxu0 %v5451_v24  ;;  %6302 = vmatprep.subr.mxu1 %v17518_v1  ;;  %v5470_v20 = vld [vmem:[%s16757_s3 + $0x518] sm:$0xff]  ;;  %v5469_v6 = vld [vmem:[%s16757_s3 + $0x510] sm:$0xff] }
 0x51e   :  { %5945 = vmatmul.mubr.f32.gmra.mxu1 %v5417_v56  ;;  %5744 = vmatprep.mubr.f32.mxu0 %v5461_v47  ;;  %v15130_v48 = vpop.f32.mrf.mxu0  ;;  %v15132_v53 = vpop.f32.mrf.mxu1  ;;  %v5436_v56 = vld [vmem:[%s16757_s3 + $0x408] sm:$0xff]  ;;  %v5478_v24 = vld [vmem:[%s16757_s3 + $0x558] sm:$0xff] }
 0x51f   :  { %5949 = vmatprep.mubr.f32.mxu1 %v5427_v12 }
 0x520   :  { %v4548_v47 = vpop.f32.mrf.mxu0  ;;  %v4949_v12 = vpop.f32.mrf.mxu1 }
 0x521   :  { %5745 = vmatmul.mubr.f32.gmra.mxu0 %v5460_v39  ;;  %v5479_v47 = vld [vmem:[%s16757_s3 + $0x560] sm:$0xff] }
 0x522   :  { %5950 = vmatmul.mubr.f32.gmra.mxu1 %v5426_v34  ;;  %5749 = vmatprep.mubr.f32.mxu0 %v5470_v20  ;;  %v15150_v41 = vpop.f32.mrf.mxu0  ;;  %v15152_v4 = vpop.f32.mrf.mxu1  ;;  %v5445_v20 = vld [vmem:[%s16757_s3 + $0x450] sm:$0xff]  ;;  %v5444_v34 = vld [vmem:[%s16757_s3 + $0x448] sm:$0xff]  ;;  %v5487_v39 = vld [vmem:[%s16757_s3 + $0x5a0] sm:$0xff] }
 0x523   :  { %17552 = vst [vmem:[#allocation67_spill] sm:$0xff] %v15150_v41  ;;  %17553 = vst [vmem:[#allocation84_spill] sm:$0xff] %v15152_v4  ;;  %5954 = vmatprep.mubr.f32.mxu1 %v5436_v56  ;;  %v5543_v4 = vld [vmem:[%s16757_s3 + $0x760] sm:$0xff]  ;;  %v5552_v41 = vld [vmem:[%s16757_s3 + $0x7a8] sm:$0xff] }
 0x524   :  { %v4553_v12 = vpop.f32.mrf.mxu0  ;;  %v4954_v56 = vpop.f32.mrf.mxu1 }
 0x525   :  { %5750 = vmatmul.mubr.f32.gmra.mxu0 %v5469_v6  ;;  %v5488_v12 = vld [vmem:[%s16757_s3 + $0x5a8] sm:$0xff]  ;;  %v5453_v6 = vld [vmem:[%s16757_s3 + $0x490] sm:$0xff] }
 0x526   :  { %5955 = vmatmul.mubr.f32.gmra.mxu1 %v5435_v30  ;;  %5754 = vmatprep.mubr.f32.mxu0 %v5479_v47  ;;  %v15170_v1 = vpop.f32.mrf.mxu0  ;;  %v15172_v63 = vpop.f32.mrf.mxu1  ;;  %v5454_v47 = vld [vmem:[%s16757_s3 + $0x498] sm:$0xff]  ;;  %v5496_v30 = vld [vmem:[%s16757_s3 + $0x5e8] sm:$0xff] }
 0x527   :  { %17554 = vst [vmem:[#allocation65_spill] sm:$0xff] %v15170_v1  ;;  %17555 = vst [vmem:[#allocation82_spill] sm:$0xff] %v15172_v63  ;;  %5959 = vmatprep.mubr.f32.mxu1 %v5445_v20  ;;  %v5525_v1 = vld [vmem:[%s16757_s3 + $0x6d0] sm:$0xff] }
 0x528   :  { %v4558_v56 = vpop.f32.mrf.mxu0  ;;  %v4959_v20 = vpop.f32.mrf.mxu1 }
 0x529   :  { %5755 = vmatmul.mubr.f32.gmra.mxu0 %v5478_v24  ;;  %v5497_v56 = vld [vmem:[%s16757_s3 + $0x5f0] sm:$0xff] }
 0x52a   :  { %5960 = vmatmul.mubr.f32.gmra.mxu1 %v5444_v34  ;;  %5759 = vmatprep.mubr.f32.mxu0 %v5488_v12  ;;  %v15190_v22 = vpop.f32.mrf.mxu0  ;;  %v15192_v15 = vpop.f32.mrf.mxu1  ;;  %v5463_v12 = vld [vmem:[%s16757_s3 + $0x4e0] sm:$0xff]  ;;  %v5462_v34 = vld [vmem:[%s16757_s3 + $0x4d8] sm:$0xff]  ;;  %v5505_v24 = vld [vmem:[%s16757_s3 + $0x630] sm:$0xff] }
 0x52b   :  { %17556 = vst [vmem:[#allocation63_spill] sm:$0xff] %v15190_v22  ;;  %17557 = vst [vmem:[#allocation80_spill] sm:$0xff] %v15192_v15  ;;  %5964 = vmatprep.mubr.f32.mxu1 %v5454_v47  ;;  %v5507_v22 = vld [vmem:[%s16757_s3 + $0x640] sm:$0xff] }
 0x52c   :  { %v4563_v20 = vpop.f32.mrf.mxu0  ;;  %v4964_v47 = vpop.f32.mrf.mxu1 }
 0x52d   :  { %5760 = vmatmul.mubr.f32.gmra.mxu0 %v5487_v39  ;;  %v5506_v20 = vld [vmem:[%s16757_s3 + $0x638] sm:$0xff] }
 0x52e   :  { %5965 = vmatmul.mubr.f32.gmra.mxu1 %v5453_v6  ;;  %5764 = vmatprep.mubr.f32.mxu0 %v5497_v56  ;;  %v15210_v63 = vpop.f32.mrf.mxu0  ;;  %v15212_v10 = vpop.f32.mrf.mxu1  ;;  %v5472_v56 = vld [vmem:[%s16757_s3 + $0x528] sm:$0xff]  ;;  %v5471_v6 = vld [vmem:[%s16757_s3 + $0x520] sm:$0xff] }
 0x52f   :  { %17558 = vst [vmem:[#allocation61_spill] sm:$0xff] %v15210_v63  ;;  %17559 = vst [vmem:[#allocation78_spill] sm:$0xff] %v15212_v10  ;;  %5969 = vmatprep.mubr.f32.mxu1 %v5463_v12  ;;  %v5480_v10 = vld [vmem:[%s16757_s3 + $0x568] sm:$0xff]  ;;  %v5489_v63 = vld [vmem:[%s16757_s3 + $0x5b0] sm:$0xff] }
 0x530   :  { %v4568_v47 = vpop.f32.mrf.mxu0  ;;  %v4969_v12 = vpop.f32.mrf.mxu1 }
 0x531   :  { %5765 = vmatmul.mubr.f32.gmra.mxu0 %v5496_v30  ;;  %v5515_v47 = vld [vmem:[%s16757_s3 + $0x680] sm:$0xff]  ;;  %v5481_v30 = vld [vmem:[%s16757_s3 + $0x570] sm:$0xff] }
 0x532   :  { %5970 = vmatmul.mubr.f32.gmra.mxu1 %v5462_v34  ;;  %5769 = vmatprep.mubr.f32.mxu0 %v5506_v20  ;;  %v15230_v15 = vpop.f32.mrf.mxu0  ;;  %v15232_v23 = vpop.f32.mrf.mxu1 }
 0x533   :  { %5974 = vmatprep.mubr.f32.mxu1 %v5472_v56  ;;  %v5514_v56 = vld [vmem:[%s16757_s3 + $0x678] sm:$0xff] }
 0x534   :  { %v4573_v34 = vpop.f32.mrf.mxu0  ;;  %v4974_v20 = vpop.f32.mrf.mxu1 }
 0x535   :  { %5770 = vmatmul.mubr.f32.gmra.mxu0 %v5505_v24  ;;  %v5524_v34 = vld [vmem:[%s16757_s3 + $0x6c8] sm:$0xff]  ;;  %v5490_v24 = vld [vmem:[%s16757_s3 + $0x5b8] sm:$0xff] }
 0x536   :  { %5975 = vmatmul.mubr.f32.gmra.mxu1 %v5471_v6  ;;  %5774 = vmatprep.mubr.f32.mxu0 %v5515_v47  ;;  %v15246_v12 = vpop.f32.mrf.mxu0  ;;  %v15248_v39 = vpop.f32.mrf.mxu1 }
 0x537   :  { %5979 = vmatprep.mubr.f32.mxu1 %v5481_v30  ;;  %v5523_v30 = vld [vmem:[%s16757_s3 + $0x6c0] sm:$0xff] }
 0x538   :  { %v4578_v6 = vpop.f32.mrf.mxu0  ;;  %v4979_v47 = vpop.f32.mrf.mxu1 }
 0x539   :  { %5775 = vmatmul.mubr.f32.gmra.mxu0 %v5514_v56  ;;  %v5533_v6 = vld [vmem:[%s16757_s3 + $0x710] sm:$0xff] }
 0x53a   :  { %5980 = vmatmul.mubr.f32.gmra.mxu1 %v5480_v10  ;;  %5779 = vmatprep.mubr.f32.mxu0 %v5524_v34  ;;  %v15262_v20 = vpop.f32.mrf.mxu0  ;;  %v15264_v31 = vpop.f32.mrf.mxu1  ;;  %v5499_v10 = vld [vmem:[%s16757_s3 + $0x600] sm:$0xff] }
 0x53b   :  { %5984 = vmatprep.mubr.f32.mxu1 %v5490_v24  ;;  %v5532_v24 = vld [vmem:[%s16757_s3 + $0x708] sm:$0xff] }
 0x53c   :  { %v4583_v56 = vpop.f32.mrf.mxu0  ;;  %v4984_v34 = vpop.f32.mrf.mxu1 }
 0x53d   :  { %5780 = vmatmul.mubr.f32.gmra.mxu0 %v5523_v30  ;;  %v5542_v56 = vld [vmem:[%s16757_s3 + $0x758] sm:$0xff] }
 0x53e   :  { %5985 = vmatmul.mubr.f32.gmra.mxu1 %v5489_v63  ;;  %5784 = vmatprep.mubr.f32.mxu0 %v5533_v6  ;;  %v15278_v47 = vpop.f32.mrf.mxu0  ;;  %v15280_v17 = vpop.f32.mrf.mxu1  ;;  %v5508_v63 = vld [vmem:[%s16757_s3 + $0x648] sm:$0xff] }
 0x53f   :  { %5989 = vmatprep.mubr.f32.mxu1 %v5499_v10  ;;  %v5541_v10 = vld [vmem:[%s16757_s3 + $0x750] sm:$0xff] }
 0x540   :  { %v4588_v30 = vpop.f32.mrf.mxu0  ;;  %v4989_v6 = vpop.f32.mrf.mxu1 }
 0x541   :  { %5785 = vmatmul.mubr.f32.gmra.mxu0 %v5532_v24  ;;  %v5551_v30 = vld [vmem:[%s16757_s3 + $0x7a0] sm:$0xff] }
 0x542   :  { %5990 = vmatmul.mubr.f32.gmra.mxu1 %v5498_v37  ;;  %5789 = vmatprep.mubr.f32.mxu0 %v5542_v56  ;;  %v15294_v34 = vpop.f32.mrf.mxu0  ;;  %v15296_v52 = vpop.f32.mrf.mxu1  ;;  %v5517_v37 = vld [vmem:[%s16757_s3 + $0x690] sm:$0xff] }
 0x543   :  { %5994 = vmatprep.mubr.f32.mxu1 %v5508_v63  ;;  %v5550_v63 = vld [vmem:[%s16757_s3 + $0x798] sm:$0xff] }
 0x544   :  { %v4593_v24 = vpop.f32.mrf.mxu0  ;;  %v4994_v56 = vpop.f32.mrf.mxu1 }
 0x545   :  { %5790 = vmatmul.mubr.f32.gmra.mxu0 %v5541_v10  ;;  %v5560_v24 = vld [vmem:[%s16757_s3 + $0x7e8] sm:$0xff] }
 0x546   :  { %5995 = vmatmul.mubr.f32.gmra.mxu1 %v5507_v22  ;;  %5794 = vmatprep.mubr.f32.mxu0 %v5551_v30  ;;  %v15310_v6 = vpop.f32.mrf.mxu0  ;;  %v15312_v9 = vpop.f32.mrf.mxu1  ;;  %v5526_v22 = vld [vmem:[%s16757_s3 + $0x6d8] sm:$0xff] }
 0x547   :  { %5999 = vmatprep.mubr.f32.mxu1 %v5517_v37  ;;  %v5559_v37 = vld [vmem:[%s16757_s3 + $0x7e0] sm:$0xff] }
 0x548   :  { %v4598_v10 = vpop.f32.mrf.mxu0  ;;  %v4999_v30 = vpop.f32.mrf.mxu1 }
 0x549   :  { %5795 = vmatmul.mubr.f32.gmra.mxu0 %v5550_v63  ;;  %v5569_v10 = vld [vmem:[%s16757_s3 + $0x830] sm:$0xff] }
 0x54a   :  { %6000 = vmatmul.mubr.f32.gmra.mxu1 %v5516_v61  ;;  %5799 = vmatprep.mubr.f32.mxu0 %v5560_v24  ;;  %v15326_v56 = vpop.f32.mrf.mxu0  ;;  %v15328_v5 = vpop.f32.mrf.mxu1  ;;  %v5535_v61 = vld [vmem:[%s16757_s3 + $0x720] sm:$0xff] }
 0x54b   :  { %6004 = vmatprep.mubr.f32.mxu1 %v5526_v22  ;;  %v5568_v22 = vld [vmem:[%s16757_s3 + $0x828] sm:$0xff] }
 0x54c   :  { %v4603_v63 = vpop.f32.mrf.mxu0  ;;  %v5004_v24 = vpop.f32.mrf.mxu1 }
 0x54d   :  { %5800 = vmatmul.mubr.f32.gmra.mxu0 %v5559_v37  ;;  %v5578_v63 = vld [vmem:[%s16757_s3 + $0x878] sm:$0xff] }
 0x54e   :  { %6005 = vmatmul.mubr.f32.gmra.mxu1 %v5525_v1  ;;  %5804 = vmatprep.mubr.f32.mxu0 %v5569_v10  ;;  %v15342_v30 = vpop.f32.mrf.mxu0  ;;  %v15344_v55 = vpop.f32.mrf.mxu1  ;;  %v5544_v1 = vld [vmem:[%s16757_s3 + $0x768] sm:$0xff] }
 0x54f   :  { %6009 = vmatprep.mubr.f32.mxu1 %v5535_v61  ;;  %v5577_v61 = vld [vmem:[%s16757_s3 + $0x870] sm:$0xff] }
 0x550   :  { %v4608_v37 = vpop.f32.mrf.mxu0  ;;  %v5009_v10 = vpop.f32.mrf.mxu1 }
 0x551   :  { %5805 = vmatmul.mubr.f32.gmra.mxu0 %v5568_v22  ;;  %v5587_v37 = vld [vmem:[%s16757_s3 + $0x8c0] sm:$0xff] }
 0x552   :  { %6010 = vmatmul.mubr.f32.gmra.mxu1 %v5534_v45  ;;  %5809 = vmatprep.mubr.f32.mxu0 %v5578_v63  ;;  %v15358_v24 = vpop.f32.mrf.mxu0  ;;  %v15360_v42 = vpop.f32.mrf.mxu1  ;;  %v5553_v45 = vld [vmem:[%s16757_s3 + $0x7b0] sm:$0xff] }
 0x553   :  { %6014 = vmatprep.mubr.f32.mxu1 %v5544_v1  ;;  %v5586_v1 = vld [vmem:[%s16757_s3 + $0x8b8] sm:$0xff] }
 0x554   :  { %v4613_v22 = vpop.f32.mrf.mxu0  ;;  %v5014_v63 = vpop.f32.mrf.mxu1 }
 0x555   :  { %5810 = vmatmul.mubr.f32.gmra.mxu0 %v5577_v61  ;;  %v5312_v22 = vld [vmem:[%s16757_s3 + $0x28] sm:$0xff] }
 0x556   :  { %6015 = vmatmul.mubr.f32.gmra.mxu1 %v5543_v4  ;;  %5814 = vmatprep.mubr.f32.mxu0 %v5587_v37  ;;  %v15374_v10 = vpop.f32.mrf.mxu0  ;;  %v15376_v46 = vpop.f32.mrf.mxu1  ;;  %v5562_v4 = vld [vmem:[%s16757_s3 + $0x7f8] sm:$0xff] }
 0x557   :  { %17560 = vst [vmem:[#allocation59_spill] sm:$0xff] %v15374_v10  ;;  %17561 = vst [vmem:[#allocation50_spill] sm:$0xff] %v15376_v46  ;;  %6019 = vmatprep.mubr.f32.mxu1 %v5553_v45  ;;  %v5311_v45 = vld [vmem:[%s16757_s3 + $0x20] sm:$0xff]  ;;  %v5561_v10 = vld [vmem:[%s16757_s3 + $0x7f0] sm:$0xff] }
 0x558   :  { %v4618_v61 = vpop.f32.mrf.mxu0  ;;  %v5019_v37 = vpop.f32.mrf.mxu1 }
 0x559   :  { %5815 = vmatmul.mubr.f32.gmra.mxu0 %v5586_v1  ;;  %v5321_v61 = vld [vmem:[%s16757_s3 + $0x70] sm:$0xff] }
 0x55a   :  { %6020 = vmatmul.mubr.f32.gmra.mxu1 %v5552_v41  ;;  %6109 = vmatprep.mubr.f32.mxu0 %v5312_v22  ;;  %v15390_v63 = vpop.f32.mrf.mxu0  ;;  %v15392_v46 = vpop.f32.mrf.mxu1  ;;  %v5571_v41 = vld [vmem:[%s16757_s3 + $0x840] sm:$0xff] }
 0x55b   :  { %17562 = vst [vmem:[#allocation57_spill] sm:$0xff] %v15390_v63  ;;  %17563 = vst [vmem:[#allocation49_spill] sm:$0xff] %v15392_v46  ;;  %6024 = vmatprep.mubr.f32.mxu1 %v5562_v4  ;;  %v5320_v4 = vld [vmem:[%s16757_s3 + $0x68] sm:$0xff]  ;;  %v5570_v63 = vld [vmem:[%s16757_s3 + $0x838] sm:$0xff] }
 0x55c   :  { %v4623_v1 = vpop.f32.mrf.mxu0  ;;  %v5024_v22 = vpop.f32.mrf.mxu1 }
 0x55d   :  { %6110 = vmatmul.mubr.f32.vlgmr.msra.gmra.mxu0 %v5311_v45  ;;  %v5330_v1 = vld [vmem:[%s16757_s3 + $0xb8] sm:$0xff] }
 0x55e   :  { %6025 = vmatmul.mubr.f32.gmra.mxu1 %v5561_v10  ;;  %6114 = vmatprep.mubr.f32.mxu0 %v5321_v61  ;;  %v15406_v37 = vpop.f32.mrf.mxu0  ;;  %v15408_v46 = vpop.f32.mrf.mxu1  ;;  %v5580_v10 = vld [vmem:[%s16757_s3 + $0x888] sm:$0xff] }
 0x55f   :  { %17564 = vst [vmem:[#allocation55_spill] sm:$0xff] %v15406_v37  ;;  %17565 = vst [vmem:[#allocation71_spill] sm:$0xff] %v15408_v46  ;;  %6029 = vmatprep.mubr.f32.mxu1 %v5571_v41  ;;  %v5329_v41 = vld [vmem:[%s16757_s3 + $0xb0] sm:$0xff]  ;;  %v4690_v37 = vmax.f32 %v14671_v32, %v14966_v35 }
 0x560   :  { %v4628_v45 = vpop.f32.mrf.mxu0  ;;  %v5029_v61 = vpop.f32.mrf.mxu1  ;;  %v5589_v32 = vld [vmem:[%s16757_s3 + $0x8d0] sm:$0xff] }
 0x561   :  { %6115 = vmatmul.mubr.f32.gmra.mxu0 %v5320_v4  ;;  %v5579_v45 = vld [vmem:[%s16757_s3 + $0x880] sm:$0xff] }
 0x562   :  { %6030 = vmatmul.mubr.f32.gmra.mxu1 %v5570_v63  ;;  %6119 = vmatprep.mubr.f32.mxu0 %v5330_v1  ;;  %v4631_v22 = vpop.f32.mrf.mxu0  ;;  %v5032_v46 = vpop.f32.mrf.mxu1  ;;  %v5339_v63 = vld [vmem:[%s16757_s3 + $0x100] sm:$0xff] }
 0x563   :  { %6034 = vmatprep.mubr.f32.mxu1 %v5580_v10  ;;  %v4702_v4 = vmax.f32 %v15230_v15, %v4631_v22  ;;  %v5103_v1 = vmax.f32 %v15232_v23, %v5032_v46  ;;  %v5338_v10 = vld [vmem:[%s16757_s3 + $0xf8] sm:$0xff]  ;;  %v4691_v46 = vmax.f32 %v14683_v43, %v14992_v36  ;;  %v5092_v23 = vmax.f32 %v14685_v58, %v14994_v14  ;;  %v5347_v14 = vld [vmem:[%s16757_s3 + $0x140] sm:$0xff] }
 0x564   :  { %v4633_v35 = vpop.f32.mrf.mxu0  ;;  %v5034_v61 = vpop.f32.mrf.mxu1  ;;  %v5314_v43 = vld [vmem:[%s16757_s3 + $0x38] sm:$0xff] }
 0x565   :  { %6120 = vmatmul.mubr.f32.gmra.mxu0 %v5329_v41  ;;  %v15437_v13 = vmax.f32 %v4690_v37, %v4702_v4  ;;  %v15439_v54 = vmax.f32 %v5091_v0, %v5103_v1  ;;  %v5588_v0 = vld [vmem:[%s16757_s3 + $0x8c8] sm:$0xff]  ;;  %v5357_v35 = vld [vmem:[%s16757_s3 + $0x190] sm:$0xff] }
 0x566   :  { %6035 = vmatmul.mubr.f32.gmra.mxu1 %v5579_v45  ;;  %6124 = vmatprep.mubr.f32.mxu0 %v5339_v63  ;;  %v4636_v15 = vpop.f32.mrf.mxu0  ;;  %v5037_v22 = vpop.f32.mrf.mxu1  ;;  %v5348_v37 = vld [vmem:[%s16757_s3 + $0x148] sm:$0xff] }
 0x567   :  { %6039 = vmatprep.mubr.f32.mxu1 %v5589_v32  ;;  %v4703_v41 = vmax.f32 %v15246_v12, %v4636_v15  ;;  %v5104_v45 = vmax.f32 %v15248_v39, %v5037_v22  ;;  %v4692_v39 = vmax.f32 %v14703_v19, %v15026_v18  ;;  %v5093_v32 = vmax.f32 %v14705_v8, %v15028_v28  ;;  %v5356_v19 = vld [vmem:[%s16757_s3 + $0x188] sm:$0xff] }
 0x568   :  { %v4638_v63 = vpop.f32.mrf.mxu0  ;;  %v5039_v4 = vpop.f32.mrf.mxu1  ;;  %v4693_v28 = vmax.f32 %v14725_v40, %v15055_v21  ;;  %v5365_v40 = vld [vmem:[%s16757_s3 + $0x1d0] sm:$0xff] }
 0x569   :  { %6125 = vmatmul.mubr.f32.gmra.mxu0 %v5338_v10  ;;  %v15459_v58 = vmax.f32 %v4691_v46, %v4703_v41  ;;  %v15461_v36 = vmax.f32 %v5092_v23, %v5104_v45 }
 0x56a   :  { %6040 = vmatmul.mubr.f32.gmra.mxu1 %v5588_v0  ;;  %6129 = vmatprep.mubr.f32.mxu0 %v5348_v37  ;;  %v4641_v12 = vpop.f32.mrf.mxu0  ;;  %v5042_v1 = vpop.f32.mrf.mxu1 }
 0x56b   :  { %v4704_v61 = vmax.f32 %v15262_v20, %v4641_v12  ;;  %v5105_v10 = vmax.f32 %v15264_v31, %v5042_v1  ;;  %6334 = vmatprep.mubr.f32.mxu1 %v5314_v43  ;;  %v5094_v31 = vmax.f32 %v14727_v27, %v15057_v29  ;;  %v5366_v20 = vld [vmem:[%s16757_s3 + $0x1d8] sm:$0xff]  ;;  %v4694_v29 = vmax.f32 %v14755_v62, %v15076_v16 }
 0x56c   :  { %v4643_v15 = vpop.f32.mrf.mxu0  ;;  %v5044_v22 = vpop.f32.mrf.mxu1  ;;  %v5374_v62 = vld [vmem:[%s16757_s3 + $0x218] sm:$0xff] }
 0x56d   :  { %6130 = vmatmul.mubr.f32.gmra.mxu0 %v5347_v14  ;;  %v15475_v46 = vmax.f32 %v4692_v39, %v4704_v61  ;;  %v15477_v23 = vmax.f32 %v5093_v32, %v5105_v10  ;;  %v5383_v15 = vld [vmem:[%s16757_s3 + $0x260] sm:$0xff] }
 0x56e   :  { %6134 = vmatprep.mubr.f32.mxu0 %v5357_v35  ;;  %v4646_v8 = vpop.f32.mrf.mxu0  ;;  %v5047_v18 = vpop.f32.mrf.mxu1 }
 0x56f   :  { %v4705_v0 = vmax.f32 %v15278_v47, %v4646_v8  ;;  %v5106_v37 = vmax.f32 %v15280_v17, %v5047_v18  ;;  %v5095_v17 = vmax.f32 %v14757_v59, %v15078_v51  ;;  %v5375_v47 = vld [vmem:[%s16757_s3 + $0x220] sm:$0xff]  ;;  %v5096_v51 = vmax.f32 %v14784_v25, %v15096_v50  ;;  %v5393_v50 = vld [vmem:[%s16757_s3 + $0x2b0] sm:$0xff] }
 0x570   :  { %v4648_v41 = vpop.f32.mrf.mxu0  ;;  %v5049_v45 = vpop.f32.mrf.mxu1  ;;  %v5097_v25 = vmax.f32 %v14806_v38, %v15114_v60  ;;  %v5392_v60 = vld [vmem:[%s16757_s3 + $0x2a8] sm:$0xff] }
 0x571   :  { %6135 = vmatmul.mubr.f32.gmra.mxu0 %v5356_v19  ;;  %v15491_v63 = vmax.f32 %v4693_v28, %v4705_v0  ;;  %v15493_v4 = vmax.f32 %v5094_v31, %v5106_v37  ;;  %v4696_v31 = vmax.f32 %v14804_v26, %v15112_v11 }
 0x572   :  { %6139 = vmatprep.mubr.f32.mxu0 %v5366_v20  ;;  %v4651_v27 = vpop.f32.mrf.mxu0  ;;  %v5052_v21 = vpop.f32.mrf.mxu1 }
 0x573   :  { %v4706_v43 = vmax.f32 %v15294_v34, %v4651_v27  ;;  %v5107_v14 = vmax.f32 %v15296_v52, %v5052_v21  ;;  %v5384_v52 = vld [vmem:[%s16757_s3 + $0x268] sm:$0xff]  ;;  %v17566_v27 = vmax.f32 %v14832_v3, %v15130_v48 }
 0x574   :  { %v4653_v12 = vpop.f32.mrf.mxu0  ;;  %v5054_v1 = vpop.f32.mrf.mxu1 }
 0x575   :  { %6140 = vmatmul.mubr.f32.gmra.mxu0 %v5365_v40  ;;  %v4718_v39 = vmax.f32 %v4694_v29, %v4706_v43  ;;  %v15507_v32 = vmax.f32 %v5095_v17, %v5107_v14  ;;  %v17568_v12 = vld [vmem:[#allocation15_spill] sm:$0xff] }
 0x576   :  { %6144 = vmatprep.mubr.f32.mxu0 %v5375_v47  ;;  %v4656_v59 = vpop.f32.mrf.mxu0  ;;  %v5057_v16 = vpop.f32.mrf.mxu1  ;;  %v5411_v47 = vld [vmem:[%s16757_s3 + $0x340] sm:$0xff] }
 0x577   :  { %v5108_v34 = vmax.f32 %v15312_v9, %v5057_v16  ;;  %v4707_v20 = vmax.f32 %v15310_v6, %v4656_v59  ;;  %v17569_v1 = vld [vmem:[#allocation67_spill] sm:$0xff]  ;;  %v17571_v16 = vld [vmem:[#allocation6_spill] sm:$0xff] }
 0x578   :  { %v4658_v35 = vpop.f32.mrf.mxu0  ;;  %v5059_v61 = vpop.f32.mrf.mxu1 }
 0x579   :  { %6145 = vmatmul.mubr.f32.gmra.mxu0 %v5374_v62  ;;  %v15518_v10 = vmax.f32 %v5096_v51, %v5108_v34  ;;  %v17570_v62 = vmax.f32 %v17568_v12, %v17569_v1  ;;  %v17572_v51 = vld [vmem:[#allocation84_spill] sm:$0xff]  ;;  %v17590_v12 = vld [vmem:[#allocation71_spill] sm:$0xff] }
 0x57a   :  { %6149 = vmatprep.mubr.f32.mxu0 %v5384_v52  ;;  %v4661_v22 = vpop.f32.mrf.mxu0  ;;  %v5062_v19 = vpop.f32.mrf.mxu1  ;;  %v17573_v52 = vmax.f32 %v17571_v16, %v17572_v51  ;;  %v17574_v61 = vld [vmem:[#allocation20_spill] sm:$0xff] }
 0x57b   :  { %v4708_v9 = vmax.f32 %v15326_v56, %v4661_v22  ;;  %v5109_v8 = vmax.f32 %v15328_v5, %v5062_v19  ;;  %v4695_v5 = vmax.f32 %v14782_v33, %v15094_v2  ;;  %v5402_v56 = vld [vmem:[%s16757_s3 + $0x2f8] sm:$0xff]  ;;  %v17567_v33 = vmax.f32 %v14834_v49, %v15132_v53  ;;  %v5420_v22 = vld [vmem:[%s16757_s3 + $0x388] sm:$0xff]  ;;  %v17575_v19 = vld [vmem:[#allocation59_spill] sm:$0xff] }
 0x57c   :  { %v4663_v18 = vpop.f32.mrf.mxu0  ;;  %v5064_v28 = vpop.f32.mrf.mxu1 }
 0x57d   :  { %6150 = vmatmul.mubr.f32.gmra.mxu0 %v5383_v15  ;;  %v15533_v0 = vmax.f32 %v5097_v25, %v5109_v8  ;;  %v4720_v26 = vmax.f32 %v4696_v31, %v4708_v9  ;;  %v4719_v40 = vmax.f32 %v4695_v5, %v4707_v20  ;;  %v4730_v15 = vadd.f32 %v4718_v39, %v17574_v61  ;;  %v17576_v8 = vld [vmem:[#allocation101_spill] sm:$0xff]  ;;  %v5419_v39 = vld [vmem:[%s16757_s3 + $0x380] sm:$0xff] }
 0x57e   :  { %6154 = vmatprep.mubr.f32.mxu0 %v5393_v50  ;;  %v4666_v38 = vpop.f32.mrf.mxu0  ;;  %v5067_v37 = vpop.f32.mrf.mxu1  ;;  %v4729_v18 = vadd.f32 %v15491_v63, %v17576_v8  ;;  %v17577_v28 = vld [vmem:[#allocation13_spill] sm:$0xff] }
 0x57f   :  { %v4709_v11 = vmax.f32 %v15342_v30, %v4666_v38  ;;  %v5110_v6 = vmax.f32 %v15344_v55, %v5067_v37  ;;  %v5401_v30 = vld [vmem:[%s16757_s3 + $0x2f0] sm:$0xff]  ;;  %v4732_v17 = vadd.f32 %v4720_v26, %v17502_v57  ;;  %v4731_v14 = vadd.f32 %v4719_v40, %v17505_v44 }
 0x580   :  { %v4668_v41 = vpop.f32.mrf.mxu0  ;;  %v5069_v45 = vpop.f32.mrf.mxu1  ;;  %v17578_v31 = vld [vmem:[#allocation65_spill] sm:$0xff] }
 0x581   :  { %6155 = vmatmul.mubr.f32.gmra.mxu0 %v5392_v60  ;;  %v4721_v21 = vmax.f32 %v17566_v27, %v4709_v11  ;;  %v15551_v2 = vmax.f32 %v17567_v33, %v5110_v6  ;;  %v17579_v20 = vmax.f32 %v17577_v28, %v17578_v31  ;;  %v17580_v5 = vld [vmem:[#allocation105_spill] sm:$0xff]  ;;  %v17582_v45 = vld [vmem:[#allocation102_spill] sm:$0xff]  ;;  %v17583_v27 = vld [vmem:[#allocation11_spill] sm:$0xff] }
 0x582   :  { %6159 = vmatprep.mubr.f32.mxu0 %v5402_v56  ;;  %v4671_v29 = vpop.f32.mrf.mxu0  ;;  %v5072_v55 = vpop.f32.mrf.mxu1  ;;  %v4728_v56 = vadd.f32 %v15475_v46, %v17580_v5  ;;  %v5429_v63 = vld [vmem:[%s16757_s3 + $0x3d0] sm:$0xff]  ;;  %v4727_v40 = vadd.f32 %v15459_v58, %v17582_v45  ;;  %v17588_v58 = vld [vmem:[#allocation50_spill] sm:$0xff] }
 0x583   :  { %v4733_v48 = vadd.f32 %v4721_v21, %v17499_v7  ;;  %v4710_v3 = vmax.f32 %v15358_v24, %v4671_v29  ;;  %v5111_v53 = vmax.f32 %v15360_v42, %v5072_v55  ;;  %v5410_v42 = vld [vmem:[%s16757_s3 + $0x338] sm:$0xff]  ;;  %v17581_v26 = vld [vmem:[#allocation57_spill] sm:$0xff]  ;;  %v17584_v21 = vld [vmem:[#allocation63_spill] sm:$0xff] }
 0x584   :  { %v4673_v49 = vpop.f32.mrf.mxu0  ;;  %v5074_v43 = vpop.f32.mrf.mxu1  ;;  %v17585_v33 = vmax.f32 %v17583_v27, %v17584_v21  ;;  %v17586_v46 = vld [vmem:[#allocation49_spill] sm:$0xff]  ;;  %v17587_v55 = vld [vmem:[#allocation108_spill] sm:$0xff]  ;;  %v5447_v27 = vld [vmem:[%s16757_s3 + $0x460] sm:$0xff] }
 0x585   :  { %6160 = vmatmul.mubr.f32.gmra.mxu0 %v5401_v30  ;;  %8435 = vtanh.f32 %v4733_v48  ;;  %v15567_v59 = vmax.f32 %v17570_v62, %v4710_v3  ;;  %v15572_v34 = vmax.f32 %v17573_v52, %v5111_v53  ;;  %v5438_v49 = vld [vmem:[%s16757_s3 + $0x418] sm:$0xff]  ;;  %v17589_v43 = vld [vmem:[#allocation55_spill] sm:$0xff] }
 0x586   :  { %6164 = vmatprep.mubr.f32.mxu0 %v5411_v47  ;;  %v4676_v24 = vpop.f32.mrf.mxu0  ;;  %v5077_v35 = vpop.f32.mrf.mxu1  ;;  %8437 = vtanh.f32 %v4732_v17  ;;  %v4726_v17 = vadd.f32 %v15437_v13, %v17587_v55  ;;  %v5428_v47 = vld [vmem:[%s16757_s3 + $0x3c8] sm:$0xff]  ;;  %v17591_v62 = vld [vmem:[#allocation111_spill] sm:$0xff]  ;;  %v17592_v13 = vld [vmem:[#allocation54_spill] sm:$0xff] }
 0x587   :  { %v4711_v25 = vmax.f32 %v17575_v19, %v4676_v24  ;;  %8439 = vtanh.f32 %v4731_v14  ;;  %v5112_v53 = vmax.f32 %v17588_v58, %v5077_v35  ;;  %v4336_v16 = vadd.f32 %v17592_v13, %v17591_v62  ;;  %v17594_v24 = vld [vmem:[#allocation80_spill] sm:$0xff]  ;;  %v17596_v35 = vld [vmem:[#allocation9_spill] sm:$0xff]  ;;  %v17608_v58 = vld [vmem:[#allocation14_spill] sm:$0xff] }
 0x588   :  { %v4678_v50 = vpop.f32.mrf.mxu0  ;;  %v5079_v9 = vpop.f32.mrf.mxu1  ;;  %8441 = vtanh.f32 %v4730_v15  ;;  %v17597_v19 = vld [vmem:[#allocation61_spill] sm:$0xff] }
 0x589   :  { %6165 = vmatmul.mubr.f32.gmra.mxu0 %v5410_v42  ;;  %v15587_v60 = vmax.f32 %v17579_v20, %v4711_v25  ;;  %8443 = vtanh.f32 %v4729_v18  ;;  %v17593_v42 = vld [vmem:[#allocation47_spill] sm:$0xff]  ;;  %v17598_v25 = vmax.f32 %v17596_v35, %v17597_v19  ;;  %v17599_v9 = vld [vmem:[#allocation69_spill] sm:$0xff]  ;;  %v17600_v18 = vld [vmem:[#allocation78_spill] sm:$0xff] }
 0x58a   :  { %6169 = vmatprep.mubr.f32.mxu0 %v5420_v22  ;;  %v4681_v38 = vpop.f32.mrf.mxu0  ;;  %v5082_v37 = vpop.f32.mrf.mxu1  ;;  %8445 = vtanh.f32 %v4728_v56  ;;  %v17595_v15 = vmax.f32 %v17593_v42, %v17594_v24  ;;  %v17601_v28 = vmax.f32 %v17599_v9, %v17600_v18  ;;  %v5437_v56 = vld [vmem:[%s16757_s3 + $0x410] sm:$0xff]  ;;  %v17612_v35 = vld [vmem:[#allocation58_spill] sm:$0xff] }
 0x58b   :  { %v4712_v11 = vmax.f32 %v17581_v26, %v4681_v38  ;;  %v5113_v29 = vmax.f32 %v17586_v46, %v5082_v37  ;;  %8447 = vtanh.f32 %v4727_v40  ;;  %v17603_v38 = vld [vmem:[#allocation37_spill] sm:$0xff]  ;;  %v4332_v19 = vadd.f32 %v17612_v35, %v17499_v7 }
 0x58c   :  { %v4683_v6 = vpop.f32.mrf.mxu0  ;;  %v5084_v41 = vpop.f32.mrf.mxu1  ;;  %8449 = vtanh.f32 %v4726_v17 }
 0x58d   :  { %6170 = vmatmul.mubr.f32.gmra.mxu0 %v5419_v39  ;;  %v15603_v30 = vmax.f32 %v17585_v33, %v4712_v11  ;;  %v5125_v22 = vmax.f32 %v17595_v15, %v5113_v29  ;;  %v17602_v39 = vld [vmem:[#allocation16_spill] sm:$0xff]  ;;  %v17604_v11 = vld [vmem:[#allocation5_spill] sm:$0xff]  ;;  %v17605_v6 = vld [vmem:[#allocation82_spill] sm:$0xff]  ;;  %8451 = vtanh.f32 %v4336_v16 }
 0x58e   :  { %6174 = vmatprep.mubr.f32.mxu0 %v5429_v63  ;;  %v4686_v48 = vpop.f32.mrf.mxu0  ;;  %v5087_v3 = vpop.f32.mrf.mxu1  ;;  %v4335_v37 = vadd.f32 %v17603_v38, %v17602_v39  ;;  %v17606_v41 = vmax.f32 %v17604_v11, %v17605_v6  ;;  %v17610_v16 = vld [vmem:[#allocation12_spill] sm:$0xff] }
 0x58f   :  { %v4713_v14 = vmax.f32 %v17589_v43, %v4686_v48  ;;  %v5114_v1 = vmax.f32 %v17590_v12, %v5087_v3  ;;  %v5137_v17 = vadd.f32 %v5125_v22, %v17602_v39  ;;  %v5446_v43 = vld [vmem:[%s16757_s3 + $0x458] sm:$0xff]  ;;  %v5456_v12 = vld [vmem:[%s16757_s3 + $0x4a8] sm:$0xff]  ;;  %v5135_v15 = vadd.f32 %v15572_v34, %v17610_v16  ;;  %v5455_v22 = vld [vmem:[%s16757_s3 + $0x4a0] sm:$0xff] }
 0x590   :  { %v4688_v51 = vpop.f32.mrf.mxu0  ;;  %v5089_v52 = vpop.f32.mrf.mxu1  ;;  %v5124_v40 = vmax.f32 %v17606_v41, %v5112_v53  ;;  %v17609_v53 = vld [vmem:[#allocation56_spill] sm:$0xff]  ;;  %v5134_v34 = vadd.f32 %v15551_v2, %v17499_v7  ;;  %v5474_v7 = vld [vmem:[%s16757_s3 + $0x538] sm:$0xff] }
 0x591   :  { %6175 = vmatmul.mubr.f32.gmra.mxu0 %v5428_v47  ;;  %v15625_v50 = vmax.f32 %v17598_v25, %v4713_v14  ;;  %v5126_v31 = vmax.f32 %v17601_v28, %v5114_v1  ;;  %v17607_v47 = vmov 0.0   ;;  %v17611_v51 = vld [vmem:[#allocation39_spill] sm:$0xff]  ;;  %v5465_v25 = vld [vmem:[%s16757_s3 + $0x4f0] sm:$0xff]  ;;  %v5464_v38 = vld [vmem:[%s16757_s3 + $0x4e8] sm:$0xff] }
 0x592   :  { %v8436_v20 = vpop.eup %8435  ;;  %6179 = vmatprep.mubr.f32.mxu0 %v5438_v49  ;;  %v5661_v63 = vpop.f32.mrf.mxu0  ;;  %v4334_v49 = vadd.f32 %v17609_v53, %v17608_v58  ;;  %v5136_v14 = vadd.f32 %v5124_v40, %v17608_v58  ;;  %v4333_v52 = vadd.f32 %v17611_v51, %v17610_v16  ;;  %v5491_v51 = vld [vmem:[%s16757_s3 + $0x5c0] sm:$0xff] }
 0x593   :  { %v5886_v26 = vpop.f32.mrf.mxu1  ;;  %v5138_v21 = vadd.f32 %v5126_v31, %v17591_v62  ;;  %6303 = vmatpush2.msra.mxu1 %v8436_v20  ;;  %v8438_v46 = vpop.eup %8437  ;;  %v17613_v31 = vld [vmem:[#allocation41_spill] sm:$0xff]  ;;  %v4737_v35 = vadd.f32 %v15625_v50, %v17591_v62 }
 0x594   :  { %v15642_v33 = vadd.f32 %v5886_v26, %v5661_v63  ;;  %v5663_v29 = vpop.f32.mrf.mxu0  ;;  %6304 = vmatprep.subr.mxu1 %v17607_v47  ;;  %v8440_v3 = vpop.eup %8439  ;;  %v4331_v20 = vadd.f32 %v17613_v31, %v17502_v57  ;;  %v17614_v26 = vld [vmem:[#allocation60_spill] sm:$0xff] }
 0x595   :  { %v5888_v48 = vpop.f32.mrf.mxu1  ;;  %6180 = vmatmul.mubr.f32.gmra.mxu0 %v5437_v56  ;;  %6305 = vmatpush2.msra.mxu1 %v8438_v46  ;;  %8453 = vtanh.f32 %v5138_v21  ;;  %v8442_v13 = vpop.eup %8441  ;;  %v5133_v56 = vadd.f32 %v15533_v0, %v17502_v57  ;;  %v4330_v11 = vadd.f32 %v17614_v26, %v17505_v44  ;;  %v5132_v57 = vadd.f32 %v15518_v10, %v17505_v44  ;;  %v5473_v0 = vld [vmem:[%s16757_s3 + $0x530] sm:$0xff]  ;;  %v5483_v46 = vld [vmem:[%s16757_s3 + $0x580] sm:$0xff] }
 0x596   :  { %6184 = vmatprep.mubr.f32.mxu0 %v5447_v27  ;;  %6306 = vmatprep.subr.mxu1 %v17607_v47  ;;  %8455 = vtanh.f32 %v4335_v37  ;;  %v8444_v24 = vpop.eup %8443  ;;  %v17615_v27 = vld [vmem:[#allocation43_spill] sm:$0xff]  ;;  %v5131_v10 = vadd.f32 %v15507_v32, %v17574_v61  ;;  %v5492_v32 = vld [vmem:[%s16757_s3 + $0x5c8] sm:$0xff] }
 0x597   :  { %v15656_v1 = vpop.f32.mrf.mxu0  ;;  %6307 = vmatpush2.msra.mxu1 %v8440_v3  ;;  %8457 = vtanh.f32 %v5137_v17  ;;  %v8446_v9 = vpop.eup %8445  ;;  %v4329_v21 = vadd.f32 %v17615_v27, %v17574_v61  ;;  %v5482_v17 = vld [vmem:[%s16757_s3 + $0x578] sm:$0xff] }
 0x598   :  { %6308 = vmatprep.subr.mxu1 %v17607_v47  ;;  %8459 = vtanh.f32 %v4334_v49  ;;  %v8448_v28 = vpop.eup %8447  ;;  %v5130_v49 = vadd.f32 %v15493_v4, %v17576_v8 }
 0x599   :  { %6185 = vmatmul.mubr.f32.gmra.mxu0 %v5446_v43  ;;  %v5668_v42 = vpop.f32.mrf.mxu0  ;;  %6309 = vmatpush2.msra.mxu1 %v8442_v13  ;;  %8461 = vtanh.f32 %v5136_v14  ;;  %v8450_v2 = vpop.eup %8449  ;;  %v5129_v13 = vadd.f32 %v15477_v23, %v17580_v5  ;;  %v5501_v23 = vld [vmem:[%s16757_s3 + $0x610] sm:$0xff] }
 0x59a   :  { %6189 = vmatprep.mubr.f32.mxu0 %v5456_v12  ;;  %6310 = vmatprep.subr.mxu1 %v17607_v47  ;;  %8463 = vtanh.f32 %v4333_v52  ;;  %v8452_v6 = vpop.eup %8451 }
 0x59b   :  { %6311 = vmatpush2.msra.mxu1 %v8444_v24  ;;  %8465 = vtanh.f32 %v5135_v15  ;;  %v5127_v24 = vadd.f32 %v15439_v54, %v17587_v55  ;;  %v5510_v54 = vld [vmem:[%s16757_s3 + $0x658] sm:$0xff] }
 0x59c   :  { %v15672_v18 = vpop.f32.mrf.mxu0  ;;  %6312 = vmatprep.subr.mxu1 %v17607_v47  ;;  %8467 = vtanh.f32 %v4332_v19 }
 0x59d   :  { %6190 = vmatmul.mubr.f32.gmra.mxu0 %v5455_v22  ;;  %6313 = vmatpush2.msra.mxu1 %v8446_v9  ;;  %8469 = vtanh.f32 %v5134_v34  ;;  %v4736_v34 = vadd.f32 %v15603_v30, %v17602_v39  ;;  %v5519_v30 = vld [vmem:[%s16757_s3 + $0x6a0] sm:$0xff] }
 0x59e   :  { %6194 = vmatprep.mubr.f32.mxu0 %v5465_v25  ;;  %v5673_v37 = vpop.f32.mrf.mxu0  ;;  %6314 = vmatprep.subr.mxu1 %v17607_v47  ;;  %8471 = vtanh.f32 %v4331_v20 }
 0x59f   :  { %6315 = vmatpush2.msra.mxu1 %v8448_v28  ;;  %8473 = vtanh.f32 %v5133_v56  ;;  %v5509_v28 = vld [vmem:[%s16757_s3 + $0x650] sm:$0xff]  ;;  %v5323_v56 = vld [vmem:[%s16757_s3 + $0x80] sm:$0xff] }
 0x5a0   :  { %v15688_v63 = vpop.f32.mrf.mxu0  ;;  %6316 = vmatprep.subr.mxu1 %v17607_v47  ;;  %8475 = vtanh.f32 %v4330_v11 }
 0x5a1   :  { %6195 = vmatmul.mubr.f32.gmra.mxu0 %v5464_v38  ;;  %6317 = vmatpush2.msra.mxu1 %v8450_v2  ;;  %8477 = vtanh.f32 %v5132_v57  ;;  %v5313_v38 = vld [vmem:[%s16757_s3 + $0x30] sm:$0xff]  ;;  %v5518_v2 = vld [vmem:[%s16757_s3 + $0x698] sm:$0xff]  ;;  %v5332_v57 = vld [vmem:[%s16757_s3 + $0xc8] sm:$0xff] }
 0x5a2   :  { %6199 = vmatprep.mubr.f32.mxu0 %v5474_v7  ;;  %v5678_v41 = vpop.f32.mrf.mxu0  ;;  %6318 = vmatprep.subr.mxu1 %v17607_v47  ;;  %v8454_v40 = vpop.eup %8453  ;;  %8479 = vtanh.f32 %v4329_v21  ;;  %v5537_v21 = vld [vmem:[%s16757_s3 + $0x730] sm:$0xff] }
 0x5a3   :  { %6319 = vmatpush2.msra.mxu1 %v8452_v6  ;;  %v8456_v29 = vpop.eup %8455  ;;  %8098 = vmatprep.subr.mxu0 %v8454_v40  ;;  %8481 = vtanh.f32 %v5131_v10  ;;  %v5322_v6 = vld [vmem:[%s16757_s3 + $0x78] sm:$0xff]  ;;  %v5527_v41 = vld [vmem:[%s16757_s3 + $0x6e0] sm:$0xff] }
 0x5a4   :  { %v15704_v44 = vpop.f32.mrf.mxu0  ;;  %6320 = vmatprep.subr.mxu1 %v17607_v47  ;;  %v8458_v48 = vpop.eup %8457  ;;  %8099 = vmatpush3.msra.mxu0 %v8454_v40  ;;  %8483 = vtanh.f32 %v5130_v49  ;;  %v5331_v10 = vld [vmem:[%s16757_s3 + $0xc0] sm:$0xff]  ;;  %v5546_v49 = vld [vmem:[%s16757_s3 + $0x778] sm:$0xff] }
 0x5a5   :  { %6200 = vmatmul.mubr.f32.gmra.mxu0 %v5473_v0  ;;  %6321 = vmatpush2.msra.mxu1 %v8456_v29  ;;  %v8460_v53 = vpop.eup %8459  ;;  %8485 = vtanh.f32 %v5129_v13 }
 0x5a6   :  { %6204 = vmatprep.mubr.f32.mxu0 %v5483_v46  ;;  %v5683_v3 = vpop.f32.mrf.mxu0  ;;  %8100 = vmatprep.subr.mxu0 %v8458_v48  ;;  %v8462_v43 = vpop.eup %8461 }
 0x5a7   :  { %6322 = vmatprep.subr.mxu1 %v17607_v47  ;;  %v5891_v61 = vpop.f32.mrf.mxu1  ;;  %8101 = vmatpush3.msra.mxu0 %v8458_v48  ;;  %v8464_v8 = vpop.eup %8463 }
 0x5a8   :  { %v15718_v14 = vpop.f32.mrf.mxu0  ;;  %v15721_v12 = vadd.f32 %v5891_v61, %v15656_v1  ;;  %6323 = vmatpush2.msra.mxu1 %v8460_v53  ;;  %8102 = vmatprep.subr.mxu0 %v8462_v43  ;;  %v8466_v42 = vpop.eup %8465  ;;  %v5128_v1 = vadd.f32 %v15461_v36, %v17582_v45  ;;  %v5500_v45 = vld [vmem:[%s16757_s3 + $0x608] sm:$0xff] }
 0x5a9   :  { %6205 = vmatmul.mubr.f32.gmra.mxu0 %v5482_v17  ;;  %v5893_v4 = vpop.f32.mrf.mxu1  ;;  %6324 = vmatprep.subr.mxu1 %v17607_v47  ;;  %v8468_v5 = vpop.eup %8467  ;;  %v5341_v17 = vld [vmem:[%s16757_s3 + $0x110] sm:$0xff]  ;;  %v5340_v61 = vld [vmem:[%s16757_s3 + $0x108] sm:$0xff] }
 0x5aa   :  { %6209 = vmatprep.mubr.f32.mxu0 %v5492_v32  ;;  %v5688_v52 = vpop.f32.mrf.mxu0  ;;  %8103 = vmatpush3.msra.mxu0 %v8462_v43  ;;  %v8470_v36 = vpop.eup %8469  ;;  %8487 = vtanh.f32 %v5128_v1  ;;  %v5350_v4 = vld [vmem:[%s16757_s3 + $0x158] sm:$0xff]  ;;  %v5555_v1 = vld [vmem:[%s16757_s3 + $0x7c0] sm:$0xff] }
 0x5ab   :  { %6325 = vmatpush2.msra.mxu1 %v8464_v8  ;;  %8104 = vmatprep.subr.mxu0 %v8466_v42  ;;  %v8472_v22 = vpop.eup %8471  ;;  %8489 = vtanh.f32 %v5127_v24  ;;  %v5545_v52 = vld [vmem:[%s16757_s3 + $0x770] sm:$0xff]  ;;  %v5359_v24 = vld [vmem:[%s16757_s3 + $0x1a0] sm:$0xff] }
 0x5ac   :  { %6326 = vmatprep.subr.mxu1 %v17607_v47  ;;  %8105 = vmatpush3.msra.mxu0 %v8466_v42  ;;  %v8474_v25 = vpop.eup %8473  ;;  %8491 = vtanh.f32 %v4737_v35 }
 0x5ad   :  { %6210 = vmatmul.mubr.f32.gmra.mxu0 %v5491_v51  ;;  %v15737_v15 = vpop.f32.mrf.mxu0  ;;  %6327 = vmatpush2.msra.mxu1 %v8468_v5  ;;  %v8476_v50 = vpop.eup %8475  ;;  %8493 = vtanh.f32 %v4736_v34 }
 0x5ae   :  { %6214 = vmatprep.mubr.f32.mxu0 %v5501_v23  ;;  %8106 = vmatprep.subr.mxu0 %v8470_v36  ;;  %v8478_v31 = vpop.eup %8477 }
 0x5af   :  { %v5896_v55 = vpop.f32.mrf.mxu1  ;;  %v5693_v19 = vpop.f32.mrf.mxu0  ;;  %6328 = vmatprep.subr.mxu1 %v17607_v47  ;;  %8107 = vmatpush3.msra.mxu0 %v8470_v36 }
 0x5b0   :  { %v15749_v9 = vadd.f32 %v5896_v55, %v15672_v18  ;;  %6329 = vmatpush2.msra.mxu1 %v8472_v22  ;;  %8108 = vmatprep.subr.mxu0 %v8474_v25  ;;  %v4735_v18 = vadd.f32 %v15587_v60, %v17608_v58  ;;  %v8480_v20 = vpop.eup %8479  ;;  %v4734_v60 = vadd.f32 %v15567_v59, %v17610_v16  ;;  %v5528_v16 = vld [vmem:[%s16757_s3 + $0x6e8] sm:$0xff]  ;;  %v5554_v22 = vld [vmem:[%s16757_s3 + $0x7b8] sm:$0xff] }
 0x5b1   :  { %6215 = vmatmul.mubr.f32.gmra.mxu0 %v5500_v45  ;;  %v5898_v62 = vpop.f32.mrf.mxu1  ;;  %6330 = vmatprep.subr.mxu1 %v17607_v47  ;;  %v8482_v7 = vpop.eup %8481  ;;  %v5564_v55 = vld [vmem:[%s16757_s3 + $0x808] sm:$0xff] }
 0x5b2   :  { %6219 = vmatprep.mubr.f32.mxu0 %v5510_v54  ;;  %8109 = vmatpush3.msra.mxu0 %v8474_v25  ;;  %8495 = vtanh.f32 %v4735_v18  ;;  %v8484_v11 = vpop.eup %8483  ;;  %v5358_v25 = vld [vmem:[%s16757_s3 + $0x198] sm:$0xff]  ;;  %v5573_v18 = vld [vmem:[%s16757_s3 + $0x850] sm:$0xff] }
 0x5b3   :  { %v15762_v39 = vpop.f32.mrf.mxu0  ;;  %6331 = vmatpush2.msra.mxu1 %v8476_v50  ;;  %8110 = vmatprep.subr.mxu0 %v8478_v31  ;;  %8497 = vtanh.f32 %v4734_v60  ;;  %v8486_v0 = vpop.eup %8485  ;;  %v5563_v50 = vld [vmem:[%s16757_s3 + $0x800] sm:$0xff]  ;;  %v5377_v60 = vld [vmem:[%s16757_s3 + $0x230] sm:$0xff] }
 0x5b4   :  { %6332 = vmatprep.subr.mxu1 %v17607_v47  ;;  %8111 = vmatpush3.msra.mxu0 %v8478_v31 }
 0x5b5   :  { %6220 = vmatmul.mubr.f32.gmra.mxu0 %v5509_v28  ;;  %v5901_v58 = vpop.f32.mrf.mxu1  ;;  %v5698_v37 = vpop.f32.mrf.mxu0  ;;  %6333 = vmatpush2.msra.mxu1 %v8480_v20  ;;  %v5367_v20 = vld [vmem:[%s16757_s3 + $0x1e0] sm:$0xff] }
 0x5b6   :  { %6224 = vmatprep.mubr.f32.mxu0 %v5519_v30  ;;  %v15777_v26 = vadd.f32 %v5901_v58, %v15688_v63  ;;  %8112 = vmatprep.subr.mxu0 %v8482_v7  ;;  %v5572_v58 = vld [vmem:[%s16757_s3 + $0x848] sm:$0xff] }
 0x5b7   :  { %v5903_v59 = vpop.f32.mrf.mxu1  ;;  %6335 = vmatmul.mubr.f32.vlgmr.msra.gmra.mxu1 %v5313_v38  ;;  %8113 = vmatpush3.msra.mxu0 %v8482_v7  ;;  %v8488_v46 = vpop.eup %8487  ;;  %v5582_v7 = vld [vmem:[%s16757_s3 + $0x898] sm:$0xff] }
 0x5b8   :  { %6339 = vmatprep.mubr.f32.mxu1 %v5323_v56  ;;  %8114 = vmatprep.subr.mxu0 %v8484_v11  ;;  %v8490_v3 = vpop.eup %8489  ;;  %v5376_v59 = vld [vmem:[%s16757_s3 + $0x228] sm:$0xff] }
 0x5b9   :  { %6225 = vmatmul.mubr.f32.gmra.mxu0 %v5518_v2  ;;  %v15785_v63 = vpop.f32.mrf.mxu0  ;;  %v8492_v32 = vpop.eup %8491  ;;  %6790 = vmatprep.subr.mxu1 %v17607_v47 }
 0x5ba   :  { %6229 = vmatprep.mubr.f32.mxu0 %v5528_v16  ;;  %8115 = vmatpush3.msra.mxu0 %v8484_v11  ;;  %v8494_v8 = vpop.eup %8493  ;;  %v5386_v11 = vld [vmem:[%s16757_s3 + $0x278] sm:$0xff] }
 0x5bb   :  { %v5906_v40 = vpop.f32.mrf.mxu1  ;;  %v5703_v27 = vpop.f32.mrf.mxu0  ;;  %8116 = vmatprep.subr.mxu0 %v8486_v0  ;;  %6340 = vmatmul.mubr.f32.gmra.mxu1 %v5322_v6 }
 0x5bc   :  { %v15797_v29 = vadd.f32 %v5906_v40, %v15704_v44  ;;  %8117 = vmatpush3.msra.mxu0 %v8486_v0  ;;  %6344 = vmatprep.mubr.f32.mxu1 %v5332_v57  ;;  %v5536_v44 = vld [vmem:[%s16757_s3 + $0x728] sm:$0xff]  ;;  %v5385_v27 = vld [vmem:[%s16757_s3 + $0x270] sm:$0xff] }
 0x5bd   :  { %6230 = vmatmul.mubr.f32.gmra.mxu0 %v5527_v41  ;;  %v5908_v48 = vpop.f32.mrf.mxu1  ;;  %8118 = vmatprep.subr.mxu0 %v8488_v46  ;;  %v5591_v41 = vld [vmem:[%s16757_s3 + $0x8e0] sm:$0xff] }
 0x5be   :  { %6234 = vmatprep.mubr.f32.mxu0 %v5537_v21  ;;  %8119 = vmatpush3.msra.mxu0 %v8488_v46  ;;  %v5395_v46 = vld [vmem:[%s16757_s3 + $0x2c0] sm:$0xff]  ;;  %v5590_v48 = vld [vmem:[%s16757_s3 + $0x8d8] sm:$0xff] }
 0x5bf   :  { %v15808_v53 = vpop.f32.mrf.mxu0  ;;  %8120 = vmatprep.subr.mxu0 %v8490_v3  ;;  %6345 = vmatmul.mubr.f32.gmra.mxu1 %v5331_v10  ;;  %v8496_v23 = vpop.eup %8495 }
 0x5c0   :  { %8121 = vmatpush3.msra.mxu0 %v8490_v3  ;;  %6349 = vmatprep.mubr.f32.mxu1 %v5341_v17  ;;  %v8498_v36 = vpop.eup %8497 }
 0x5c1   :  { %6235 = vmatmul.mubr.f32.gmra.mxu0 %v5536_v44  ;;  %v5911_v43 = vpop.f32.mrf.mxu1  ;;  %v5708_v13 = vpop.f32.mrf.mxu0  ;;  %8122 = vmatprep.subr.mxu0 %v8492_v32  ;;  %v5315_v44 = vld [vmem:[%s16757_s3 + $0x40] sm:$0xff] }
 0x5c2   :  { %v15820_v51 = vadd.f32 %v5911_v43, %v15718_v14  ;;  %6239 = vmatprep.mubr.f32.mxu0 %v5546_v49  ;;  %8123 = vmatpush3.msra.mxu0 %v8492_v32  ;;  %v5349_v14 = vld [vmem:[%s16757_s3 + $0x150] sm:$0xff]  ;;  %v5394_v49 = vld [vmem:[%s16757_s3 + $0x2b8] sm:$0xff]  ;;  %v5324_v13 = vld [vmem:[%s16757_s3 + $0x88] sm:$0xff] }
 0x5c3   :  { %v5913_v42 = vpop.f32.mrf.mxu1  ;;  %8124 = vmatprep.subr.mxu0 %v8494_v8  ;;  %6350 = vmatmul.mubr.f32.gmra.mxu1 %v5340_v61  ;;  %v5404_v61 = vld [vmem:[%s16757_s3 + $0x308] sm:$0xff] }
 0x5c4   :  { %8125 = vmatpush3.msra.mxu0 %v8494_v8  ;;  %6354 = vmatprep.mubr.f32.mxu1 %v5350_v4 }
 0x5c5   :  { %v15831_v5 = vpop.f32.mrf.mxu0  ;;  %6240 = vmatmul.mubr.f32.gmra.mxu0 %v5545_v52  ;;  %8126 = vmatprep.subr.mxu0 %v8496_v23  ;;  %v5333_v52 = vld [vmem:[%s16757_s3 + $0xd0] sm:$0xff] }
 0x5c6   :  { %v5916_v45 = vpop.f32.mrf.mxu1  ;;  %6244 = vmatprep.mubr.f32.mxu0 %v5555_v1  ;;  %8127 = vmatpush3.msra.mxu0 %v8496_v23  ;;  %v5403_v1 = vld [vmem:[%s16757_s3 + $0x300] sm:$0xff] }
 0x5c7   :  { %v15840_v35 = vadd.f32 %v5916_v45, %v15737_v15  ;;  %v5713_v54 = vpop.f32.mrf.mxu0  ;;  %8128 = vmatprep.subr.mxu0 %v8498_v36  ;;  %6355 = vmatmul.mubr.f32.gmra.mxu1 %v5349_v14  ;;  %v5368_v15 = vld [vmem:[%s16757_s3 + $0x1e8] sm:$0xff]  ;;  %v5413_v14 = vld [vmem:[%s16757_s3 + $0x350] sm:$0xff] }
 0x5c8   :  { %v5918_v19 = vpop.f32.mrf.mxu1  ;;  %8129 = vmatpush3.msra.mxu0 %v8498_v36  ;;  %6359 = vmatprep.mubr.f32.mxu1 %v5359_v24  ;;  %v5342_v24 = vld [vmem:[%s16757_s3 + $0x118] sm:$0xff] }
 0x5c9   :  { %v5716_v34 = vpop.f32.mrf.mxu0  ;;  %6245 = vmatmul.mubr.f32.gmra.mxu0 %v5554_v22  ;;  %6999 = vmatprep.subr.mxu0 %v17607_v47  ;;  %v5351_v22 = vld [vmem:[%s16757_s3 + $0x160] sm:$0xff] }
 0x5ca   :  { %v5921_v62 = vpop.f32.mrf.mxu1  ;;  %6249 = vmatprep.mubr.f32.mxu0 %v5564_v55  ;;  %v5412_v55 = vld [vmem:[%s16757_s3 + $0x348] sm:$0xff] }
 0x5cb   :  { %v15857_v28 = vadd.f32 %v5921_v62, %v15762_v39  ;;  %v5718_v31 = vpop.f32.mrf.mxu0  ;;  %6360 = vmatmul.mubr.f32.gmra.mxu1 %v5358_v25  ;;  %v5422_v25 = vld [vmem:[%s16757_s3 + $0x398] sm:$0xff] }
 0x5cc   :  { %v5923_v30 = vpop.f32.mrf.mxu1  ;;  %6364 = vmatprep.mubr.f32.mxu1 %v5368_v15  ;;  %v5360_v15 = vld [vmem:[%s16757_s3 + $0x1a8] sm:$0xff]  ;;  %v5369_v31 = vld [vmem:[%s16757_s3 + $0x1f0] sm:$0xff] }
 0x5cd   :  { %v5721_v38 = vpop.f32.mrf.mxu0  ;;  %6250 = vmatmul.mubr.f32.gmra.mxu0 %v5563_v50  ;;  %v5421_v30 = vld [vmem:[%s16757_s3 + $0x390] sm:$0xff] }
 0x5ce   :  { %v5926_v39 = vpop.f32.mrf.mxu1  ;;  %6254 = vmatprep.mubr.f32.mxu0 %v5573_v18 }
 0x5cf   :  { %v15872_v37 = vadd.f32 %v5926_v39, %v15785_v63  ;;  %v5723_v56 = vpop.f32.mrf.mxu0  ;;  %6365 = vmatmul.mubr.f32.gmra.mxu1 %v5367_v20  ;;  %v5581_v63 = vld [vmem:[%s16757_s3 + $0x890] sm:$0xff]  ;;  %v5378_v39 = vld [vmem:[%s16757_s3 + $0x238] sm:$0xff] }
 0x5d0   :  { %v5928_v2 = vpop.f32.mrf.mxu1  ;;  %6369 = vmatprep.mubr.f32.mxu1 %v5377_v60 }
 0x5d1   :  { %v5726_v16 = vpop.f32.mrf.mxu0  ;;  %6255 = vmatmul.mubr.f32.gmra.mxu0 %v5572_v58 }
 0x5d2   :  { %v5931_v6 = vpop.f32.mrf.mxu1  ;;  %6259 = vmatprep.mubr.f32.mxu0 %v5582_v7  ;;  %v5387_v7 = vld [vmem:[%s16757_s3 + $0x280] sm:$0xff] }
 0x5d3   :  { %v15887_v57 = vadd.f32 %v5931_v6, %v15808_v53  ;;  %v5728_v0 = vpop.f32.mrf.mxu0  ;;  %6370 = vmatmul.mubr.f32.gmra.mxu1 %v5376_v59  ;;  %v5430_v59 = vld [vmem:[%s16757_s3 + $0x3d8] sm:$0xff] }
 0x5d4   :  { %v5933_v40 = vpop.f32.mrf.mxu1  ;;  %6374 = vmatprep.mubr.f32.mxu1 %v5386_v11  ;;  %v5440_v11 = vld [vmem:[%s16757_s3 + $0x428] sm:$0xff] }
 0x5d5   :  { %v5731_v21 = vpop.f32.mrf.mxu0  ;;  %6260 = vmatmul.mubr.f32.gmra.mxu0 %v5581_v63  ;;  %v5396_v63 = vld [vmem:[%s16757_s3 + $0x2c8] sm:$0xff]  ;;  %v5405_v40 = vld [vmem:[%s16757_s3 + $0x310] sm:$0xff] }
 0x5d6   :  { %v5936_v10 = vpop.f32.mrf.mxu1  ;;  %6264 = vmatprep.mubr.f32.mxu0 %v5591_v41 }
 0x5d7   :  { %v15902_v17 = vadd.f32 %v5936_v10, %v15831_v5  ;;  %v5733_v3 = vpop.f32.mrf.mxu0  ;;  %6375 = vmatmul.mubr.f32.gmra.mxu1 %v5385_v27  ;;  %v5449_v10 = vld [vmem:[%s16757_s3 + $0x470] sm:$0xff] }
 0x5d8   :  { %v5938_v53 = vpop.f32.mrf.mxu1  ;;  %6379 = vmatprep.mubr.f32.mxu1 %v5395_v46  ;;  %v5414_v3 = vld [vmem:[%s16757_s3 + $0x358] sm:$0xff] }
 0x5d9   :  { %v5736_v32 = vpop.f32.mrf.mxu0  ;;  %6265 = vmatmul.mubr.f32.gmra.mxu0 %v5590_v48 }
 0x5da   :  { %v5941_v43 = vpop.f32.mrf.mxu1  ;;  %8130 = vmatprep.mubr.f32.mxu0 %v5315_v44 }
 0x5db   :  { %v15916_v4 = vadd.f32 %v5941_v43, %v5716_v34  ;;  %v5738_v8 = vpop.f32.mrf.mxu0  ;;  %6380 = vmatmul.mubr.f32.gmra.mxu1 %v5394_v49  ;;  %v5423_v49 = vld [vmem:[%s16757_s3 + $0x3a0] sm:$0xff] }
 0x5dc   :  { %v5943_v42 = vpop.f32.mrf.mxu1  ;;  %6384 = vmatprep.mubr.f32.mxu1 %v5404_v61  ;;  %v5448_v61 = vld [vmem:[%s16757_s3 + $0x468] sm:$0xff] }
 0x5dd   :  { %v5741_v23 = vpop.f32.mrf.mxu0  ;;  %8131 = vmatmul.mubr.f32.vlgmr.msra.gmra.mxu0 %v5324_v13  ;;  %v5458_v13 = vld [vmem:[%s16757_s3 + $0x4b8] sm:$0xff] }
 0x5de   :  { %v5946_v5 = vpop.f32.mrf.mxu1  ;;  %8133 = vmatprep.mubr.f32.mxu0 %v5333_v52  ;;  %v5432_v52 = vld [vmem:[%s16757_s3 + $0x3e8] sm:$0xff] }
 0x5df   :  { %v15930_v36 = vadd.f32 %v5946_v5, %v5721_v38  ;;  %v5743_v45 = vpop.f32.mrf.mxu0  ;;  %6385 = vmatmul.mubr.f32.gmra.mxu1 %v5403_v1  ;;  %v5431_v38 = vld [vmem:[%s16757_s3 + $0x3e0] sm:$0xff]  ;;  %v5457_v5 = vld [vmem:[%s16757_s3 + $0x4b0] sm:$0xff] }
 0x5e0   :  { %v5948_v54 = vpop.f32.mrf.mxu1  ;;  %6389 = vmatprep.mubr.f32.mxu1 %v5413_v14  ;;  %v5467_v45 = vld [vmem:[%s16757_s3 + $0x500] sm:$0xff] }
 0x5e1   :  { %v5746_v19 = vpop.f32.mrf.mxu0  ;;  %8134 = vmatmul.mubr.f32.gmra.mxu0 %v5342_v24  ;;  %v5450_v54 = vld [vmem:[%s16757_s3 + $0x478] sm:$0xff] }
 0x5e2   :  { %v5951_v34 = vpop.f32.mrf.mxu1  ;;  %8136 = vmatprep.mubr.f32.mxu0 %v5351_v22 }
 0x5e3   :  { %v15944_v62 = vadd.f32 %v5951_v34, %v5726_v16  ;;  %v5748_v50 = vpop.f32.mrf.mxu0  ;;  %6390 = vmatmul.mubr.f32.gmra.mxu1 %v5412_v55 }
 0x5e4   :  { %v5953_v18 = vpop.f32.mrf.mxu1  ;;  %6394 = vmatprep.mubr.f32.mxu1 %v5422_v25  ;;  %v5459_v25 = vld [vmem:[%s16757_s3 + $0x4c0] sm:$0xff] }
 0x5e5   :  { %v5751_v20 = vpop.f32.mrf.mxu0  ;;  %8137 = vmatmul.mubr.f32.gmra.mxu0 %v5360_v15  ;;  %v5466_v15 = vld [vmem:[%s16757_s3 + $0x4f8] sm:$0xff] }
 0x5e6   :  { %v5956_v60 = vpop.f32.mrf.mxu1  ;;  %8139 = vmatprep.mubr.f32.mxu0 %v5369_v31  ;;  %v5476_v31 = vld [vmem:[%s16757_s3 + $0x548] sm:$0xff] }
 0x5e7   :  { %v15958_v58 = vadd.f32 %v5956_v60, %v5731_v21  ;;  %v5753_v56 = vpop.f32.mrf.mxu0  ;;  %6395 = vmatmul.mubr.f32.gmra.mxu1 %v5421_v30  ;;  %v5439_v21 = vld [vmem:[%s16757_s3 + $0x420] sm:$0xff]  ;;  %v5468_v30 = vld [vmem:[%s16757_s3 + $0x508] sm:$0xff]  ;;  %v5477_v60 = vld [vmem:[%s16757_s3 + $0x550] sm:$0xff] }
 0x5e8   :  { %v5958_v2 = vpop.f32.mrf.mxu1  ;;  %6399 = vmatprep.mubr.f32.mxu1 %v5431_v38  ;;  %v5475_v56 = vld [vmem:[%s16757_s3 + $0x540] sm:$0xff] }
 0x5e9   :  { %v5756_v16 = vpop.f32.mrf.mxu0  ;;  %8140 = vmatmul.mubr.f32.gmra.mxu0 %v5378_v39  ;;  %v5485_v2 = vld [vmem:[%s16757_s3 + $0x590] sm:$0xff] }
 0x5ea   :  { %v5961_v6 = vpop.f32.mrf.mxu1  ;;  %8142 = vmatprep.mubr.f32.mxu0 %v5387_v7 }
 0x5eb   :  { %v15972_v0 = vadd.f32 %v5961_v6, %v5736_v32  ;;  %v5758_v41 = vpop.f32.mrf.mxu0  ;;  %6400 = vmatmul.mubr.f32.gmra.mxu1 %v5430_v59 }
 0x5ec   :  { %v5963_v27 = vpop.f32.mrf.mxu1  ;;  %6404 = vmatprep.mubr.f32.mxu1 %v5440_v11 }
 0x5ed   :  { %v5761_v46 = vpop.f32.mrf.mxu0  ;;  %8143 = vmatmul.mubr.f32.gmra.mxu0 %v5396_v63  ;;  %v5495_v63 = vld [vmem:[%s16757_s3 + $0x5e0] sm:$0xff] }
 0x5ee   :  { %v5966_v48 = vpop.f32.mrf.mxu1  ;;  %8145 = vmatprep.mubr.f32.mxu0 %v5405_v40  ;;  %v5484_v40 = vld [vmem:[%s16757_s3 + $0x588] sm:$0xff] }
 0x5ef   :  { %v15986_v44 = vadd.f32 %v5966_v48, %v5741_v23  ;;  %v5763_v53 = vpop.f32.mrf.mxu0  ;;  %6405 = vmatmul.mubr.f32.gmra.mxu1 %v5439_v21  ;;  %v5441_v23 = vld [vmem:[%s16757_s3 + $0x430] sm:$0xff]  ;;  %v5494_v21 = vld [vmem:[%s16757_s3 + $0x5d8] sm:$0xff] }
 0x5f0   :  { %v5968_v32 = vpop.f32.mrf.mxu1  ;;  %6409 = vmatprep.mubr.f32.mxu1 %v5449_v10  ;;  %v5504_v10 = vld [vmem:[%s16757_s3 + $0x628] sm:$0xff]  ;;  %v5513_v53 = vld [vmem:[%s16757_s3 + $0x670] sm:$0xff] }
 0x5f1   :  { %v5766_v43 = vpop.f32.mrf.mxu0  ;;  %8146 = vmatmul.mubr.f32.gmra.mxu0 %v5414_v3  ;;  %v5493_v32 = vld [vmem:[%s16757_s3 + $0x5d0] sm:$0xff] }
 0x5f2   :  { %v5971_v8 = vpop.f32.mrf.mxu1  ;;  %8148 = vmatprep.mubr.f32.mxu0 %v5423_v49 }
 0x5f3   :  { %v16000_v42 = vadd.f32 %v5971_v8, %v5746_v19  ;;  %v5768_v1 = vpop.f32.mrf.mxu0  ;;  %6410 = vmatmul.mubr.f32.gmra.mxu1 %v5448_v61  ;;  %v5522_v8 = vld [vmem:[%s16757_s3 + $0x6b8] sm:$0xff] }
 0x5f4   :  { %v5973_v14 = vpop.f32.mrf.mxu1  ;;  %6414 = vmatprep.mubr.f32.mxu1 %v5458_v13  ;;  %v5503_v13 = vld [vmem:[%s16757_s3 + $0x620] sm:$0xff] }
 0x5f5   :  { %v5771_v24 = vpop.f32.mrf.mxu0  ;;  %8149 = vmatmul.mubr.f32.gmra.mxu0 %v5432_v52 }
 0x5f6   :  { %v5976_v22 = vpop.f32.mrf.mxu1  ;;  %8151 = vmatprep.mubr.f32.mxu0 %v5441_v23  ;;  %v5531_v23 = vld [vmem:[%s16757_s3 + $0x700] sm:$0xff] }
 0x5f7   :  { %v16014_v55 = vadd.f32 %v5976_v22, %v5751_v20  ;;  %v5773_v19 = vpop.f32.mrf.mxu0  ;;  %6415 = vmatmul.mubr.f32.gmra.mxu1 %v5457_v5  ;;  %v5502_v5 = vld [vmem:[%s16757_s3 + $0x618] sm:$0xff]  ;;  %v5512_v22 = vld [vmem:[%s16757_s3 + $0x668] sm:$0xff] }
 0x5f8   :  { %v5978_v34 = vpop.f32.mrf.mxu1  ;;  %6419 = vmatprep.mubr.f32.mxu1 %v5467_v45 }
 0x5f9   :  { %v5776_v50 = vpop.f32.mrf.mxu0  ;;  %8152 = vmatmul.mubr.f32.gmra.mxu0 %v5450_v54  ;;  %v5540_v54 = vld [vmem:[%s16757_s3 + $0x748] sm:$0xff]  ;;  %v5549_v34 = vld [vmem:[%s16757_s3 + $0x790] sm:$0xff] }
 0x5fa   :  { %v5981_v18 = vpop.f32.mrf.mxu1  ;;  %8154 = vmatprep.mubr.f32.mxu0 %v5459_v25 }
 0x5fb   :  { %v16028_v20 = vadd.f32 %v5981_v18, %v5756_v16  ;;  %v5778_v38 = vpop.f32.mrf.mxu0  ;;  %6420 = vmatmul.mubr.f32.gmra.mxu1 %v5466_v15  ;;  %v5486_v16 = vld [vmem:[%s16757_s3 + $0x598] sm:$0xff] }
 0x5fc   :  { %v5983_v39 = vpop.f32.mrf.mxu1  ;;  %6424 = vmatprep.mubr.f32.mxu1 %v5476_v31  ;;  %v5511_v31 = vld [vmem:[%s16757_s3 + $0x660] sm:$0xff]  ;;  %v5558_v38 = vld [vmem:[%s16757_s3 + $0x7d8] sm:$0xff] }
 0x5fd   :  { %v5781_v7 = vpop.f32.mrf.mxu0  ;;  %8155 = vmatmul.mubr.f32.gmra.mxu0 %v5468_v30  ;;  %v5521_v30 = vld [vmem:[%s16757_s3 + $0x6b0] sm:$0xff] }
 0x5fe   :  { %v5986_v59 = vpop.f32.mrf.mxu1  ;;  %8157 = vmatprep.mubr.f32.mxu0 %v5477_v60 }
 0x5ff   :  { %v16042_v11 = vadd.f32 %v5986_v59, %v5761_v46  ;;  %v5783_v6 = vpop.f32.mrf.mxu0  ;;  %6425 = vmatmul.mubr.f32.gmra.mxu1 %v5475_v56  ;;  %v5567_v56 = vld [vmem:[%s16757_s3 + $0x820] sm:$0xff]  ;;  %v5520_v59 = vld [vmem:[%s16757_s3 + $0x6a8] sm:$0xff] }
 0x600   :  { %v5988_v41 = vpop.f32.mrf.mxu1  ;;  %6429 = vmatprep.mubr.f32.mxu1 %v5485_v2  ;;  %v5530_v6 = vld [vmem:[%s16757_s3 + $0x6f8] sm:$0xff] }
 0x601   :  { %v5786_v27 = vpop.f32.mrf.mxu0  ;;  %8158 = vmatmul.mubr.f32.gmra.mxu0 %v5486_v16 }
 0x602   :  { %v5991_v46 = vpop.f32.mrf.mxu1  ;;  %8160 = vmatprep.mubr.f32.mxu0 %v5495_v63  ;;  %v5576_v63 = vld [vmem:[%s16757_s3 + $0x868] sm:$0xff] }
 0x603   :  { %v16056_v48 = vadd.f32 %v5991_v46, %v5766_v43  ;;  %v5788_v3 = vpop.f32.mrf.mxu0  ;;  %6430 = vmatmul.mubr.f32.gmra.mxu1 %v5484_v40 }
 0x604   :  { %v5993_v49 = vpop.f32.mrf.mxu1  ;;  %6434 = vmatprep.mubr.f32.mxu1 %v5494_v21  ;;  %v5585_v21 = vld [vmem:[%s16757_s3 + $0x8b0] sm:$0xff] }
 0x605   :  { %v5791_v61 = vpop.f32.mrf.mxu0  ;;  %8161 = vmatmul.mubr.f32.gmra.mxu0 %v5504_v10  ;;  %v5529_v10 = vld [vmem:[%s16757_s3 + $0x6f0] sm:$0xff]  ;;  %v5594_v49 = vld [vmem:[%s16757_s3 + $0x8f8] sm:$0xff] }
 0x606   :  { %v5996_v43 = vpop.f32.mrf.mxu1  ;;  %8163 = vmatprep.mubr.f32.mxu0 %v5513_v53  ;;  %v5539_v53 = vld [vmem:[%s16757_s3 + $0x740] sm:$0xff] }
 0x607   :  { %v16070_v52 = vadd.f32 %v5996_v43, %v5771_v24  ;;  %v5793_v1 = vpop.f32.mrf.mxu0  ;;  %6435 = vmatmul.mubr.f32.gmra.mxu1 %v5493_v32 }
 0x608   :  { %v5998_v14 = vpop.f32.mrf.mxu1  ;;  %6439 = vmatprep.mubr.f32.mxu1 %v5503_v13 }
 0x609   :  { %v5796_v45 = vpop.f32.mrf.mxu0  ;;  %8164 = vmatmul.mubr.f32.gmra.mxu0 %v5522_v8  ;;  %v5538_v8 = vld [vmem:[%s16757_s3 + $0x738] sm:$0xff] }
 0x60a   :  { %v6001_v24 = vpop.f32.mrf.mxu1  ;;  %8166 = vmatprep.mubr.f32.mxu0 %v5531_v23  ;;  %v5548_v23 = vld [vmem:[%s16757_s3 + $0x788] sm:$0xff] }
 0x60b   :  { %v16084_v19 = vadd.f32 %v6001_v24, %v5776_v50  ;;  %v5798_v25 = vpop.f32.mrf.mxu0  ;;  %6440 = vmatmul.mubr.f32.gmra.mxu1 %v5502_v5  ;;  %v5547_v24 = vld [vmem:[%s16757_s3 + $0x780] sm:$0xff] }
 0x60c   :  { %v6003_v15 = vpop.f32.mrf.mxu1  ;;  %6444 = vmatprep.mubr.f32.mxu1 %v5512_v22  ;;  %v5557_v25 = vld [vmem:[%s16757_s3 + $0x7d0] sm:$0xff] }
 0x60d   :  { %v5801_v18 = vpop.f32.mrf.mxu0  ;;  %8167 = vmatmul.mubr.f32.gmra.mxu0 %v5540_v54 }
 0x60e   :  { %v6006_v50 = vpop.f32.mrf.mxu1  ;;  %8169 = vmatprep.mubr.f32.mxu0 %v5549_v34 }
 0x60f   :  { %v16098_v60 = vadd.f32 %v6006_v50, %v5781_v7  ;;  %v5803_v39 = vpop.f32.mrf.mxu0  ;;  %6445 = vmatmul.mubr.f32.gmra.mxu1 %v5511_v31  ;;  %v5556_v50 = vld [vmem:[%s16757_s3 + $0x7c8] sm:$0xff] }
 0x610   :  { %v6008_v2 = vpop.f32.mrf.mxu1  ;;  %6449 = vmatprep.mubr.f32.mxu1 %v5521_v30  ;;  %v5566_v39 = vld [vmem:[%s16757_s3 + $0x818] sm:$0xff] }
 0x611   :  { %v5806_v16 = vpop.f32.mrf.mxu0  ;;  %8170 = vmatmul.mubr.f32.gmra.mxu0 %v5558_v38 }
 0x612   :  { %v6011_v7 = vpop.f32.mrf.mxu1  ;;  %8172 = vmatprep.mubr.f32.mxu0 %v5567_v56 }
 0x613   :  { %v16112_v41 = vadd.f32 %v6011_v7, %v5786_v27  ;;  %v5808_v40 = vpop.f32.mrf.mxu0  ;;  %6450 = vmatmul.mubr.f32.gmra.mxu1 %v5520_v59 }
 0x614   :  { %v6013_v46 = vpop.f32.mrf.mxu1  ;;  %6454 = vmatprep.mubr.f32.mxu1 %v5530_v6  ;;  %v5565_v6 = vld [vmem:[%s16757_s3 + $0x810] sm:$0xff] }
 0x615   :  { %v5811_v3 = vpop.f32.mrf.mxu0  ;;  %8173 = vmatmul.mubr.f32.gmra.mxu0 %v5576_v63  ;;  %v5575_v63 = vld [vmem:[%s16757_s3 + $0x860] sm:$0xff] }
 0x616   :  { %v6016_v27 = vpop.f32.mrf.mxu1  ;;  %8175 = vmatprep.mubr.f32.mxu0 %v5585_v21 }
 0x617   :  { %v16126_v32 = vadd.f32 %v6016_v27, %v5791_v61  ;;  %v5813_v13 = vpop.f32.mrf.mxu0  ;;  %6455 = vmatmul.mubr.f32.gmra.mxu1 %v5529_v10  ;;  %v5574_v10 = vld [vmem:[%s16757_s3 + $0x858] sm:$0xff]  ;;  %v5584_v27 = vld [vmem:[%s16757_s3 + $0x8a8] sm:$0xff] }
 0x618   :  { %v6018_v43 = vpop.f32.mrf.mxu1  ;;  %6459 = vmatprep.mubr.f32.mxu1 %v5539_v53 }
 0x619   :  { %v5816_v1 = vpop.f32.mrf.mxu0  ;;  %8176 = vmatmul.mubr.f32.gmra.mxu0 %v5594_v49  ;;  %v5583_v43 = vld [vmem:[%s16757_s3 + $0x8a0] sm:$0xff] }
 0x61a   :  { %v6021_v14 = vpop.f32.mrf.mxu1 }
 0x61b   :  { %v16134_v5 = vadd.f32 %v6021_v14, %v5796_v45  ;;  %v5818_v22 = vpop.f32.mrf.mxu0  ;;  %6460 = vmatmul.mubr.f32.gmra.mxu1 %v5538_v8  ;;  %v5593_v14 = vld [vmem:[%s16757_s3 + $0x8f0] sm:$0xff] }
 0x61c   :  { %v6023_v61 = vpop.f32.mrf.mxu1  ;;  %6464 = vmatprep.mubr.f32.mxu1 %v5548_v23 }
 0x61d   :  { %v6111_v54 = vpop.f32.mrf.mxu0 }
 0x61e   :  { %v16143_v34 = vadd.f32 %v6111_v54, %v15642_v33  ;;  %v6026_v15 = vpop.f32.mrf.mxu1 }
 0x61f   :  { %v16145_v31 = vadd.f32 %v6026_v15, %v5801_v18  ;;  %v6113_v45 = vpop.f32.mrf.mxu0  ;;  %6465 = vmatmul.mubr.f32.gmra.mxu1 %v5547_v24 }
 0x620   :  { %v6028_v30 = vpop.f32.mrf.mxu1  ;;  %6469 = vmatprep.mubr.f32.mxu1 %v5557_v25 }
 0x621   :  { %v6116_v38 = vpop.f32.mrf.mxu0 }
 0x622   :  { %v16154_v56 = vadd.f32 %v6116_v38, %v15721_v12  ;;  %v6031_v33 = vpop.f32.mrf.mxu1 }
 0x623   :  { %v16156_v2 = vadd.f32 %v6031_v33, %v5806_v16  ;;  %v6118_v18 = vpop.f32.mrf.mxu0  ;;  %6470 = vmatmul.mubr.f32.gmra.mxu1 %v5556_v50 }
 0x624   :  { %v6033_v59 = vpop.f32.mrf.mxu1  ;;  %6474 = vmatprep.mubr.f32.mxu1 %v5566_v39 }
 0x625   :  { %v6121_v7 = vpop.f32.mrf.mxu0 }
 0x626   :  { %v16165_v40 = vadd.f32 %v6121_v7, %v15749_v9  ;;  %v6036_v12 = vpop.f32.mrf.mxu1 }
 0x627   :  { %v16167_v21 = vadd.f32 %v6036_v12, %v5811_v3  ;;  %v6123_v16 = vpop.f32.mrf.mxu0  ;;  %6475 = vmatmul.mubr.f32.gmra.mxu1 %v5565_v6 }
 0x628   :  { %v6038_v46 = vpop.f32.mrf.mxu1  ;;  %6479 = vmatprep.mubr.f32.mxu1 %v5575_v63 }
 0x629   :  { %v6126_v53 = vpop.f32.mrf.mxu0 }
 0x62a   :  { %v16176_v49 = vadd.f32 %v6126_v53, %v15777_v26  ;;  %v6041_v9 = vpop.f32.mrf.mxu1 }
 0x62b   :  { %v16178_v13 = vadd.f32 %v6041_v9, %v5816_v1  ;;  %v6128_v3 = vpop.f32.mrf.mxu0  ;;  %6480 = vmatmul.mubr.f32.gmra.mxu1 %v5574_v10  ;;  %v5592_v1 = vld [vmem:[%s16757_s3 + $0x8e8] sm:$0xff] }
 0x62c   :  { %6484 = vmatprep.mubr.f32.mxu1 %v5584_v27  ;;  %v6043_v8 = vpop.f32.mrf.mxu1 }
 0x62d   :  { %v6131_v23 = vpop.f32.mrf.mxu0 }
 0x62e   :  { %v16187_v22 = vadd.f32 %v6131_v23, %v15797_v29 }
 0x62f   :  { %v6133_v26 = vpop.f32.mrf.mxu0  ;;  %6485 = vmatmul.mubr.f32.gmra.mxu1 %v5583_v43 }
 0x630   :  { %6489 = vmatprep.mubr.f32.mxu1 %v5593_v14 }
 0x631   :  { %v6136_v61 = vpop.f32.mrf.mxu0 }
 0x632   :  { %v16193_v24 = vadd.f32 %v6136_v61, %v15820_v51 }
 0x633   :  { %v6138_v54 = vpop.f32.mrf.mxu0  ;;  %6490 = vmatmul.mubr.f32.gmra.mxu1 %v5592_v1 }
 0x635   :  { %v6141_v25 = vpop.f32.mrf.mxu0 }
 0x636   :  { %v16196_v15 = vadd.f32 %v6141_v25, %v15840_v35 }
 0x637   :  { %v6143_v45 = vpop.f32.mrf.mxu0 }
 0x639   :  { %v6146_v29 = vpop.f32.mrf.mxu0 }
 0x63a   :  { %v16199_v30 = vadd.f32 %v6146_v29, %v15857_v28 }
 0x63b   :  { %v6148_v50 = vpop.f32.mrf.mxu0 }
 0x63d   :  { %v6151_v38 = vpop.f32.mrf.mxu0 }
 0x63e   :  { %v16202_v39 = vadd.f32 %v6151_v38, %v15872_v37 }
 0x63f   :  { %v6153_v33 = vpop.f32.mrf.mxu0 }
 0x641   :  { %v6156_v18 = vpop.f32.mrf.mxu0 }
 0x642   :  { %v16205_v51 = vadd.f32 %v6156_v18, %v15887_v57 }
 0x643   :  { %v6158_v59 = vpop.f32.mrf.mxu0 }
 0x645   :  { %v6161_v6 = vpop.f32.mrf.mxu0 }
 0x646   :  { %v16208_v35 = vadd.f32 %v6161_v6, %v15902_v17 }
 0x647   :  { %v6163_v7 = vpop.f32.mrf.mxu0 }
 0x649   :  { %v6166_v63 = vpop.f32.mrf.mxu0 }
 0x64a   :  { %v16211_v28 = vadd.f32 %v6166_v63, %v15916_v4 }
 0x64b   :  { %v6168_v12 = vpop.f32.mrf.mxu0 }
 0x64d   :  { %v6171_v16 = vpop.f32.mrf.mxu0 }
 0x64e   :  { %v16214_v37 = vadd.f32 %v6171_v16, %v15930_v36 }
 0x64f   :  { %v6173_v46 = vpop.f32.mrf.mxu0 }
 0x651   :  { %v6176_v10 = vpop.f32.mrf.mxu0 }
 0x652   :  { %v16217_v57 = vadd.f32 %v6176_v10, %v15944_v62 }
 0x653   :  { %v6178_v53 = vpop.f32.mrf.mxu0 }
 0x655   :  { %v6181_v27 = vpop.f32.mrf.mxu0 }
 0x656   :  { %v16220_v17 = vadd.f32 %v6181_v27, %v15958_v58 }
 0x657   :  { %v6183_v9 = vpop.f32.mrf.mxu0 }
 0x659   :  { %v6186_v3 = vpop.f32.mrf.mxu0 }
 0x65a   :  { %v16223_v4 = vadd.f32 %v6186_v3, %v15972_v0 }
 0x65b   :  { %v6188_v43 = vpop.f32.mrf.mxu0 }
 0x65d   :  { %v6191_v8 = vpop.f32.mrf.mxu0 }
 0x65e   :  { %v16226_v36 = vadd.f32 %v6191_v8, %v15986_v44 }
 0x65f   :  { %v6193_v23 = vpop.f32.mrf.mxu0 }
 0x661   :  { %v6196_v14 = vpop.f32.mrf.mxu0 }
 0x662   :  { %v16229_v62 = vadd.f32 %v6196_v14, %v16000_v42 }
 0x663   :  { %v6198_v26 = vpop.f32.mrf.mxu0 }
 0x665   :  { %v6201_v1 = vpop.f32.mrf.mxu0 }
 0x666   :  { %v16232_v58 = vadd.f32 %v6201_v1, %v16014_v55 }
 0x667   :  { %v6203_v61 = vpop.f32.mrf.mxu0 }
 0x669   :  { %v6206_v54 = vpop.f32.mrf.mxu0 }
 0x66a   :  { %v16235_v0 = vadd.f32 %v6206_v54, %v16028_v20 }
 0x66b   :  { %v6208_v25 = vpop.f32.mrf.mxu0 }
 0x66d   :  { %v6211_v45 = vpop.f32.mrf.mxu0 }
 0x66e   :  { %v16238_v44 = vadd.f32 %v6211_v45, %v16042_v11 }
 0x66f   :  { %v6213_v29 = vpop.f32.mrf.mxu0 }
 0x671   :  { %v6216_v50 = vpop.f32.mrf.mxu0 }
 0x672   :  { %v16241_v42 = vadd.f32 %v6216_v50, %v16056_v48 }
 0x673   :  { %v6218_v38 = vpop.f32.mrf.mxu0 }
 0x674   :  { %17616 = vst [vmem:[#allocation53_spill] sm:$0xff] %v16241_v42 }
 0x675   :  { %v6221_v33 = vpop.f32.mrf.mxu0 }
 0x676   :  { %v16244_v55 = vadd.f32 %v6221_v33, %v16070_v52 }
 0x677   :  { %v6223_v18 = vpop.f32.mrf.mxu0  ;;  %v6336_v59 = vpop.f32.mrf.mxu1 }
 0x678   :  { %17617 = vst [vmem:[#allocation93_spill] sm:$0xff] %v16244_v55  ;;  %v16247_v20 = vadd.f32 %v6336_v59, %v16143_v34 }
 0x679   :  { %v6226_v6 = vpop.f32.mrf.mxu0  ;;  %v6338_v7 = vpop.f32.mrf.mxu1 }
 0x67a   :  { %v16250_v11 = vadd.f32 %v6226_v6, %v16084_v19 }
 0x67b   :  { %v6228_v63 = vpop.f32.mrf.mxu0  ;;  %v6341_v12 = vpop.f32.mrf.mxu1 }
 0x67c   :  { %17618 = vst [vmem:[#allocation29_spill] sm:$0xff] %v16250_v11  ;;  %v16253_v48 = vadd.f32 %v6341_v12, %v16154_v56 }
 0x67d   :  { %v6231_v16 = vpop.f32.mrf.mxu0  ;;  %v6343_v46 = vpop.f32.mrf.mxu1 }
 0x67e   :  { %v16256_v52 = vadd.f32 %v6231_v16, %v16098_v60 }
 0x67f   :  { %v6233_v10 = vpop.f32.mrf.mxu0  ;;  %v6346_v53 = vpop.f32.mrf.mxu1 }
 0x680   :  { %17619 = vst [vmem:[#allocation91_spill] sm:$0xff] %v16256_v52  ;;  %v16259_v34 = vadd.f32 %v6346_v53, %v16165_v40 }
 0x681   :  { %v6236_v27 = vpop.f32.mrf.mxu0  ;;  %v6348_v9 = vpop.f32.mrf.mxu1 }
 0x682   :  { %v16262_v19 = vadd.f32 %v6236_v27, %v16112_v41 }
 0x683   :  { %v6238_v3 = vpop.f32.mrf.mxu0  ;;  %v6351_v43 = vpop.f32.mrf.mxu1 }
 0x684   :  { %17620 = vst [vmem:[#allocation28_spill] sm:$0xff] %v16262_v19  ;;  %v16265_v56 = vadd.f32 %v6351_v43, %v16176_v49 }
 0x685   :  { %v6241_v8 = vpop.f32.mrf.mxu0  ;;  %v6353_v23 = vpop.f32.mrf.mxu1 }
 0x686   :  { %v16268_v60 = vadd.f32 %v6241_v8, %v16126_v32 }
 0x687   :  { %v6243_v14 = vpop.f32.mrf.mxu0  ;;  %v6356_v26 = vpop.f32.mrf.mxu1 }
 0x688   :  { %17621 = vst [vmem:[#allocation89_spill] sm:$0xff] %v16268_v60  ;;  %v16271_v40 = vadd.f32 %v6356_v26, %v16187_v22 }
 0x689   :  { %v6246_v1 = vpop.f32.mrf.mxu0  ;;  %v6358_v61 = vpop.f32.mrf.mxu1 }
 0x68a   :  { %v16274_v41 = vadd.f32 %v6246_v1, %v16134_v5 }
 0x68b   :  { %v6248_v54 = vpop.f32.mrf.mxu0  ;;  %v6361_v25 = vpop.f32.mrf.mxu1 }
 0x68c   :  { %v16277_v49 = vadd.f32 %v6361_v25, %v16193_v24 }
 0x68d   :  { %v6251_v45 = vpop.f32.mrf.mxu0  ;;  %v6363_v29 = vpop.f32.mrf.mxu1 }
 0x68e   :  { %v16280_v32 = vadd.f32 %v6251_v45, %v16145_v31 }
 0x68f   :  { %v6253_v50 = vpop.f32.mrf.mxu0  ;;  %v16282_v38 = vpop.f32.mrf.mxu1 }
 0x691   :  { %v6256_v22 = vpop.f32.mrf.mxu0  ;;  %v6368_v33 = vpop.f32.mrf.mxu1 }
 0x692   :  { %v16285_v18 = vadd.f32 %v6256_v22, %v16156_v2 }
 0x693   :  { %v6258_v5 = vpop.f32.mrf.mxu0  ;;  %v16287_v59 = vpop.f32.mrf.mxu1 }
 0x695   :  { %v6261_v6 = vpop.f32.mrf.mxu0  ;;  %v6373_v7 = vpop.f32.mrf.mxu1 }
 0x696   :  { %v16290_v24 = vadd.f32 %v6261_v6, %v16167_v21 }
 0x697   :  { %v6263_v63 = vpop.f32.mrf.mxu0  ;;  %v16292_v12 = vpop.f32.mrf.mxu1 }
 0x699   :  { %v6266_v31 = vpop.f32.mrf.mxu0  ;;  %v6378_v16 = vpop.f32.mrf.mxu1 }
 0x69a   :  { %v16295_v46 = vadd.f32 %v6266_v31, %v16178_v13  ;;  %v6753_v13 = vld [vmem:[%s16758_s4 + $0x8] sm:$0xff] }
 0x69b   :  { %v6268_v10 = vpop.f32.mrf.mxu0  ;;  %v6381_v53 = vpop.f32.mrf.mxu1  ;;  %6854 = vmatprep.mubr.f32.mxu1 %v6753_v13 }
 0x69d   :  { %v16297_v2 = vpop.f32.mrf.mxu0  ;;  %v6383_v27 = vpop.f32.mrf.mxu1 }
 0x69f   :  { %v16299_v9 = vpop.f32.mrf.mxu0  ;;  %v6386_v3 = vpop.f32.mrf.mxu1 }
 0x6a1   :  { %v16301_v43 = vpop.f32.mrf.mxu0  ;;  %v6388_v21 = vpop.f32.mrf.mxu1 }
 0x6a3   :  { %v16303_v8 = vpop.f32.mrf.mxu0  ;;  %v6391_v23 = vpop.f32.mrf.mxu1 }
 0x6a5   :  { %v16305_v14 = vpop.f32.mrf.mxu0  ;;  %v6393_v26 = vpop.f32.mrf.mxu1 }
 0x6a7   :  { %v16310_v1 = vpop.f32.mrf.mxu0  ;;  %v6396_v61 = vpop.f32.mrf.mxu1 }
 0x6a9   :  { %v8141_v54 = vpop.f32.mrf.mxu0  ;;  %v6398_v25 = vpop.f32.mrf.mxu1 }
 0x6ab   :  { %v6591_v45 = vpop.f32.mrf.mxu0  ;;  %v6401_v29 = vpop.f32.mrf.mxu1 }
 0x6ac   :  { %v6402_v55 = vadd.f32 %v6401_v29, %v16217_v57  ;;  %v6387_v57 = vadd.f32 %v6386_v3, %v16208_v35 }
 0x6ad   :  { %v8144_v50 = vpop.f32.mrf.mxu0  ;;  %v6403_v22 = vpop.f32.mrf.mxu1 }
 0x6af   :  { %v6601_v33 = vpop.f32.mrf.mxu0  ;;  %v6406_v5 = vpop.f32.mrf.mxu1 }
 0x6b0   :  { %v6407_v22 = vadd.f32 %v6406_v5, %v16220_v17 }
 0x6b1   :  { %v8147_v6 = vpop.f32.mrf.mxu0  ;;  %v6408_v7 = vpop.f32.mrf.mxu1 }
 0x6b2   :  { %v6397_v7 = vadd.f32 %v6396_v61, %v16214_v37 }
 0x6b3   :  { %v6611_v63 = vpop.f32.mrf.mxu0  ;;  %v6411_v31 = vpop.f32.mrf.mxu1 }
 0x6b4   :  { %v6412_v27 = vadd.f32 %v6411_v31, %v16223_v4 }
 0x6b5   :  { %v8150_v16 = vpop.f32.mrf.mxu0  ;;  %v6413_v10 = vpop.f32.mrf.mxu1 }
 0x6b6   :  { %v6627_v60 = vadd.f32 %v8150_v16, %v6402_v55  ;;  %v6382_v55 = vadd.f32 %v6381_v53, %v16205_v51  ;;  %v6367_v53 = vadd.f32 %v16282_v38, %v16196_v15 }
 0x6b7   :  { %v6621_v21 = vpop.f32.mrf.mxu0  ;;  %v6416_v26 = vpop.f32.mrf.mxu1 }
 0x6b8   :  { %v16314_v13 = vadd.f32 %v6416_v26, %v16226_v36  ;;  %v6392_v36 = vadd.f32 %v6391_v23, %v16211_v28  ;;  %v6622_v26 = vadd.f32 %v6621_v21, %v6397_v7  ;;  %v6607_v28 = vadd.f32 %v8144_v50, %v6382_v55 }
 0x6b9   :  { %v8153_v25 = vpop.f32.mrf.mxu0  ;;  %v6418_v42 = vpop.f32.mrf.mxu1  ;;  %v6592_v50 = vadd.f32 %v6591_v45, %v6367_v53  ;;  %v6582_v45 = vadd.f32 %v16310_v1, %v16271_v40 }
 0x6ba   :  { %v6637_v11 = vadd.f32 %v8153_v25, %v6412_v27  ;;  %v6617_v17 = vadd.f32 %v8147_v6, %v6392_v36 }
 0x6bb   :  { %v6631_v52 = vpop.f32.mrf.mxu0  ;;  %v6421_v19 = vpop.f32.mrf.mxu1 }
 0x6bc   :  { %8499 = vtanh.f32 %v6637_v11  ;;  %v6632_v10 = vadd.f32 %v6631_v52, %v6407_v22  ;;  %v16320_v4 = vadd.f32 %v6421_v19, %v16229_v62  ;;  %v6612_v11 = vadd.f32 %v6611_v63, %v6387_v57 }
 0x6bd   :  { %v6423_v31 = vpop.f32.mrf.mxu1  ;;  %v6377_v52 = vadd.f32 %v16292_v12, %v16202_v39  ;;  %v16333_v35 = vpop.f32.mrf.mxu0  ;;  %v6572_v63 = vadd.f32 %v16303_v8, %v16259_v34  ;;  %v6562_v8 = vadd.f32 %v16299_v9, %v16247_v20 }
 0x6be   :  { %8501 = vtanh.f32 %v6632_v10 }
 0x6bf   :  { %v6426_v42 = vpop.f32.mrf.mxu1  ;;  %8503 = vtanh.f32 %v6627_v60  ;;  %v6602_v3 = vadd.f32 %v6601_v33, %v6377_v52 }
 0x6c0   :  { %v16325_v37 = vadd.f32 %v6426_v42, %v16232_v58  ;;  %8505 = vtanh.f32 %v6622_v26  ;;  %v6372_v58 = vadd.f32 %v16287_v59, %v16199_v30 }
 0x6c1   :  { %v6428_v61 = vpop.f32.mrf.mxu1  ;;  %8507 = vtanh.f32 %v6617_v17 }
 0x6c2   :  { %8509 = vtanh.f32 %v6612_v11  ;;  %v6597_v23 = vadd.f32 %v8141_v54, %v6372_v58 }
 0x6c3   :  { %v6431_v62 = vpop.f32.mrf.mxu1  ;;  %8511 = vtanh.f32 %v6607_v28 }
 0x6c4   :  { %v16331_v19 = vadd.f32 %v6431_v62, %v16235_v0  ;;  %v16344_v0 = vpop.f32.mrf.mxu0  ;;  %8513 = vtanh.f32 %v6602_v3 }
 0x6c5   :  { %v6433_v60 = vpop.f32.mrf.mxu1  ;;  %8515 = vtanh.f32 %v6597_v23 }
 0x6c6   :  { %v16349_v59 = vpop.f32.mrf.mxu0  ;;  %8517 = vtanh.f32 %v6592_v50 }
 0x6c7   :  { %v6436_v51 = vpop.f32.mrf.mxu1 }
 0x6c8   :  { %v16340_v39 = vadd.f32 %v6436_v51, %v16238_v44  ;;  %v6587_v44 = vadd.f32 %v16305_v14, %v16277_v49  ;;  %v16365_v5 = vpop.f32.mrf.mxu0  ;;  %v6577_v14 = vadd.f32 %v16301_v43, %v16265_v56  ;;  %v6567_v43 = vadd.f32 %v16297_v2, %v16253_v48 }
 0x6c9   :  { %v16342_v12 = vpop.eup %8499  ;;  %v6438_v29 = vpop.f32.mrf.mxu1 }
 0x6ca   :  { %6791 = vmatpush1.msra.mxu1 %v16342_v12  ;;  %8519 = vtanh.f32 %v6587_v44  ;;  %v16375_v40 = vpop.f32.mrf.mxu0 }
 0x6cb   :  { %v16347_v30 = vpop.eup %8501  ;;  %6792 = vmatprep.subr.mxu1 %v17607_v47  ;;  %v16352_v15 = vpop.f32.mrf.mxu1  ;;  %8521 = vtanh.f32 %v6582_v45 }
 0x6cc   :  { %6793 = vmatpush1.msra.mxu1 %v16347_v30  ;;  %v16357_v38 = vpop.eup %8503  ;;  %8523 = vtanh.f32 %v6577_v14  ;;  %v16391_v21 = vpop.f32.mrf.mxu0 }
 0x6cd   :  { %6794 = vmatprep.subr.mxu1 %v17607_v47  ;;  %v6443_v54 = vpop.f32.mrf.mxu1  ;;  %v16363_v33 = vpop.eup %8505  ;;  %8525 = vtanh.f32 %v6572_v63 }
 0x6ce   :  { %6795 = vmatpush1.msra.mxu1 %v16357_v38  ;;  %v16373_v6 = vpop.eup %8507  ;;  %v16399_v22 = vpop.f32.mrf.mxu0  ;;  %8527 = vtanh.f32 %v6567_v43 }
 0x6cf   :  { %6796 = vmatprep.subr.mxu1 %v17607_v47  ;;  %v16368_v49 = vpop.f32.mrf.mxu1  ;;  %v16381_v16 = vpop.eup %8509  ;;  %8529 = vtanh.f32 %v6562_v8 }
 0x6d0   :  { %6797 = vmatpush1.msra.mxu1 %v16363_v33  ;;  %v16389_v27 = vpop.eup %8511  ;;  %v16411_v9 = vpop.f32.mrf.mxu0 }
 0x6d1   :  { %6798 = vmatprep.subr.mxu1 %v17607_v47  ;;  %v6448_v1 = vpop.f32.mrf.mxu1  ;;  %v16397_v25 = vpop.eup %8513 }
 0x6d2   :  { %6799 = vmatpush1.msra.mxu1 %v16373_v6  ;;  %v16405_v2 = vpop.eup %8515  ;;  %v8168_v36 = vpop.f32.mrf.mxu0 }
 0x6d3   :  { %6800 = vmatprep.subr.mxu1 %v17607_v47  ;;  %v16384_v56 = vpop.f32.mrf.mxu1  ;;  %v16409_v20 = vpop.eup %8517 }
 0x6d4   :  { %6801 = vmatpush1.msra.mxu1 %v16381_v16  ;;  %v6681_v61 = vpop.f32.mrf.mxu0 }
 0x6d5   :  { %6802 = vmatprep.subr.mxu1 %v17607_v47  ;;  %v6453_v34 = vpop.f32.mrf.mxu1 }
 0x6d6   :  { %6803 = vmatpush1.msra.mxu1 %v16389_v27  ;;  %v8171_v62 = vpop.f32.mrf.mxu0 }
 0x6d7   :  { %6804 = vmatprep.subr.mxu1 %v17607_v47  ;;  %v16402_v48 = vpop.f32.mrf.mxu1  ;;  %v16415_v31 = vpop.eup %8519 }
 0x6d8   :  { %6805 = vmatpush1.msra.mxu1 %v16397_v25  ;;  %v16419_v42 = vpop.eup %8521  ;;  %v6691_v3 = vpop.f32.mrf.mxu0 }
 0x6d9   :  { %6806 = vmatprep.subr.mxu1 %v17607_v47  ;;  %v6458_v7 = vpop.f32.mrf.mxu1  ;;  %v16423_v17 = vpop.eup %8523 }
 0x6da   :  { %6807 = vmatpush1.msra.mxu1 %v16405_v2  ;;  %v16427_v11 = vpop.eup %8525  ;;  %v8174_v53 = vpop.f32.mrf.mxu0 }
 0x6db   :  { %6808 = vmatprep.subr.mxu1 %v17607_v47  ;;  %v6461_v10 = vpop.f32.mrf.mxu1  ;;  %17622 = vst [vmem:[#allocation4_spill] sm:$0xff] %v16427_v11  ;;  %v16431_v28 = vpop.eup %8527 }
 0x6dc   :  { %6809 = vmatpush1.msra.mxu1 %v16409_v20  ;;  %17623 = vst [vmem:[#allocation87_spill] sm:$0xff] %v16431_v28  ;;  %v16435_v58 = vpop.eup %8529  ;;  %v6701_v50 = vpop.f32.mrf.mxu0 }
 0x6dd   :  { %6810 = vmatprep.subr.mxu1 %v17607_v47  ;;  %v6463_v26 = vpop.f32.mrf.mxu1  ;;  %17624 = vst [vmem:[#allocation46_spill] sm:$0xff] %v16435_v58 }
 0x6de   :  { %6811 = vmatpush1.msra.mxu1 %v16415_v31  ;;  %v8177_v45 = vpop.f32.mrf.mxu0 }
 0x6df   :  { %6812 = vmatprep.subr.mxu1 %v17607_v47  ;;  %v6466_v57 = vpop.f32.mrf.mxu1 }
 0x6e0   :  { %6813 = vmatpush1.msra.mxu1 %v16419_v42  ;;  %v6711_v63 = vpop.f32.mrf.mxu0 }
 0x6e1   :  { %6814 = vmatprep.subr.mxu1 %v17607_v47  ;;  %v6468_v55 = vpop.f32.mrf.mxu1 }
 0x6e2   :  { %6815 = vmatpush1.msra.mxu1 %v16423_v17 }
 0x6e3   :  { %6816 = vmatprep.subr.mxu1 %v17607_v47  ;;  %v6471_v52 = vpop.f32.mrf.mxu1 }
 0x6e4   :  { %6817 = vmatpush1.msra.mxu1 %v16427_v11 }
 0x6e5   :  { %6818 = vmatprep.subr.mxu1 %v17607_v47  ;;  %v6473_v60 = vpop.f32.mrf.mxu1 }
 0x6e6   :  { %6819 = vmatpush1.msra.mxu1 %v16431_v28 }
 0x6e7   :  { %6820 = vmatprep.subr.mxu1 %v17607_v47  ;;  %v6476_v51 = vpop.f32.mrf.mxu1 }
 0x6e8   :  { %6821 = vmatpush1.msra.mxu1 %v16435_v58  ;;  %v6477_v26 = vadd.f32 %v6476_v51, %v16280_v32  ;;  %v17628_v32 = vld [vmem:[#allocation29_spill] sm:$0xff] }
 0x6e9   :  { %v6478_v23 = vpop.f32.mrf.mxu1  ;;  %6822 = vmatprep.subr.mxu1 %v17607_v47  ;;  %v6452_v51 = vadd.f32 %v16384_v56, %v17628_v32  ;;  %v6780_v32 = vld [vmem:[%s16758_s4 + $0xe0] sm:$0xff] }
 0x6ea   :  { %v6472_v23 = vadd.f32 %v6471_v52, %v16274_v41  ;;  %v17629_v41 = vld [vmem:[#allocation93_spill] sm:$0xff] }
 0x6eb   :  { %v6481_v29 = vpop.f32.mrf.mxu1  ;;  %v6447_v52 = vadd.f32 %v16368_v49, %v17629_v41  ;;  %v6785_v41 = vld [vmem:[%s16758_s4 + $0x108] sm:$0xff] }
 0x6ec   :  { %v6482_v34 = vadd.f32 %v6481_v29, %v16285_v18  ;;  %v6697_v11 = vadd.f32 %v8171_v62, %v6472_v23  ;;  %v17627_v18 = vld [vmem:[#allocation91_spill] sm:$0xff]  ;;  %v6677_v62 = vadd.f32 %v16399_v22, %v6452_v51  ;;  %v6662_v22 = vadd.f32 %v16391_v21, %v16340_v39  ;;  %v6783_v51 = vld [vmem:[%s16758_s4 + $0xf8] sm:$0xff] }
 0x6ed   :  { %v6483_v44 = vpop.f32.mrf.mxu1  ;;  %v6647_v21 = vadd.f32 %v16333_v35, %v16320_v4  ;;  %v6772_v23 = vld [vmem:[%s16758_s4 + $0xa0] sm:$0xff] }
 0x6ee   :  { %v6707_v58 = vadd.f32 %v8174_v53, %v6482_v34  ;;  %v17625_v44 = vld [vmem:[#allocation89_spill] sm:$0xff]  ;;  %v6759_v34 = vld [vmem:[%s16758_s4 + $0x38] sm:$0xff] }
 0x6ef   :  { %v6486_v54 = vpop.f32.mrf.mxu1  ;;  %v6467_v28 = vadd.f32 %v6466_v57, %v17625_v44  ;;  %v17630_v53 = vld [vmem:[#allocation53_spill] sm:$0xff]  ;;  %v6775_v44 = vld [vmem:[%s16758_s4 + $0xb8] sm:$0xff] }
 0x6f0   :  { %v6487_v1 = vadd.f32 %v6486_v54, %v16290_v24  ;;  %v17626_v24 = vld [vmem:[#allocation28_spill] sm:$0xff] }
 0x6f1   :  { %v6488_v14 = vpop.f32.mrf.mxu1  ;;  %v6462_v54 = vadd.f32 %v6461_v10, %v17626_v24  ;;  %v6692_v29 = vadd.f32 %v6691_v3, %v6467_v28  ;;  %v6442_v10 = vadd.f32 %v16352_v15, %v17630_v53  ;;  %v6752_v3 = vld [vmem:[%s16758_s4] sm:$0xff]  ;;  %v6777_v24 = vld [vmem:[%s16758_s4 + $0xc8] sm:$0xff]  ;;  %v6786_v53 = vld [vmem:[%s16758_s4 + $0x110] sm:$0xff] }
 0x6f2   :  { %v6712_v55 = vadd.f32 %v6711_v63, %v6487_v1  ;;  %v6702_v14 = vadd.f32 %v6701_v50, %v6477_v26  ;;  %v6755_v1 = vld [vmem:[%s16758_s4 + $0x18] sm:$0xff]  ;;  %v6754_v63 = vld [vmem:[%s16758_s4 + $0x10] sm:$0xff] }
 0x6f3   :  { %v6491_v43 = vpop.f32.mrf.mxu1  ;;  %v6667_v49 = vadd.f32 %v16375_v40, %v6442_v10  ;;  %v6657_v40 = vadd.f32 %v16349_v59, %v16331_v19  ;;  %v6642_v59 = vadd.f32 %v16344_v0, %v16314_v13  ;;  %v17633_v26 = vld [vmem:[#allocation46_spill] sm:$0xff]  ;;  %v6789_v10 = vld [vmem:[%s16758_s4 + $0x128] sm:$0x3f] }
 0x6f4   :  { %v6492_v8 = vadd.f32 %v6491_v43, %v16295_v46  ;;  %v6457_v46 = vadd.f32 %v16402_v48, %v17627_v18  ;;  %v6672_v48 = vadd.f32 %v16411_v9, %v6447_v52  ;;  %v6757_v43 = vld [vmem:[%s16758_s4 + $0x28] sm:$0xff]  ;;  %v6779_v18 = vld [vmem:[%s16758_s4 + $0xd8] sm:$0xff]  ;;  %v6784_v52 = vld [vmem:[%s16758_s4 + $0x100] sm:$0xff] }
 0x6f5   :  { %v6493_v7 = vpop.f32.mrf.mxu1 }
 0x6f6   :  { %v6717_v60 = vadd.f32 %v8177_v45, %v6492_v8  ;;  %v6687_v45 = vadd.f32 %v8168_v36, %v6462_v54  ;;  %v6682_v57 = vadd.f32 %v6681_v61, %v6457_v46  ;;  %v6652_v61 = vadd.f32 %v16365_v5, %v16325_v37  ;;  %v17631_v8 = vld [vmem:[#allocation4_spill] sm:$0xff]  ;;  %v6771_v7 = vld [vmem:[%s16758_s4 + $0x98] sm:$0xff]  ;;  %v6776_v54 = vld [vmem:[%s16758_s4 + $0xc0] sm:$0xff] }
 0x6f7   :  { %v6778_v46 = vld [vmem:[%s16758_s4 + $0xd0] sm:$0xff] }
 0x6f8   :  { %8531 = vtanh.f32 %v6717_v60  ;;  %v6773_v60 = vld [vmem:[%s16758_s4 + $0xa8] sm:$0xff] }
 0x6f9   :  { %8533 = vtanh.f32 %v6712_v55  ;;  %v6770_v55 = vld [vmem:[%s16758_s4 + $0x90] sm:$0xff] }
 0x6fa   :  { %8535 = vtanh.f32 %v6707_v58 }
 0x6fb   :  { %8537 = vtanh.f32 %v6702_v14  ;;  %v6774_v14 = vld [vmem:[%s16758_s4 + $0xb0] sm:$0xff] }
 0x6fc   :  { %8539 = vtanh.f32 %v6697_v11 }
 0x6fd   :  { %8541 = vtanh.f32 %v6692_v29  ;;  %v6781_v29 = vld [vmem:[%s16758_s4 + $0xe8] sm:$0xff] }
 0x6fe   :  { %8543 = vtanh.f32 %v6687_v45  ;;  %v6782_v45 = vld [vmem:[%s16758_s4 + $0xf0] sm:$0xff] }
 0x6ff   :  { %8545 = vtanh.f32 %v6682_v57  ;;  %v6787_v57 = vld [vmem:[%s16758_s4 + $0x118] sm:$0xff] }
 0x700   :  { %8547 = vtanh.f32 %v6677_v62  ;;  %v6788_v62 = vld [vmem:[%s16758_s4 + $0x120] sm:$0x3f] }
 0x701   :  { %8549 = vtanh.f32 %v6672_v48 }
 0x702   :  { %8551 = vtanh.f32 %v6667_v49 }
 0x703   :  { %8553 = vtanh.f32 %v6662_v22 }
 0x704   :  { %8555 = vtanh.f32 %v6657_v40 }
 0x705   :  { %v16456_v58 = vpop.eup %8531  ;;  %8557 = vtanh.f32 %v6652_v61 }
 0x706   :  { %6823 = vmatpush2.msra.mxu1 %v16456_v58  ;;  %v16460_v56 = vpop.eup %8533  ;;  %8559 = vtanh.f32 %v6647_v21 }
 0x707   :  { %6824 = vmatprep.subr.mxu1 %v17607_v47  ;;  %v16465_v15 = vpop.eup %8535  ;;  %8561 = vtanh.f32 %v6642_v59 }
 0x708   :  { %6825 = vmatpush2.msra.mxu1 %v16460_v56  ;;  %v16471_v9 = vpop.eup %8537 }
 0x709   :  { %6826 = vmatprep.subr.mxu1 %v17607_v47  ;;  %v8540_v36 = vpop.eup %8539 }
 0x70a   :  { %6827 = vmatpush2.msra.mxu1 %v16465_v15  ;;  %v8542_v39 = vpop.eup %8541 }
 0x70b   :  { %6828 = vmatprep.subr.mxu1 %v17607_v47  ;;  %v8544_v19 = vpop.eup %8543 }
 0x70c   :  { %6829 = vmatpush2.msra.mxu1 %v16471_v9  ;;  %v8546_v11 = vpop.eup %8545 }
 0x70d   :  { %6830 = vmatprep.subr.mxu1 %v17607_v47  ;;  %v8548_v37 = vpop.eup %8547 }
 0x70e   :  { %6831 = vmatpush2.msra.mxu1 %v8540_v36  ;;  %v8550_v4 = vpop.eup %8549 }
 0x70f   :  { %6832 = vmatprep.subr.mxu1 %v17607_v47  ;;  %v8552_v35 = vpop.eup %8551 }
 0x710   :  { %6833 = vmatpush2.msra.mxu1 %v8542_v39  ;;  %v8554_v13 = vpop.eup %8553 }
 0x711   :  { %6834 = vmatprep.subr.mxu1 %v17607_v47  ;;  %v8556_v0 = vpop.eup %8555 }
 0x712   :  { %6835 = vmatpush2.msra.mxu1 %v8544_v19  ;;  %v16492_v5 = vpop.eup %8557 }
 0x713   :  { %6836 = vmatprep.subr.mxu1 %v17607_v47  ;;  %v16496_v28 = vpop.eup %8559 }
 0x714   :  { %6837 = vmatpush2.msra.mxu1 %v8546_v11  ;;  %v16503_v50 = vpop.eup %8561 }
 0x715   :  { %6838 = vmatprep.subr.mxu1 %v17607_v47 }
 0x716   :  { %6839 = vmatpush2.msra.mxu1 %v8548_v37 }
 0x717   :  { %6840 = vmatprep.subr.mxu1 %v17607_v47 }
 0x718   :  { %6841 = vmatpush2.msra.mxu1 %v8550_v4 }
 0x719   :  { %6842 = vmatprep.subr.mxu1 %v17607_v47 }
 0x71a   :  { %6843 = vmatpush2.msra.mxu1 %v8552_v35 }
 0x71b   :  { %6844 = vmatprep.subr.mxu1 %v17607_v47 }
 0x71c   :  { %6845 = vmatpush2.msra.mxu1 %v8554_v13 }
 0x71d   :  { %6846 = vmatprep.subr.mxu1 %v17607_v47 }
 0x71e   :  { %6847 = vmatpush2.msra.mxu1 %v8556_v0 }
 0x71f   :  { %6848 = vmatprep.subr.mxu1 %v17607_v47 }
 0x720   :  { %6849 = vmatpush2.msra.mxu1 %v16492_v5 }
 0x721   :  { %6850 = vmatprep.subr.mxu1 %v17607_v47 }
 0x722   :  { %6851 = vmatpush2.msra.mxu1 %v16496_v28 }
 0x723   :  { %6852 = vmatprep.subr.mxu1 %v17607_v47 }
 0x724   :  { %6853 = vmatpush2.msra.mxu1 %v16503_v50 }
 0x725   :  { %6855 = vmatmul.mubr.f32.vlgmr.msra.gmra.mxu1 %v6752_v3  ;;  %8044 = vmatprep.subr.mxu1 %v16456_v58  ;;  %v6970_v58 = vld [vmem:[%s16759_s5 + $0x8] sm:$0xff] }
 0x726   :  { %8045 = vmatpush3.msra.mxu1 %v16342_v12  ;;  %6859 = vmatprep.mubr.f32.mxu1 %v6755_v1  ;;  %v6756_v12 = vld [vmem:[%s16758_s4 + $0x20] sm:$0xff] }
 0x727   :  { %8046 = vmatprep.subr.mxu1 %v16460_v56  ;;  %7984 = vmatprep.mubr.msk.f32.mxu0 %vm6979_vm1, %v6970_v58  ;;  %v6976_v58 = vld [vmem:[%s16759_s5 + $0x38] sm:$0xff] }
 0x728   :  { %8047 = vmatpush3.msra.mxu1 %v16347_v30  ;;  %v6758_v30 = vld [vmem:[%s16758_s4 + $0x30] sm:$0xff] }
 0x729   :  { %6860 = vmatmul.mubr.f32.gmra.mxu1 %v6754_v63  ;;  %8048 = vmatprep.subr.mxu1 %v16465_v15 }
 0x72a   :  { %8049 = vmatpush3.msra.mxu1 %v16357_v38  ;;  %6864 = vmatprep.mubr.f32.mxu1 %v6757_v43  ;;  %v6761_v38 = vld [vmem:[%s16758_s4 + $0x48] sm:$0xff] }
 0x72b   :  { %8050 = vmatprep.subr.mxu1 %v16471_v9 }
 0x72c   :  { %8051 = vmatpush3.msra.mxu1 %v16363_v33  ;;  %v6760_v33 = vld [vmem:[%s16758_s4 + $0x40] sm:$0xff] }
 0x72d   :  { %6865 = vmatmul.mubr.f32.gmra.mxu1 %v6756_v12  ;;  %8052 = vmatprep.subr.mxu1 %v8540_v36 }
 0x72e   :  { %8053 = vmatpush3.msra.mxu1 %v16373_v6  ;;  %6869 = vmatprep.mubr.f32.mxu1 %v6759_v34  ;;  %v6763_v6 = vld [vmem:[%s16758_s4 + $0x58] sm:$0xff] }
 0x72f   :  { %8054 = vmatprep.subr.mxu1 %v8542_v39 }
 0x730   :  { %8055 = vmatpush3.msra.mxu1 %v16381_v16  ;;  %v6762_v16 = vld [vmem:[%s16758_s4 + $0x50] sm:$0xff] }
 0x731   :  { %6870 = vmatmul.mubr.f32.gmra.mxu1 %v6758_v30  ;;  %8056 = vmatprep.subr.mxu1 %v8544_v19 }
 0x732   :  { %8057 = vmatpush3.msra.mxu1 %v16389_v27  ;;  %6874 = vmatprep.mubr.f32.mxu1 %v6761_v38  ;;  %v6765_v27 = vld [vmem:[%s16758_s4 + $0x68] sm:$0xff] }
 0x733   :  { %8058 = vmatprep.subr.mxu1 %v8546_v11 }
 0x734   :  { %8059 = vmatpush3.msra.mxu1 %v16397_v25  ;;  %v6764_v25 = vld [vmem:[%s16758_s4 + $0x60] sm:$0xff] }
 0x735   :  { %6875 = vmatmul.mubr.f32.gmra.mxu1 %v6760_v33  ;;  %8060 = vmatprep.subr.mxu1 %v8548_v37 }
 0x736   :  { %8061 = vmatpush3.msra.mxu1 %v16405_v2  ;;  %6879 = vmatprep.mubr.f32.mxu1 %v6763_v6  ;;  %v6767_v2 = vld [vmem:[%s16758_s4 + $0x78] sm:$0xff] }
 0x737   :  { %8062 = vmatprep.subr.mxu1 %v8550_v4 }
 0x738   :  { %8063 = vmatpush3.msra.mxu1 %v16409_v20  ;;  %v6766_v20 = vld [vmem:[%s16758_s4 + $0x70] sm:$0xff] }
 0x739   :  { %6880 = vmatmul.mubr.f32.gmra.mxu1 %v6762_v16  ;;  %8064 = vmatprep.subr.mxu1 %v8552_v35 }
 0x73a   :  { %8065 = vmatpush3.msra.mxu1 %v16415_v31  ;;  %6884 = vmatprep.mubr.f32.mxu1 %v6765_v27  ;;  %v6769_v31 = vld [vmem:[%s16758_s4 + $0x88] sm:$0xff] }
 0x73b   :  { %8066 = vmatprep.subr.mxu1 %v8554_v13 }
 0x73c   :  { %8067 = vmatpush3.msra.mxu1 %v16419_v42  ;;  %v17632_v42 = vld [vmem:[#allocation87_spill] sm:$0xff] }
 0x73d   :  { %6885 = vmatmul.mubr.f32.gmra.mxu1 %v6764_v25  ;;  %8068 = vmatprep.subr.mxu1 %v8556_v0 }
 0x73e   :  { %8069 = vmatpush3.msra.mxu1 %v16423_v17  ;;  %6889 = vmatprep.mubr.f32.mxu1 %v6767_v2  ;;  %v6768_v17 = vld [vmem:[%s16758_s4 + $0x80] sm:$0xff] }
 0x73f   :  { %8070 = vmatprep.subr.mxu1 %v16492_v5 }
 0x740   :  { %8071 = vmatpush3.msra.mxu1 %v17631_v8 }
 0x741   :  { %6890 = vmatmul.mubr.f32.gmra.mxu1 %v6766_v20  ;;  %8072 = vmatprep.subr.mxu1 %v16496_v28 }
 0x742   :  { %8073 = vmatpush3.msra.mxu1 %v17632_v42  ;;  %6894 = vmatprep.mubr.f32.mxu1 %v6769_v31 }
 0x743   :  { %8074 = vmatprep.subr.mxu1 %v16503_v50 }
 0x744   :  { %8075 = vmatpush3.msra.mxu1 %v17633_v26 }
 0x745   :  { %6895 = vmatmul.mubr.f32.gmra.mxu1 %v6768_v17 }
 0x746   :  { %6899 = vmatprep.mubr.f32.mxu1 %v6771_v7 }
 0x749   :  { %6900 = vmatmul.mubr.f32.gmra.mxu1 %v6770_v55 }
 0x74a   :  { %6904 = vmatprep.mubr.f32.mxu1 %v6773_v60 }
 0x74d   :  { %6905 = vmatmul.mubr.f32.gmra.mxu1 %v6772_v23 }
 0x74e   :  { %6909 = vmatprep.mubr.f32.mxu1 %v6775_v44 }
 0x751   :  { %6910 = vmatmul.mubr.f32.gmra.mxu1 %v6774_v14 }
 0x752   :  { %6914 = vmatprep.mubr.f32.mxu1 %v6777_v24 }
 0x755   :  { %6915 = vmatmul.mubr.f32.gmra.mxu1 %v6776_v54 }
 0x756   :  { %6919 = vmatprep.mubr.f32.mxu1 %v6779_v18 }
 0x759   :  { %6920 = vmatmul.mubr.f32.gmra.mxu1 %v6778_v46 }
 0x75a   :  { %6924 = vmatprep.mubr.f32.mxu1 %v6781_v29 }
 0x75d   :  { %6925 = vmatmul.mubr.f32.gmra.mxu1 %v6780_v32 }
 0x75e   :  { %6929 = vmatprep.mubr.f32.mxu1 %v6783_v51 }
 0x761   :  { %6930 = vmatmul.mubr.f32.gmra.mxu1 %v6782_v45 }
 0x762   :  { %6934 = vmatprep.mubr.f32.mxu1 %v6785_v41  ;;  %v6969_v41 = vld [vmem:[%s16759_s5] sm:$0xff] }
 0x765   :  { %6935 = vmatmul.mubr.f32.gmra.mxu1 %v6784_v52 }
 0x766   :  { %6939 = vmatprep.mubr.f32.mxu1 %v6787_v57  ;;  %v6972_v57 = vld [vmem:[%s16759_s5 + $0x18] sm:$0xff] }
 0x769   :  { %6940 = vmatmul.mubr.f32.gmra.mxu1 %v6786_v53  ;;  %v6971_v53 = vld [vmem:[%s16759_s5 + $0x10] sm:$0xff] }
 0x76a   :  { %6944 = vmatprep.mubr.f32.mxu1 %v6789_v10  ;;  %v6974_v10 = vld [vmem:[%s16759_s5 + $0x28] sm:$0xff] }
 0x76d   :  { %6945 = vmatmul.mubr.f32.gmra.mxu1 %v6788_v62  ;;  %v6973_v62 = vld [vmem:[%s16759_s5 + $0x20] sm:$0xff] }
 0x7e5   :  { %v16642_v48 = vpop.f32.mrf.mxu1 }
 0x7e7   :  { %v6858_v56 = vpop.f32.mrf.mxu1 }
 0x7e8   :  { %v6978_v56 = vld [vmem:[%s16759_s5 + $0x48] sm:$0xf] }
 0x7e9   :  { %v16644_v49 = vpop.f32.mrf.mxu1 }
 0x7eb   :  { %v6863_v15 = vpop.f32.mrf.mxu1 }
 0x7ec   :  { %v7098_v15 = vld [vmem:[%s16760_s7 + $0x8] sm:$0xff] }
 0x7ed   :  { %v16646_v22 = vpop.f32.mrf.mxu1  ;;  %7167 = vmatprep.mubr.f32.mxu1 %v7098_v15 }
 0x7ef   :  { %v6868_v9 = vpop.f32.mrf.mxu1 }
 0x7f0   :  { %v7100_v9 = vld [vmem:[%s16760_s7 + $0x18] sm:$0xff] }
 0x7f1   :  { %v6871_v40 = vpop.f32.mrf.mxu1 }
 0x7f3   :  { %v6873_v36 = vpop.f32.mrf.mxu1 }
 0x7f4   :  { %v7102_v36 = vld [vmem:[%s16760_s7 + $0x28] sm:$0x3] }
 0x7f5   :  { %v6876_v61 = vpop.f32.mrf.mxu1 }
 0x7f7   :  { %v6878_v39 = vpop.f32.mrf.mxu1 }
 0x7f9   :  { %v6881_v21 = vpop.f32.mrf.mxu1 }
 0x7fb   :  { %v6883_v19 = vpop.f32.mrf.mxu1 }
 0x7fd   :  { %v6886_v59 = vpop.f32.mrf.mxu1 }
 0x7ff   :  { %v6888_v11 = vpop.f32.mrf.mxu1 }
 0x801   :  { %v6891_v37 = vpop.f32.mrf.mxu1 }
 0x803   :  { %v6893_v4 = vpop.f32.mrf.mxu1 }
 0x805   :  { %v6896_v35 = vpop.f32.mrf.mxu1 }
 0x807   :  { %v6898_v13 = vpop.f32.mrf.mxu1 }
 0x809   :  { %v6901_v0 = vpop.f32.mrf.mxu1 }
 0x80b   :  { %v6903_v5 = vpop.f32.mrf.mxu1 }
 0x80d   :  { %v6906_v28 = vpop.f32.mrf.mxu1 }
 0x80f   :  { %v6908_v3 = vpop.f32.mrf.mxu1 }
 0x811   :  { %v6911_v50 = vpop.f32.mrf.mxu1 }
 0x813   :  { %v6913_v1 = vpop.f32.mrf.mxu1 }
 0x814   :  { %v7094_v1 = vld [vmem:[%s16761_s6] sm:$0xff] }
 0x815   :  { %v6916_v63 = vpop.f32.mrf.mxu1 }
 0x817   :  { %v6918_v43 = vpop.f32.mrf.mxu1 }
 0x818   :  { %v7095_v43 = vld [vmem:[%s16761_s6 + $0x8] sm:$0xff] }
 0x819   :  { %v6921_v12 = vpop.f32.mrf.mxu1 }
 0x81b   :  { %v6923_v34 = vpop.f32.mrf.mxu1 }
 0x81c   :  { %v7301_v34 = vld [vmem:[%s16762_s9] sm:$0xff] }
 0x81d   :  { %v6926_v30 = vpop.f32.mrf.mxu1 }
 0x81f   :  { %v6928_v38 = vpop.f32.mrf.mxu1 }
 0x821   :  { %v6931_v33 = vpop.f32.mrf.mxu1 }
 0x822   :  { %8563 = vtanh.f32 %v6931_v33 }
 0x823   :  { %v6933_v6 = vpop.f32.mrf.mxu1  ;;  %8565 = vtanh.f32 %v6926_v30 }
 0x824   :  { %8567 = vtanh.f32 %v6921_v12  ;;  %v7096_v12 = vld [vmem:[%s16761_s6 + $0x10] sm:$0x3] }
 0x825   :  { %v6936_v16 = vpop.f32.mrf.mxu1  ;;  %8569 = vtanh.f32 %v6916_v63 }
 0x826   :  { %8571 = vtanh.f32 %v6911_v50 }
 0x827   :  { %v6938_v27 = vpop.f32.mrf.mxu1  ;;  %8573 = vtanh.f32 %v6906_v28 }
 0x828   :  { %8575 = vtanh.f32 %v6901_v0 }
 0x829   :  { %v6941_v25 = vpop.f32.mrf.mxu1  ;;  %8577 = vtanh.f32 %v6896_v35 }
 0x82a   :  { %8579 = vtanh.f32 %v6891_v37 }
 0x82b   :  { %v6943_v2 = vpop.f32.mrf.mxu1  ;;  %8581 = vtanh.f32 %v6886_v59 }
 0x82c   :  { %8583 = vtanh.f32 %v6881_v21 }
 0x82d   :  { %v6946_v20 = vpop.f32.mrf.mxu1  ;;  %8585 = vtanh.f32 %v6876_v61  ;;  %v7101_v61 = vld [vmem:[%s16760_s7 + $0x20] sm:$0x3] }
 0x82e   :  { %8587 = vtanh.f32 %v6871_v40  ;;  %v7099_v40 = vld [vmem:[%s16760_s7 + $0x10] sm:$0xff] }
 0x82f   :  { %v8564_v31 = vpop.eup %8563  ;;  %v6948_v8 = vpop.f32.mrf.mxu1  ;;  %8589 = vtanh.f32 %v16646_v22  ;;  %v7097_v22 = vld [vmem:[%s16760_s7] sm:$0xff] }
 0x830   :  { %7000 = vmatpush1.msra.mxu0 %v8564_v31  ;;  %v8566_v42 = vpop.eup %8565  ;;  %8591 = vtanh.f32 %v16644_v49  ;;  %v6977_v49 = vld [vmem:[%s16759_s5 + $0x40] sm:$0xf]  ;;  %7168 = vmatmul.mubr.f32.vlgmr.msra.gmra.mxu1 %v7097_v22  ;;  %v7293_v31 = vpop.permute.xlu0 %7292 }
 0x831   :  { %7001 = vmatprep.subr.mxu0 %v17607_v47  ;;  %v8568_v17 = vpop.eup %8567  ;;  %8593 = vtanh.f32 %v16642_v48  ;;  %v6975_v48 = vld [vmem:[%s16759_s5 + $0x30] sm:$0xff]  ;;  %7172 = vmatprep.mubr.f32.mxu1 %v7100_v9 }
 0x832   :  { %7002 = vmatpush1.msra.mxu0 %v8566_v42  ;;  %v8570_v7 = vpop.eup %8569  ;;  %8595 = vtanh.f32 %v6946_v20 }
 0x833   :  { %7003 = vmatprep.subr.mxu0 %v17607_v47  ;;  %v8572_v26 = vpop.eup %8571  ;;  %8597 = vtanh.f32 %v6941_v25 }
 0x834   :  { %7004 = vmatpush1.msra.mxu0 %v8568_v17  ;;  %v8574_v55 = vpop.eup %8573  ;;  %8599 = vtanh.f32 %v6936_v16  ;;  %7173 = vmatmul.mubr.f32.gmra.mxu1 %v7099_v40 }
 0x835   :  { %7005 = vmatprep.subr.mxu0 %v17607_v47  ;;  %v8576_v60 = vpop.eup %8575  ;;  %7177 = vmatprep.mubr.f32.mxu1 %v7102_v36 }
 0x836   :  { %7006 = vmatpush1.msra.mxu0 %v8570_v7  ;;  %v8578_v23 = vpop.eup %8577 }
 0x837   :  { %7007 = vmatprep.subr.mxu0 %v17607_v47  ;;  %v8580_v44 = vpop.eup %8579 }
 0x838   :  { %7008 = vmatpush1.msra.mxu0 %v8572_v26  ;;  %v8582_v14 = vpop.eup %8581  ;;  %7178 = vmatmul.mubr.f32.gmra.mxu1 %v7101_v61 }
 0x839   :  { %7009 = vmatprep.subr.mxu0 %v17607_v47  ;;  %v8584_v24 = vpop.eup %8583  ;;  %8203 = vmatprep.mubr.msk.f32.mxu1 %vm7315_vm6, %v7301_v34 }
 0x83a   :  { %7010 = vmatpush1.msra.mxu0 %v8574_v55  ;;  %v8586_v54 = vpop.eup %8585 }
 0x83b   :  { %7011 = vmatprep.subr.mxu0 %v17607_v47  ;;  %v8588_v18 = vpop.eup %8587 }
 0x83c   :  { %7012 = vmatpush1.msra.mxu0 %v8576_v60  ;;  %v8590_v46 = vpop.eup %8589 }
 0x83d   :  { %7013 = vmatprep.subr.mxu0 %v17607_v47  ;;  %v8592_v29 = vpop.eup %8591 }
 0x83e   :  { %7014 = vmatpush1.msra.mxu0 %v8578_v23  ;;  %v8594_v32 = vpop.eup %8593  ;;  %v7288_v23 = vpop.permute.xlu1 %7287 }
 0x83f   :  { %7015 = vmatprep.subr.mxu0 %v17607_v47  ;;  %v8596_v51 = vpop.eup %8595 }
 0x840   :  { %7016 = vmatpush1.msra.mxu0 %v8580_v44  ;;  %v8598_v45 = vpop.eup %8597 }
 0x841   :  { %7017 = vmatprep.subr.mxu0 %v17607_v47  ;;  %v8600_v52 = vpop.eup %8599 }
 0x842   :  { %7018 = vmatpush1.msra.mxu0 %v8582_v14 }
 0x843   :  { %7019 = vmatprep.subr.mxu0 %v17607_v47 }
 0x844   :  { %7020 = vmatpush1.msra.mxu0 %v8584_v24 }
 0x845   :  { %7021 = vmatprep.subr.mxu0 %v17607_v47 }
 0x846   :  { %7022 = vmatpush1.msra.mxu0 %v8586_v54  ;;  %v7283_v54 = vpop.permute.xlu0 %7282 }
 0x847   :  { %7023 = vmatprep.subr.mxu0 %v17607_v47 }
 0x848   :  { %7024 = vmatpush1.msra.mxu0 %v8588_v18 }
 0x849   :  { %7025 = vmatprep.subr.mxu0 %v17607_v47 }
 0x84a   :  { %7026 = vmatpush1.msra.mxu0 %v8590_v46 }
 0x84b   :  { %7027 = vmatprep.subr.mxu0 %v17607_v47 }
 0x84c   :  { %7028 = vmatpush1.msra.mxu0 %v8592_v29 }
 0x84d   :  { %7029 = vmatprep.subr.mxu0 %v17607_v47 }
 0x84e   :  { %7030 = vmatpush1.msra.mxu0 %v8594_v32 }
 0x84f   :  { %7057 = vmatprep.subr.mxu0 %v17607_v47 }
 0x850   :  { %7983 = vmatpush2.msk.msra.mxu0 %vm6995_vm2, %v8596_v51  ;;  %v7302_v51 = vld [vmem:[%s16762_s9 + $0x8] sm:$0x3] }
 0x851   :  { %7059 = vmatprep.subr.mxu0 %v17607_v47 }
 0x852   :  { %7060 = vmatpush2.msra.mxu0 %v8598_v45  ;;  %v7313_v45 = vpop.permute.xlu0 %7312 }
 0x853   :  { %7061 = vmatprep.subr.mxu0 %v17607_v47 }
 0x854   :  { %7062 = vmatpush2.msra.mxu0 %v8600_v52 }
 0x855   :  { %7064 = vmatmul.mubr.f32.vlgmr.msra.gmra.mxu0 %v6969_v41  ;;  %8178 = vmatprep.subr.mxu0 %v17607_v47 }
 0x856   :  { %7985 = vmatprep.mubr.msk.f32.mxu0 %vm6979_vm1, %v6972_v57  ;;  %v7308_v57 = vpop.permute.xlu1 %7307 }
 0x859   :  { %7069 = vmatmul.mubr.f32.gmra.mxu0 %v6971_v53 }
 0x85a   :  { %7986 = vmatprep.mubr.msk.f32.mxu0 %vm6979_vm1, %v6974_v10 }
 0x85d   :  { %7074 = vmatmul.mubr.f32.gmra.mxu0 %v6973_v62 }
 0x85e   :  { %7987 = vmatprep.mubr.msk.f32.mxu0 %vm6979_vm1, %v6976_v58 }
 0x861   :  { %7079 = vmatmul.mubr.f32.gmra.mxu0 %v6975_v48 }
 0x862   :  { %7988 = vmatprep.mubr.msk.f32.mxu0 %vm6979_vm1, %v6978_v56 }
 0x865   :  { %7084 = vmatmul.mubr.f32.gmra.mxu0 %v6977_v49 }
 0x866   :  { %8188 = vmatprep.mubr.msk.f32.mxu0 %vm9039_vm3, %v17607_v47 }
 0x8f0   :  { %v8076_v30 = vpop.f32.mrf.mxu1 }
 0x8f2   :  { %v8077_v38 = vpop.f32.mrf.mxu1 }
 0x8f3   :  { %v8078_v42 = vadd.f32 %v8077_v38, %v8076_v30 }
 0x8f4   :  { %v8079_v33 = vpop.f32.mrf.mxu1 }
 0x8f6   :  { %v8080_v6 = vpop.f32.mrf.mxu1 }
 0x8f7   :  { %v8081_v20 = vadd.f32 %v8080_v6, %v8079_v33 }
 0x8f8   :  { %v8082_v27 = vpop.f32.mrf.mxu1 }
 0x8fa   :  { %v8083_v2 = vpop.f32.mrf.mxu1 }
 0x8fb   :  { %v8084_v7 = vadd.f32 %v8083_v2, %v8082_v27 }
 0x915   :  { %v7065_v39 = vpop.f32.mrf.mxu0 }
 0x917   :  { %v7067_v21 = vpop.f32.mrf.mxu0 }
 0x919   :  { %v7070_v19 = vpop.f32.mrf.mxu0 }
 0x91b   :  { %v7072_v59 = vpop.f32.mrf.mxu0 }
 0x91d   :  { %v7075_v11 = vpop.f32.mrf.mxu0 }
 0x91f   :  { %v7077_v37 = vpop.f32.mrf.mxu0 }
 0x921   :  { %v7080_v4 = vpop.f32.mrf.mxu0 }
 0x923   :  { %v7082_v35 = vpop.f32.mrf.mxu0 }
 0x925   :  { %v7085_v13 = vpop.f32.mrf.mxu0 }
 0x926   :  { %8601 = vtanh.f32 %v7085_v13 }
 0x927   :  { %v7087_v0 = vpop.f32.mrf.mxu0  ;;  %8603 = vtanh.f32 %v7080_v4 }
 0x928   :  { %8605 = vtanh.f32 %v7075_v11 }
 0x929   :  { %8607 = vtanh.f32 %v7070_v19 }
 0x92a   :  { %8609 = vtanh.f32 %v7065_v39 }
 0x933   :  { %v8602_v5 = vpop.eup %8601 }
 0x934   :  { %8179 = vmatpush3.msk.msra.mxu0 %vm7193_vm4, %v8602_v5  ;;  %v8604_v28 = vpop.eup %8603 }
 0x935   :  { %8180 = vmatprep.subr.mxu0 %v17607_v47  ;;  %v8606_v3 = vpop.eup %8605 }
 0x936   :  { %8181 = vmatpush3.msra.mxu0 %v8604_v28  ;;  %v8608_v50 = vpop.eup %8607 }
 0x937   :  { %8182 = vmatprep.subr.mxu0 %v17607_v47  ;;  %v8610_v63 = vpop.eup %8609 }
 0x938   :  { %8183 = vmatpush3.msra.mxu0 %v8606_v3 }
 0x939   :  { %8184 = vmatprep.subr.mxu0 %v17607_v47 }
 0x93a   :  { %8185 = vmatpush3.msra.mxu0 %v8608_v50 }
 0x93b   :  { %8186 = vmatprep.subr.mxu0 %v17607_v47 }
 0x93c   :  { %8187 = vmatpush3.msra.mxu0 %v8610_v63 }
 0x93d   :  { %8189 = vmatmul.mubr.msk.f32.vlgmr.msra.gmra.mxu0 %vm7183_vm5, %v7094_v1 }
 0x93e   :  { %8191 = vmatprep.mubr.msk.f32.mxu0 %vm9039_vm3, %v17607_v47 }
 0x941   :  { %8192 = vmatmul.mubr.msk.f32.gmra.mxu0 %vm7183_vm5, %v7095_v43 }
 0x942   :  { %8194 = vmatprep.mubr.msk.f32.mxu0 %vm9039_vm3, %v17607_v47 }
 0x945   :  { %8195 = vmatmul.mubr.msk.f32.gmra.mxu0 %vm7183_vm5, %v7096_v12 }
 0x9fd   :  { %v7263_v16 = vpop.f32.mrf.mxu0 }
 0x9fe   :  { %v7264_v55 = vadd.f32 %v8078_v42, %v7263_v16 }
 0x9ff   :  { %v8190_v25 = vpop.f32.mrf.mxu0 }
 0xa00   :  { %v7295_v18 = vadd.f32 %v7283_v54, %v7264_v55 }
 0xa01   :  { %v7268_v47 = vpop.f32.mrf.mxu0 }
 0xa02   :  { %v7269_v17 = vadd.f32 %v8081_v20, %v7268_v47 }
 0xa03   :  { %v8193_v8 = vpop.f32.mrf.mxu0 }
 0xa04   :  { %v7296_v14 = vadd.f32 %v7288_v23, %v7269_v17 }
 0xa05   :  { %v7273_v26 = vpop.f32.mrf.mxu0 }
 0xa06   :  { %v7274_v60 = vadd.f32 %v8084_v7, %v7273_v26 }
 0xa07   :  { %v8196_v44 = vpop.f32.mrf.mxu0 }
 0xa08   :  { %v7297_v24 = vadd.f32 %v7293_v31, %v7274_v60 }
 0xa0a   :  { %8611 = vtanh.f32 %v7297_v24 }
 0xa0b   :  { %8613 = vtanh.f32 %v7296_v14 }
 0xa0c   :  { %8615 = vtanh.f32 %v7295_v18 }
 0xa17   :  { %v8612_v46 = vpop.eup %8611 }
 0xa18   :  { %8197 = vmatprep.subr.msk.mxu1 %vm7322_vm7, %v8612_v46  ;;  %v8614_v29 = vpop.eup %8613 }
 0xa19   :  { %8198 = vmatpush3.msk.msra.mxu1 %vm7322_vm7, %v8612_v46  ;;  %v8616_v32 = vpop.eup %8615 }
 0xa1a   :  { %8199 = vmatprep.subr.mxu1 %v8614_v29 }
 0xa1b   :  { %8200 = vmatpush3.msra.mxu1 %v8614_v29 }
 0xa1c   :  { %8201 = vmatprep.subr.mxu1 %v8616_v32 }
 0xa1d   :  { %8202 = vmatpush3.msra.mxu1 %v8616_v32 }
 0xa1e   :  { %8204 = vmatmul.mubr.msk.f32.vlgmr.msra.gmra.mxu1 %vm7315_vm6, %v7302_v51 }
 0xade   :  { %v8205_v41 = vpop.f32.mrf.mxu1 }
 0xadf   :  { %v7398_v52 = vadd.f32 %v8205_v41, %v7313_v45 }
 0xae0   :  { %v7392_v53 = vpop.f32.mrf.mxu1 }
 0xae1   :  { %7402 = vst [vmem:[%s16763_s11 + $0x8] sm:$0x3] %v7398_v52  ;;  %v7393_v10 = vadd.f32 %v7392_v53, %v7308_v57 }
 0xae3   :  { %7401 = vst [vmem:[%s16763_s11] sm:$0xff] %v7393_v10 }

</bundles_post_ra>
